<compile_context>
chip_gen: v7x
topology: tpu7x:2x2x1
jax: 0.10.0
libtpu: 0.0.40
codegen_flags: <defaults>
</compile_context>

<pallas_src>
import jax
import jax.numpy as jnp
from jax import lax
from jax.experimental import pallas as pl
from jax.experimental.pallas import tpu as pltpu


ACT_DTYPE = jnp.bfloat16   # storage / MXU-input dtype for activations & weights
EPS = 1e-5                 # nn.InstanceNorm2d default


# ----------------------------------------------------------------------------
# Fused conv + InstanceNorm + activation kernel (one pallas_call per layer)
# ----------------------------------------------------------------------------
def _make_fused_kernel(K, Hout, Wout, cout_full, mode, n_phase, has_bias, has_res):
    """Kernel computing one whole sample of a stride-1 VALID KxK conv with a
    fused epilogue.

    Ref order:
      x_ref    : (1, Hp, Wp, Cin)       padded (possibly repacked) input, bf16
      w_ref    : (K*K*Cin, CoutF)       tap-folded weight, bf16, resident
      [res_ref]: (1, Hout, Wout, CoutF) residual (mode == "in_res")
      [b_ref]  : (1, CoutF)             bias, f32 (mode == "bias_tanh")
      o_ref    : (1, Hout, Wout, CoutF)
      [acc_ref]: (Hout, Wout, CoutF)    f32 scratch (InstanceNorm modes)

    modes:
      "in_relu"   InstanceNorm2d(affine=False) + ReLU.  n_phase=4 for the
                  sub-pixel upsample layers: stats combined across phases.
      "in_res"    InstanceNorm2d(affine=False) + residual add (ResnetBlock).
      "bias_tanh" + bias, tanh (final 7x7 conv; no norm).
    """
    C = cout_full // n_phase
    inv_n = 1.0 / float(Hout * Wout * n_phase)

    def conv_row(x_ref, w_ref, r):
        # In-register im2col for one output row: K*K shifted (Wout, Cin)
        # slices concatenated along the channel/lane axis -> one MXU matmul
        # with contraction K*K*Cin.
        cols = []
        for kh in range(K):
            row = x_ref[0, r + kh]                       # (Wp, Cin)
            for kw in range(K):
                cols.append(row[kw:kw + Wout, :])        # (Wout, Cin)
        patches = jnp.concatenate(cols, axis=-1)         # (Wout, K*K*Cin)
        return jnp.dot(patches, w_ref[...],
                       preferred_element_type=jnp.float32)   # (Wout, CoutF) f32

    def kernel(*refs):
        x_ref, w_ref = refs[0], refs[1]
        i = 2
        res_ref = None
        b_ref = None
        if has_res:
            res_ref = refs[i]
            i += 1
        if has_bias:
            b_ref = refs[i]
            i += 1
        o_ref = refs[i]

        if mode == "bias_tanh":
            bias = b_ref[...].astype(jnp.float32)        # (1, CoutF)

            def body(r, carry):
                y = conv_row(x_ref, w_ref, r) + bias
                o_ref[0, r] = jnp.tanh(y).astype(o_ref.dtype)
                return carry

            lax.fori_loop(0, Hout, body, 0)
            return

        acc_ref = refs[i + 1]

        # Pass 1: conv rows -> f32 scratch; accumulate per-channel sums.
        def body1(r, carry):
            s, ss = carry
            y = conv_row(x_ref, w_ref, r)
            acc_ref[r] = y
            s = s + jnp.sum(y, axis=0, keepdims=True)
            ss = ss + jnp.sum(y * y, axis=0, keepdims=True)
            return s, ss

        zero = jnp.zeros((1, cout_full), jnp.float32)
        s, ss = lax.fori_loop(0, Hout, body1, (zero, zero))

        # InstanceNorm statistics (per output channel; phases share a channel).
        if n_phase > 1:
            s = sum(s[:, p * C:(p + 1) * C] for p in range(n_phase))
            ss = sum(ss[:, p * C:(p + 1) * C] for p in range(n_phase))
        mean = s * inv_n
        var = jnp.maximum(ss * inv_n - mean * mean, 0.0)
        rstd = lax.rsqrt(var + EPS)
        if n_phase > 1:
            mean = jnp.concatenate([mean] * n_phase, axis=-1)
            rstd = jnp.concatenate([rstd] * n_phase, axis=-1)

        # Pass 2: normalize + activation / residual, store.
        def body2(r, carry):
            y = (acc_ref[r] - mean) * rstd
            if mode == "in_relu":
                y = jnp.maximum(y, 0.0)
            else:                                        # "in_res"
                y = y + res_ref[0, r].astype(jnp.float32)
            o_ref[0, r] = y.astype(o_ref.dtype)
            return carry

        lax.fori_loop(0, Hout, body2, 0)

    return kernel


def fused_conv_layer(x_pad, w_packed, K, *, mode="in_relu", residual=None,
                     bias=None, n_phase=1):
    """Stride-1 VALID KxK conv with fused InstanceNorm / activation epilogue on
    an already padded NHWC input.  grid=(B,), one whole sample per grid step."""
    B, Hp, Wp, Cin = x_pad.shape
    KKC, cout_full = w_packed.shape
    assert KKC == K * K * Cin, (KKC, K, Cin)
    Hout, Wout = Hp - K + 1, Wp - K + 1

    kernel = _make_fused_kernel(K, Hout, Wout, cout_full, mode, n_phase,
                                bias is not None, residual is not None)

    # TODO(synk): for Cout < 128 the (Wout, Cout) output stores are lane-masked;
    # a lane-dense (W*C) inter-layer layout would remove that on v5e.
    in_specs = [
        pl.BlockSpec((1, Hp, Wp, Cin), lambda b: (b, 0, 0, 0)),
        pl.BlockSpec((KKC, cout_full), lambda b: (0, 0)),        # resident
    ]
    args = [x_pad, w_packed]
    if residual is not None:
        in_specs.append(pl.BlockSpec((1, Hout, Wout, cout_full),
                                     lambda b: (b, 0, 0, 0)))
        args.append(residual)
    if bias is not None:
        in_specs.append(pl.BlockSpec((1, cout_full), lambda b: (0, 0)))
        args.append(bias)

    scratch_shapes = []
    if mode != "bias_tanh":
        scratch_shapes.append(pltpu.VMEM((Hout, Wout, cout_full), jnp.float32))

    return pl.pallas_call(
        kernel,
        out_shape=jax.ShapeDtypeStruct((B, Hout, Wout, cout_full), x_pad.dtype),
        grid_spec=pltpu.PrefetchScalarGridSpec(
            num_scalar_prefetch=0,
            grid=(B,),
            in_specs=in_specs,
            out_specs=pl.BlockSpec((1, Hout, Wout, cout_full),
                                   lambda b: (b, 0, 0, 0)),
            scratch_shapes=scratch_shapes,
        ),
        compiler_params=pltpu.CompilerParams(
            dimension_semantics=("parallel",),
        ),
    )(*args)


# ----------------------------------------------------------------------------
# Layout-only glue between layers (padding / space<->depth repacks)
# TODO(synk): fold these pads / repacks into the conv kernel's input DMA to
# remove the extra HBM round-trip per layer at production resolutions.
# ----------------------------------------------------------------------------
def _reflect_pad(x, p):
    return jnp.pad(x, ((0, 0), (p, p), (p, p), (0, 0)), mode="reflect")


def _zero_pad(x, p):
    return jnp.pad(x, ((0, 0), (p, p), (p, p), (0, 0)))


def _pad_bottom_right(x):
    return jnp.pad(x, ((0, 0), (0, 1), (0, 1), (0, 0)))


def _space_to_depth2(x):
    """(B,H,W,C) -> (B,H//2,W//2,4C); channel order (row-parity, col-parity, C)."""
    B, H, W, C = x.shape
    x = x.reshape(B, H // 2, 2, W // 2, 2, C)
    x = jnp.transpose(x, (0, 1, 3, 2, 4, 5))
    return x.reshape(B, H // 2, W // 2, 4 * C)


def _depth_to_space2(x, cout):
    """(B,H,W,4*cout) phase-major -> (B,2H,2W,cout)."""
    B, H, W, _ = x.shape
    x = x.reshape(B, H, W, 2, 2, cout)
    x = jnp.transpose(x, (0, 1, 3, 2, 4, 5))
    return x.reshape(B, 2 * H, 2 * W, cout)


# ----------------------------------------------------------------------------
# Weight packing (tap folding into the matmul contraction dimension)
# ----------------------------------------------------------------------------
def _pack_stride2_weight(w):
    """(3,3,Cin,Cout) stride-2/pad-1 conv weight -> (16*Cin, Cout) taps for the
    space-to-depth (K=2, stride-1) formulation; contraction ordering
    (tap_dh, tap_dw, row_parity, col_parity, ci)."""
    cin, cout = w.shape[2], w.shape[3]
    taps = jnp.zeros((2, 2, 2, 2, cin, cout), w.dtype)
    for kh in range(3):
        for kw in range(3):
            dh, ph = divmod(kh, 2)
            dw, pw = divmod(kw, 2)
            taps = taps.at[dh, dw, ph, pw].set(w[kh, kw])
    return taps.reshape(16 * cin, cout)


def _pack_convtranspose_weight(wt):
    """PyTorch ConvTranspose2d(k=3,s=2,p=1,op=1) weight (Cin,Cout,3,3) ->
    sub-pixel 2x2 forward-conv taps (4*Cin, 4*Cout): for each output phase
    (a, b) the 2x2 VALID conv (on the input zero-padded by one row/col at the
    bottom/right) producing out[2m+a, 2n+b]."""
    cin, cout = wt.shape[0], wt.shape[1]
    taps = jnp.zeros((2, 2, cin, 4, cout), wt.dtype)   # (th, tw, ci, phase, co)

    def W(kh, kw):
        return wt[:, :, kh, kw]                         # (cin, cout)

    # phase (0,0): out[2m,2n]     = x[m,n]*W11
    taps = taps.at[0, 0, :, 0, :].set(W(1, 1))
    # phase (0,1): out[2m,2n+1]   = x[m,n]*W12 + x[m,n+1]*W10
    taps = taps.at[0, 0, :, 1, :].set(W(1, 2))
    taps = taps.at[0, 1, :, 1, :].set(W(1, 0))
    # phase (1,0): out[2m+1,2n]   = x[m,n]*W21 + x[m+1,n]*W01
    taps = taps.at[0, 0, :, 2, :].set(W(2, 1))
    taps = taps.at[1, 0, :, 2, :].set(W(0, 1))
    # phase (1,1): out[2m+1,2n+1] = x[m,n]*W22 + x[m,n+1]*W20
    #                               + x[m+1,n]*W02 + x[m+1,n+1]*W00
    taps = taps.at[0, 0, :, 3, :].set(W(2, 2))
    taps = taps.at[0, 1, :, 3, :].set(W(2, 0))
    taps = taps.at[1, 0, :, 3, :].set(W(0, 2))
    taps = taps.at[1, 1, :, 3, :].set(W(0, 0))
    return taps.reshape(4 * cin, 4 * cout)


# ----------------------------------------------------------------------------
# Parameters (deterministic stand-in for the PyTorch conv weights)
# ----------------------------------------------------------------------------
def init_params(key, input_nc, ngf, output_nc, n_downsample, n_blocks):
    """Convs wrapped by the 'instance' norm layer have their bias removed by
    get_nonspade_norm_layer, so only the final 7x7 conv carries a bias."""
    n_keys = 2 + 2 * n_downsample + 2 * n_blocks
    keys = iter(jax.random.split(key, n_keys))

    def w_init(k, cin, cout):
        return 0.02 * jax.random.normal(next(keys), (k, k, cin, cout), jnp.float32)

    params = {}
    params["stem_w"] = (
        w_init(7, input_nc, ngf).reshape(49 * input_nc, ngf).astype(ACT_DTYPE))

    mult = 1
    down = []
    for _ in range(n_downsample):
        cin, cout = ngf * mult, ngf * mult * 2
        down.append(_pack_stride2_weight(w_init(3, cin, cout)).astype(ACT_DTYPE))
        mult *= 2
    params["down_ws"] = down

    dim = ngf * mult
    params["block_ws"] = [
        (w_init(3, dim, dim).reshape(9 * dim, dim).astype(ACT_DTYPE),
         w_init(3, dim, dim).reshape(9 * dim, dim).astype(ACT_DTYPE))
        for _ in range(n_blocks)]

    up = []
    for _ in range(n_downsample):
        cin, cout = ngf * mult, ngf * mult // 2
        wt = 0.02 * jax.random.normal(next(keys), (cin, cout, 3, 3), jnp.float32)
        up.append(_pack_convtranspose_weight(wt).astype(ACT_DTYPE))
        mult //= 2
    params["up_ws"] = up

    params["head_w"] = (
        w_init(7, ngf, output_nc).reshape(49 * ngf, output_nc).astype(ACT_DTYPE))
    params["head_b"] = jnp.zeros((1, output_nc), jnp.float32)
    return params


# ----------------------------------------------------------------------------
# Pix2PixHDGenerator.forward
# ----------------------------------------------------------------------------
def pix2pixhd_forward(params, x_nchw):
    n_down = len(params["down_ws"])
    _, _, H, W = x_nchw.shape
    assert H % (1 << n_down) == 0 and W % (1 << n_down) == 0
    assert (H >> n_down) >= 2 and (W >> n_down) >= 2, \
        "bottleneck must be >= 2x2 for ReflectionPad2d(1) in the resblocks"

    h = jnp.transpose(x_nchw, (0, 2, 3, 1)).astype(ACT_DTYPE)    # NCHW -> NHWC

    # ReflectionPad(3) + 7x7 conv (no bias) + InstanceNorm + ReLU (fused)
    h = fused_conv_layer(_reflect_pad(h, 3), params["stem_w"], K=7)

    # Downsampling: Conv2d(k=3, s=2, p=1, no bias) + InstanceNorm + ReLU,
    # rewritten as a stride-1 K=2 conv on the space-to-depth repacked input.
    for w in params["down_ws"]:
        h = fused_conv_layer(_space_to_depth2(_zero_pad(h, 1)), w, K=2)

    # ResnetBlocks: x + IN(conv(pad(relu(IN(conv(pad(x))))))), with IN+ReLU
    # and IN+residual fused into the conv kernels.
    for w1, w2 in params["block_ws"]:
        y = fused_conv_layer(_reflect_pad(h, 1), w1, K=3)
        h = fused_conv_layer(_reflect_pad(y, 1), w2, K=3,
                             mode="in_res", residual=h)

    # Upsampling: ConvTranspose2d(k=3,s=2,p=1,op=1, no bias) + IN + ReLU as a
    # 4-phase sub-pixel K=2 conv (IN stats combined across phases in-kernel),
    # followed by a cheap depth-to-space HLO.
    for w in params["up_ws"]:
        cout = w.shape[1] // 4
        y = fused_conv_layer(_pad_bottom_right(h), w, K=2, n_phase=4)
        h = _depth_to_space2(y, cout)

    # ReflectionPad(3) + 7x7 conv (+bias) + Tanh, fused in one kernel.
    out = fused_conv_layer(_reflect_pad(h, 3), params["head_w"],
                           K=7, mode="bias_tanh", bias=params["head_b"])
    return jnp.transpose(out, (0, 3, 1, 2)).astype(jnp.float32)  # NHWC -> NCHW


# ----------------------------------------------------------------------------
if __name__ == "__main__":
    # opt: label_nc=3, contain_dontcare_label=False, no_instance=False -> input_nc=4
    #      ngf=8, output_nc=3, resnet_n_downsample=4, resnet_n_blocks=9,
    #      resnet_kernel_size=3, resnet_initial_kernel_size=7, norm_G='instance'
    INPUT_NC, NGF, OUTPUT_NC = 4, 8, 3
    N_DOWNSAMPLE, N_BLOCKS = 4, 9
    B, H, W = 2, 32, 32     # 32 so four stride-2 downsamples leave a 2x2 bottleneck

    key = jax.random.PRNGKey(0)
    kp, kx = jax.random.split(key)
    params = init_params(kp, INPUT_NC, NGF, OUTPUT_NC, N_DOWNSAMPLE, N_BLOCKS)
    x = jax.random.normal(kx, (B, INPUT_NC, H, W), jnp.float32)

    fwd = jax.jit(pix2pixhd_forward)
    out = fwd(params, x)
    jax.block_until_ready(out)

    assert out.shape == (B, OUTPUT_NC, H, W)
    assert bool(jnp.all(jnp.isfinite(out)))
    assert bool(jnp.all(jnp.abs(out) <= 1.0 + 1e-2))    # tanh output range
    print("KERNEL_OK")
</pallas_src>

<mosaic_0001>
module attributes {stable_mosaic.version = 11 : i64} {
  func.func @kernel(%arg0: i32, %arg1: memref<1x38x38x4xbf16, #tpu.memory_space<vmem>>, %arg2: memref<196x8xbf16, #tpu.memory_space<vmem>>, %arg3: memref<1x32x32x8xbf16, #tpu.memory_space<vmem>>, %arg4: memref<32x32x8xf32, #tpu.memory_space<vmem>>) attributes {dimension_semantics = [#tpu.dimension_semantics<parallel>], iteration_bounds = array<i64: 2>, scalar_prefetch = 0 : i64, scratch_operands = 1 : i64, tpu.core_type = #tpu.core_type<tc>, window_params = [{transform_indices = @transform_0, window_bounds = array<i64: 1, 38, 38, 4>}, {pipeline_mode = #tpu.pipeline_mode<synchronous>, transform_indices = @transform_1, window_bounds = array<i64: 196, 8>}, {transform_indices = @transform_2, window_bounds = array<i64: 1, 32, 32, 8>}]} {
    %cst = arith.constant 0.000000e+00 : f32
    %0 = vector.broadcast %cst : f32 to vector<1x8xf32>
    %c0_i32 = arith.constant 0 : i32
    %c32_i32 = arith.constant 32 : i32
    %1 = arith.addi %c0_i32, %c32_i32 : i32
    %c1_i32 = arith.constant 1 : i32
    %2:2 = scf.for %arg5 = %c0_i32 to %1 step %c1_i32 iter_args(%arg6 = %0, %arg7 = %0) -> (vector<1x8xf32>, vector<1x8xf32>)  : i32 {
      %c0_i32_9 = arith.constant 0 : i32
      %15 = arith.addi %arg5, %c0_i32_9 : i32
      %c0 = arith.constant 0 : index
      %16 = arith.index_cast %15 : i32 to index
      %c0_10 = arith.constant 0 : index
      %c0_11 = arith.constant 0 : index
      %17 = vector.load %arg1[%c0, %16, %c0_10, %c0_11] : memref<1x38x38x4xbf16, #tpu.memory_space<vmem>>, vector<1x1x38x4xbf16>
      %18 = vector.shape_cast %17 : vector<1x1x38x4xbf16> to vector<38x4xbf16>
      %19 = vector.extract_strided_slice %18 {offsets = [0, 0], sizes = [32, 4], strides = [1, 1]} : vector<38x4xbf16> to vector<32x4xbf16>
      %20 = vector.extract_strided_slice %18 {offsets = [1, 0], sizes = [32, 4], strides = [1, 1]} : vector<38x4xbf16> to vector<32x4xbf16>
      %21 = vector.extract_strided_slice %18 {offsets = [2, 0], sizes = [32, 4], strides = [1, 1]} : vector<38x4xbf16> to vector<32x4xbf16>
      %22 = vector.extract_strided_slice %18 {offsets = [3, 0], sizes = [32, 4], strides = [1, 1]} : vector<38x4xbf16> to vector<32x4xbf16>
      %23 = vector.extract_strided_slice %18 {offsets = [4, 0], sizes = [32, 4], strides = [1, 1]} : vector<38x4xbf16> to vector<32x4xbf16>
      %24 = vector.extract_strided_slice %18 {offsets = [5, 0], sizes = [32, 4], strides = [1, 1]} : vector<38x4xbf16> to vector<32x4xbf16>
      %25 = vector.extract_strided_slice %18 {offsets = [6, 0], sizes = [32, 4], strides = [1, 1]} : vector<38x4xbf16> to vector<32x4xbf16>
      %c1_i32_12 = arith.constant 1 : i32
      %26 = arith.addi %arg5, %c1_i32_12 : i32
      %c0_13 = arith.constant 0 : index
      %27 = arith.index_cast %26 : i32 to index
      %c0_14 = arith.constant 0 : index
      %c0_15 = arith.constant 0 : index
      %28 = vector.load %arg1[%c0_13, %27, %c0_14, %c0_15] : memref<1x38x38x4xbf16, #tpu.memory_space<vmem>>, vector<1x1x38x4xbf16>
      %29 = vector.shape_cast %28 : vector<1x1x38x4xbf16> to vector<38x4xbf16>
      %30 = vector.extract_strided_slice %29 {offsets = [0, 0], sizes = [32, 4], strides = [1, 1]} : vector<38x4xbf16> to vector<32x4xbf16>
      %31 = vector.extract_strided_slice %29 {offsets = [1, 0], sizes = [32, 4], strides = [1, 1]} : vector<38x4xbf16> to vector<32x4xbf16>
      %32 = vector.extract_strided_slice %29 {offsets = [2, 0], sizes = [32, 4], strides = [1, 1]} : vector<38x4xbf16> to vector<32x4xbf16>
      %33 = vector.extract_strided_slice %29 {offsets = [3, 0], sizes = [32, 4], strides = [1, 1]} : vector<38x4xbf16> to vector<32x4xbf16>
      %34 = vector.extract_strided_slice %29 {offsets = [4, 0], sizes = [32, 4], strides = [1, 1]} : vector<38x4xbf16> to vector<32x4xbf16>
      %35 = vector.extract_strided_slice %29 {offsets = [5, 0], sizes = [32, 4], strides = [1, 1]} : vector<38x4xbf16> to vector<32x4xbf16>
      %36 = vector.extract_strided_slice %29 {offsets = [6, 0], sizes = [32, 4], strides = [1, 1]} : vector<38x4xbf16> to vector<32x4xbf16>
      %c2_i32 = arith.constant 2 : i32
      %37 = arith.addi %arg5, %c2_i32 : i32
      %c0_16 = arith.constant 0 : index
      %38 = arith.index_cast %37 : i32 to index
      %c0_17 = arith.constant 0 : index
      %c0_18 = arith.constant 0 : index
      %39 = vector.load %arg1[%c0_16, %38, %c0_17, %c0_18] : memref<1x38x38x4xbf16, #tpu.memory_space<vmem>>, vector<1x1x38x4xbf16>
      %40 = vector.shape_cast %39 : vector<1x1x38x4xbf16> to vector<38x4xbf16>
      %41 = vector.extract_strided_slice %40 {offsets = [0, 0], sizes = [32, 4], strides = [1, 1]} : vector<38x4xbf16> to vector<32x4xbf16>
      %42 = vector.extract_strided_slice %40 {offsets = [1, 0], sizes = [32, 4], strides = [1, 1]} : vector<38x4xbf16> to vector<32x4xbf16>
      %43 = vector.extract_strided_slice %40 {offsets = [2, 0], sizes = [32, 4], strides = [1, 1]} : vector<38x4xbf16> to vector<32x4xbf16>
      %44 = vector.extract_strided_slice %40 {offsets = [3, 0], sizes = [32, 4], strides = [1, 1]} : vector<38x4xbf16> to vector<32x4xbf16>
      %45 = vector.extract_strided_slice %40 {offsets = [4, 0], sizes = [32, 4], strides = [1, 1]} : vector<38x4xbf16> to vector<32x4xbf16>
      %46 = vector.extract_strided_slice %40 {offsets = [5, 0], sizes = [32, 4], strides = [1, 1]} : vector<38x4xbf16> to vector<32x4xbf16>
      %47 = vector.extract_strided_slice %40 {offsets = [6, 0], sizes = [32, 4], strides = [1, 1]} : vector<38x4xbf16> to vector<32x4xbf16>
      %c3_i32 = arith.constant 3 : i32
      %48 = arith.addi %arg5, %c3_i32 : i32
      %c0_19 = arith.constant 0 : index
      %49 = arith.index_cast %48 : i32 to index
      %c0_20 = arith.constant 0 : index
      %c0_21 = arith.constant 0 : index
      %50 = vector.load %arg1[%c0_19, %49, %c0_20, %c0_21] : memref<1x38x38x4xbf16, #tpu.memory_space<vmem>>, vector<1x1x38x4xbf16>
      %51 = vector.shape_cast %50 : vector<1x1x38x4xbf16> to vector<38x4xbf16>
      %52 = vector.extract_strided_slice %51 {offsets = [0, 0], sizes = [32, 4], strides = [1, 1]} : vector<38x4xbf16> to vector<32x4xbf16>
      %53 = vector.extract_strided_slice %51 {offsets = [1, 0], sizes = [32, 4], strides = [1, 1]} : vector<38x4xbf16> to vector<32x4xbf16>
      %54 = vector.extract_strided_slice %51 {offsets = [2, 0], sizes = [32, 4], strides = [1, 1]} : vector<38x4xbf16> to vector<32x4xbf16>
      %55 = vector.extract_strided_slice %51 {offsets = [3, 0], sizes = [32, 4], strides = [1, 1]} : vector<38x4xbf16> to vector<32x4xbf16>
      %56 = vector.extract_strided_slice %51 {offsets = [4, 0], sizes = [32, 4], strides = [1, 1]} : vector<38x4xbf16> to vector<32x4xbf16>
      %57 = vector.extract_strided_slice %51 {offsets = [5, 0], sizes = [32, 4], strides = [1, 1]} : vector<38x4xbf16> to vector<32x4xbf16>
      %58 = vector.extract_strided_slice %51 {offsets = [6, 0], sizes = [32, 4], strides = [1, 1]} : vector<38x4xbf16> to vector<32x4xbf16>
      %c4_i32 = arith.constant 4 : i32
      %59 = arith.addi %arg5, %c4_i32 : i32
      %c0_22 = arith.constant 0 : index
      %60 = arith.index_cast %59 : i32 to index
      %c0_23 = arith.constant 0 : index
      %c0_24 = arith.constant 0 : index
      %61 = vector.load %arg1[%c0_22, %60, %c0_23, %c0_24] : memref<1x38x38x4xbf16, #tpu.memory_space<vmem>>, vector<1x1x38x4xbf16>
      %62 = vector.shape_cast %61 : vector<1x1x38x4xbf16> to vector<38x4xbf16>
      %63 = vector.extract_strided_slice %62 {offsets = [0, 0], sizes = [32, 4], strides = [1, 1]} : vector<38x4xbf16> to vector<32x4xbf16>
      %64 = vector.extract_strided_slice %62 {offsets = [1, 0], sizes = [32, 4], strides = [1, 1]} : vector<38x4xbf16> to vector<32x4xbf16>
      %65 = vector.extract_strided_slice %62 {offsets = [2, 0], sizes = [32, 4], strides = [1, 1]} : vector<38x4xbf16> to vector<32x4xbf16>
      %66 = vector.extract_strided_slice %62 {offsets = [3, 0], sizes = [32, 4], strides = [1, 1]} : vector<38x4xbf16> to vector<32x4xbf16>
      %67 = vector.extract_strided_slice %62 {offsets = [4, 0], sizes = [32, 4], strides = [1, 1]} : vector<38x4xbf16> to vector<32x4xbf16>
      %68 = vector.extract_strided_slice %62 {offsets = [5, 0], sizes = [32, 4], strides = [1, 1]} : vector<38x4xbf16> to vector<32x4xbf16>
      %69 = vector.extract_strided_slice %62 {offsets = [6, 0], sizes = [32, 4], strides = [1, 1]} : vector<38x4xbf16> to vector<32x4xbf16>
      %c5_i32 = arith.constant 5 : i32
      %70 = arith.addi %arg5, %c5_i32 : i32
      %c0_25 = arith.constant 0 : index
      %71 = arith.index_cast %70 : i32 to index
      %c0_26 = arith.constant 0 : index
      %c0_27 = arith.constant 0 : index
      %72 = vector.load %arg1[%c0_25, %71, %c0_26, %c0_27] : memref<1x38x38x4xbf16, #tpu.memory_space<vmem>>, vector<1x1x38x4xbf16>
      %73 = vector.shape_cast %72 : vector<1x1x38x4xbf16> to vector<38x4xbf16>
      %74 = vector.extract_strided_slice %73 {offsets = [0, 0], sizes = [32, 4], strides = [1, 1]} : vector<38x4xbf16> to vector<32x4xbf16>
      %75 = vector.extract_strided_slice %73 {offsets = [1, 0], sizes = [32, 4], strides = [1, 1]} : vector<38x4xbf16> to vector<32x4xbf16>
      %76 = vector.extract_strided_slice %73 {offsets = [2, 0], sizes = [32, 4], strides = [1, 1]} : vector<38x4xbf16> to vector<32x4xbf16>
      %77 = vector.extract_strided_slice %73 {offsets = [3, 0], sizes = [32, 4], strides = [1, 1]} : vector<38x4xbf16> to vector<32x4xbf16>
      %78 = vector.extract_strided_slice %73 {offsets = [4, 0], sizes = [32, 4], strides = [1, 1]} : vector<38x4xbf16> to vector<32x4xbf16>
      %79 = vector.extract_strided_slice %73 {offsets = [5, 0], sizes = [32, 4], strides = [1, 1]} : vector<38x4xbf16> to vector<32x4xbf16>
      %80 = vector.extract_strided_slice %73 {offsets = [6, 0], sizes = [32, 4], strides = [1, 1]} : vector<38x4xbf16> to vector<32x4xbf16>
      %c6_i32 = arith.constant 6 : i32
      %81 = arith.addi %arg5, %c6_i32 : i32
      %c0_28 = arith.constant 0 : index
      %82 = arith.index_cast %81 : i32 to index
      %c0_29 = arith.constant 0 : index
      %c0_30 = arith.constant 0 : index
      %83 = vector.load %arg1[%c0_28, %82, %c0_29, %c0_30] : memref<1x38x38x4xbf16, #tpu.memory_space<vmem>>, vector<1x1x38x4xbf16>
      %84 = vector.shape_cast %83 : vector<1x1x38x4xbf16> to vector<38x4xbf16>
      %85 = vector.extract_strided_slice %84 {offsets = [0, 0], sizes = [32, 4], strides = [1, 1]} : vector<38x4xbf16> to vector<32x4xbf16>
      %86 = vector.extract_strided_slice %84 {offsets = [1, 0], sizes = [32, 4], strides = [1, 1]} : vector<38x4xbf16> to vector<32x4xbf16>
      %87 = vector.extract_strided_slice %84 {offsets = [2, 0], sizes = [32, 4], strides = [1, 1]} : vector<38x4xbf16> to vector<32x4xbf16>
      %88 = vector.extract_strided_slice %84 {offsets = [3, 0], sizes = [32, 4], strides = [1, 1]} : vector<38x4xbf16> to vector<32x4xbf16>
      %89 = vector.extract_strided_slice %84 {offsets = [4, 0], sizes = [32, 4], strides = [1, 1]} : vector<38x4xbf16> to vector<32x4xbf16>
      %90 = vector.extract_strided_slice %84 {offsets = [5, 0], sizes = [32, 4], strides = [1, 1]} : vector<38x4xbf16> to vector<32x4xbf16>
      %91 = vector.extract_strided_slice %84 {offsets = [6, 0], sizes = [32, 4], strides = [1, 1]} : vector<38x4xbf16> to vector<32x4xbf16>
      %92 = tpu.concatenate %19, %20, %21, %22, %23, %24, %25, %30, %31, %32, %33, %34, %35, %36, %41, %42 in 1 : vector<32x4xbf16>, vector<32x4xbf16>, vector<32x4xbf16>, vector<32x4xbf16>, vector<32x4xbf16>, vector<32x4xbf16>, vector<32x4xbf16>, vector<32x4xbf16>, vector<32x4xbf16>, vector<32x4xbf16>, vector<32x4xbf16>, vector<32x4xbf16>, vector<32x4xbf16>, vector<32x4xbf16>, vector<32x4xbf16>, vector<32x4xbf16> -> vector<32x64xbf16>
      %93 = tpu.concatenate %43, %44, %45, %46, %47, %52, %53, %54, %55, %56, %57, %58, %63, %64, %65, %66 in 1 : vector<32x4xbf16>, vector<32x4xbf16>, vector<32x4xbf16>, vector<32x4xbf16>, vector<32x4xbf16>, vector<32x4xbf16>, vector<32x4xbf16>, vector<32x4xbf16>, vector<32x4xbf16>, vector<32x4xbf16>, vector<32x4xbf16>, vector<32x4xbf16>, vector<32x4xbf16>, vector<32x4xbf16>, vector<32x4xbf16>, vector<32x4xbf16> -> vector<32x64xbf16>
      %94 = tpu.concatenate %67, %68, %69, %74, %75, %76, %77, %78, %79, %80, %85, %86, %87, %88, %89, %90 in 1 : vector<32x4xbf16>, vector<32x4xbf16>, vector<32x4xbf16>, vector<32x4xbf16>, vector<32x4xbf16>, vector<32x4xbf16>, vector<32x4xbf16>, vector<32x4xbf16>, vector<32x4xbf16>, vector<32x4xbf16>, vector<32x4xbf16>, vector<32x4xbf16>, vector<32x4xbf16>, vector<32x4xbf16>, vector<32x4xbf16>, vector<32x4xbf16> -> vector<32x64xbf16>
      %95 = tpu.concatenate %92, %93, %94, %91 in 1 : vector<32x64xbf16>, vector<32x64xbf16>, vector<32x64xbf16>, vector<32x4xbf16> -> vector<32x196xbf16>
      %c0_31 = arith.constant 0 : index
      %c0_32 = arith.constant 0 : index
      %96 = vector.load %arg2[%c0_31, %c0_32] : memref<196x8xbf16, #tpu.memory_space<vmem>>, vector<196x8xbf16>
      %cst_33 = arith.constant dense<0.000000e+00> : vector<32x8xf32>
      %97 = tpu.matmul %95, %96, %cst_33 {dimension_numbers = #tpu.dot_dimension_numbers<[1], [0], [0], [1], [0, 0, 1, 1], [], []>} : vector<32x196xbf16>, vector<196x8xbf16>, vector<32x8xf32> -> vector<32x8xf32>
      %98 = arith.index_cast %arg5 : i32 to index
      %c0_34 = arith.constant 0 : index
      %c0_35 = arith.constant 0 : index
      %99 = vector.load %arg4[%98, %c0_34, %c0_35] : memref<32x32x8xf32, #tpu.memory_space<vmem>>, vector<1x32x8xf32>
      %100 = vector.shape_cast %99 : vector<1x32x8xf32> to vector<32x8xf32>
      %101 = vector.shape_cast %97 : vector<32x8xf32> to vector<1x32x8xf32>
      tpu.vector_store %arg4[%98, %c0_34, %c0_35], %101 {strides = array<i32>} : memref<32x32x8xf32, #tpu.memory_space<vmem>>, vector<1x32x8xf32>,
      %cst_36 = arith.constant dense<0.000000e+00> : vector<8xf32>
      %102 = vector.multi_reduction <add>, %97, %cst_36 [0] : vector<32x8xf32> to vector<8xf32>
      %103 = vector.shape_cast %102 : vector<8xf32> to vector<1x8xf32>
      %104 = arith.addf %arg6, %103 : vector<1x8xf32>
      %105 = arith.mulf %97, %97 : vector<32x8xf32>
      %cst_37 = arith.constant dense<0.000000e+00> : vector<8xf32>
      %106 = vector.multi_reduction <add>, %105, %cst_37 [0] : vector<32x8xf32> to vector<8xf32>
      %107 = vector.shape_cast %106 : vector<8xf32> to vector<1x8xf32>
      %108 = arith.addf %arg7, %107 : vector<1x8xf32>
      scf.yield %104, %108 : vector<1x8xf32>, vector<1x8xf32>
    }
    %c32_i32_0 = arith.constant 32 : i32
    %cst_1 = arith.constant 9.765625E-4 : f32
    %3 = vector.broadcast %cst_1 : f32 to vector<1x8xf32>
    %4 = arith.mulf %2#0, %3 : vector<1x8xf32>
    %cst_2 = arith.constant 9.765625E-4 : f32
    %5 = vector.broadcast %cst_2 : f32 to vector<1x8xf32>
    %6 = arith.mulf %2#1, %5 : vector<1x8xf32>
    %7 = arith.mulf %4, %4 : vector<1x8xf32>
    %8 = arith.subf %6, %7 : vector<1x8xf32>
    %cst_3 = arith.constant 0.000000e+00 : f32
    %9 = vector.broadcast %cst_3 : f32 to vector<1x8xf32>
    %10 = arith.maximumf %8, %9 : vector<1x8xf32>
    %cst_4 = arith.constant 9.99999974E-6 : f32
    %11 = vector.broadcast %cst_4 : f32 to vector<1x8xf32>
    %12 = arith.addf %10, %11 : vector<1x8xf32>
    %13 = math.rsqrt %12 : vector<1x8xf32>
    %c0_i32_5 = arith.constant 0 : i32
    %c32_i32_6 = arith.constant 32 : i32
    %14 = arith.addi %c0_i32_5, %c32_i32_6 : i32
    %c1_i32_7 = arith.constant 1 : i32
    scf.for %arg5 = %c0_i32_5 to %14 step %c1_i32_7  : i32 {
      %15 = arith.index_cast %arg5 : i32 to index
      %c0 = arith.constant 0 : index
      %c0_9 = arith.constant 0 : index
      %16 = vector.load %arg4[%15, %c0, %c0_9] : memref<32x32x8xf32, #tpu.memory_space<vmem>>, vector<1x32x8xf32>
      %17 = vector.shape_cast %16 : vector<1x32x8xf32> to vector<32x8xf32>
      %18 = vector.broadcast %4 : vector<1x8xf32> to vector<32x8xf32>
      %19 = arith.subf %17, %18 : vector<32x8xf32>
      %20 = vector.broadcast %13 : vector<1x8xf32> to vector<32x8xf32>
      %21 = arith.mulf %19, %20 : vector<32x8xf32>
      %cst_10 = arith.constant 0.000000e+00 : f32
      %22 = vector.broadcast %cst_10 : f32 to vector<32x8xf32>
      %23 = arith.maximumf %21, %22 : vector<32x8xf32>
      %24 = arith.truncf %23 : vector<32x8xf32> to vector<32x8xbf16>
      %c0_11 = arith.constant 0 : index
      %25 = arith.index_cast %arg5 : i32 to index
      %c0_12 = arith.constant 0 : index
      %c0_13 = arith.constant 0 : index
      %26 = vector.load %arg3[%c0_11, %25, %c0_12, %c0_13] : memref<1x32x32x8xbf16, #tpu.memory_space<vmem>>, vector<1x1x32x8xbf16>
      %27 = vector.shape_cast %26 : vector<1x1x32x8xbf16> to vector<32x8xbf16>
      %28 = vector.shape_cast %24 : vector<32x8xbf16> to vector<1x1x32x8xbf16>
      tpu.vector_store %arg3[%c0_11, %25, %c0_12, %c0_13], %28 {strides = array<i32>} : memref<1x32x32x8xbf16, #tpu.memory_space<vmem>>, vector<1x1x32x8xbf16>,
    }
    %c32_i32_8 = arith.constant 32 : i32
    return
  }
  func.func @transform_0(%arg0: i32) -> (i32, i32, i32, i32) {
    %c0_i32 = arith.constant 0 : i32
    %c0_i32_0 = arith.constant 0 : i32
    %c0_i32_1 = arith.constant 0 : i32
    %c0_i32_2 = arith.constant 0 : i32
    return %arg0, %c0_i32, %c0_i32_0, %c0_i32_1 : i32, i32, i32, i32
  }
  func.func @transform_1(%arg0: i32) -> (i32, i32) {
    %c0_i32 = arith.constant 0 : i32
    %c0_i32_0 = arith.constant 0 : i32
    %c0_i32_1 = arith.constant 0 : i32
    return %c0_i32, %c0_i32_0 : i32, i32
  }
  func.func @transform_2(%arg0: i32) -> (i32, i32, i32, i32) {
    %c0_i32 = arith.constant 0 : i32
    %c0_i32_0 = arith.constant 0 : i32
    %c0_i32_1 = arith.constant 0 : i32
    %c0_i32_2 = arith.constant 0 : i32
    return %arg0, %c0_i32, %c0_i32_0, %c0_i32_1 : i32, i32, i32, i32
  }
}

module attributes {stable_mosaic.version = 11 : i64} {
  func.func @kernel(%arg0: i32, %arg1: memref<1x17x17x32xbf16, #tpu.memory_space<vmem>>, %arg2: memref<128x16xbf16, #tpu.memory_space<vmem>>, %arg3: memref<1x16x16x16xbf16, #tpu.memory_space<vmem>>, %arg4: memref<16x16x16xf32, #tpu.memory_space<vmem>>) attributes {dimension_semantics = [#tpu.dimension_semantics<parallel>], iteration_bounds = array<i64: 2>, scalar_prefetch = 0 : i64, scratch_operands = 1 : i64, tpu.core_type = #tpu.core_type<tc>, window_params = [{transform_indices = @transform_0, window_bounds = array<i64: 1, 17, 17, 32>}, {pipeline_mode = #tpu.pipeline_mode<synchronous>, transform_indices = @transform_1, window_bounds = array<i64: 128, 16>}, {transform_indices = @transform_2, window_bounds = array<i64: 1, 16, 16, 16>}]} {
    %cst = arith.constant 0.000000e+00 : f32
    %0 = vector.broadcast %cst : f32 to vector<1x16xf32>
    %c0_i32 = arith.constant 0 : i32
    %c16_i32 = arith.constant 16 : i32
    %1 = arith.addi %c0_i32, %c16_i32 : i32
    %c1_i32 = arith.constant 1 : i32
    %2:2 = scf.for %arg5 = %c0_i32 to %1 step %c1_i32 iter_args(%arg6 = %0, %arg7 = %0) -> (vector<1x16xf32>, vector<1x16xf32>)  : i32 {
      %c0_i32_9 = arith.constant 0 : i32
      %15 = arith.addi %arg5, %c0_i32_9 : i32
      %c0 = arith.constant 0 : index
      %16 = arith.index_cast %15 : i32 to index
      %c0_10 = arith.constant 0 : index
      %c0_11 = arith.constant 0 : index
      %17 = vector.load %arg1[%c0, %16, %c0_10, %c0_11] : memref<1x17x17x32xbf16, #tpu.memory_space<vmem>>, vector<1x1x17x32xbf16>
      %18 = vector.shape_cast %17 : vector<1x1x17x32xbf16> to vector<17x32xbf16>
      %19 = vector.extract_strided_slice %18 {offsets = [0, 0], sizes = [16, 32], strides = [1, 1]} : vector<17x32xbf16> to vector<16x32xbf16>
      %20 = vector.extract_strided_slice %18 {offsets = [1, 0], sizes = [16, 32], strides = [1, 1]} : vector<17x32xbf16> to vector<16x32xbf16>
      %c1_i32_12 = arith.constant 1 : i32
      %21 = arith.addi %arg5, %c1_i32_12 : i32
      %c0_13 = arith.constant 0 : index
      %22 = arith.index_cast %21 : i32 to index
      %c0_14 = arith.constant 0 : index
      %c0_15 = arith.constant 0 : index
      %23 = vector.load %arg1[%c0_13, %22, %c0_14, %c0_15] : memref<1x17x17x32xbf16, #tpu.memory_space<vmem>>, vector<1x1x17x32xbf16>
      %24 = vector.shape_cast %23 : vector<1x1x17x32xbf16> to vector<17x32xbf16>
      %25 = vector.extract_strided_slice %24 {offsets = [0, 0], sizes = [16, 32], strides = [1, 1]} : vector<17x32xbf16> to vector<16x32xbf16>
      %26 = vector.extract_strided_slice %24 {offsets = [1, 0], sizes = [16, 32], strides = [1, 1]} : vector<17x32xbf16> to vector<16x32xbf16>
      %27 = tpu.concatenate %19, %20, %25, %26 in 1 : vector<16x32xbf16>, vector<16x32xbf16>, vector<16x32xbf16>, vector<16x32xbf16> -> vector<16x128xbf16>
      %c0_16 = arith.constant 0 : index
      %c0_17 = arith.constant 0 : index
      %28 = vector.load %arg2[%c0_16, %c0_17] : memref<128x16xbf16, #tpu.memory_space<vmem>>, vector<128x16xbf16>
      %cst_18 = arith.constant dense<0.000000e+00> : vector<16x16xf32>
      %29 = tpu.matmul %27, %28, %cst_18 {dimension_numbers = #tpu.dot_dimension_numbers<[1], [0], [0], [1], [0, 0, 1, 1], [], []>} : vector<16x128xbf16>, vector<128x16xbf16>, vector<16x16xf32> -> vector<16x16xf32>
      %30 = arith.index_cast %arg5 : i32 to index
      %c0_19 = arith.constant 0 : index
      %c0_20 = arith.constant 0 : index
      %31 = vector.load %arg4[%30, %c0_19, %c0_20] : memref<16x16x16xf32, #tpu.memory_space<vmem>>, vector<1x16x16xf32>
      %32 = vector.shape_cast %31 : vector<1x16x16xf32> to vector<16x16xf32>
      %33 = vector.shape_cast %29 : vector<16x16xf32> to vector<1x16x16xf32>
      tpu.vector_store %arg4[%30, %c0_19, %c0_20], %33 {strides = array<i32>} : memref<16x16x16xf32, #tpu.memory_space<vmem>>, vector<1x16x16xf32>,
      %cst_21 = arith.constant dense<0.000000e+00> : vector<16xf32>
      %34 = vector.multi_reduction <add>, %29, %cst_21 [0] : vector<16x16xf32> to vector<16xf32>
      %35 = vector.shape_cast %34 : vector<16xf32> to vector<1x16xf32>
      %36 = arith.addf %arg6, %35 : vector<1x16xf32>
      %37 = arith.mulf %29, %29 : vector<16x16xf32>
      %cst_22 = arith.constant dense<0.000000e+00> : vector<16xf32>
      %38 = vector.multi_reduction <add>, %37, %cst_22 [0] : vector<16x16xf32> to vector<16xf32>
      %39 = vector.shape_cast %38 : vector<16xf32> to vector<1x16xf32>
      %40 = arith.addf %arg7, %39 : vector<1x16xf32>
      scf.yield %36, %40 : vector<1x16xf32>, vector<1x16xf32>
    }
    %c16_i32_0 = arith.constant 16 : i32
    %cst_1 = arith.constant 3.906250e-03 : f32
    %3 = vector.broadcast %cst_1 : f32 to vector<1x16xf32>
    %4 = arith.mulf %2#0, %3 : vector<1x16xf32>
    %cst_2 = arith.constant 3.906250e-03 : f32
    %5 = vector.broadcast %cst_2 : f32 to vector<1x16xf32>
    %6 = arith.mulf %2#1, %5 : vector<1x16xf32>
    %7 = arith.mulf %4, %4 : vector<1x16xf32>
    %8 = arith.subf %6, %7 : vector<1x16xf32>
    %cst_3 = arith.constant 0.000000e+00 : f32
    %9 = vector.broadcast %cst_3 : f32 to vector<1x16xf32>
    %10 = arith.maximumf %8, %9 : vector<1x16xf32>
    %cst_4 = arith.constant 9.99999974E-6 : f32
    %11 = vector.broadcast %cst_4 : f32 to vector<1x16xf32>
    %12 = arith.addf %10, %11 : vector<1x16xf32>
    %13 = math.rsqrt %12 : vector<1x16xf32>
    %c0_i32_5 = arith.constant 0 : i32
    %c16_i32_6 = arith.constant 16 : i32
    %14 = arith.addi %c0_i32_5, %c16_i32_6 : i32
    %c1_i32_7 = arith.constant 1 : i32
    scf.for %arg5 = %c0_i32_5 to %14 step %c1_i32_7  : i32 {
      %15 = arith.index_cast %arg5 : i32 to index
      %c0 = arith.constant 0 : index
      %c0_9 = arith.constant 0 : index
      %16 = vector.load %arg4[%15, %c0, %c0_9] : memref<16x16x16xf32, #tpu.memory_space<vmem>>, vector<1x16x16xf32>
      %17 = vector.shape_cast %16 : vector<1x16x16xf32> to vector<16x16xf32>
      %18 = vector.broadcast %4 : vector<1x16xf32> to vector<16x16xf32>
      %19 = arith.subf %17, %18 : vector<16x16xf32>
      %20 = vector.broadcast %13 : vector<1x16xf32> to vector<16x16xf32>
      %21 = arith.mulf %19, %20 : vector<16x16xf32>
      %cst_10 = arith.constant 0.000000e+00 : f32
      %22 = vector.broadcast %cst_10 : f32 to vector<16x16xf32>
      %23 = arith.maximumf %21, %22 : vector<16x16xf32>
      %24 = arith.truncf %23 : vector<16x16xf32> to vector<16x16xbf16>
      %c0_11 = arith.constant 0 : index
      %25 = arith.index_cast %arg5 : i32 to index
      %c0_12 = arith.constant 0 : index
      %c0_13 = arith.constant 0 : index
      %26 = vector.load %arg3[%c0_11, %25, %c0_12, %c0_13] : memref<1x16x16x16xbf16, #tpu.memory_space<vmem>>, vector<1x1x16x16xbf16>
      %27 = vector.shape_cast %26 : vector<1x1x16x16xbf16> to vector<16x16xbf16>
      %28 = vector.shape_cast %24 : vector<16x16xbf16> to vector<1x1x16x16xbf16>
      tpu.vector_store %arg3[%c0_11, %25, %c0_12, %c0_13], %28 {strides = array<i32>} : memref<1x16x16x16xbf16, #tpu.memory_space<vmem>>, vector<1x1x16x16xbf16>,
    }
    %c16_i32_8 = arith.constant 16 : i32
    return
  }
  func.func @transform_0(%arg0: i32) -> (i32, i32, i32, i32) {
    %c0_i32 = arith.constant 0 : i32
    %c0_i32_0 = arith.constant 0 : i32
    %c0_i32_1 = arith.constant 0 : i32
    %c0_i32_2 = arith.constant 0 : i32
    return %arg0, %c0_i32, %c0_i32_0, %c0_i32_1 : i32, i32, i32, i32
  }
  func.func @transform_1(%arg0: i32) -> (i32, i32) {
    %c0_i32 = arith.constant 0 : i32
    %c0_i32_0 = arith.constant 0 : i32
    %c0_i32_1 = arith.constant 0 : i32
    return %c0_i32, %c0_i32_0 : i32, i32
  }
  func.func @transform_2(%arg0: i32) -> (i32, i32, i32, i32) {
    %c0_i32 = arith.constant 0 : i32
    %c0_i32_0 = arith.constant 0 : i32
    %c0_i32_1 = arith.constant 0 : i32
    %c0_i32_2 = arith.constant 0 : i32
    return %arg0, %c0_i32, %c0_i32_0, %c0_i32_1 : i32, i32, i32, i32
  }
}

module attributes {stable_mosaic.version = 11 : i64} {
  func.func @kernel(%arg0: i32, %arg1: memref<1x9x9x64xbf16, #tpu.memory_space<vmem>>, %arg2: memref<256x32xbf16, #tpu.memory_space<vmem>>, %arg3: memref<1x8x8x32xbf16, #tpu.memory_space<vmem>>, %arg4: memref<8x8x32xf32, #tpu.memory_space<vmem>>) attributes {dimension_semantics = [#tpu.dimension_semantics<parallel>], iteration_bounds = array<i64: 2>, scalar_prefetch = 0 : i64, scratch_operands = 1 : i64, tpu.core_type = #tpu.core_type<tc>, window_params = [{transform_indices = @transform_0, window_bounds = array<i64: 1, 9, 9, 64>}, {pipeline_mode = #tpu.pipeline_mode<synchronous>, transform_indices = @transform_1, window_bounds = array<i64: 256, 32>}, {transform_indices = @transform_2, window_bounds = array<i64: 1, 8, 8, 32>}]} {
    %cst = arith.constant 0.000000e+00 : f32
    %0 = vector.broadcast %cst : f32 to vector<1x32xf32>
    %c0_i32 = arith.constant 0 : i32
    %c8_i32 = arith.constant 8 : i32
    %1 = arith.addi %c0_i32, %c8_i32 : i32
    %c1_i32 = arith.constant 1 : i32
    %2:2 = scf.for %arg5 = %c0_i32 to %1 step %c1_i32 iter_args(%arg6 = %0, %arg7 = %0) -> (vector<1x32xf32>, vector<1x32xf32>)  : i32 {
      %c0_i32_9 = arith.constant 0 : i32
      %15 = arith.addi %arg5, %c0_i32_9 : i32
      %c0 = arith.constant 0 : index
      %16 = arith.index_cast %15 : i32 to index
      %c0_10 = arith.constant 0 : index
      %c0_11 = arith.constant 0 : index
      %17 = vector.load %arg1[%c0, %16, %c0_10, %c0_11] : memref<1x9x9x64xbf16, #tpu.memory_space<vmem>>, vector<1x1x9x64xbf16>
      %18 = vector.shape_cast %17 : vector<1x1x9x64xbf16> to vector<9x64xbf16>
      %19 = vector.extract_strided_slice %18 {offsets = [0, 0], sizes = [8, 64], strides = [1, 1]} : vector<9x64xbf16> to vector<8x64xbf16>
      %20 = vector.extract_strided_slice %18 {offsets = [1, 0], sizes = [8, 64], strides = [1, 1]} : vector<9x64xbf16> to vector<8x64xbf16>
      %c1_i32_12 = arith.constant 1 : i32
      %21 = arith.addi %arg5, %c1_i32_12 : i32
      %c0_13 = arith.constant 0 : index
      %22 = arith.index_cast %21 : i32 to index
      %c0_14 = arith.constant 0 : index
      %c0_15 = arith.constant 0 : index
      %23 = vector.load %arg1[%c0_13, %22, %c0_14, %c0_15] : memref<1x9x9x64xbf16, #tpu.memory_space<vmem>>, vector<1x1x9x64xbf16>
      %24 = vector.shape_cast %23 : vector<1x1x9x64xbf16> to vector<9x64xbf16>
      %25 = vector.extract_strided_slice %24 {offsets = [0, 0], sizes = [8, 64], strides = [1, 1]} : vector<9x64xbf16> to vector<8x64xbf16>
      %26 = vector.extract_strided_slice %24 {offsets = [1, 0], sizes = [8, 64], strides = [1, 1]} : vector<9x64xbf16> to vector<8x64xbf16>
      %27 = tpu.concatenate %19, %20, %25, %26 in 1 : vector<8x64xbf16>, vector<8x64xbf16>, vector<8x64xbf16>, vector<8x64xbf16> -> vector<8x256xbf16>
      %c0_16 = arith.constant 0 : index
      %c0_17 = arith.constant 0 : index
      %28 = vector.load %arg2[%c0_16, %c0_17] : memref<256x32xbf16, #tpu.memory_space<vmem>>, vector<256x32xbf16>
      %cst_18 = arith.constant dense<0.000000e+00> : vector<8x32xf32>
      %29 = tpu.matmul %27, %28, %cst_18 {dimension_numbers = #tpu.dot_dimension_numbers<[1], [0], [0], [1], [0, 0, 1, 1], [], []>} : vector<8x256xbf16>, vector<256x32xbf16>, vector<8x32xf32> -> vector<8x32xf32>
      %30 = arith.index_cast %arg5 : i32 to index
      %c0_19 = arith.constant 0 : index
      %c0_20 = arith.constant 0 : index
      %31 = vector.load %arg4[%30, %c0_19, %c0_20] : memref<8x8x32xf32, #tpu.memory_space<vmem>>, vector<1x8x32xf32>
      %32 = vector.shape_cast %31 : vector<1x8x32xf32> to vector<8x32xf32>
      %33 = vector.shape_cast %29 : vector<8x32xf32> to vector<1x8x32xf32>
      tpu.vector_store %arg4[%30, %c0_19, %c0_20], %33 {strides = array<i32>} : memref<8x8x32xf32, #tpu.memory_space<vmem>>, vector<1x8x32xf32>,
      %cst_21 = arith.constant dense<0.000000e+00> : vector<32xf32>
      %34 = vector.multi_reduction <add>, %29, %cst_21 [0] : vector<8x32xf32> to vector<32xf32>
      %35 = vector.shape_cast %34 : vector<32xf32> to vector<1x32xf32>
      %36 = arith.addf %arg6, %35 : vector<1x32xf32>
      %37 = arith.mulf %29, %29 : vector<8x32xf32>
      %cst_22 = arith.constant dense<0.000000e+00> : vector<32xf32>
      %38 = vector.multi_reduction <add>, %37, %cst_22 [0] : vector<8x32xf32> to vector<32xf32>
      %39 = vector.shape_cast %38 : vector<32xf32> to vector<1x32xf32>
      %40 = arith.addf %arg7, %39 : vector<1x32xf32>
      scf.yield %36, %40 : vector<1x32xf32>, vector<1x32xf32>
    }
    %c8_i32_0 = arith.constant 8 : i32
    %cst_1 = arith.constant 1.562500e-02 : f32
    %3 = vector.broadcast %cst_1 : f32 to vector<1x32xf32>
    %4 = arith.mulf %2#0, %3 : vector<1x32xf32>
    %cst_2 = arith.constant 1.562500e-02 : f32
    %5 = vector.broadcast %cst_2 : f32 to vector<1x32xf32>
    %6 = arith.mulf %2#1, %5 : vector<1x32xf32>
    %7 = arith.mulf %4, %4 : vector<1x32xf32>
    %8 = arith.subf %6, %7 : vector<1x32xf32>
    %cst_3 = arith.constant 0.000000e+00 : f32
    %9 = vector.broadcast %cst_3 : f32 to vector<1x32xf32>
    %10 = arith.maximumf %8, %9 : vector<1x32xf32>
    %cst_4 = arith.constant 9.99999974E-6 : f32
    %11 = vector.broadcast %cst_4 : f32 to vector<1x32xf32>
    %12 = arith.addf %10, %11 : vector<1x32xf32>
    %13 = math.rsqrt %12 : vector<1x32xf32>
    %c0_i32_5 = arith.constant 0 : i32
    %c8_i32_6 = arith.constant 8 : i32
    %14 = arith.addi %c0_i32_5, %c8_i32_6 : i32
    %c1_i32_7 = arith.constant 1 : i32
    scf.for %arg5 = %c0_i32_5 to %14 step %c1_i32_7  : i32 {
      %15 = arith.index_cast %arg5 : i32 to index
      %c0 = arith.constant 0 : index
      %c0_9 = arith.constant 0 : index
      %16 = vector.load %arg4[%15, %c0, %c0_9] : memref<8x8x32xf32, #tpu.memory_space<vmem>>, vector<1x8x32xf32>
      %17 = vector.shape_cast %16 : vector<1x8x32xf32> to vector<8x32xf32>
      %18 = vector.broadcast %4 : vector<1x32xf32> to vector<8x32xf32>
      %19 = arith.subf %17, %18 : vector<8x32xf32>
      %20 = vector.broadcast %13 : vector<1x32xf32> to vector<8x32xf32>
      %21 = arith.mulf %19, %20 : vector<8x32xf32>
      %cst_10 = arith.constant 0.000000e+00 : f32
      %22 = vector.broadcast %cst_10 : f32 to vector<8x32xf32>
      %23 = arith.maximumf %21, %22 : vector<8x32xf32>
      %24 = arith.truncf %23 : vector<8x32xf32> to vector<8x32xbf16>
      %c0_11 = arith.constant 0 : index
      %25 = arith.index_cast %arg5 : i32 to index
      %c0_12 = arith.constant 0 : index
      %c0_13 = arith.constant 0 : index
      %26 = vector.load %arg3[%c0_11, %25, %c0_12, %c0_13] : memref<1x8x8x32xbf16, #tpu.memory_space<vmem>>, vector<1x1x8x32xbf16>
      %27 = vector.shape_cast %26 : vector<1x1x8x32xbf16> to vector<8x32xbf16>
      %28 = vector.shape_cast %24 : vector<8x32xbf16> to vector<1x1x8x32xbf16>
      tpu.vector_store %arg3[%c0_11, %25, %c0_12, %c0_13], %28 {strides = array<i32>} : memref<1x8x8x32xbf16, #tpu.memory_space<vmem>>, vector<1x1x8x32xbf16>,
    }
    %c8_i32_8 = arith.constant 8 : i32
    return
  }
  func.func @transform_0(%arg0: i32) -> (i32, i32, i32, i32) {
    %c0_i32 = arith.constant 0 : i32
    %c0_i32_0 = arith.constant 0 : i32
    %c0_i32_1 = arith.constant 0 : i32
    %c0_i32_2 = arith.constant 0 : i32
    return %arg0, %c0_i32, %c0_i32_0, %c0_i32_1 : i32, i32, i32, i32
  }
  func.func @transform_1(%arg0: i32) -> (i32, i32) {
    %c0_i32 = arith.constant 0 : i32
    %c0_i32_0 = arith.constant 0 : i32
    %c0_i32_1 = arith.constant 0 : i32
    return %c0_i32, %c0_i32_0 : i32, i32
  }
  func.func @transform_2(%arg0: i32) -> (i32, i32, i32, i32) {
    %c0_i32 = arith.constant 0 : i32
    %c0_i32_0 = arith.constant 0 : i32
    %c0_i32_1 = arith.constant 0 : i32
    %c0_i32_2 = arith.constant 0 : i32
    return %arg0, %c0_i32, %c0_i32_0, %c0_i32_1 : i32, i32, i32, i32
  }
}

module attributes {stable_mosaic.version = 11 : i64} {
  func.func @kernel(%arg0: i32, %arg1: memref<1x5x5x128xbf16, #tpu.memory_space<vmem>>, %arg2: memref<512x64xbf16, #tpu.memory_space<vmem>>, %arg3: memref<1x4x4x64xbf16, #tpu.memory_space<vmem>>, %arg4: memref<4x4x64xf32, #tpu.memory_space<vmem>>) attributes {dimension_semantics = [#tpu.dimension_semantics<parallel>], iteration_bounds = array<i64: 2>, scalar_prefetch = 0 : i64, scratch_operands = 1 : i64, tpu.core_type = #tpu.core_type<tc>, window_params = [{transform_indices = @transform_0, window_bounds = array<i64: 1, 5, 5, 128>}, {pipeline_mode = #tpu.pipeline_mode<synchronous>, transform_indices = @transform_1, window_bounds = array<i64: 512, 64>}, {transform_indices = @transform_2, window_bounds = array<i64: 1, 4, 4, 64>}]} {
    %cst = arith.constant 0.000000e+00 : f32
    %0 = vector.broadcast %cst : f32 to vector<1x64xf32>
    %c0_i32 = arith.constant 0 : i32
    %c4_i32 = arith.constant 4 : i32
    %1 = arith.addi %c0_i32, %c4_i32 : i32
    %c1_i32 = arith.constant 1 : i32
    %2:2 = scf.for %arg5 = %c0_i32 to %1 step %c1_i32 iter_args(%arg6 = %0, %arg7 = %0) -> (vector<1x64xf32>, vector<1x64xf32>)  : i32 {
      %c0_i32_9 = arith.constant 0 : i32
      %15 = arith.addi %arg5, %c0_i32_9 : i32
      %c0 = arith.constant 0 : index
      %16 = arith.index_cast %15 : i32 to index
      %c0_10 = arith.constant 0 : index
      %c0_11 = arith.constant 0 : index
      %17 = vector.load %arg1[%c0, %16, %c0_10, %c0_11] : memref<1x5x5x128xbf16, #tpu.memory_space<vmem>>, vector<1x1x5x128xbf16>
      %18 = vector.shape_cast %17 : vector<1x1x5x128xbf16> to vector<5x128xbf16>
      %19 = vector.extract_strided_slice %18 {offsets = [0, 0], sizes = [4, 128], strides = [1, 1]} : vector<5x128xbf16> to vector<4x128xbf16>
      %20 = vector.extract_strided_slice %18 {offsets = [1, 0], sizes = [4, 128], strides = [1, 1]} : vector<5x128xbf16> to vector<4x128xbf16>
      %c1_i32_12 = arith.constant 1 : i32
      %21 = arith.addi %arg5, %c1_i32_12 : i32
      %c0_13 = arith.constant 0 : index
      %22 = arith.index_cast %21 : i32 to index
      %c0_14 = arith.constant 0 : index
      %c0_15 = arith.constant 0 : index
      %23 = vector.load %arg1[%c0_13, %22, %c0_14, %c0_15] : memref<1x5x5x128xbf16, #tpu.memory_space<vmem>>, vector<1x1x5x128xbf16>
      %24 = vector.shape_cast %23 : vector<1x1x5x128xbf16> to vector<5x128xbf16>
      %25 = vector.extract_strided_slice %24 {offsets = [0, 0], sizes = [4, 128], strides = [1, 1]} : vector<5x128xbf16> to vector<4x128xbf16>
      %26 = vector.extract_strided_slice %24 {offsets = [1, 0], sizes = [4, 128], strides = [1, 1]} : vector<5x128xbf16> to vector<4x128xbf16>
      %27 = tpu.concatenate %19, %20, %25, %26 in 1 : vector<4x128xbf16>, vector<4x128xbf16>, vector<4x128xbf16>, vector<4x128xbf16> -> vector<4x512xbf16>
      %c0_16 = arith.constant 0 : index
      %c0_17 = arith.constant 0 : index
      %28 = vector.load %arg2[%c0_16, %c0_17] : memref<512x64xbf16, #tpu.memory_space<vmem>>, vector<512x64xbf16>
      %cst_18 = arith.constant dense<0.000000e+00> : vector<4x64xf32>
      %29 = tpu.matmul %27, %28, %cst_18 {dimension_numbers = #tpu.dot_dimension_numbers<[1], [0], [0], [1], [0, 0, 1, 1], [], []>} : vector<4x512xbf16>, vector<512x64xbf16>, vector<4x64xf32> -> vector<4x64xf32>
      %30 = arith.index_cast %arg5 : i32 to index
      %c0_19 = arith.constant 0 : index
      %c0_20 = arith.constant 0 : index
      %31 = vector.load %arg4[%30, %c0_19, %c0_20] : memref<4x4x64xf32, #tpu.memory_space<vmem>>, vector<1x4x64xf32>
      %32 = vector.shape_cast %31 : vector<1x4x64xf32> to vector<4x64xf32>
      %33 = vector.shape_cast %29 : vector<4x64xf32> to vector<1x4x64xf32>
      tpu.vector_store %arg4[%30, %c0_19, %c0_20], %33 {strides = array<i32>} : memref<4x4x64xf32, #tpu.memory_space<vmem>>, vector<1x4x64xf32>,
      %cst_21 = arith.constant dense<0.000000e+00> : vector<64xf32>
      %34 = vector.multi_reduction <add>, %29, %cst_21 [0] : vector<4x64xf32> to vector<64xf32>
      %35 = vector.shape_cast %34 : vector<64xf32> to vector<1x64xf32>
      %36 = arith.addf %arg6, %35 : vector<1x64xf32>
      %37 = arith.mulf %29, %29 : vector<4x64xf32>
      %cst_22 = arith.constant dense<0.000000e+00> : vector<64xf32>
      %38 = vector.multi_reduction <add>, %37, %cst_22 [0] : vector<4x64xf32> to vector<64xf32>
      %39 = vector.shape_cast %38 : vector<64xf32> to vector<1x64xf32>
      %40 = arith.addf %arg7, %39 : vector<1x64xf32>
      scf.yield %36, %40 : vector<1x64xf32>, vector<1x64xf32>
    }
    %c4_i32_0 = arith.constant 4 : i32
    %cst_1 = arith.constant 6.250000e-02 : f32
    %3 = vector.broadcast %cst_1 : f32 to vector<1x64xf32>
    %4 = arith.mulf %2#0, %3 : vector<1x64xf32>
    %cst_2 = arith.constant 6.250000e-02 : f32
    %5 = vector.broadcast %cst_2 : f32 to vector<1x64xf32>
    %6 = arith.mulf %2#1, %5 : vector<1x64xf32>
    %7 = arith.mulf %4, %4 : vector<1x64xf32>
    %8 = arith.subf %6, %7 : vector<1x64xf32>
    %cst_3 = arith.constant 0.000000e+00 : f32
    %9 = vector.broadcast %cst_3 : f32 to vector<1x64xf32>
    %10 = arith.maximumf %8, %9 : vector<1x64xf32>
    %cst_4 = arith.constant 9.99999974E-6 : f32
    %11 = vector.broadcast %cst_4 : f32 to vector<1x64xf32>
    %12 = arith.addf %10, %11 : vector<1x64xf32>
    %13 = math.rsqrt %12 : vector<1x64xf32>
    %c0_i32_5 = arith.constant 0 : i32
    %c4_i32_6 = arith.constant 4 : i32
    %14 = arith.addi %c0_i32_5, %c4_i32_6 : i32
    %c1_i32_7 = arith.constant 1 : i32
    scf.for %arg5 = %c0_i32_5 to %14 step %c1_i32_7  : i32 {
      %15 = arith.index_cast %arg5 : i32 to index
      %c0 = arith.constant 0 : index
      %c0_9 = arith.constant 0 : index
      %16 = vector.load %arg4[%15, %c0, %c0_9] : memref<4x4x64xf32, #tpu.memory_space<vmem>>, vector<1x4x64xf32>
      %17 = vector.shape_cast %16 : vector<1x4x64xf32> to vector<4x64xf32>
      %18 = vector.broadcast %4 : vector<1x64xf32> to vector<4x64xf32>
      %19 = arith.subf %17, %18 : vector<4x64xf32>
      %20 = vector.broadcast %13 : vector<1x64xf32> to vector<4x64xf32>
      %21 = arith.mulf %19, %20 : vector<4x64xf32>
      %cst_10 = arith.constant 0.000000e+00 : f32
      %22 = vector.broadcast %cst_10 : f32 to vector<4x64xf32>
      %23 = arith.maximumf %21, %22 : vector<4x64xf32>
      %24 = arith.truncf %23 : vector<4x64xf32> to vector<4x64xbf16>
      %c0_11 = arith.constant 0 : index
      %25 = arith.index_cast %arg5 : i32 to index
      %c0_12 = arith.constant 0 : index
      %c0_13 = arith.constant 0 : index
      %26 = vector.load %arg3[%c0_11, %25, %c0_12, %c0_13] : memref<1x4x4x64xbf16, #tpu.memory_space<vmem>>, vector<1x1x4x64xbf16>
      %27 = vector.shape_cast %26 : vector<1x1x4x64xbf16> to vector<4x64xbf16>
      %28 = vector.shape_cast %24 : vector<4x64xbf16> to vector<1x1x4x64xbf16>
      tpu.vector_store %arg3[%c0_11, %25, %c0_12, %c0_13], %28 {strides = array<i32>} : memref<1x4x4x64xbf16, #tpu.memory_space<vmem>>, vector<1x1x4x64xbf16>,
    }
    %c4_i32_8 = arith.constant 4 : i32
    return
  }
  func.func @transform_0(%arg0: i32) -> (i32, i32, i32, i32) {
    %c0_i32 = arith.constant 0 : i32
    %c0_i32_0 = arith.constant 0 : i32
    %c0_i32_1 = arith.constant 0 : i32
    %c0_i32_2 = arith.constant 0 : i32
    return %arg0, %c0_i32, %c0_i32_0, %c0_i32_1 : i32, i32, i32, i32
  }
  func.func @transform_1(%arg0: i32) -> (i32, i32) {
    %c0_i32 = arith.constant 0 : i32
    %c0_i32_0 = arith.constant 0 : i32
    %c0_i32_1 = arith.constant 0 : i32
    return %c0_i32, %c0_i32_0 : i32, i32
  }
  func.func @transform_2(%arg0: i32) -> (i32, i32, i32, i32) {
    %c0_i32 = arith.constant 0 : i32
    %c0_i32_0 = arith.constant 0 : i32
    %c0_i32_1 = arith.constant 0 : i32
    %c0_i32_2 = arith.constant 0 : i32
    return %arg0, %c0_i32, %c0_i32_0, %c0_i32_1 : i32, i32, i32, i32
  }
}

module attributes {stable_mosaic.version = 11 : i64} {
  func.func @kernel(%arg0: i32, %arg1: memref<1x3x3x256xbf16, #tpu.memory_space<vmem>>, %arg2: memref<1024x128xbf16, #tpu.memory_space<vmem>>, %arg3: memref<1x2x2x128xbf16, #tpu.memory_space<vmem>>, %arg4: memref<2x2x128xf32, #tpu.memory_space<vmem>>) attributes {dimension_semantics = [#tpu.dimension_semantics<parallel>], iteration_bounds = array<i64: 2>, scalar_prefetch = 0 : i64, scratch_operands = 1 : i64, tpu.core_type = #tpu.core_type<tc>, window_params = [{transform_indices = @transform_0, window_bounds = array<i64: 1, 3, 3, 256>}, {pipeline_mode = #tpu.pipeline_mode<synchronous>, transform_indices = @transform_1, window_bounds = array<i64: 1024, 128>}, {transform_indices = @transform_2, window_bounds = array<i64: 1, 2, 2, 128>}]} {
    %cst = arith.constant 0.000000e+00 : f32
    %0 = vector.broadcast %cst : f32 to vector<1x128xf32>
    %c0_i32 = arith.constant 0 : i32
    %c2_i32 = arith.constant 2 : i32
    %1 = arith.addi %c0_i32, %c2_i32 : i32
    %c1_i32 = arith.constant 1 : i32
    %2:2 = scf.for %arg5 = %c0_i32 to %1 step %c1_i32 iter_args(%arg6 = %0, %arg7 = %0) -> (vector<1x128xf32>, vector<1x128xf32>)  : i32 {
      %c0_i32_9 = arith.constant 0 : i32
      %15 = arith.addi %arg5, %c0_i32_9 : i32
      %c0 = arith.constant 0 : index
      %16 = arith.index_cast %15 : i32 to index
      %c0_10 = arith.constant 0 : index
      %c0_11 = arith.constant 0 : index
      %17 = vector.load %arg1[%c0, %16, %c0_10, %c0_11] : memref<1x3x3x256xbf16, #tpu.memory_space<vmem>>, vector<1x1x3x256xbf16>
      %18 = vector.shape_cast %17 : vector<1x1x3x256xbf16> to vector<3x256xbf16>
      %19 = vector.extract_strided_slice %18 {offsets = [0, 0], sizes = [2, 256], strides = [1, 1]} : vector<3x256xbf16> to vector<2x256xbf16>
      %20 = vector.extract_strided_slice %18 {offsets = [1, 0], sizes = [2, 256], strides = [1, 1]} : vector<3x256xbf16> to vector<2x256xbf16>
      %c1_i32_12 = arith.constant 1 : i32
      %21 = arith.addi %arg5, %c1_i32_12 : i32
      %c0_13 = arith.constant 0 : index
      %22 = arith.index_cast %21 : i32 to index
      %c0_14 = arith.constant 0 : index
      %c0_15 = arith.constant 0 : index
      %23 = vector.load %arg1[%c0_13, %22, %c0_14, %c0_15] : memref<1x3x3x256xbf16, #tpu.memory_space<vmem>>, vector<1x1x3x256xbf16>
      %24 = vector.shape_cast %23 : vector<1x1x3x256xbf16> to vector<3x256xbf16>
      %25 = vector.extract_strided_slice %24 {offsets = [0, 0], sizes = [2, 256], strides = [1, 1]} : vector<3x256xbf16> to vector<2x256xbf16>
      %26 = vector.extract_strided_slice %24 {offsets = [1, 0], sizes = [2, 256], strides = [1, 1]} : vector<3x256xbf16> to vector<2x256xbf16>
      %27 = tpu.concatenate %19, %20, %25, %26 in 1 : vector<2x256xbf16>, vector<2x256xbf16>, vector<2x256xbf16>, vector<2x256xbf16> -> vector<2x1024xbf16>
      %c0_16 = arith.constant 0 : index
      %c0_17 = arith.constant 0 : index
      %28 = vector.load %arg2[%c0_16, %c0_17] : memref<1024x128xbf16, #tpu.memory_space<vmem>>, vector<1024x128xbf16>
      %cst_18 = arith.constant dense<0.000000e+00> : vector<2x128xf32>
      %29 = tpu.matmul %27, %28, %cst_18 {dimension_numbers = #tpu.dot_dimension_numbers<[1], [0], [0], [1], [0, 0, 1, 1], [], []>} : vector<2x1024xbf16>, vector<1024x128xbf16>, vector<2x128xf32> -> vector<2x128xf32>
      %30 = arith.index_cast %arg5 : i32 to index
      %c0_19 = arith.constant 0 : index
      %c0_20 = arith.constant 0 : index
      %31 = vector.load %arg4[%30, %c0_19, %c0_20] : memref<2x2x128xf32, #tpu.memory_space<vmem>>, vector<1x2x128xf32>
      %32 = vector.shape_cast %31 : vector<1x2x128xf32> to vector<2x128xf32>
      %33 = vector.shape_cast %29 : vector<2x128xf32> to vector<1x2x128xf32>
      tpu.vector_store %arg4[%30, %c0_19, %c0_20], %33 {strides = array<i32>} : memref<2x2x128xf32, #tpu.memory_space<vmem>>, vector<1x2x128xf32>,
      %cst_21 = arith.constant dense<0.000000e+00> : vector<128xf32>
      %34 = vector.multi_reduction <add>, %29, %cst_21 [0] : vector<2x128xf32> to vector<128xf32>
      %35 = vector.shape_cast %34 : vector<128xf32> to vector<1x128xf32>
      %36 = arith.addf %arg6, %35 : vector<1x128xf32>
      %37 = arith.mulf %29, %29 : vector<2x128xf32>
      %cst_22 = arith.constant dense<0.000000e+00> : vector<128xf32>
      %38 = vector.multi_reduction <add>, %37, %cst_22 [0] : vector<2x128xf32> to vector<128xf32>
      %39 = vector.shape_cast %38 : vector<128xf32> to vector<1x128xf32>
      %40 = arith.addf %arg7, %39 : vector<1x128xf32>
      scf.yield %36, %40 : vector<1x128xf32>, vector<1x128xf32>
    }
    %c2_i32_0 = arith.constant 2 : i32
    %cst_1 = arith.constant 2.500000e-01 : f32
    %3 = vector.broadcast %cst_1 : f32 to vector<1x128xf32>
    %4 = arith.mulf %2#0, %3 : vector<1x128xf32>
    %cst_2 = arith.constant 2.500000e-01 : f32
    %5 = vector.broadcast %cst_2 : f32 to vector<1x128xf32>
    %6 = arith.mulf %2#1, %5 : vector<1x128xf32>
    %7 = arith.mulf %4, %4 : vector<1x128xf32>
    %8 = arith.subf %6, %7 : vector<1x128xf32>
    %cst_3 = arith.constant 0.000000e+00 : f32
    %9 = vector.broadcast %cst_3 : f32 to vector<1x128xf32>
    %10 = arith.maximumf %8, %9 : vector<1x128xf32>
    %cst_4 = arith.constant 9.99999974E-6 : f32
    %11 = vector.broadcast %cst_4 : f32 to vector<1x128xf32>
    %12 = arith.addf %10, %11 : vector<1x128xf32>
    %13 = math.rsqrt %12 : vector<1x128xf32>
    %c0_i32_5 = arith.constant 0 : i32
    %c2_i32_6 = arith.constant 2 : i32
    %14 = arith.addi %c0_i32_5, %c2_i32_6 : i32
    %c1_i32_7 = arith.constant 1 : i32
    scf.for %arg5 = %c0_i32_5 to %14 step %c1_i32_7  : i32 {
      %15 = arith.index_cast %arg5 : i32 to index
      %c0 = arith.constant 0 : index
      %c0_9 = arith.constant 0 : index
      %16 = vector.load %arg4[%15, %c0, %c0_9] : memref<2x2x128xf32, #tpu.memory_space<vmem>>, vector<1x2x128xf32>
      %17 = vector.shape_cast %16 : vector<1x2x128xf32> to vector<2x128xf32>
      %18 = vector.broadcast %4 : vector<1x128xf32> to vector<2x128xf32>
      %19 = arith.subf %17, %18 : vector<2x128xf32>
      %20 = vector.broadcast %13 : vector<1x128xf32> to vector<2x128xf32>
      %21 = arith.mulf %19, %20 : vector<2x128xf32>
      %cst_10 = arith.constant 0.000000e+00 : f32
      %22 = vector.broadcast %cst_10 : f32 to vector<2x128xf32>
      %23 = arith.maximumf %21, %22 : vector<2x128xf32>
      %24 = arith.truncf %23 : vector<2x128xf32> to vector<2x128xbf16>
      %c0_11 = arith.constant 0 : index
      %25 = arith.index_cast %arg5 : i32 to index
      %c0_12 = arith.constant 0 : index
      %c0_13 = arith.constant 0 : index
      %26 = vector.load %arg3[%c0_11, %25, %c0_12, %c0_13] : memref<1x2x2x128xbf16, #tpu.memory_space<vmem>>, vector<1x1x2x128xbf16>
      %27 = vector.shape_cast %26 : vector<1x1x2x128xbf16> to vector<2x128xbf16>
      %28 = vector.shape_cast %24 : vector<2x128xbf16> to vector<1x1x2x128xbf16>
      tpu.vector_store %arg3[%c0_11, %25, %c0_12, %c0_13], %28 {strides = array<i32>} : memref<1x2x2x128xbf16, #tpu.memory_space<vmem>>, vector<1x1x2x128xbf16>,
    }
    %c2_i32_8 = arith.constant 2 : i32
    return
  }
  func.func @transform_0(%arg0: i32) -> (i32, i32, i32, i32) {
    %c0_i32 = arith.constant 0 : i32
    %c0_i32_0 = arith.constant 0 : i32
    %c0_i32_1 = arith.constant 0 : i32
    %c0_i32_2 = arith.constant 0 : i32
    return %arg0, %c0_i32, %c0_i32_0, %c0_i32_1 : i32, i32, i32, i32
  }
  func.func @transform_1(%arg0: i32) -> (i32, i32) {
    %c0_i32 = arith.constant 0 : i32
    %c0_i32_0 = arith.constant 0 : i32
    %c0_i32_1 = arith.constant 0 : i32
    return %c0_i32, %c0_i32_0 : i32, i32
  }
  func.func @transform_2(%arg0: i32) -> (i32, i32, i32, i32) {
    %c0_i32 = arith.constant 0 : i32
    %c0_i32_0 = arith.constant 0 : i32
    %c0_i32_1 = arith.constant 0 : i32
    %c0_i32_2 = arith.constant 0 : i32
    return %arg0, %c0_i32, %c0_i32_0, %c0_i32_1 : i32, i32, i32, i32
  }
}

module attributes {stable_mosaic.version = 11 : i64} {
  func.func @kernel(%arg0: i32, %arg1: memref<1x4x4x128xbf16, #tpu.memory_space<vmem>>, %arg2: memref<1152x128xbf16, #tpu.memory_space<vmem>>, %arg3: memref<1x2x2x128xbf16, #tpu.memory_space<vmem>>, %arg4: memref<1x2x2x128xbf16, #tpu.memory_space<vmem>>, %arg5: memref<2x2x128xf32, #tpu.memory_space<vmem>>) attributes {dimension_semantics = [#tpu.dimension_semantics<parallel>], iteration_bounds = array<i64: 2>, scalar_prefetch = 0 : i64, scratch_operands = 1 : i64, tpu.core_type = #tpu.core_type<tc>, window_params = [{transform_indices = @transform_0, window_bounds = array<i64: 1, 4, 4, 128>}, {pipeline_mode = #tpu.pipeline_mode<synchronous>, transform_indices = @transform_1, window_bounds = array<i64: 1152, 128>}, {transform_indices = @transform_2, window_bounds = array<i64: 1, 2, 2, 128>}, {transform_indices = @transform_3, window_bounds = array<i64: 1, 2, 2, 128>}]} {
    %cst = arith.constant 0.000000e+00 : f32
    %0 = vector.broadcast %cst : f32 to vector<1x128xf32>
    %c0_i32 = arith.constant 0 : i32
    %c2_i32 = arith.constant 2 : i32
    %1 = arith.addi %c0_i32, %c2_i32 : i32
    %c1_i32 = arith.constant 1 : i32
    %2:2 = scf.for %arg6 = %c0_i32 to %1 step %c1_i32 iter_args(%arg7 = %0, %arg8 = %0) -> (vector<1x128xf32>, vector<1x128xf32>)  : i32 {
      %c0_i32_9 = arith.constant 0 : i32
      %15 = arith.addi %arg6, %c0_i32_9 : i32
      %c0 = arith.constant 0 : index
      %16 = arith.index_cast %15 : i32 to index
      %c0_10 = arith.constant 0 : index
      %c0_11 = arith.constant 0 : index
      %17 = vector.load %arg1[%c0, %16, %c0_10, %c0_11] : memref<1x4x4x128xbf16, #tpu.memory_space<vmem>>, vector<1x1x4x128xbf16>
      %18 = vector.shape_cast %17 : vector<1x1x4x128xbf16> to vector<4x128xbf16>
      %19 = vector.extract_strided_slice %18 {offsets = [0, 0], sizes = [2, 128], strides = [1, 1]} : vector<4x128xbf16> to vector<2x128xbf16>
      %20 = vector.extract_strided_slice %18 {offsets = [1, 0], sizes = [2, 128], strides = [1, 1]} : vector<4x128xbf16> to vector<2x128xbf16>
      %21 = vector.extract_strided_slice %18 {offsets = [2, 0], sizes = [2, 128], strides = [1, 1]} : vector<4x128xbf16> to vector<2x128xbf16>
      %c1_i32_12 = arith.constant 1 : i32
      %22 = arith.addi %arg6, %c1_i32_12 : i32
      %c0_13 = arith.constant 0 : index
      %23 = arith.index_cast %22 : i32 to index
      %c0_14 = arith.constant 0 : index
      %c0_15 = arith.constant 0 : index
      %24 = vector.load %arg1[%c0_13, %23, %c0_14, %c0_15] : memref<1x4x4x128xbf16, #tpu.memory_space<vmem>>, vector<1x1x4x128xbf16>
      %25 = vector.shape_cast %24 : vector<1x1x4x128xbf16> to vector<4x128xbf16>
      %26 = vector.extract_strided_slice %25 {offsets = [0, 0], sizes = [2, 128], strides = [1, 1]} : vector<4x128xbf16> to vector<2x128xbf16>
      %27 = vector.extract_strided_slice %25 {offsets = [1, 0], sizes = [2, 128], strides = [1, 1]} : vector<4x128xbf16> to vector<2x128xbf16>
      %28 = vector.extract_strided_slice %25 {offsets = [2, 0], sizes = [2, 128], strides = [1, 1]} : vector<4x128xbf16> to vector<2x128xbf16>
      %c2_i32_16 = arith.constant 2 : i32
      %29 = arith.addi %arg6, %c2_i32_16 : i32
      %c0_17 = arith.constant 0 : index
      %30 = arith.index_cast %29 : i32 to index
      %c0_18 = arith.constant 0 : index
      %c0_19 = arith.constant 0 : index
      %31 = vector.load %arg1[%c0_17, %30, %c0_18, %c0_19] : memref<1x4x4x128xbf16, #tpu.memory_space<vmem>>, vector<1x1x4x128xbf16>
      %32 = vector.shape_cast %31 : vector<1x1x4x128xbf16> to vector<4x128xbf16>
      %33 = vector.extract_strided_slice %32 {offsets = [0, 0], sizes = [2, 128], strides = [1, 1]} : vector<4x128xbf16> to vector<2x128xbf16>
      %34 = vector.extract_strided_slice %32 {offsets = [1, 0], sizes = [2, 128], strides = [1, 1]} : vector<4x128xbf16> to vector<2x128xbf16>
      %35 = vector.extract_strided_slice %32 {offsets = [2, 0], sizes = [2, 128], strides = [1, 1]} : vector<4x128xbf16> to vector<2x128xbf16>
      %36 = tpu.concatenate %19, %20, %21, %26, %27, %28, %33, %34, %35 in 1 : vector<2x128xbf16>, vector<2x128xbf16>, vector<2x128xbf16>, vector<2x128xbf16>, vector<2x128xbf16>, vector<2x128xbf16>, vector<2x128xbf16>, vector<2x128xbf16>, vector<2x128xbf16> -> vector<2x1152xbf16>
      %c0_20 = arith.constant 0 : index
      %c0_21 = arith.constant 0 : index
      %37 = vector.load %arg2[%c0_20, %c0_21] : memref<1152x128xbf16, #tpu.memory_space<vmem>>, vector<1152x128xbf16>
      %cst_22 = arith.constant dense<0.000000e+00> : vector<2x128xf32>
      %38 = tpu.matmul %36, %37, %cst_22 {dimension_numbers = #tpu.dot_dimension_numbers<[1], [0], [0], [1], [0, 0, 1, 1], [], []>} : vector<2x1152xbf16>, vector<1152x128xbf16>, vector<2x128xf32> -> vector<2x128xf32>
      %39 = arith.index_cast %arg6 : i32 to index
      %c0_23 = arith.constant 0 : index
      %c0_24 = arith.constant 0 : index
      %40 = vector.load %arg5[%39, %c0_23, %c0_24] : memref<2x2x128xf32, #tpu.memory_space<vmem>>, vector<1x2x128xf32>
      %41 = vector.shape_cast %40 : vector<1x2x128xf32> to vector<2x128xf32>
      %42 = vector.shape_cast %38 : vector<2x128xf32> to vector<1x2x128xf32>
      tpu.vector_store %arg5[%39, %c0_23, %c0_24], %42 {strides = array<i32>} : memref<2x2x128xf32, #tpu.memory_space<vmem>>, vector<1x2x128xf32>,
      %cst_25 = arith.constant dense<0.000000e+00> : vector<128xf32>
      %43 = vector.multi_reduction <add>, %38, %cst_25 [0] : vector<2x128xf32> to vector<128xf32>
      %44 = vector.shape_cast %43 : vector<128xf32> to vector<1x128xf32>
      %45 = arith.addf %arg7, %44 : vector<1x128xf32>
      %46 = arith.mulf %38, %38 : vector<2x128xf32>
      %cst_26 = arith.constant dense<0.000000e+00> : vector<128xf32>
      %47 = vector.multi_reduction <add>, %46, %cst_26 [0] : vector<2x128xf32> to vector<128xf32>
      %48 = vector.shape_cast %47 : vector<128xf32> to vector<1x128xf32>
      %49 = arith.addf %arg8, %48 : vector<1x128xf32>
      scf.yield %45, %49 : vector<1x128xf32>, vector<1x128xf32>
    }
    %c2_i32_0 = arith.constant 2 : i32
    %cst_1 = arith.constant 2.500000e-01 : f32
    %3 = vector.broadcast %cst_1 : f32 to vector<1x128xf32>
    %4 = arith.mulf %2#0, %3 : vector<1x128xf32>
    %cst_2 = arith.constant 2.500000e-01 : f32
    %5 = vector.broadcast %cst_2 : f32 to vector<1x128xf32>
    %6 = arith.mulf %2#1, %5 : vector<1x128xf32>
    %7 = arith.mulf %4, %4 : vector<1x128xf32>
    %8 = arith.subf %6, %7 : vector<1x128xf32>
    %cst_3 = arith.constant 0.000000e+00 : f32
    %9 = vector.broadcast %cst_3 : f32 to vector<1x128xf32>
    %10 = arith.maximumf %8, %9 : vector<1x128xf32>
    %cst_4 = arith.constant 9.99999974E-6 : f32
    %11 = vector.broadcast %cst_4 : f32 to vector<1x128xf32>
    %12 = arith.addf %10, %11 : vector<1x128xf32>
    %13 = math.rsqrt %12 : vector<1x128xf32>
    %c0_i32_5 = arith.constant 0 : i32
    %c2_i32_6 = arith.constant 2 : i32
    %14 = arith.addi %c0_i32_5, %c2_i32_6 : i32
    %c1_i32_7 = arith.constant 1 : i32
    scf.for %arg6 = %c0_i32_5 to %14 step %c1_i32_7  : i32 {
      %15 = arith.index_cast %arg6 : i32 to index
      %c0 = arith.constant 0 : index
      %c0_9 = arith.constant 0 : index
      %16 = vector.load %arg5[%15, %c0, %c0_9] : memref<2x2x128xf32, #tpu.memory_space<vmem>>, vector<1x2x128xf32>
      %17 = vector.shape_cast %16 : vector<1x2x128xf32> to vector<2x128xf32>
      %18 = vector.broadcast %4 : vector<1x128xf32> to vector<2x128xf32>
      %19 = arith.subf %17, %18 : vector<2x128xf32>
      %20 = vector.broadcast %13 : vector<1x128xf32> to vector<2x128xf32>
      %21 = arith.mulf %19, %20 : vector<2x128xf32>
      %c0_10 = arith.constant 0 : index
      %22 = arith.index_cast %arg6 : i32 to index
      %c0_11 = arith.constant 0 : index
      %c0_12 = arith.constant 0 : index
      %23 = vector.load %arg3[%c0_10, %22, %c0_11, %c0_12] : memref<1x2x2x128xbf16, #tpu.memory_space<vmem>>, vector<1x1x2x128xbf16>
      %24 = vector.shape_cast %23 : vector<1x1x2x128xbf16> to vector<2x128xbf16>
      %25 = arith.extf %24 : vector<2x128xbf16> to vector<2x128xf32>
      %26 = arith.addf %21, %25 : vector<2x128xf32>
      %27 = arith.truncf %26 : vector<2x128xf32> to vector<2x128xbf16>
      %c0_13 = arith.constant 0 : index
      %28 = arith.index_cast %arg6 : i32 to index
      %c0_14 = arith.constant 0 : index
      %c0_15 = arith.constant 0 : index
      %29 = vector.load %arg4[%c0_13, %28, %c0_14, %c0_15] : memref<1x2x2x128xbf16, #tpu.memory_space<vmem>>, vector<1x1x2x128xbf16>
      %30 = vector.shape_cast %29 : vector<1x1x2x128xbf16> to vector<2x128xbf16>
      %31 = vector.shape_cast %27 : vector<2x128xbf16> to vector<1x1x2x128xbf16>
      tpu.vector_store %arg4[%c0_13, %28, %c0_14, %c0_15], %31 {strides = array<i32>} : memref<1x2x2x128xbf16, #tpu.memory_space<vmem>>, vector<1x1x2x128xbf16>,
    }
    %c2_i32_8 = arith.constant 2 : i32
    return
  }
  func.func @transform_0(%arg0: i32) -> (i32, i32, i32, i32) {
    %c0_i32 = arith.constant 0 : i32
    %c0_i32_0 = arith.constant 0 : i32
    %c0_i32_1 = arith.constant 0 : i32
    %c0_i32_2 = arith.constant 0 : i32
    return %arg0, %c0_i32, %c0_i32_0, %c0_i32_1 : i32, i32, i32, i32
  }
  func.func @transform_1(%arg0: i32) -> (i32, i32) {
    %c0_i32 = arith.constant 0 : i32
    %c0_i32_0 = arith.constant 0 : i32
    %c0_i32_1 = arith.constant 0 : i32
    return %c0_i32, %c0_i32_0 : i32, i32
  }
  func.func @transform_2(%arg0: i32) -> (i32, i32, i32, i32) {
    %c0_i32 = arith.constant 0 : i32
    %c0_i32_0 = arith.constant 0 : i32
    %c0_i32_1 = arith.constant 0 : i32
    %c0_i32_2 = arith.constant 0 : i32
    return %arg0, %c0_i32, %c0_i32_0, %c0_i32_1 : i32, i32, i32, i32
  }
  func.func @transform_3(%arg0: i32) -> (i32, i32, i32, i32) {
    %c0_i32 = arith.constant 0 : i32
    %c0_i32_0 = arith.constant 0 : i32
    %c0_i32_1 = arith.constant 0 : i32
    %c0_i32_2 = arith.constant 0 : i32
    return %arg0, %c0_i32, %c0_i32_0, %c0_i32_1 : i32, i32, i32, i32
  }
}

module attributes {stable_mosaic.version = 11 : i64} {
  func.func @kernel(%arg0: i32, %arg1: memref<1x3x3x128xbf16, #tpu.memory_space<vmem>>, %arg2: memref<512x256xbf16, #tpu.memory_space<vmem>>, %arg3: memref<1x2x2x256xbf16, #tpu.memory_space<vmem>>, %arg4: memref<2x2x256xf32, #tpu.memory_space<vmem>>) attributes {dimension_semantics = [#tpu.dimension_semantics<parallel>], iteration_bounds = array<i64: 2>, scalar_prefetch = 0 : i64, scratch_operands = 1 : i64, tpu.core_type = #tpu.core_type<tc>, window_params = [{transform_indices = @transform_0, window_bounds = array<i64: 1, 3, 3, 128>}, {pipeline_mode = #tpu.pipeline_mode<synchronous>, transform_indices = @transform_1, window_bounds = array<i64: 512, 256>}, {transform_indices = @transform_2, window_bounds = array<i64: 1, 2, 2, 256>}]} {
    %cst = arith.constant 0.000000e+00 : f32
    %0 = vector.broadcast %cst : f32 to vector<1x256xf32>
    %c0_i32 = arith.constant 0 : i32
    %c2_i32 = arith.constant 2 : i32
    %1 = arith.addi %c0_i32, %c2_i32 : i32
    %c1_i32 = arith.constant 1 : i32
    %2:2 = scf.for %arg5 = %c0_i32 to %1 step %c1_i32 iter_args(%arg6 = %0, %arg7 = %0) -> (vector<1x256xf32>, vector<1x256xf32>)  : i32 {
      %c0_i32_11 = arith.constant 0 : i32
      %35 = arith.addi %arg5, %c0_i32_11 : i32
      %c0 = arith.constant 0 : index
      %36 = arith.index_cast %35 : i32 to index
      %c0_12 = arith.constant 0 : index
      %c0_13 = arith.constant 0 : index
      %37 = vector.load %arg1[%c0, %36, %c0_12, %c0_13] : memref<1x3x3x128xbf16, #tpu.memory_space<vmem>>, vector<1x1x3x128xbf16>
      %38 = vector.shape_cast %37 : vector<1x1x3x128xbf16> to vector<3x128xbf16>
      %39 = vector.extract_strided_slice %38 {offsets = [0, 0], sizes = [2, 128], strides = [1, 1]} : vector<3x128xbf16> to vector<2x128xbf16>
      %40 = vector.extract_strided_slice %38 {offsets = [1, 0], sizes = [2, 128], strides = [1, 1]} : vector<3x128xbf16> to vector<2x128xbf16>
      %c1_i32_14 = arith.constant 1 : i32
      %41 = arith.addi %arg5, %c1_i32_14 : i32
      %c0_15 = arith.constant 0 : index
      %42 = arith.index_cast %41 : i32 to index
      %c0_16 = arith.constant 0 : index
      %c0_17 = arith.constant 0 : index
      %43 = vector.load %arg1[%c0_15, %42, %c0_16, %c0_17] : memref<1x3x3x128xbf16, #tpu.memory_space<vmem>>, vector<1x1x3x128xbf16>
      %44 = vector.shape_cast %43 : vector<1x1x3x128xbf16> to vector<3x128xbf16>
      %45 = vector.extract_strided_slice %44 {offsets = [0, 0], sizes = [2, 128], strides = [1, 1]} : vector<3x128xbf16> to vector<2x128xbf16>
      %46 = vector.extract_strided_slice %44 {offsets = [1, 0], sizes = [2, 128], strides = [1, 1]} : vector<3x128xbf16> to vector<2x128xbf16>
      %47 = tpu.concatenate %39, %40, %45, %46 in 1 : vector<2x128xbf16>, vector<2x128xbf16>, vector<2x128xbf16>, vector<2x128xbf16> -> vector<2x512xbf16>
      %c0_18 = arith.constant 0 : index
      %c0_19 = arith.constant 0 : index
      %48 = vector.load %arg2[%c0_18, %c0_19] : memref<512x256xbf16, #tpu.memory_space<vmem>>, vector<512x256xbf16>
      %cst_20 = arith.constant dense<0.000000e+00> : vector<2x256xf32>
      %49 = tpu.matmul %47, %48, %cst_20 {dimension_numbers = #tpu.dot_dimension_numbers<[1], [0], [0], [1], [0, 0, 1, 1], [], []>} : vector<2x512xbf16>, vector<512x256xbf16>, vector<2x256xf32> -> vector<2x256xf32>
      %50 = arith.index_cast %arg5 : i32 to index
      %c0_21 = arith.constant 0 : index
      %c0_22 = arith.constant 0 : index
      %51 = vector.load %arg4[%50, %c0_21, %c0_22] : memref<2x2x256xf32, #tpu.memory_space<vmem>>, vector<1x2x256xf32>
      %52 = vector.shape_cast %51 : vector<1x2x256xf32> to vector<2x256xf32>
      %53 = vector.shape_cast %49 : vector<2x256xf32> to vector<1x2x256xf32>
      tpu.vector_store %arg4[%50, %c0_21, %c0_22], %53 {strides = array<i32>} : memref<2x2x256xf32, #tpu.memory_space<vmem>>, vector<1x2x256xf32>,
      %cst_23 = arith.constant dense<0.000000e+00> : vector<256xf32>
      %54 = vector.multi_reduction <add>, %49, %cst_23 [0] : vector<2x256xf32> to vector<256xf32>
      %55 = vector.shape_cast %54 : vector<256xf32> to vector<1x256xf32>
      %56 = arith.addf %arg6, %55 : vector<1x256xf32>
      %57 = arith.mulf %49, %49 : vector<2x256xf32>
      %cst_24 = arith.constant dense<0.000000e+00> : vector<256xf32>
      %58 = vector.multi_reduction <add>, %57, %cst_24 [0] : vector<2x256xf32> to vector<256xf32>
      %59 = vector.shape_cast %58 : vector<256xf32> to vector<1x256xf32>
      %60 = arith.addf %arg7, %59 : vector<1x256xf32>
      scf.yield %56, %60 : vector<1x256xf32>, vector<1x256xf32>
    }
    %c2_i32_0 = arith.constant 2 : i32
    %3 = vector.extract_strided_slice %2#0 {offsets = [0, 0], sizes = [1, 64], strides = [1, 1]} : vector<1x256xf32> to vector<1x64xf32>
    %cst_1 = arith.constant 0.000000e+00 : f32
    %4 = vector.broadcast %cst_1 : f32 to vector<1x64xf32>
    %5 = arith.addf %4, %3 : vector<1x64xf32>
    %6 = vector.extract_strided_slice %2#0 {offsets = [0, 64], sizes = [1, 64], strides = [1, 1]} : vector<1x256xf32> to vector<1x64xf32>
    %7 = arith.addf %5, %6 : vector<1x64xf32>
    %8 = vector.extract_strided_slice %2#0 {offsets = [0, 128], sizes = [1, 64], strides = [1, 1]} : vector<1x256xf32> to vector<1x64xf32>
    %9 = arith.addf %7, %8 : vector<1x64xf32>
    %10 = vector.extract_strided_slice %2#0 {offsets = [0, 192], sizes = [1, 64], strides = [1, 1]} : vector<1x256xf32> to vector<1x64xf32>
    %11 = arith.addf %9, %10 : vector<1x64xf32>
    %12 = vector.extract_strided_slice %2#1 {offsets = [0, 0], sizes = [1, 64], strides = [1, 1]} : vector<1x256xf32> to vector<1x64xf32>
    %cst_2 = arith.constant 0.000000e+00 : f32
    %13 = vector.broadcast %cst_2 : f32 to vector<1x64xf32>
    %14 = arith.addf %13, %12 : vector<1x64xf32>
    %15 = vector.extract_strided_slice %2#1 {offsets = [0, 64], sizes = [1, 64], strides = [1, 1]} : vector<1x256xf32> to vector<1x64xf32>
    %16 = arith.addf %14, %15 : vector<1x64xf32>
    %17 = vector.extract_strided_slice %2#1 {offsets = [0, 128], sizes = [1, 64], strides = [1, 1]} : vector<1x256xf32> to vector<1x64xf32>
    %18 = arith.addf %16, %17 : vector<1x64xf32>
    %19 = vector.extract_strided_slice %2#1 {offsets = [0, 192], sizes = [1, 64], strides = [1, 1]} : vector<1x256xf32> to vector<1x64xf32>
    %20 = arith.addf %18, %19 : vector<1x64xf32>
    %cst_3 = arith.constant 6.250000e-02 : f32
    %21 = vector.broadcast %cst_3 : f32 to vector<1x64xf32>
    %22 = arith.mulf %11, %21 : vector<1x64xf32>
    %cst_4 = arith.constant 6.250000e-02 : f32
    %23 = vector.broadcast %cst_4 : f32 to vector<1x64xf32>
    %24 = arith.mulf %20, %23 : vector<1x64xf32>
    %25 = arith.mulf %22, %22 : vector<1x64xf32>
    %26 = arith.subf %24, %25 : vector<1x64xf32>
    %cst_5 = arith.constant 0.000000e+00 : f32
    %27 = vector.broadcast %cst_5 : f32 to vector<1x64xf32>
    %28 = arith.maximumf %26, %27 : vector<1x64xf32>
    %cst_6 = arith.constant 9.99999974E-6 : f32
    %29 = vector.broadcast %cst_6 : f32 to vector<1x64xf32>
    %30 = arith.addf %28, %29 : vector<1x64xf32>
    %31 = math.rsqrt %30 : vector<1x64xf32>
    %32 = tpu.concatenate %22, %22, %22, %22 in 1 : vector<1x64xf32>, vector<1x64xf32>, vector<1x64xf32>, vector<1x64xf32> -> vector<1x256xf32>
    %33 = tpu.concatenate %31, %31, %31, %31 in 1 : vector<1x64xf32>, vector<1x64xf32>, vector<1x64xf32>, vector<1x64xf32> -> vector<1x256xf32>
    %c0_i32_7 = arith.constant 0 : i32
    %c2_i32_8 = arith.constant 2 : i32
    %34 = arith.addi %c0_i32_7, %c2_i32_8 : i32
    %c1_i32_9 = arith.constant 1 : i32
    scf.for %arg5 = %c0_i32_7 to %34 step %c1_i32_9  : i32 {
      %35 = arith.index_cast %arg5 : i32 to index
      %c0 = arith.constant 0 : index
      %c0_11 = arith.constant 0 : index
      %36 = vector.load %arg4[%35, %c0, %c0_11] : memref<2x2x256xf32, #tpu.memory_space<vmem>>, vector<1x2x256xf32>
      %37 = vector.shape_cast %36 : vector<1x2x256xf32> to vector<2x256xf32>
      %38 = vector.broadcast %32 : vector<1x256xf32> to vector<2x256xf32>
      %39 = arith.subf %37, %38 : vector<2x256xf32>
      %40 = vector.broadcast %33 : vector<1x256xf32> to vector<2x256xf32>
      %41 = arith.mulf %39, %40 : vector<2x256xf32>
      %cst_12 = arith.constant 0.000000e+00 : f32
      %42 = vector.broadcast %cst_12 : f32 to vector<2x256xf32>
      %43 = arith.maximumf %41, %42 : vector<2x256xf32>
      %44 = arith.truncf %43 : vector<2x256xf32> to vector<2x256xbf16>
      %c0_13 = arith.constant 0 : index
      %45 = arith.index_cast %arg5 : i32 to index
      %c0_14 = arith.constant 0 : index
      %c0_15 = arith.constant 0 : index
      %46 = vector.load %arg3[%c0_13, %45, %c0_14, %c0_15] : memref<1x2x2x256xbf16, #tpu.memory_space<vmem>>, vector<1x1x2x256xbf16>
      %47 = vector.shape_cast %46 : vector<1x1x2x256xbf16> to vector<2x256xbf16>
      %48 = vector.shape_cast %44 : vector<2x256xbf16> to vector<1x1x2x256xbf16>
      tpu.vector_store %arg3[%c0_13, %45, %c0_14, %c0_15], %48 {strides = array<i32>} : memref<1x2x2x256xbf16, #tpu.memory_space<vmem>>, vector<1x1x2x256xbf16>,
    }
    %c2_i32_10 = arith.constant 2 : i32
    return
  }
  func.func @transform_0(%arg0: i32) -> (i32, i32, i32, i32) {
    %c0_i32 = arith.constant 0 : i32
    %c0_i32_0 = arith.constant 0 : i32
    %c0_i32_1 = arith.constant 0 : i32
    %c0_i32_2 = arith.constant 0 : i32
    return %arg0, %c0_i32, %c0_i32_0, %c0_i32_1 : i32, i32, i32, i32
  }
  func.func @transform_1(%arg0: i32) -> (i32, i32) {
    %c0_i32 = arith.constant 0 : i32
    %c0_i32_0 = arith.constant 0 : i32
    %c0_i32_1 = arith.constant 0 : i32
    return %c0_i32, %c0_i32_0 : i32, i32
  }
  func.func @transform_2(%arg0: i32) -> (i32, i32, i32, i32) {
    %c0_i32 = arith.constant 0 : i32
    %c0_i32_0 = arith.constant 0 : i32
    %c0_i32_1 = arith.constant 0 : i32
    %c0_i32_2 = arith.constant 0 : i32
    return %arg0, %c0_i32, %c0_i32_0, %c0_i32_1 : i32, i32, i32, i32
  }
}

module attributes {stable_mosaic.version = 11 : i64} {
  func.func @kernel(%arg0: i32, %arg1: memref<1x4x4x128xbf16, #tpu.memory_space<vmem>>, %arg2: memref<1152x128xbf16, #tpu.memory_space<vmem>>, %arg3: memref<1x2x2x128xbf16, #tpu.memory_space<vmem>>, %arg4: memref<2x2x128xf32, #tpu.memory_space<vmem>>) attributes {dimension_semantics = [#tpu.dimension_semantics<parallel>], iteration_bounds = array<i64: 2>, scalar_prefetch = 0 : i64, scratch_operands = 1 : i64, tpu.core_type = #tpu.core_type<tc>, window_params = [{transform_indices = @transform_0, window_bounds = array<i64: 1, 4, 4, 128>}, {pipeline_mode = #tpu.pipeline_mode<synchronous>, transform_indices = @transform_1, window_bounds = array<i64: 1152, 128>}, {transform_indices = @transform_2, window_bounds = array<i64: 1, 2, 2, 128>}]} {
    %cst = arith.constant 0.000000e+00 : f32
    %0 = vector.broadcast %cst : f32 to vector<1x128xf32>
    %c0_i32 = arith.constant 0 : i32
    %c2_i32 = arith.constant 2 : i32
    %1 = arith.addi %c0_i32, %c2_i32 : i32
    %c1_i32 = arith.constant 1 : i32
    %2:2 = scf.for %arg5 = %c0_i32 to %1 step %c1_i32 iter_args(%arg6 = %0, %arg7 = %0) -> (vector<1x128xf32>, vector<1x128xf32>)  : i32 {
      %c0_i32_9 = arith.constant 0 : i32
      %15 = arith.addi %arg5, %c0_i32_9 : i32
      %c0 = arith.constant 0 : index
      %16 = arith.index_cast %15 : i32 to index
      %c0_10 = arith.constant 0 : index
      %c0_11 = arith.constant 0 : index
      %17 = vector.load %arg1[%c0, %16, %c0_10, %c0_11] : memref<1x4x4x128xbf16, #tpu.memory_space<vmem>>, vector<1x1x4x128xbf16>
      %18 = vector.shape_cast %17 : vector<1x1x4x128xbf16> to vector<4x128xbf16>
      %19 = vector.extract_strided_slice %18 {offsets = [0, 0], sizes = [2, 128], strides = [1, 1]} : vector<4x128xbf16> to vector<2x128xbf16>
      %20 = vector.extract_strided_slice %18 {offsets = [1, 0], sizes = [2, 128], strides = [1, 1]} : vector<4x128xbf16> to vector<2x128xbf16>
      %21 = vector.extract_strided_slice %18 {offsets = [2, 0], sizes = [2, 128], strides = [1, 1]} : vector<4x128xbf16> to vector<2x128xbf16>
      %c1_i32_12 = arith.constant 1 : i32
      %22 = arith.addi %arg5, %c1_i32_12 : i32
      %c0_13 = arith.constant 0 : index
      %23 = arith.index_cast %22 : i32 to index
      %c0_14 = arith.constant 0 : index
      %c0_15 = arith.constant 0 : index
      %24 = vector.load %arg1[%c0_13, %23, %c0_14, %c0_15] : memref<1x4x4x128xbf16, #tpu.memory_space<vmem>>, vector<1x1x4x128xbf16>
      %25 = vector.shape_cast %24 : vector<1x1x4x128xbf16> to vector<4x128xbf16>
      %26 = vector.extract_strided_slice %25 {offsets = [0, 0], sizes = [2, 128], strides = [1, 1]} : vector<4x128xbf16> to vector<2x128xbf16>
      %27 = vector.extract_strided_slice %25 {offsets = [1, 0], sizes = [2, 128], strides = [1, 1]} : vector<4x128xbf16> to vector<2x128xbf16>
      %28 = vector.extract_strided_slice %25 {offsets = [2, 0], sizes = [2, 128], strides = [1, 1]} : vector<4x128xbf16> to vector<2x128xbf16>
      %c2_i32_16 = arith.constant 2 : i32
      %29 = arith.addi %arg5, %c2_i32_16 : i32
      %c0_17 = arith.constant 0 : index
      %30 = arith.index_cast %29 : i32 to index
      %c0_18 = arith.constant 0 : index
      %c0_19 = arith.constant 0 : index
      %31 = vector.load %arg1[%c0_17, %30, %c0_18, %c0_19] : memref<1x4x4x128xbf16, #tpu.memory_space<vmem>>, vector<1x1x4x128xbf16>
      %32 = vector.shape_cast %31 : vector<1x1x4x128xbf16> to vector<4x128xbf16>
      %33 = vector.extract_strided_slice %32 {offsets = [0, 0], sizes = [2, 128], strides = [1, 1]} : vector<4x128xbf16> to vector<2x128xbf16>
      %34 = vector.extract_strided_slice %32 {offsets = [1, 0], sizes = [2, 128], strides = [1, 1]} : vector<4x128xbf16> to vector<2x128xbf16>
      %35 = vector.extract_strided_slice %32 {offsets = [2, 0], sizes = [2, 128], strides = [1, 1]} : vector<4x128xbf16> to vector<2x128xbf16>
      %36 = tpu.concatenate %19, %20, %21, %26, %27, %28, %33, %34, %35 in 1 : vector<2x128xbf16>, vector<2x128xbf16>, vector<2x128xbf16>, vector<2x128xbf16>, vector<2x128xbf16>, vector<2x128xbf16>, vector<2x128xbf16>, vector<2x128xbf16>, vector<2x128xbf16> -> vector<2x1152xbf16>
      %c0_20 = arith.constant 0 : index
      %c0_21 = arith.constant 0 : index
      %37 = vector.load %arg2[%c0_20, %c0_21] : memref<1152x128xbf16, #tpu.memory_space<vmem>>, vector<1152x128xbf16>
      %cst_22 = arith.constant dense<0.000000e+00> : vector<2x128xf32>
      %38 = tpu.matmul %36, %37, %cst_22 {dimension_numbers = #tpu.dot_dimension_numbers<[1], [0], [0], [1], [0, 0, 1, 1], [], []>} : vector<2x1152xbf16>, vector<1152x128xbf16>, vector<2x128xf32> -> vector<2x128xf32>
      %39 = arith.index_cast %arg5 : i32 to index
      %c0_23 = arith.constant 0 : index
      %c0_24 = arith.constant 0 : index
      %40 = vector.load %arg4[%39, %c0_23, %c0_24] : memref<2x2x128xf32, #tpu.memory_space<vmem>>, vector<1x2x128xf32>
      %41 = vector.shape_cast %40 : vector<1x2x128xf32> to vector<2x128xf32>
      %42 = vector.shape_cast %38 : vector<2x128xf32> to vector<1x2x128xf32>
      tpu.vector_store %arg4[%39, %c0_23, %c0_24], %42 {strides = array<i32>} : memref<2x2x128xf32, #tpu.memory_space<vmem>>, vector<1x2x128xf32>,
      %cst_25 = arith.constant dense<0.000000e+00> : vector<128xf32>
      %43 = vector.multi_reduction <add>, %38, %cst_25 [0] : vector<2x128xf32> to vector<128xf32>
      %44 = vector.shape_cast %43 : vector<128xf32> to vector<1x128xf32>
      %45 = arith.addf %arg6, %44 : vector<1x128xf32>
      %46 = arith.mulf %38, %38 : vector<2x128xf32>
      %cst_26 = arith.constant dense<0.000000e+00> : vector<128xf32>
      %47 = vector.multi_reduction <add>, %46, %cst_26 [0] : vector<2x128xf32> to vector<128xf32>
      %48 = vector.shape_cast %47 : vector<128xf32> to vector<1x128xf32>
      %49 = arith.addf %arg7, %48 : vector<1x128xf32>
      scf.yield %45, %49 : vector<1x128xf32>, vector<1x128xf32>
    }
    %c2_i32_0 = arith.constant 2 : i32
    %cst_1 = arith.constant 2.500000e-01 : f32
    %3 = vector.broadcast %cst_1 : f32 to vector<1x128xf32>
    %4 = arith.mulf %2#0, %3 : vector<1x128xf32>
    %cst_2 = arith.constant 2.500000e-01 : f32
    %5 = vector.broadcast %cst_2 : f32 to vector<1x128xf32>
    %6 = arith.mulf %2#1, %5 : vector<1x128xf32>
    %7 = arith.mulf %4, %4 : vector<1x128xf32>
    %8 = arith.subf %6, %7 : vector<1x128xf32>
    %cst_3 = arith.constant 0.000000e+00 : f32
    %9 = vector.broadcast %cst_3 : f32 to vector<1x128xf32>
    %10 = arith.maximumf %8, %9 : vector<1x128xf32>
    %cst_4 = arith.constant 9.99999974E-6 : f32
    %11 = vector.broadcast %cst_4 : f32 to vector<1x128xf32>
    %12 = arith.addf %10, %11 : vector<1x128xf32>
    %13 = math.rsqrt %12 : vector<1x128xf32>
    %c0_i32_5 = arith.constant 0 : i32
    %c2_i32_6 = arith.constant 2 : i32
    %14 = arith.addi %c0_i32_5, %c2_i32_6 : i32
    %c1_i32_7 = arith.constant 1 : i32
    scf.for %arg5 = %c0_i32_5 to %14 step %c1_i32_7  : i32 {
      %15 = arith.index_cast %arg5 : i32 to index
      %c0 = arith.constant 0 : index
      %c0_9 = arith.constant 0 : index
      %16 = vector.load %arg4[%15, %c0, %c0_9] : memref<2x2x128xf32, #tpu.memory_space<vmem>>, vector<1x2x128xf32>
      %17 = vector.shape_cast %16 : vector<1x2x128xf32> to vector<2x128xf32>
      %18 = vector.broadcast %4 : vector<1x128xf32> to vector<2x128xf32>
      %19 = arith.subf %17, %18 : vector<2x128xf32>
      %20 = vector.broadcast %13 : vector<1x128xf32> to vector<2x128xf32>
      %21 = arith.mulf %19, %20 : vector<2x128xf32>
      %cst_10 = arith.constant 0.000000e+00 : f32
      %22 = vector.broadcast %cst_10 : f32 to vector<2x128xf32>
      %23 = arith.maximumf %21, %22 : vector<2x128xf32>
      %24 = arith.truncf %23 : vector<2x128xf32> to vector<2x128xbf16>
      %c0_11 = arith.constant 0 : index
      %25 = arith.index_cast %arg5 : i32 to index
      %c0_12 = arith.constant 0 : index
      %c0_13 = arith.constant 0 : index
      %26 = vector.load %arg3[%c0_11, %25, %c0_12, %c0_13] : memref<1x2x2x128xbf16, #tpu.memory_space<vmem>>, vector<1x1x2x128xbf16>
      %27 = vector.shape_cast %26 : vector<1x1x2x128xbf16> to vector<2x128xbf16>
      %28 = vector.shape_cast %24 : vector<2x128xbf16> to vector<1x1x2x128xbf16>
      tpu.vector_store %arg3[%c0_11, %25, %c0_12, %c0_13], %28 {strides = array<i32>} : memref<1x2x2x128xbf16, #tpu.memory_space<vmem>>, vector<1x1x2x128xbf16>,
    }
    %c2_i32_8 = arith.constant 2 : i32
    return
  }
  func.func @transform_0(%arg0: i32) -> (i32, i32, i32, i32) {
    %c0_i32 = arith.constant 0 : i32
    %c0_i32_0 = arith.constant 0 : i32
    %c0_i32_1 = arith.constant 0 : i32
    %c0_i32_2 = arith.constant 0 : i32
    return %arg0, %c0_i32, %c0_i32_0, %c0_i32_1 : i32, i32, i32, i32
  }
  func.func @transform_1(%arg0: i32) -> (i32, i32) {
    %c0_i32 = arith.constant 0 : i32
    %c0_i32_0 = arith.constant 0 : i32
    %c0_i32_1 = arith.constant 0 : i32
    return %c0_i32, %c0_i32_0 : i32, i32
  }
  func.func @transform_2(%arg0: i32) -> (i32, i32, i32, i32) {
    %c0_i32 = arith.constant 0 : i32
    %c0_i32_0 = arith.constant 0 : i32
    %c0_i32_1 = arith.constant 0 : i32
    %c0_i32_2 = arith.constant 0 : i32
    return %arg0, %c0_i32, %c0_i32_0, %c0_i32_1 : i32, i32, i32, i32
  }
}

module attributes {stable_mosaic.version = 11 : i64} {
  func.func @kernel(%arg0: i32, %arg1: memref<1x5x5x64xbf16, #tpu.memory_space<vmem>>, %arg2: memref<256x128xbf16, #tpu.memory_space<vmem>>, %arg3: memref<1x4x4x128xbf16, #tpu.memory_space<vmem>>, %arg4: memref<4x4x128xf32, #tpu.memory_space<vmem>>) attributes {dimension_semantics = [#tpu.dimension_semantics<parallel>], iteration_bounds = array<i64: 2>, scalar_prefetch = 0 : i64, scratch_operands = 1 : i64, tpu.core_type = #tpu.core_type<tc>, window_params = [{transform_indices = @transform_0, window_bounds = array<i64: 1, 5, 5, 64>}, {pipeline_mode = #tpu.pipeline_mode<synchronous>, transform_indices = @transform_1, window_bounds = array<i64: 256, 128>}, {transform_indices = @transform_2, window_bounds = array<i64: 1, 4, 4, 128>}]} {
    %cst = arith.constant 0.000000e+00 : f32
    %0 = vector.broadcast %cst : f32 to vector<1x128xf32>
    %c0_i32 = arith.constant 0 : i32
    %c4_i32 = arith.constant 4 : i32
    %1 = arith.addi %c0_i32, %c4_i32 : i32
    %c1_i32 = arith.constant 1 : i32
    %2:2 = scf.for %arg5 = %c0_i32 to %1 step %c1_i32 iter_args(%arg6 = %0, %arg7 = %0) -> (vector<1x128xf32>, vector<1x128xf32>)  : i32 {
      %c0_i32_11 = arith.constant 0 : i32
      %35 = arith.addi %arg5, %c0_i32_11 : i32
      %c0 = arith.constant 0 : index
      %36 = arith.index_cast %35 : i32 to index
      %c0_12 = arith.constant 0 : index
      %c0_13 = arith.constant 0 : index
      %37 = vector.load %arg1[%c0, %36, %c0_12, %c0_13] : memref<1x5x5x64xbf16, #tpu.memory_space<vmem>>, vector<1x1x5x64xbf16>
      %38 = vector.shape_cast %37 : vector<1x1x5x64xbf16> to vector<5x64xbf16>
      %39 = vector.extract_strided_slice %38 {offsets = [0, 0], sizes = [4, 64], strides = [1, 1]} : vector<5x64xbf16> to vector<4x64xbf16>
      %40 = vector.extract_strided_slice %38 {offsets = [1, 0], sizes = [4, 64], strides = [1, 1]} : vector<5x64xbf16> to vector<4x64xbf16>
      %c1_i32_14 = arith.constant 1 : i32
      %41 = arith.addi %arg5, %c1_i32_14 : i32
      %c0_15 = arith.constant 0 : index
      %42 = arith.index_cast %41 : i32 to index
      %c0_16 = arith.constant 0 : index
      %c0_17 = arith.constant 0 : index
      %43 = vector.load %arg1[%c0_15, %42, %c0_16, %c0_17] : memref<1x5x5x64xbf16, #tpu.memory_space<vmem>>, vector<1x1x5x64xbf16>
      %44 = vector.shape_cast %43 : vector<1x1x5x64xbf16> to vector<5x64xbf16>
      %45 = vector.extract_strided_slice %44 {offsets = [0, 0], sizes = [4, 64], strides = [1, 1]} : vector<5x64xbf16> to vector<4x64xbf16>
      %46 = vector.extract_strided_slice %44 {offsets = [1, 0], sizes = [4, 64], strides = [1, 1]} : vector<5x64xbf16> to vector<4x64xbf16>
      %47 = tpu.concatenate %39, %40, %45, %46 in 1 : vector<4x64xbf16>, vector<4x64xbf16>, vector<4x64xbf16>, vector<4x64xbf16> -> vector<4x256xbf16>
      %c0_18 = arith.constant 0 : index
      %c0_19 = arith.constant 0 : index
      %48 = vector.load %arg2[%c0_18, %c0_19] : memref<256x128xbf16, #tpu.memory_space<vmem>>, vector<256x128xbf16>
      %cst_20 = arith.constant dense<0.000000e+00> : vector<4x128xf32>
      %49 = tpu.matmul %47, %48, %cst_20 {dimension_numbers = #tpu.dot_dimension_numbers<[1], [0], [0], [1], [0, 0, 1, 1], [], []>} : vector<4x256xbf16>, vector<256x128xbf16>, vector<4x128xf32> -> vector<4x128xf32>
      %50 = arith.index_cast %arg5 : i32 to index
      %c0_21 = arith.constant 0 : index
      %c0_22 = arith.constant 0 : index
      %51 = vector.load %arg4[%50, %c0_21, %c0_22] : memref<4x4x128xf32, #tpu.memory_space<vmem>>, vector<1x4x128xf32>
      %52 = vector.shape_cast %51 : vector<1x4x128xf32> to vector<4x128xf32>
      %53 = vector.shape_cast %49 : vector<4x128xf32> to vector<1x4x128xf32>
      tpu.vector_store %arg4[%50, %c0_21, %c0_22], %53 {strides = array<i32>} : memref<4x4x128xf32, #tpu.memory_space<vmem>>, vector<1x4x128xf32>,
      %cst_23 = arith.constant dense<0.000000e+00> : vector<128xf32>
      %54 = vector.multi_reduction <add>, %49, %cst_23 [0] : vector<4x128xf32> to vector<128xf32>
      %55 = vector.shape_cast %54 : vector<128xf32> to vector<1x128xf32>
      %56 = arith.addf %arg6, %55 : vector<1x128xf32>
      %57 = arith.mulf %49, %49 : vector<4x128xf32>
      %cst_24 = arith.constant dense<0.000000e+00> : vector<128xf32>
      %58 = vector.multi_reduction <add>, %57, %cst_24 [0] : vector<4x128xf32> to vector<128xf32>
      %59 = vector.shape_cast %58 : vector<128xf32> to vector<1x128xf32>
      %60 = arith.addf %arg7, %59 : vector<1x128xf32>
      scf.yield %56, %60 : vector<1x128xf32>, vector<1x128xf32>
    }
    %c4_i32_0 = arith.constant 4 : i32
    %3 = vector.extract_strided_slice %2#0 {offsets = [0, 0], sizes = [1, 32], strides = [1, 1]} : vector<1x128xf32> to vector<1x32xf32>
    %cst_1 = arith.constant 0.000000e+00 : f32
    %4 = vector.broadcast %cst_1 : f32 to vector<1x32xf32>
    %5 = arith.addf %4, %3 : vector<1x32xf32>
    %6 = vector.extract_strided_slice %2#0 {offsets = [0, 32], sizes = [1, 32], strides = [1, 1]} : vector<1x128xf32> to vector<1x32xf32>
    %7 = arith.addf %5, %6 : vector<1x32xf32>
    %8 = vector.extract_strided_slice %2#0 {offsets = [0, 64], sizes = [1, 32], strides = [1, 1]} : vector<1x128xf32> to vector<1x32xf32>
    %9 = arith.addf %7, %8 : vector<1x32xf32>
    %10 = vector.extract_strided_slice %2#0 {offsets = [0, 96], sizes = [1, 32], strides = [1, 1]} : vector<1x128xf32> to vector<1x32xf32>
    %11 = arith.addf %9, %10 : vector<1x32xf32>
    %12 = vector.extract_strided_slice %2#1 {offsets = [0, 0], sizes = [1, 32], strides = [1, 1]} : vector<1x128xf32> to vector<1x32xf32>
    %cst_2 = arith.constant 0.000000e+00 : f32
    %13 = vector.broadcast %cst_2 : f32 to vector<1x32xf32>
    %14 = arith.addf %13, %12 : vector<1x32xf32>
    %15 = vector.extract_strided_slice %2#1 {offsets = [0, 32], sizes = [1, 32], strides = [1, 1]} : vector<1x128xf32> to vector<1x32xf32>
    %16 = arith.addf %14, %15 : vector<1x32xf32>
    %17 = vector.extract_strided_slice %2#1 {offsets = [0, 64], sizes = [1, 32], strides = [1, 1]} : vector<1x128xf32> to vector<1x32xf32>
    %18 = arith.addf %16, %17 : vector<1x32xf32>
    %19 = vector.extract_strided_slice %2#1 {offsets = [0, 96], sizes = [1, 32], strides = [1, 1]} : vector<1x128xf32> to vector<1x32xf32>
    %20 = arith.addf %18, %19 : vector<1x32xf32>
    %cst_3 = arith.constant 1.562500e-02 : f32
    %21 = vector.broadcast %cst_3 : f32 to vector<1x32xf32>
    %22 = arith.mulf %11, %21 : vector<1x32xf32>
    %cst_4 = arith.constant 1.562500e-02 : f32
    %23 = vector.broadcast %cst_4 : f32 to vector<1x32xf32>
    %24 = arith.mulf %20, %23 : vector<1x32xf32>
    %25 = arith.mulf %22, %22 : vector<1x32xf32>
    %26 = arith.subf %24, %25 : vector<1x32xf32>
    %cst_5 = arith.constant 0.000000e+00 : f32
    %27 = vector.broadcast %cst_5 : f32 to vector<1x32xf32>
    %28 = arith.maximumf %26, %27 : vector<1x32xf32>
    %cst_6 = arith.constant 9.99999974E-6 : f32
    %29 = vector.broadcast %cst_6 : f32 to vector<1x32xf32>
    %30 = arith.addf %28, %29 : vector<1x32xf32>
    %31 = math.rsqrt %30 : vector<1x32xf32>
    %32 = tpu.concatenate %22, %22, %22, %22 in 1 : vector<1x32xf32>, vector<1x32xf32>, vector<1x32xf32>, vector<1x32xf32> -> vector<1x128xf32>
    %33 = tpu.concatenate %31, %31, %31, %31 in 1 : vector<1x32xf32>, vector<1x32xf32>, vector<1x32xf32>, vector<1x32xf32> -> vector<1x128xf32>
    %c0_i32_7 = arith.constant 0 : i32
    %c4_i32_8 = arith.constant 4 : i32
    %34 = arith.addi %c0_i32_7, %c4_i32_8 : i32
    %c1_i32_9 = arith.constant 1 : i32
    scf.for %arg5 = %c0_i32_7 to %34 step %c1_i32_9  : i32 {
      %35 = arith.index_cast %arg5 : i32 to index
      %c0 = arith.constant 0 : index
      %c0_11 = arith.constant 0 : index
      %36 = vector.load %arg4[%35, %c0, %c0_11] : memref<4x4x128xf32, #tpu.memory_space<vmem>>, vector<1x4x128xf32>
      %37 = vector.shape_cast %36 : vector<1x4x128xf32> to vector<4x128xf32>
      %38 = vector.broadcast %32 : vector<1x128xf32> to vector<4x128xf32>
      %39 = arith.subf %37, %38 : vector<4x128xf32>
      %40 = vector.broadcast %33 : vector<1x128xf32> to vector<4x128xf32>
      %41 = arith.mulf %39, %40 : vector<4x128xf32>
      %cst_12 = arith.constant 0.000000e+00 : f32
      %42 = vector.broadcast %cst_12 : f32 to vector<4x128xf32>
      %43 = arith.maximumf %41, %42 : vector<4x128xf32>
      %44 = arith.truncf %43 : vector<4x128xf32> to vector<4x128xbf16>
      %c0_13 = arith.constant 0 : index
      %45 = arith.index_cast %arg5 : i32 to index
      %c0_14 = arith.constant 0 : index
      %c0_15 = arith.constant 0 : index
      %46 = vector.load %arg3[%c0_13, %45, %c0_14, %c0_15] : memref<1x4x4x128xbf16, #tpu.memory_space<vmem>>, vector<1x1x4x128xbf16>
      %47 = vector.shape_cast %46 : vector<1x1x4x128xbf16> to vector<4x128xbf16>
      %48 = vector.shape_cast %44 : vector<4x128xbf16> to vector<1x1x4x128xbf16>
      tpu.vector_store %arg3[%c0_13, %45, %c0_14, %c0_15], %48 {strides = array<i32>} : memref<1x4x4x128xbf16, #tpu.memory_space<vmem>>, vector<1x1x4x128xbf16>,
    }
    %c4_i32_10 = arith.constant 4 : i32
    return
  }
  func.func @transform_0(%arg0: i32) -> (i32, i32, i32, i32) {
    %c0_i32 = arith.constant 0 : i32
    %c0_i32_0 = arith.constant 0 : i32
    %c0_i32_1 = arith.constant 0 : i32
    %c0_i32_2 = arith.constant 0 : i32
    return %arg0, %c0_i32, %c0_i32_0, %c0_i32_1 : i32, i32, i32, i32
  }
  func.func @transform_1(%arg0: i32) -> (i32, i32) {
    %c0_i32 = arith.constant 0 : i32
    %c0_i32_0 = arith.constant 0 : i32
    %c0_i32_1 = arith.constant 0 : i32
    return %c0_i32, %c0_i32_0 : i32, i32
  }
  func.func @transform_2(%arg0: i32) -> (i32, i32, i32, i32) {
    %c0_i32 = arith.constant 0 : i32
    %c0_i32_0 = arith.constant 0 : i32
    %c0_i32_1 = arith.constant 0 : i32
    %c0_i32_2 = arith.constant 0 : i32
    return %arg0, %c0_i32, %c0_i32_0, %c0_i32_1 : i32, i32, i32, i32
  }
}

module attributes {stable_mosaic.version = 11 : i64} {
  func.func @kernel(%arg0: i32, %arg1: memref<1x9x9x32xbf16, #tpu.memory_space<vmem>>, %arg2: memref<128x64xbf16, #tpu.memory_space<vmem>>, %arg3: memref<1x8x8x64xbf16, #tpu.memory_space<vmem>>, %arg4: memref<8x8x64xf32, #tpu.memory_space<vmem>>) attributes {dimension_semantics = [#tpu.dimension_semantics<parallel>], iteration_bounds = array<i64: 2>, scalar_prefetch = 0 : i64, scratch_operands = 1 : i64, tpu.core_type = #tpu.core_type<tc>, window_params = [{transform_indices = @transform_0, window_bounds = array<i64: 1, 9, 9, 32>}, {pipeline_mode = #tpu.pipeline_mode<synchronous>, transform_indices = @transform_1, window_bounds = array<i64: 128, 64>}, {transform_indices = @transform_2, window_bounds = array<i64: 1, 8, 8, 64>}]} {
    %cst = arith.constant 0.000000e+00 : f32
    %0 = vector.broadcast %cst : f32 to vector<1x64xf32>
    %c0_i32 = arith.constant 0 : i32
    %c8_i32 = arith.constant 8 : i32
    %1 = arith.addi %c0_i32, %c8_i32 : i32
    %c1_i32 = arith.constant 1 : i32
    %2:2 = scf.for %arg5 = %c0_i32 to %1 step %c1_i32 iter_args(%arg6 = %0, %arg7 = %0) -> (vector<1x64xf32>, vector<1x64xf32>)  : i32 {
      %c0_i32_11 = arith.constant 0 : i32
      %35 = arith.addi %arg5, %c0_i32_11 : i32
      %c0 = arith.constant 0 : index
      %36 = arith.index_cast %35 : i32 to index
      %c0_12 = arith.constant 0 : index
      %c0_13 = arith.constant 0 : index
      %37 = vector.load %arg1[%c0, %36, %c0_12, %c0_13] : memref<1x9x9x32xbf16, #tpu.memory_space<vmem>>, vector<1x1x9x32xbf16>
      %38 = vector.shape_cast %37 : vector<1x1x9x32xbf16> to vector<9x32xbf16>
      %39 = vector.extract_strided_slice %38 {offsets = [0, 0], sizes = [8, 32], strides = [1, 1]} : vector<9x32xbf16> to vector<8x32xbf16>
      %40 = vector.extract_strided_slice %38 {offsets = [1, 0], sizes = [8, 32], strides = [1, 1]} : vector<9x32xbf16> to vector<8x32xbf16>
      %c1_i32_14 = arith.constant 1 : i32
      %41 = arith.addi %arg5, %c1_i32_14 : i32
      %c0_15 = arith.constant 0 : index
      %42 = arith.index_cast %41 : i32 to index
      %c0_16 = arith.constant 0 : index
      %c0_17 = arith.constant 0 : index
      %43 = vector.load %arg1[%c0_15, %42, %c0_16, %c0_17] : memref<1x9x9x32xbf16, #tpu.memory_space<vmem>>, vector<1x1x9x32xbf16>
      %44 = vector.shape_cast %43 : vector<1x1x9x32xbf16> to vector<9x32xbf16>
      %45 = vector.extract_strided_slice %44 {offsets = [0, 0], sizes = [8, 32], strides = [1, 1]} : vector<9x32xbf16> to vector<8x32xbf16>
      %46 = vector.extract_strided_slice %44 {offsets = [1, 0], sizes = [8, 32], strides = [1, 1]} : vector<9x32xbf16> to vector<8x32xbf16>
      %47 = tpu.concatenate %39, %40, %45, %46 in 1 : vector<8x32xbf16>, vector<8x32xbf16>, vector<8x32xbf16>, vector<8x32xbf16> -> vector<8x128xbf16>
      %c0_18 = arith.constant 0 : index
      %c0_19 = arith.constant 0 : index
      %48 = vector.load %arg2[%c0_18, %c0_19] : memref<128x64xbf16, #tpu.memory_space<vmem>>, vector<128x64xbf16>
      %cst_20 = arith.constant dense<0.000000e+00> : vector<8x64xf32>
      %49 = tpu.matmul %47, %48, %cst_20 {dimension_numbers = #tpu.dot_dimension_numbers<[1], [0], [0], [1], [0, 0, 1, 1], [], []>} : vector<8x128xbf16>, vector<128x64xbf16>, vector<8x64xf32> -> vector<8x64xf32>
      %50 = arith.index_cast %arg5 : i32 to index
      %c0_21 = arith.constant 0 : index
      %c0_22 = arith.constant 0 : index
      %51 = vector.load %arg4[%50, %c0_21, %c0_22] : memref<8x8x64xf32, #tpu.memory_space<vmem>>, vector<1x8x64xf32>
      %52 = vector.shape_cast %51 : vector<1x8x64xf32> to vector<8x64xf32>
      %53 = vector.shape_cast %49 : vector<8x64xf32> to vector<1x8x64xf32>
      tpu.vector_store %arg4[%50, %c0_21, %c0_22], %53 {strides = array<i32>} : memref<8x8x64xf32, #tpu.memory_space<vmem>>, vector<1x8x64xf32>,
      %cst_23 = arith.constant dense<0.000000e+00> : vector<64xf32>
      %54 = vector.multi_reduction <add>, %49, %cst_23 [0] : vector<8x64xf32> to vector<64xf32>
      %55 = vector.shape_cast %54 : vector<64xf32> to vector<1x64xf32>
      %56 = arith.addf %arg6, %55 : vector<1x64xf32>
      %57 = arith.mulf %49, %49 : vector<8x64xf32>
      %cst_24 = arith.constant dense<0.000000e+00> : vector<64xf32>
      %58 = vector.multi_reduction <add>, %57, %cst_24 [0] : vector<8x64xf32> to vector<64xf32>
      %59 = vector.shape_cast %58 : vector<64xf32> to vector<1x64xf32>
      %60 = arith.addf %arg7, %59 : vector<1x64xf32>
      scf.yield %56, %60 : vector<1x64xf32>, vector<1x64xf32>
    }
    %c8_i32_0 = arith.constant 8 : i32
    %3 = vector.extract_strided_slice %2#0 {offsets = [0, 0], sizes = [1, 16], strides = [1, 1]} : vector<1x64xf32> to vector<1x16xf32>
    %cst_1 = arith.constant 0.000000e+00 : f32
    %4 = vector.broadcast %cst_1 : f32 to vector<1x16xf32>
    %5 = arith.addf %4, %3 : vector<1x16xf32>
    %6 = vector.extract_strided_slice %2#0 {offsets = [0, 16], sizes = [1, 16], strides = [1, 1]} : vector<1x64xf32> to vector<1x16xf32>
    %7 = arith.addf %5, %6 : vector<1x16xf32>
    %8 = vector.extract_strided_slice %2#0 {offsets = [0, 32], sizes = [1, 16], strides = [1, 1]} : vector<1x64xf32> to vector<1x16xf32>
    %9 = arith.addf %7, %8 : vector<1x16xf32>
    %10 = vector.extract_strided_slice %2#0 {offsets = [0, 48], sizes = [1, 16], strides = [1, 1]} : vector<1x64xf32> to vector<1x16xf32>
    %11 = arith.addf %9, %10 : vector<1x16xf32>
    %12 = vector.extract_strided_slice %2#1 {offsets = [0, 0], sizes = [1, 16], strides = [1, 1]} : vector<1x64xf32> to vector<1x16xf32>
    %cst_2 = arith.constant 0.000000e+00 : f32
    %13 = vector.broadcast %cst_2 : f32 to vector<1x16xf32>
    %14 = arith.addf %13, %12 : vector<1x16xf32>
    %15 = vector.extract_strided_slice %2#1 {offsets = [0, 16], sizes = [1, 16], strides = [1, 1]} : vector<1x64xf32> to vector<1x16xf32>
    %16 = arith.addf %14, %15 : vector<1x16xf32>
    %17 = vector.extract_strided_slice %2#1 {offsets = [0, 32], sizes = [1, 16], strides = [1, 1]} : vector<1x64xf32> to vector<1x16xf32>
    %18 = arith.addf %16, %17 : vector<1x16xf32>
    %19 = vector.extract_strided_slice %2#1 {offsets = [0, 48], sizes = [1, 16], strides = [1, 1]} : vector<1x64xf32> to vector<1x16xf32>
    %20 = arith.addf %18, %19 : vector<1x16xf32>
    %cst_3 = arith.constant 3.906250e-03 : f32
    %21 = vector.broadcast %cst_3 : f32 to vector<1x16xf32>
    %22 = arith.mulf %11, %21 : vector<1x16xf32>
    %cst_4 = arith.constant 3.906250e-03 : f32
    %23 = vector.broadcast %cst_4 : f32 to vector<1x16xf32>
    %24 = arith.mulf %20, %23 : vector<1x16xf32>
    %25 = arith.mulf %22, %22 : vector<1x16xf32>
    %26 = arith.subf %24, %25 : vector<1x16xf32>
    %cst_5 = arith.constant 0.000000e+00 : f32
    %27 = vector.broadcast %cst_5 : f32 to vector<1x16xf32>
    %28 = arith.maximumf %26, %27 : vector<1x16xf32>
    %cst_6 = arith.constant 9.99999974E-6 : f32
    %29 = vector.broadcast %cst_6 : f32 to vector<1x16xf32>
    %30 = arith.addf %28, %29 : vector<1x16xf32>
    %31 = math.rsqrt %30 : vector<1x16xf32>
    %32 = tpu.concatenate %22, %22, %22, %22 in 1 : vector<1x16xf32>, vector<1x16xf32>, vector<1x16xf32>, vector<1x16xf32> -> vector<1x64xf32>
    %33 = tpu.concatenate %31, %31, %31, %31 in 1 : vector<1x16xf32>, vector<1x16xf32>, vector<1x16xf32>, vector<1x16xf32> -> vector<1x64xf32>
    %c0_i32_7 = arith.constant 0 : i32
    %c8_i32_8 = arith.constant 8 : i32
    %34 = arith.addi %c0_i32_7, %c8_i32_8 : i32
    %c1_i32_9 = arith.constant 1 : i32
    scf.for %arg5 = %c0_i32_7 to %34 step %c1_i32_9  : i32 {
      %35 = arith.index_cast %arg5 : i32 to index
      %c0 = arith.constant 0 : index
      %c0_11 = arith.constant 0 : index
      %36 = vector.load %arg4[%35, %c0, %c0_11] : memref<8x8x64xf32, #tpu.memory_space<vmem>>, vector<1x8x64xf32>
      %37 = vector.shape_cast %36 : vector<1x8x64xf32> to vector<8x64xf32>
      %38 = vector.broadcast %32 : vector<1x64xf32> to vector<8x64xf32>
      %39 = arith.subf %37, %38 : vector<8x64xf32>
      %40 = vector.broadcast %33 : vector<1x64xf32> to vector<8x64xf32>
      %41 = arith.mulf %39, %40 : vector<8x64xf32>
      %cst_12 = arith.constant 0.000000e+00 : f32
      %42 = vector.broadcast %cst_12 : f32 to vector<8x64xf32>
      %43 = arith.maximumf %41, %42 : vector<8x64xf32>
      %44 = arith.truncf %43 : vector<8x64xf32> to vector<8x64xbf16>
      %c0_13 = arith.constant 0 : index
      %45 = arith.index_cast %arg5 : i32 to index
      %c0_14 = arith.constant 0 : index
      %c0_15 = arith.constant 0 : index
      %46 = vector.load %arg3[%c0_13, %45, %c0_14, %c0_15] : memref<1x8x8x64xbf16, #tpu.memory_space<vmem>>, vector<1x1x8x64xbf16>
      %47 = vector.shape_cast %46 : vector<1x1x8x64xbf16> to vector<8x64xbf16>
      %48 = vector.shape_cast %44 : vector<8x64xbf16> to vector<1x1x8x64xbf16>
      tpu.vector_store %arg3[%c0_13, %45, %c0_14, %c0_15], %48 {strides = array<i32>} : memref<1x8x8x64xbf16, #tpu.memory_space<vmem>>, vector<1x1x8x64xbf16>,
    }
    %c8_i32_10 = arith.constant 8 : i32
    return
  }
  func.func @transform_0(%arg0: i32) -> (i32, i32, i32, i32) {
    %c0_i32 = arith.constant 0 : i32
    %c0_i32_0 = arith.constant 0 : i32
    %c0_i32_1 = arith.constant 0 : i32
    %c0_i32_2 = arith.constant 0 : i32
    return %arg0, %c0_i32, %c0_i32_0, %c0_i32_1 : i32, i32, i32, i32
  }
  func.func @transform_1(%arg0: i32) -> (i32, i32) {
    %c0_i32 = arith.constant 0 : i32
    %c0_i32_0 = arith.constant 0 : i32
    %c0_i32_1 = arith.constant 0 : i32
    return %c0_i32, %c0_i32_0 : i32, i32
  }
  func.func @transform_2(%arg0: i32) -> (i32, i32, i32, i32) {
    %c0_i32 = arith.constant 0 : i32
    %c0_i32_0 = arith.constant 0 : i32
    %c0_i32_1 = arith.constant 0 : i32
    %c0_i32_2 = arith.constant 0 : i32
    return %arg0, %c0_i32, %c0_i32_0, %c0_i32_1 : i32, i32, i32, i32
  }
}

module attributes {stable_mosaic.version = 11 : i64} {
  func.func @kernel(%arg0: i32, %arg1: memref<1x17x17x16xbf16, #tpu.memory_space<vmem>>, %arg2: memref<64x32xbf16, #tpu.memory_space<vmem>>, %arg3: memref<1x16x16x32xbf16, #tpu.memory_space<vmem>>, %arg4: memref<16x16x32xf32, #tpu.memory_space<vmem>>) attributes {dimension_semantics = [#tpu.dimension_semantics<parallel>], iteration_bounds = array<i64: 2>, scalar_prefetch = 0 : i64, scratch_operands = 1 : i64, tpu.core_type = #tpu.core_type<tc>, window_params = [{transform_indices = @transform_0, window_bounds = array<i64: 1, 17, 17, 16>}, {pipeline_mode = #tpu.pipeline_mode<synchronous>, transform_indices = @transform_1, window_bounds = array<i64: 64, 32>}, {transform_indices = @transform_2, window_bounds = array<i64: 1, 16, 16, 32>}]} {
    %cst = arith.constant 0.000000e+00 : f32
    %0 = vector.broadcast %cst : f32 to vector<1x32xf32>
    %c0_i32 = arith.constant 0 : i32
    %c16_i32 = arith.constant 16 : i32
    %1 = arith.addi %c0_i32, %c16_i32 : i32
    %c1_i32 = arith.constant 1 : i32
    %2:2 = scf.for %arg5 = %c0_i32 to %1 step %c1_i32 iter_args(%arg6 = %0, %arg7 = %0) -> (vector<1x32xf32>, vector<1x32xf32>)  : i32 {
      %c0_i32_11 = arith.constant 0 : i32
      %35 = arith.addi %arg5, %c0_i32_11 : i32
      %c0 = arith.constant 0 : index
      %36 = arith.index_cast %35 : i32 to index
      %c0_12 = arith.constant 0 : index
      %c0_13 = arith.constant 0 : index
      %37 = vector.load %arg1[%c0, %36, %c0_12, %c0_13] : memref<1x17x17x16xbf16, #tpu.memory_space<vmem>>, vector<1x1x17x16xbf16>
      %38 = vector.shape_cast %37 : vector<1x1x17x16xbf16> to vector<17x16xbf16>
      %39 = vector.extract_strided_slice %38 {offsets = [0, 0], sizes = [16, 16], strides = [1, 1]} : vector<17x16xbf16> to vector<16x16xbf16>
      %40 = vector.extract_strided_slice %38 {offsets = [1, 0], sizes = [16, 16], strides = [1, 1]} : vector<17x16xbf16> to vector<16x16xbf16>
      %c1_i32_14 = arith.constant 1 : i32
      %41 = arith.addi %arg5, %c1_i32_14 : i32
      %c0_15 = arith.constant 0 : index
      %42 = arith.index_cast %41 : i32 to index
      %c0_16 = arith.constant 0 : index
      %c0_17 = arith.constant 0 : index
      %43 = vector.load %arg1[%c0_15, %42, %c0_16, %c0_17] : memref<1x17x17x16xbf16, #tpu.memory_space<vmem>>, vector<1x1x17x16xbf16>
      %44 = vector.shape_cast %43 : vector<1x1x17x16xbf16> to vector<17x16xbf16>
      %45 = vector.extract_strided_slice %44 {offsets = [0, 0], sizes = [16, 16], strides = [1, 1]} : vector<17x16xbf16> to vector<16x16xbf16>
      %46 = vector.extract_strided_slice %44 {offsets = [1, 0], sizes = [16, 16], strides = [1, 1]} : vector<17x16xbf16> to vector<16x16xbf16>
      %47 = tpu.concatenate %39, %40, %45, %46 in 1 : vector<16x16xbf16>, vector<16x16xbf16>, vector<16x16xbf16>, vector<16x16xbf16> -> vector<16x64xbf16>
      %c0_18 = arith.constant 0 : index
      %c0_19 = arith.constant 0 : index
      %48 = vector.load %arg2[%c0_18, %c0_19] : memref<64x32xbf16, #tpu.memory_space<vmem>>, vector<64x32xbf16>
      %cst_20 = arith.constant dense<0.000000e+00> : vector<16x32xf32>
      %49 = tpu.matmul %47, %48, %cst_20 {dimension_numbers = #tpu.dot_dimension_numbers<[1], [0], [0], [1], [0, 0, 1, 1], [], []>} : vector<16x64xbf16>, vector<64x32xbf16>, vector<16x32xf32> -> vector<16x32xf32>
      %50 = arith.index_cast %arg5 : i32 to index
      %c0_21 = arith.constant 0 : index
      %c0_22 = arith.constant 0 : index
      %51 = vector.load %arg4[%50, %c0_21, %c0_22] : memref<16x16x32xf32, #tpu.memory_space<vmem>>, vector<1x16x32xf32>
      %52 = vector.shape_cast %51 : vector<1x16x32xf32> to vector<16x32xf32>
      %53 = vector.shape_cast %49 : vector<16x32xf32> to vector<1x16x32xf32>
      tpu.vector_store %arg4[%50, %c0_21, %c0_22], %53 {strides = array<i32>} : memref<16x16x32xf32, #tpu.memory_space<vmem>>, vector<1x16x32xf32>,
      %cst_23 = arith.constant dense<0.000000e+00> : vector<32xf32>
      %54 = vector.multi_reduction <add>, %49, %cst_23 [0] : vector<16x32xf32> to vector<32xf32>
      %55 = vector.shape_cast %54 : vector<32xf32> to vector<1x32xf32>
      %56 = arith.addf %arg6, %55 : vector<1x32xf32>
      %57 = arith.mulf %49, %49 : vector<16x32xf32>
      %cst_24 = arith.constant dense<0.000000e+00> : vector<32xf32>
      %58 = vector.multi_reduction <add>, %57, %cst_24 [0] : vector<16x32xf32> to vector<32xf32>
      %59 = vector.shape_cast %58 : vector<32xf32> to vector<1x32xf32>
      %60 = arith.addf %arg7, %59 : vector<1x32xf32>
      scf.yield %56, %60 : vector<1x32xf32>, vector<1x32xf32>
    }
    %c16_i32_0 = arith.constant 16 : i32
    %3 = vector.extract_strided_slice %2#0 {offsets = [0, 0], sizes = [1, 8], strides = [1, 1]} : vector<1x32xf32> to vector<1x8xf32>
    %cst_1 = arith.constant 0.000000e+00 : f32
    %4 = vector.broadcast %cst_1 : f32 to vector<1x8xf32>
    %5 = arith.addf %4, %3 : vector<1x8xf32>
    %6 = vector.extract_strided_slice %2#0 {offsets = [0, 8], sizes = [1, 8], strides = [1, 1]} : vector<1x32xf32> to vector<1x8xf32>
    %7 = arith.addf %5, %6 : vector<1x8xf32>
    %8 = vector.extract_strided_slice %2#0 {offsets = [0, 16], sizes = [1, 8], strides = [1, 1]} : vector<1x32xf32> to vector<1x8xf32>
    %9 = arith.addf %7, %8 : vector<1x8xf32>
    %10 = vector.extract_strided_slice %2#0 {offsets = [0, 24], sizes = [1, 8], strides = [1, 1]} : vector<1x32xf32> to vector<1x8xf32>
    %11 = arith.addf %9, %10 : vector<1x8xf32>
    %12 = vector.extract_strided_slice %2#1 {offsets = [0, 0], sizes = [1, 8], strides = [1, 1]} : vector<1x32xf32> to vector<1x8xf32>
    %cst_2 = arith.constant 0.000000e+00 : f32
    %13 = vector.broadcast %cst_2 : f32 to vector<1x8xf32>
    %14 = arith.addf %13, %12 : vector<1x8xf32>
    %15 = vector.extract_strided_slice %2#1 {offsets = [0, 8], sizes = [1, 8], strides = [1, 1]} : vector<1x32xf32> to vector<1x8xf32>
    %16 = arith.addf %14, %15 : vector<1x8xf32>
    %17 = vector.extract_strided_slice %2#1 {offsets = [0, 16], sizes = [1, 8], strides = [1, 1]} : vector<1x32xf32> to vector<1x8xf32>
    %18 = arith.addf %16, %17 : vector<1x8xf32>
    %19 = vector.extract_strided_slice %2#1 {offsets = [0, 24], sizes = [1, 8], strides = [1, 1]} : vector<1x32xf32> to vector<1x8xf32>
    %20 = arith.addf %18, %19 : vector<1x8xf32>
    %cst_3 = arith.constant 9.765625E-4 : f32
    %21 = vector.broadcast %cst_3 : f32 to vector<1x8xf32>
    %22 = arith.mulf %11, %21 : vector<1x8xf32>
    %cst_4 = arith.constant 9.765625E-4 : f32
    %23 = vector.broadcast %cst_4 : f32 to vector<1x8xf32>
    %24 = arith.mulf %20, %23 : vector<1x8xf32>
    %25 = arith.mulf %22, %22 : vector<1x8xf32>
    %26 = arith.subf %24, %25 : vector<1x8xf32>
    %cst_5 = arith.constant 0.000000e+00 : f32
    %27 = vector.broadcast %cst_5 : f32 to vector<1x8xf32>
    %28 = arith.maximumf %26, %27 : vector<1x8xf32>
    %cst_6 = arith.constant 9.99999974E-6 : f32
    %29 = vector.broadcast %cst_6 : f32 to vector<1x8xf32>
    %30 = arith.addf %28, %29 : vector<1x8xf32>
    %31 = math.rsqrt %30 : vector<1x8xf32>
    %32 = tpu.concatenate %22, %22, %22, %22 in 1 : vector<1x8xf32>, vector<1x8xf32>, vector<1x8xf32>, vector<1x8xf32> -> vector<1x32xf32>
    %33 = tpu.concatenate %31, %31, %31, %31 in 1 : vector<1x8xf32>, vector<1x8xf32>, vector<1x8xf32>, vector<1x8xf32> -> vector<1x32xf32>
    %c0_i32_7 = arith.constant 0 : i32
    %c16_i32_8 = arith.constant 16 : i32
    %34 = arith.addi %c0_i32_7, %c16_i32_8 : i32
    %c1_i32_9 = arith.constant 1 : i32
    scf.for %arg5 = %c0_i32_7 to %34 step %c1_i32_9  : i32 {
      %35 = arith.index_cast %arg5 : i32 to index
      %c0 = arith.constant 0 : index
      %c0_11 = arith.constant 0 : index
      %36 = vector.load %arg4[%35, %c0, %c0_11] : memref<16x16x32xf32, #tpu.memory_space<vmem>>, vector<1x16x32xf32>
      %37 = vector.shape_cast %36 : vector<1x16x32xf32> to vector<16x32xf32>
      %38 = vector.broadcast %32 : vector<1x32xf32> to vector<16x32xf32>
      %39 = arith.subf %37, %38 : vector<16x32xf32>
      %40 = vector.broadcast %33 : vector<1x32xf32> to vector<16x32xf32>
      %41 = arith.mulf %39, %40 : vector<16x32xf32>
      %cst_12 = arith.constant 0.000000e+00 : f32
      %42 = vector.broadcast %cst_12 : f32 to vector<16x32xf32>
      %43 = arith.maximumf %41, %42 : vector<16x32xf32>
      %44 = arith.truncf %43 : vector<16x32xf32> to vector<16x32xbf16>
      %c0_13 = arith.constant 0 : index
      %45 = arith.index_cast %arg5 : i32 to index
      %c0_14 = arith.constant 0 : index
      %c0_15 = arith.constant 0 : index
      %46 = vector.load %arg3[%c0_13, %45, %c0_14, %c0_15] : memref<1x16x16x32xbf16, #tpu.memory_space<vmem>>, vector<1x1x16x32xbf16>
      %47 = vector.shape_cast %46 : vector<1x1x16x32xbf16> to vector<16x32xbf16>
      %48 = vector.shape_cast %44 : vector<16x32xbf16> to vector<1x1x16x32xbf16>
      tpu.vector_store %arg3[%c0_13, %45, %c0_14, %c0_15], %48 {strides = array<i32>} : memref<1x16x16x32xbf16, #tpu.memory_space<vmem>>, vector<1x1x16x32xbf16>,
    }
    %c16_i32_10 = arith.constant 16 : i32
    return
  }
  func.func @transform_0(%arg0: i32) -> (i32, i32, i32, i32) {
    %c0_i32 = arith.constant 0 : i32
    %c0_i32_0 = arith.constant 0 : i32
    %c0_i32_1 = arith.constant 0 : i32
    %c0_i32_2 = arith.constant 0 : i32
    return %arg0, %c0_i32, %c0_i32_0, %c0_i32_1 : i32, i32, i32, i32
  }
  func.func @transform_1(%arg0: i32) -> (i32, i32) {
    %c0_i32 = arith.constant 0 : i32
    %c0_i32_0 = arith.constant 0 : i32
    %c0_i32_1 = arith.constant 0 : i32
    return %c0_i32, %c0_i32_0 : i32, i32
  }
  func.func @transform_2(%arg0: i32) -> (i32, i32, i32, i32) {
    %c0_i32 = arith.constant 0 : i32
    %c0_i32_0 = arith.constant 0 : i32
    %c0_i32_1 = arith.constant 0 : i32
    %c0_i32_2 = arith.constant 0 : i32
    return %arg0, %c0_i32, %c0_i32_0, %c0_i32_1 : i32, i32, i32, i32
  }
}

module attributes {stable_mosaic.version = 11 : i64} {
  func.func @kernel(%arg0: i32, %arg1: memref<1x38x38x8xbf16, #tpu.memory_space<vmem>>, %arg2: memref<392x3xbf16, #tpu.memory_space<vmem>>, %arg3: memref<1x3xf32, #tpu.memory_space<vmem>>, %arg4: memref<1x32x32x3xbf16, #tpu.memory_space<vmem>>) attributes {dimension_semantics = [#tpu.dimension_semantics<parallel>], iteration_bounds = array<i64: 2>, scalar_prefetch = 0 : i64, scratch_operands = 0 : i64, tpu.core_type = #tpu.core_type<tc>, window_params = [{transform_indices = @transform_0, window_bounds = array<i64: 1, 38, 38, 8>}, {pipeline_mode = #tpu.pipeline_mode<synchronous>, transform_indices = @transform_1, window_bounds = array<i64: 392, 3>}, {pipeline_mode = #tpu.pipeline_mode<synchronous>, transform_indices = @transform_2, window_bounds = array<i64: 1, 3>}, {transform_indices = @transform_3, window_bounds = array<i64: 1, 32, 32, 3>}]} {
    %c0 = arith.constant 0 : index
    %c0_0 = arith.constant 0 : index
    %0 = vector.load %arg3[%c0, %c0_0] : memref<1x3xf32, #tpu.memory_space<vmem>>, vector<1x3xf32>
    %c0_i32 = arith.constant 0 : i32
    %c32_i32 = arith.constant 32 : i32
    %1 = arith.addi %c0_i32, %c32_i32 : i32
    %c1_i32 = arith.constant 1 : i32
    scf.for %arg5 = %c0_i32 to %1 step %c1_i32  : i32 {
      %c0_i32_2 = arith.constant 0 : i32
      %2 = arith.addi %arg5, %c0_i32_2 : i32
      %c0_3 = arith.constant 0 : index
      %3 = arith.index_cast %2 : i32 to index
      %c0_4 = arith.constant 0 : index
      %c0_5 = arith.constant 0 : index
      %4 = vector.load %arg1[%c0_3, %3, %c0_4, %c0_5] : memref<1x38x38x8xbf16, #tpu.memory_space<vmem>>, vector<1x1x38x8xbf16>
      %5 = vector.shape_cast %4 : vector<1x1x38x8xbf16> to vector<38x8xbf16>
      %6 = vector.extract_strided_slice %5 {offsets = [0, 0], sizes = [32, 8], strides = [1, 1]} : vector<38x8xbf16> to vector<32x8xbf16>
      %7 = vector.extract_strided_slice %5 {offsets = [1, 0], sizes = [32, 8], strides = [1, 1]} : vector<38x8xbf16> to vector<32x8xbf16>
      %8 = vector.extract_strided_slice %5 {offsets = [2, 0], sizes = [32, 8], strides = [1, 1]} : vector<38x8xbf16> to vector<32x8xbf16>
      %9 = vector.extract_strided_slice %5 {offsets = [3, 0], sizes = [32, 8], strides = [1, 1]} : vector<38x8xbf16> to vector<32x8xbf16>
      %10 = vector.extract_strided_slice %5 {offsets = [4, 0], sizes = [32, 8], strides = [1, 1]} : vector<38x8xbf16> to vector<32x8xbf16>
      %11 = vector.extract_strided_slice %5 {offsets = [5, 0], sizes = [32, 8], strides = [1, 1]} : vector<38x8xbf16> to vector<32x8xbf16>
      %12 = vector.extract_strided_slice %5 {offsets = [6, 0], sizes = [32, 8], strides = [1, 1]} : vector<38x8xbf16> to vector<32x8xbf16>
      %c1_i32_6 = arith.constant 1 : i32
      %13 = arith.addi %arg5, %c1_i32_6 : i32
      %c0_7 = arith.constant 0 : index
      %14 = arith.index_cast %13 : i32 to index
      %c0_8 = arith.constant 0 : index
      %c0_9 = arith.constant 0 : index
      %15 = vector.load %arg1[%c0_7, %14, %c0_8, %c0_9] : memref<1x38x38x8xbf16, #tpu.memory_space<vmem>>, vector<1x1x38x8xbf16>
      %16 = vector.shape_cast %15 : vector<1x1x38x8xbf16> to vector<38x8xbf16>
      %17 = vector.extract_strided_slice %16 {offsets = [0, 0], sizes = [32, 8], strides = [1, 1]} : vector<38x8xbf16> to vector<32x8xbf16>
      %18 = vector.extract_strided_slice %16 {offsets = [1, 0], sizes = [32, 8], strides = [1, 1]} : vector<38x8xbf16> to vector<32x8xbf16>
      %19 = vector.extract_strided_slice %16 {offsets = [2, 0], sizes = [32, 8], strides = [1, 1]} : vector<38x8xbf16> to vector<32x8xbf16>
      %20 = vector.extract_strided_slice %16 {offsets = [3, 0], sizes = [32, 8], strides = [1, 1]} : vector<38x8xbf16> to vector<32x8xbf16>
      %21 = vector.extract_strided_slice %16 {offsets = [4, 0], sizes = [32, 8], strides = [1, 1]} : vector<38x8xbf16> to vector<32x8xbf16>
      %22 = vector.extract_strided_slice %16 {offsets = [5, 0], sizes = [32, 8], strides = [1, 1]} : vector<38x8xbf16> to vector<32x8xbf16>
      %23 = vector.extract_strided_slice %16 {offsets = [6, 0], sizes = [32, 8], strides = [1, 1]} : vector<38x8xbf16> to vector<32x8xbf16>
      %c2_i32 = arith.constant 2 : i32
      %24 = arith.addi %arg5, %c2_i32 : i32
      %c0_10 = arith.constant 0 : index
      %25 = arith.index_cast %24 : i32 to index
      %c0_11 = arith.constant 0 : index
      %c0_12 = arith.constant 0 : index
      %26 = vector.load %arg1[%c0_10, %25, %c0_11, %c0_12] : memref<1x38x38x8xbf16, #tpu.memory_space<vmem>>, vector<1x1x38x8xbf16>
      %27 = vector.shape_cast %26 : vector<1x1x38x8xbf16> to vector<38x8xbf16>
      %28 = vector.extract_strided_slice %27 {offsets = [0, 0], sizes = [32, 8], strides = [1, 1]} : vector<38x8xbf16> to vector<32x8xbf16>
      %29 = vector.extract_strided_slice %27 {offsets = [1, 0], sizes = [32, 8], strides = [1, 1]} : vector<38x8xbf16> to vector<32x8xbf16>
      %30 = vector.extract_strided_slice %27 {offsets = [2, 0], sizes = [32, 8], strides = [1, 1]} : vector<38x8xbf16> to vector<32x8xbf16>
      %31 = vector.extract_strided_slice %27 {offsets = [3, 0], sizes = [32, 8], strides = [1, 1]} : vector<38x8xbf16> to vector<32x8xbf16>
      %32 = vector.extract_strided_slice %27 {offsets = [4, 0], sizes = [32, 8], strides = [1, 1]} : vector<38x8xbf16> to vector<32x8xbf16>
      %33 = vector.extract_strided_slice %27 {offsets = [5, 0], sizes = [32, 8], strides = [1, 1]} : vector<38x8xbf16> to vector<32x8xbf16>
      %34 = vector.extract_strided_slice %27 {offsets = [6, 0], sizes = [32, 8], strides = [1, 1]} : vector<38x8xbf16> to vector<32x8xbf16>
      %c3_i32 = arith.constant 3 : i32
      %35 = arith.addi %arg5, %c3_i32 : i32
      %c0_13 = arith.constant 0 : index
      %36 = arith.index_cast %35 : i32 to index
      %c0_14 = arith.constant 0 : index
      %c0_15 = arith.constant 0 : index
      %37 = vector.load %arg1[%c0_13, %36, %c0_14, %c0_15] : memref<1x38x38x8xbf16, #tpu.memory_space<vmem>>, vector<1x1x38x8xbf16>
      %38 = vector.shape_cast %37 : vector<1x1x38x8xbf16> to vector<38x8xbf16>
      %39 = vector.extract_strided_slice %38 {offsets = [0, 0], sizes = [32, 8], strides = [1, 1]} : vector<38x8xbf16> to vector<32x8xbf16>
      %40 = vector.extract_strided_slice %38 {offsets = [1, 0], sizes = [32, 8], strides = [1, 1]} : vector<38x8xbf16> to vector<32x8xbf16>
      %41 = vector.extract_strided_slice %38 {offsets = [2, 0], sizes = [32, 8], strides = [1, 1]} : vector<38x8xbf16> to vector<32x8xbf16>
      %42 = vector.extract_strided_slice %38 {offsets = [3, 0], sizes = [32, 8], strides = [1, 1]} : vector<38x8xbf16> to vector<32x8xbf16>
      %43 = vector.extract_strided_slice %38 {offsets = [4, 0], sizes = [32, 8], strides = [1, 1]} : vector<38x8xbf16> to vector<32x8xbf16>
      %44 = vector.extract_strided_slice %38 {offsets = [5, 0], sizes = [32, 8], strides = [1, 1]} : vector<38x8xbf16> to vector<32x8xbf16>
      %45 = vector.extract_strided_slice %38 {offsets = [6, 0], sizes = [32, 8], strides = [1, 1]} : vector<38x8xbf16> to vector<32x8xbf16>
      %c4_i32 = arith.constant 4 : i32
      %46 = arith.addi %arg5, %c4_i32 : i32
      %c0_16 = arith.constant 0 : index
      %47 = arith.index_cast %46 : i32 to index
      %c0_17 = arith.constant 0 : index
      %c0_18 = arith.constant 0 : index
      %48 = vector.load %arg1[%c0_16, %47, %c0_17, %c0_18] : memref<1x38x38x8xbf16, #tpu.memory_space<vmem>>, vector<1x1x38x8xbf16>
      %49 = vector.shape_cast %48 : vector<1x1x38x8xbf16> to vector<38x8xbf16>
      %50 = vector.extract_strided_slice %49 {offsets = [0, 0], sizes = [32, 8], strides = [1, 1]} : vector<38x8xbf16> to vector<32x8xbf16>
      %51 = vector.extract_strided_slice %49 {offsets = [1, 0], sizes = [32, 8], strides = [1, 1]} : vector<38x8xbf16> to vector<32x8xbf16>
      %52 = vector.extract_strided_slice %49 {offsets = [2, 0], sizes = [32, 8], strides = [1, 1]} : vector<38x8xbf16> to vector<32x8xbf16>
      %53 = vector.extract_strided_slice %49 {offsets = [3, 0], sizes = [32, 8], strides = [1, 1]} : vector<38x8xbf16> to vector<32x8xbf16>
      %54 = vector.extract_strided_slice %49 {offsets = [4, 0], sizes = [32, 8], strides = [1, 1]} : vector<38x8xbf16> to vector<32x8xbf16>
      %55 = vector.extract_strided_slice %49 {offsets = [5, 0], sizes = [32, 8], strides = [1, 1]} : vector<38x8xbf16> to vector<32x8xbf16>
      %56 = vector.extract_strided_slice %49 {offsets = [6, 0], sizes = [32, 8], strides = [1, 1]} : vector<38x8xbf16> to vector<32x8xbf16>
      %c5_i32 = arith.constant 5 : i32
      %57 = arith.addi %arg5, %c5_i32 : i32
      %c0_19 = arith.constant 0 : index
      %58 = arith.index_cast %57 : i32 to index
      %c0_20 = arith.constant 0 : index
      %c0_21 = arith.constant 0 : index
      %59 = vector.load %arg1[%c0_19, %58, %c0_20, %c0_21] : memref<1x38x38x8xbf16, #tpu.memory_space<vmem>>, vector<1x1x38x8xbf16>
      %60 = vector.shape_cast %59 : vector<1x1x38x8xbf16> to vector<38x8xbf16>
      %61 = vector.extract_strided_slice %60 {offsets = [0, 0], sizes = [32, 8], strides = [1, 1]} : vector<38x8xbf16> to vector<32x8xbf16>
      %62 = vector.extract_strided_slice %60 {offsets = [1, 0], sizes = [32, 8], strides = [1, 1]} : vector<38x8xbf16> to vector<32x8xbf16>
      %63 = vector.extract_strided_slice %60 {offsets = [2, 0], sizes = [32, 8], strides = [1, 1]} : vector<38x8xbf16> to vector<32x8xbf16>
      %64 = vector.extract_strided_slice %60 {offsets = [3, 0], sizes = [32, 8], strides = [1, 1]} : vector<38x8xbf16> to vector<32x8xbf16>
      %65 = vector.extract_strided_slice %60 {offsets = [4, 0], sizes = [32, 8], strides = [1, 1]} : vector<38x8xbf16> to vector<32x8xbf16>
      %66 = vector.extract_strided_slice %60 {offsets = [5, 0], sizes = [32, 8], strides = [1, 1]} : vector<38x8xbf16> to vector<32x8xbf16>
      %67 = vector.extract_strided_slice %60 {offsets = [6, 0], sizes = [32, 8], strides = [1, 1]} : vector<38x8xbf16> to vector<32x8xbf16>
      %c6_i32 = arith.constant 6 : i32
      %68 = arith.addi %arg5, %c6_i32 : i32
      %c0_22 = arith.constant 0 : index
      %69 = arith.index_cast %68 : i32 to index
      %c0_23 = arith.constant 0 : index
      %c0_24 = arith.constant 0 : index
      %70 = vector.load %arg1[%c0_22, %69, %c0_23, %c0_24] : memref<1x38x38x8xbf16, #tpu.memory_space<vmem>>, vector<1x1x38x8xbf16>
      %71 = vector.shape_cast %70 : vector<1x1x38x8xbf16> to vector<38x8xbf16>
      %72 = vector.extract_strided_slice %71 {offsets = [0, 0], sizes = [32, 8], strides = [1, 1]} : vector<38x8xbf16> to vector<32x8xbf16>
      %73 = vector.extract_strided_slice %71 {offsets = [1, 0], sizes = [32, 8], strides = [1, 1]} : vector<38x8xbf16> to vector<32x8xbf16>
      %74 = vector.extract_strided_slice %71 {offsets = [2, 0], sizes = [32, 8], strides = [1, 1]} : vector<38x8xbf16> to vector<32x8xbf16>
      %75 = vector.extract_strided_slice %71 {offsets = [3, 0], sizes = [32, 8], strides = [1, 1]} : vector<38x8xbf16> to vector<32x8xbf16>
      %76 = vector.extract_strided_slice %71 {offsets = [4, 0], sizes = [32, 8], strides = [1, 1]} : vector<38x8xbf16> to vector<32x8xbf16>
      %77 = vector.extract_strided_slice %71 {offsets = [5, 0], sizes = [32, 8], strides = [1, 1]} : vector<38x8xbf16> to vector<32x8xbf16>
      %78 = vector.extract_strided_slice %71 {offsets = [6, 0], sizes = [32, 8], strides = [1, 1]} : vector<38x8xbf16> to vector<32x8xbf16>
      %79 = tpu.concatenate %6, %7, %8, %9, %10, %11, %12, %17, %18, %19, %20, %21, %22, %23, %28, %29 in 1 : vector<32x8xbf16>, vector<32x8xbf16>, vector<32x8xbf16>, vector<32x8xbf16>, vector<32x8xbf16>, vector<32x8xbf16>, vector<32x8xbf16>, vector<32x8xbf16>, vector<32x8xbf16>, vector<32x8xbf16>, vector<32x8xbf16>, vector<32x8xbf16>, vector<32x8xbf16>, vector<32x8xbf16>, vector<32x8xbf16>, vector<32x8xbf16> -> vector<32x128xbf16>
      %80 = tpu.concatenate %30, %31, %32, %33, %34, %39, %40, %41, %42, %43, %44, %45, %50, %51, %52, %53 in 1 : vector<32x8xbf16>, vector<32x8xbf16>, vector<32x8xbf16>, vector<32x8xbf16>, vector<32x8xbf16>, vector<32x8xbf16>, vector<32x8xbf16>, vector<32x8xbf16>, vector<32x8xbf16>, vector<32x8xbf16>, vector<32x8xbf16>, vector<32x8xbf16>, vector<32x8xbf16>, vector<32x8xbf16>, vector<32x8xbf16>, vector<32x8xbf16> -> vector<32x128xbf16>
      %81 = tpu.concatenate %54, %55, %56, %61, %62, %63, %64, %65, %66, %67, %72, %73, %74, %75, %76, %77 in 1 : vector<32x8xbf16>, vector<32x8xbf16>, vector<32x8xbf16>, vector<32x8xbf16>, vector<32x8xbf16>, vector<32x8xbf16>, vector<32x8xbf16>, vector<32x8xbf16>, vector<32x8xbf16>, vector<32x8xbf16>, vector<32x8xbf16>, vector<32x8xbf16>, vector<32x8xbf16>, vector<32x8xbf16>, vector<32x8xbf16>, vector<32x8xbf16> -> vector<32x128xbf16>
      %82 = tpu.concatenate %79, %80, %81, %78 in 1 : vector<32x128xbf16>, vector<32x128xbf16>, vector<32x128xbf16>, vector<32x8xbf16> -> vector<32x392xbf16>
      %c0_25 = arith.constant 0 : index
      %c0_26 = arith.constant 0 : index
      %83 = vector.load %arg2[%c0_25, %c0_26] : memref<392x3xbf16, #tpu.memory_space<vmem>>, vector<392x3xbf16>
      %cst = arith.constant dense<0.000000e+00> : vector<32x3xf32>
      %84 = tpu.matmul %82, %83, %cst {dimension_numbers = #tpu.dot_dimension_numbers<[1], [0], [0], [1], [0, 0, 1, 1], [], []>} : vector<32x392xbf16>, vector<392x3xbf16>, vector<32x3xf32> -> vector<32x3xf32>
      %85 = vector.broadcast %0 : vector<1x3xf32> to vector<32x3xf32>
      %86 = arith.addf %84, %85 : vector<32x3xf32>
      %87 = math.tanh %86 : vector<32x3xf32>
      %88 = arith.truncf %87 : vector<32x3xf32> to vector<32x3xbf16>
      %c0_27 = arith.constant 0 : index
      %89 = arith.index_cast %arg5 : i32 to index
      %c0_28 = arith.constant 0 : index
      %c0_29 = arith.constant 0 : index
      %90 = vector.load %arg4[%c0_27, %89, %c0_28, %c0_29] : memref<1x32x32x3xbf16, #tpu.memory_space<vmem>>, vector<1x1x32x3xbf16>
      %91 = vector.shape_cast %90 : vector<1x1x32x3xbf16> to vector<32x3xbf16>
      %92 = vector.shape_cast %88 : vector<32x3xbf16> to vector<1x1x32x3xbf16>
      tpu.vector_store %arg4[%c0_27, %89, %c0_28, %c0_29], %92 {strides = array<i32>} : memref<1x32x32x3xbf16, #tpu.memory_space<vmem>>, vector<1x1x32x3xbf16>,
    }
    %c32_i32_1 = arith.constant 32 : i32
    return
  }
  func.func @transform_0(%arg0: i32) -> (i32, i32, i32, i32) {
    %c0_i32 = arith.constant 0 : i32
    %c0_i32_0 = arith.constant 0 : i32
    %c0_i32_1 = arith.constant 0 : i32
    %c0_i32_2 = arith.constant 0 : i32
    return %arg0, %c0_i32, %c0_i32_0, %c0_i32_1 : i32, i32, i32, i32
  }
  func.func @transform_1(%arg0: i32) -> (i32, i32) {
    %c0_i32 = arith.constant 0 : i32
    %c0_i32_0 = arith.constant 0 : i32
    %c0_i32_1 = arith.constant 0 : i32
    return %c0_i32, %c0_i32_0 : i32, i32
  }
  func.func @transform_2(%arg0: i32) -> (i32, i32) {
    %c0_i32 = arith.constant 0 : i32
    %c0_i32_0 = arith.constant 0 : i32
    %c0_i32_1 = arith.constant 0 : i32
    return %c0_i32, %c0_i32_0 : i32, i32
  }
  func.func @transform_3(%arg0: i32) -> (i32, i32, i32, i32) {
    %c0_i32 = arith.constant 0 : i32
    %c0_i32_0 = arith.constant 0 : i32
    %c0_i32_1 = arith.constant 0 : i32
    %c0_i32_2 = arith.constant 0 : i32
    return %arg0, %c0_i32, %c0_i32_0, %c0_i32_1 : i32, i32, i32, i32
  }
}

</mosaic_0001>

<bundles_post_ra>
// kernel: pix2pixhd_forward.28
= control target key start
LH: loop header
LB: loop body
LE: loop exit
PB: predicated region body
PF: predicated region fallthrough
CT: control target
= control target key end

     0   :  { %s1842_s9 = smov 0   ;;  %s2814_s0 = inlined_call_operand.vmem [shape: bf16[2,38,38,4], index: 0, kind: input, shape index: {}]   ;;  %s2815_s1 = inlined_call_operand.vmem [shape: bf16[196,8], index: 1, kind: input, shape index: {}]   ;;  %s2816_s2 = inlined_call_operand.vmem [shape: bf16[2,32,32,8], index: 2, kind: output, shape index: {}]  }
   0x1 LB: > { %s1554_s10 = sadd.s32 4294967295, %s1792_s9   ;;  %p1558_p0 = scmp.ge.s32.totalorder %s1792_s9, 1  ;;  %s1792_s9 = sphi %s1842_s9, %s12_s9  }
   0x2   : > { %p112_p1 = scmp.lt.s32.totalorder %s1792_s9, 3 }
   0x4   : > { %p113_p2 = pnand %p1558_p0, %p112_p1 }
   0x5   : > { %p134_p3 = scmp.lt.s32.totalorder (!%p113_p2), %s1554_s10, 1  ;;  %v1860_v0 = vmov (!%p113_p2), 0.0   ;;  %v1862_v1 = vmov (!%p113_p2), 0.0   ;;  %s1864_s19 = smov (!%p113_p2), 0  }
   0x6   : > { %116 = sbr.rel (%p113_p2) target bundleno = 651 (0x28b), region = 28 }
   0xd   : > { %s2904_s10 = smov (!%p134_p3, %s1554_s10), 1 }
   0xe   : > { %s1672_s11 = smul.u32 760, %s2904_s10  ;;  %s1639_s12 = sshll.u32 %s2904_s10, 9 }
   0xf   : > { %s1853_s15 = scalar_lea.vmem %s2816_s2, %s1639_s12 }
  0x10   : > { %s1858_s18 = scalar_lea.vmem %s2814_s0, %s1672_s11 }
  0x11 LB: >> { %2834 = vst [vmem:[#allocation3_spill] sm:$0xff] %v1796_v0  ;;  %2835 = vst [vmem:[#allocation4_spill] sm:$0xff] %v1800_v1  ;;  %s1640_s20 = smul.u32 20, %s1804_s19  ;;  %vm2833_vm0 = vcmask 1045504   ;;  %vm2830_vm1 = vcmask 1046528   ;;  %s1810_s22 = smov 16   ;;  %s1804_s19 = sphi %s1864_s19, %s150_s19   ;;  %v1800_v1 = vphi %v1862_v1, %v2902_v1   ;;  %v1796_v0 = vphi %v1860_v0, %v2901_v0  }
  0x12   : >> { %vm228_vm2 = vsmask.f32 7424  ;;  %s1811_s23 = smov 8   ;;  %s1812_s24 = smov 4   ;;  %vm263_vm3 = vsmask.f32 6400 }
  0x13   : >> { %s1877_s21 = scalar_lea.vmem %s1858_s18, %s1640_s20  ;;  %s1813_s25 = smov 12   ;;  %vm591_vm4 = vcmask 1040384   ;;  %vm604_vm5 = vsmask.f32 256  ;;  %vm877_vm6 = vcmask 1041408   ;;  %vm2831_vm9 = vcmask 1044480  }
  0x14   : >> { %v1730_v2 = vld [vmem:[%s1877_s21 + $0x28] sm:$0xff]   ;;  %v1731_v3 = vld [vmem:[%s1877_s21 + $0x30] sm:$0xff]   ;;  %v1882_v4 = vld [vmem:[%s1877_s21 + $0x38] ss:$0 sps:$4 sm:$0x77]   ;;  %s1814_s26 = smov 20  }
  0x15   : >> { %v570_v5 = vrot.slane %v1730_v2, 2  ;;  %v571_v6 = vrot.slane %v1731_v3, 2  ;;  %v542_v7 = vrot.slane %v1730_v2, 1  ;;  %v543_v8 = vrot.slane %v1731_v3, 1  ;;  %v1903_v35 = vld [vmem:[%s1877_s21 + $0x44] sm:$0xff]   ;;  %v1910_v38 = vld [vmem:[%s1877_s21 + $0x3c] sm:$0xff]  }
  0x16   : >> { %v545_v9 = vrot.slane %v1882_v4, 1  ;;  %v435_v10 = vshrl.u32 %v1730_v2, 16  ;;  %v437_v11 = vshll.u32 %v1730_v2, 16  ;;  %v442_v12 = vshll.u32 %v1731_v3, 16  ;;  %s1815_s27 = smov 24   ;;  %s1816_s28 = smov 28  }
  0x17   : >> { %v572_v13 = vsel %vm2833_vm0, %v570_v5, %v571_v6  ;;  %v544_v14 = vsel %vm2830_vm1, %v542_v7, %v543_v8  ;;  %v446_v15 = vshrl.u32 %v1731_v3, 16  ;;  %v573_v18 = vrot.slane %v1882_v4, 2  ;;  %v1931_v54 = vld [vmem:[%s1877_s21 + $0x4c] ss:$0 sps:$4 sm:$0x77]   ;;  %s1817_s29 = smov 32  }
  0x18   : >> { %575 = vrot.lane.b32.xlu0 %v572_v13, %s1810_s22  ;;  %547 = vrot.lane.b32.xlu1 %v544_v14, %s1811_s23  ;;  %v439_v16 = vrot.slane %v437_v11, 1  ;;  %v444_v17 = vrot.slane %v442_v12, 1  ;;  %v450_v19 = vshll.u32 %v1882_v4, 16  ;;  %v546_v20 = vsel %vm2830_vm1, %v543_v8, %v545_v9  ;;  %s1818_s30 = smov 36   ;;  %s1819_s3 = smov 40  }
  0x19   : >> { %v533_v21 = vshrl.u32 %v1882_v4, 16  ;;  %v556_v22 = vrot.slane %v446_v15, 1  ;;  %v557_v23 = vrot.slane %v442_v12, 2  ;;  %v553_v29 = vrot.slane %v435_v10, 1  ;;  %s1820_s4 = smov 44   ;;  %s1821_s5 = smov 48  }
  0x1a   : >> { %v440_v24 = vor.u32 %v439_v16, %v435_v10  ;;  %v448_v25 = vor.u32 %v446_v15, %v444_v17  ;;  %v452_v26 = vrot.slane %v450_v19, 1  ;;  %v561_v27 = vrot.slane %v450_v19, 2  ;;  %s1822_s6 = smov 52   ;;  %s1823_s7 = smov 56  }
  0x1b   : >> { %v560_v28 = vrot.slane %v533_v21, 1  ;;  %v554_v30 = vrot.slane %v437_v11, 2  ;;  %v574_v32 = vsel %vm2833_vm0, %v571_v6, %v573_v18  ;;  %v558_v33 = vor.u32 %v557_v23, %v556_v22  ;;  %v1970_v23 = vld [vmem:[%s1877_s21 + $0x58] sm:$0xff]   ;;  %s1824_s8 = smov 60  }
  0x1c   : >> { %549 = vrot.lane.b32.xlu1 %v546_v20, %s1811_s23  ;;  %v1895_v31 = vsel %vm228_vm2, %v440_v24, %v444_v17  ;;  %v1906_v36 = vsel %vm228_vm2, %v448_v25, %v452_v26  ;;  %v613_v40 = vshrl.u32 %v1903_v35, 16  ;;  %v592_v42 = vrot.slane %v1910_v38, 7 }
  0x1d   : >> { %2836 = vst [vmem:[#allocation5_spill] sm:$0xff] %v1895_v31  ;;  %536 = vrot.lane.b32.xlu0 %v1895_v31, %s1812_s24  ;;  %v562_v34 = vor.u32 %v561_v27, %v560_v28  ;;  %2837 = vst [vmem:[#allocation6_spill] sm:$0xff] %v1906_v36  ;;  %v555_v37 = vor.u32 %v554_v30, %v553_v29  ;;  %v535_v43 = vor.u32 %v533_v21, %v452_v26  ;;  %v1965_v21 = vld [vmem:[%s1877_s21 + $0x50] sm:$0xff]   ;;  %vm890_vm7 = vsmask.f32 1280 }
  0x1e   : >> { %v606_v44 = vshrl.u32 %v1910_v38, 16  ;;  %v615_v45 = vrot.slane %v613_v40, 7  ;;  %v616_v46 = vshll.u32 %v1903_v35, 16  ;;  %v593_v47 = vrot.slane %v1903_v35, 7 }
  0x1f   : >> { %v563_v39 = vsel %vm263_vm3, %v558_v33, %v562_v34  ;;  %v559_v41 = vsel %vm263_vm3, %v555_v37, %v558_v33  ;;  %v609_v50 = vshll.u32 %v1910_v38, 16  ;;  %v621_v55 = vshll.u32 %v1931_v54, 16 }
  0x20   : >> { %577 = vrot.lane.b32.xlu1 %v574_v32, %s1810_s22  ;;  %v608_v48 = vrot.slane %v606_v44, 7  ;;  %v618_v49 = vor.u32 %v616_v46, %v615_v45  ;;  %v594_v51 = vsel %vm591_vm4, %v592_v42, %v593_v47  ;;  %v638_v56 = vrot.slane %v616_v46, 1 }
  0x21   : >> { %538 = vrot.lane.b32.xlu0 %v1906_v36, %s1812_s24  ;;  %v636_v57 = vrot.slane %v609_v50, 1  ;;  %v641_v59 = vrot.slane %v621_v55, 1  ;;  %v652_v61 = vrot.slane %v1910_v38, 1  ;;  %v653_v62 = vrot.slane %v1903_v35, 1 }
  0x22   : >> { %v619_v52 = vsel %vm604_vm5, %v608_v48, %v618_v49  ;;  %v611_v53 = vor.u32 %v609_v50, %v608_v48  ;;  %v640_v58 = vor.u32 %v638_v56, %v613_v40  ;;  %v643_v2 = vshrl.u32 %v1931_v54, 16 }
  0x23   : >> { %v637_v60 = vor.u32 %v636_v57, %v606_v44  ;;  %v654_v5 = vsel %vm2830_vm1, %v652_v61, %v653_v62  ;;  %v666_v4 = vrot.slane %v613_v40, 1  ;;  %v667_v6 = vrot.slane %v616_v46, 2  ;;  %v2021_v57 = vld [vmem:[%s1877_s21 + $0x6c] sm:$0xff]  }
  0x24   : >> { %566 = vrot.lane.b32.xlu1 %v563_v39, %s1813_s25  ;;  %v642_v63 = vsel %vm228_vm2, %v640_v58, %v641_v59  ;;  %v670_v7 = vrot.slane %v643_v2, 1  ;;  %v671_v8 = vrot.slane %v621_v55, 2  ;;  %v663_v10 = vrot.slane %v606_v44, 1  ;;  %v2033_v61 = vld [vmem:[%s1877_s21 + $0x8] sm:$0xff]  }
  0x25   : >> { %564 = vrot.lane.b32.xlu0 %v559_v41, %s1813_s25  ;;  %v639_v3 = vsel %vm228_vm2, %v637_v60, %v638_v56  ;;  %v664_v11 = vrot.slane %v609_v50, 2  ;;  %v623_v12 = vsel %vm604_vm5, %v615_v45, %v621_v55  ;;  %v668_v13 = vor.u32 %v667_v6, %v666_v4  ;;  %v2018_v56 = vld [vmem:[%s1877_s21] sm:$0xff]  }
  0x26   : >> { %v672_v14 = vor.u32 %v671_v8, %v670_v7  ;;  %v681_v19 = vrot.slane %v1903_v35, 2  ;;  %v683_v24 = vrot.slane %v1931_v54, 2  ;;  %v645_v25 = vor.u32 %v643_v2, %v641_v59 }
  0x27   : >> { %v665_v16 = vor.u32 %v664_v11, %v663_v10  ;;  %v714_v26 = vshrl.u32 %v1965_v21, 16  ;;  %v701_v27 = vrot.slane %v1965_v21, 7  ;;  %v702_v28 = vrot.slane %v1970_v23, 7 }
  0x28   : >> { %595 = vrot.lane.b32.xlu1 %v592_v42, %s1814_s26  ;;  %v673_v17 = vsel %vm263_vm3, %v668_v13, %v672_v14  ;;  %v684_v29 = vsel %vm2833_vm0, %v681_v19, %v683_v24  ;;  %v721_v30 = vshrl.u32 %v1970_v23, 16  ;;  %v717_v33 = vshll.u32 %v1965_v21, 16  ;;  %v1992_v42 = vld [vmem:[%s1877_s21 + $0x60] ss:$0 sps:$4 sm:$0x77]  }
  0x29   : >> { %540 = vrot.lane.b32.xlu0 %v535_v43, %s1812_s24  ;;  %v669_v20 = vsel %vm263_vm3, %v665_v16, %v668_v13  ;;  %v716_v32 = vrot.slane %v714_v26, 7  ;;  %v724_v37 = vshll.u32 %v1970_v23, 16  ;;  %2838 = vst [vmem:[#allocation7_spill] sm:$0xff] %v1992_v42  ;;  %v729_v45 = vshll.u32 %v1992_v42, 16 }
  0x2a   : >> { %v744_v40 = vrot.slane %v717_v33, 1  ;;  %v751_v50 = vshrl.u32 %v1992_v42, 16  ;;  %v857_v55 = vrot.slane %v1970_v23, 1  ;;  %v2040_v2 = vshrl.u32 %v2021_v57, 16 }
  0x2b   : >> { %v746_v44 = vrot.slane %v724_v37, 1  ;;  %v749_v48 = vrot.slane %v729_v45, 1  ;;  %v2051_v7 = vshrl.u32 %v2018_v56, 16  ;;  %v879_v11 = vrot.slane %v2021_v57, 6 }
  0x2c   : >> { %551 = vrot.lane.b32.xlu1 %v545_v9, %s1811_s23  ;;  %v655_v9 = vrot.slane %v1931_v54, 1  ;;  %v745_v43 = vor.u32 %v744_v40, %v714_v26  ;;  %v2076_v26 = vshrl.u32 %v2033_v61, 16  ;;  %vm2832_vm8 = vsmask.f32 5376 }
  0x2d   : >> { %597 = vrot.lane.b32.xlu0 %v594_v51, %s1814_s26  ;;  %vm458_vm10 = vcmask 31744   ;;  %vm463_vm11 = vcmask 64512   ;;  %vm468_vm12 = vcmask 97280   ;;  %vm473_vm13 = vcmask 130048  }
  0x2e   : >> { %v656_v15 = vsel %vm2830_vm1, %v653_v62, %v655_v9  ;;  %v747_v46 = vsel %vm228_vm2, %v745_v43, %v746_v44  ;;  %v2036_v62 = vshll.u32 %v2018_v56, 16  ;;  %vm478_vm14 = vcmask 162816  }
  0x2f   : >> { %vm483_vm15 = vcmask 195584  }
  0x30   : >> { %626 = vrot.lane.b32.xlu1 %v619_v52, %s1815_s27  ;;  %v2012_v52 = vld [vmem:[%s1877_s21 + $0x64] sm:$0xff]   ;;  %v234_v8 = vrot.slane %v2036_v62, 1 }
  0x31   : >> { %624 = vrot.lane.b32.xlu0 %v611_v53, %s1815_s27  ;;  %v753_v53 = vor.u32 %v751_v50, %v749_v48  ;;  %v2025_v58 = vshrl.u32 %v2012_v52, 16  ;;  %v2028_v59 = vshll.u32 %v2012_v52, 16  ;;  %v282_v50 = vrot.slane %v2018_v56, 2 }
  0x33   : >> { %v894_v4 = vrot.slane %v2025_v58, 6  ;;  %v897_v6 = vrot.slane %v2028_v59, 7 }
  0x34   : >> { %630 = vrot.lane.b32.xlu1 %v1910_v38, %s1816_s28 }
  0x35   : >> { %568 = vrot.lane.b32.xlu0 %v562_v34, %s1813_s25  ;;  %v703_v34 = vsel %vm591_vm4, %v701_v27, %v702_v28 }
  0x38   : >> { %579 = vrot.lane.b32.xlu1 %v573_v18, %s1810_s22  ;;  %v680_v18 = vrot.slane %v1910_v38, 2  ;;  %v719_v38 = vor.u32 %v717_v33, %v716_v32  ;;  %v267_v33 = vrot.slane %v2076_v26, 1 }
  0x39   : >> { %632 = vrot.lane.b32.xlu0 %v1903_v35, %s1816_s28  ;;  %v723_v35 = vrot.slane %v721_v30, 7 }
  0x3a   : >> { %v682_v22 = vsel %vm2833_vm0, %v680_v18, %v681_v19 }
  0x3b   : >> { %v726_v39 = vor.u32 %v724_v37, %v723_v35  ;;  %v731_v51 = vsel %vm604_vm5, %v723_v35, %v729_v45  ;;  %v932_v37 = vrot.slane %v2040_v2, 7 }
  0x3c   : >> { %648 = vrot.lane.b32.xlu1 %v642_v63, %s1817_s29  ;;  %v859_v63 = vrot.slane %v1992_v42, 1 }
  0x3d   : >> { %646 = vrot.lane.b32.xlu0 %v639_v3, %s1817_s29  ;;  %v727_v41 = vsel %vm604_vm5, %v716_v32, %v726_v39  ;;  %v2043_v3 = vshll.u32 %v2021_v57, 16  ;;  %v265_v32 = vrot.slane %v2036_v62, 2 }
  0x3e   : >> { %v860_v10 = vsel %vm2830_vm1, %v857_v55, %v859_v63 }
  0x3f   : >> { %v905_v13 = vrot.slane %v2043_v3, 7 }
  0x40   : >> { %657 = vrot.lane.b32.xlu1 %v654_v5, %s1818_s30  ;;  %v878_v5 = vrot.slane %v2012_v52, 6 }
  0x41   : >> { %599 = vrot.lane.b32.xlu0 %v593_v47, %s1814_s26  ;;  %v748_v47 = vor.u32 %v746_v44, %v721_v30  ;;  %v264_v30 = vrot.slane %v2051_v7, 1  ;;  %v933_v44 = vor.u32 %v932_v37, %v2043_v3 }
  0x43   : >> { %v750_v49 = vsel %vm228_vm2, %v748_v47, %v749_v48  ;;  %v266_v39 = vor.u32 %v265_v32, %v264_v30  ;;  %v967_v32 = vrot.slane %v2021_v57, 1 }
  0x44   : >> { %628 = vrot.lane.b32.xlu1 %v623_v12, %s1815_s27  ;;  %v902_v12 = vrot.slane %v2040_v2, 6 }
  0x45   : >> { %659 = vrot.lane.b32.xlu0 %v656_v15, %s1818_s30  ;;  %v235_v15 = vor.u32 %v234_v8, %v2051_v7 }
  0x46   : >> { %v906_v18 = vor.u32 %v905_v13, %v902_v12 }
  0x48   : >> { %676 = vrot.lane.b32.xlu1 %v673_v17, %s1819_s3  ;;  %v880_v17 = vsel %vm877_vm6, %v878_v5, %v879_v11 }
  0x49   : >> { %674 = vrot.lane.b32.xlu0 %v669_v20, %s1819_s3 }
  0x4c   : >> { %685 = vrot.lane.b32.xlu1 %v682_v22, %s1820_s4  ;;  %v919_v22 = vrot.slane %v2012_v52, 7 }
  0x4d   : >> { %634 = vrot.lane.b32.xlu0 %v1931_v54, %s1816_s28  ;;  %v856_v54 = vrot.slane %v1965_v21, 1 }
  0x4f   : >> { %v858_v60 = vsel %vm2830_vm1, %v856_v54, %v857_v55  ;;  %v952_v54 = vrot.slane %v2028_v59, 1  ;;  %v2126_v55 = vld [vmem:[%s1877_s21 + $0x10] ss:$0 sps:$4 sm:$0x77]  }
  0x50   : >> { %650 = vrot.lane.b32.xlu1 %v645_v25, %s1817_s29  ;;  %v255_v25 = vrot.slane %v2033_v61, 1  ;;  %v2142_v8 = vshll.u32 %v2126_v55, 16 }
  0x51   : >> { %687 = vrot.lane.b32.xlu0 %v684_v29, %s1820_s4  ;;  %v930_v29 = vrot.slane %v2025_v58, 7 }
  0x53   : >> { %v934_v48 = vsel %vm604_vm5, %v930_v29, %v933_v44 }
  0x54   : >> { %706 = vrot.lane.b32.xlu1 %v703_v34, %s1821_s5 }
  0x55   : >> { %704 = vrot.lane.b32.xlu0 %v701_v27, %s1821_s5  ;;  %v920_v27 = vrot.slane %v2021_v57, 7 }
  0x57   : >> { %v921_v35 = vsel %vm591_vm4, %v919_v22, %v920_v27 }
  0x58   : >> { %732 = vrot.lane.b32.xlu1 %v719_v38, %s1822_s6  ;;  %v931_v38 = vor.u32 %v930_v29, %v2028_v59  ;;  %v954_v59 = vrot.slane %v2043_v3, 1 }
  0x59   : >> { %661 = vrot.lane.b32.xlu0 %v655_v9, %s1818_s30  ;;  %v2055_v9 = vshll.u32 %v2033_v61, 16 }
  0x5b   : >> { %v239_v16 = vrot.slane %v2055_v9, 1  ;;  %v268_v34 = vrot.slane %v2055_v9, 2 }
  0x5c   : >> { %678 = vrot.lane.b32.xlu1 %v672_v14, %s1819_s3  ;;  %v898_v14 = vor.u32 %v897_v6, %v894_v4  ;;  %v953_v6 = vor.u32 %v952_v54, %v2025_v58  ;;  %v257_v54 = vrot.slane %v2126_v55, 1 }
  0x5d   : >> { %734 = vrot.lane.b32.xlu0 %v727_v41, %s1822_s6  ;;  %v240_v19 = vsel %vm228_vm2, %v235_v15, %v239_v16  ;;  %v2096_v40 = vor.u32 %v268_v34, %v267_v33  ;;  %v247_v15 = vrot.slane %v2142_v8, 1 }
  0x5e   : >> { %v907_v20 = vsel %vm890_vm7, %v898_v14, %v906_v18  ;;  %v955_v3 = vsel %vm228_vm2, %v953_v6, %v954_v59  ;;  %v2211_v6 = vld [vmem:[%s1877_s21 + $0x78] sm:$0xff]  }
  0x5f   : >> { %v270_v45 = vsel %vm263_vm3, %v266_v39, %v2096_v40 }
  0x60   : >> { %740 = vrot.lane.b32.xlu1 %v1970_v23, %s1823_s7 }
  0x61   : >> { %738 = vrot.lane.b32.xlu0 %v1965_v21, %s1823_s7 }
  0x64   : >> { %754 = vrot.lane.b32.xlu1 %v747_v46, %s1824_s8 }
  0x65   : >> { %689 = vrot.lane.b32.xlu0 %v683_v24, %s1820_s4  ;;  %v254_v24 = vrot.slane %v2018_v56, 1 }
  0x68   : >> { %708 = vrot.lane.b32.xlu1 %v702_v28, %s1821_s5  ;;  %v256_v28 = vsel %vm2830_vm1, %v254_v24, %v255_v25 }
  0x69   : >> { %756 = vrot.lane.b32.xlu0 %v750_v49, %s1824_s8 }
  0x6c   : >> { %742 = vrot.lane.b32.xlu1 %v1992_v42, %s1823_s7 }
  0x6d   : >> { %736 = vrot.lane.b32.xlu0 %v731_v51, %s1822_s6  ;;  %v283_v51 = vrot.slane %v2033_v61, 2 }
  0x70   : >> { %850 = vrot.lane.b32.xlu1 %v747_v46, %s1812_s24  ;;  %v2110_v46 = vld [vmem:[%s1877_s21 + $0x74] ss:$0 sps:$4 sm:$0x77]  }
  0x71   : >> { %758 = vrot.lane.b32.xlu0 %v753_v53, %s1824_s8  ;;  %v2819_v33 = vrot.slane %v2110_v46, 1  ;;  %v2821_v39 = vshrl.u32 %v2110_v46, 16 }
  0x74   : >> { %861 = vrot.lane.b32.xlu1 %v858_v60, %s1811_s23 }
  0x75   : >> { %852 = vrot.lane.b32.xlu0 %v750_v49, %s1812_s24 }
  0x78   : >> { %881 = vrot.lane.b32.xlu1 %v878_v5, %s1813_s25  ;;  %v284_v5 = vsel %vm2833_vm0, %v282_v50, %v283_v51 }
  0x79   : >> { %863 = vrot.lane.b32.xlu0 %v860_v10, %s1811_s23 }
  0x7c   : >> { %913 = vrot.lane.b32.xlu1 %v898_v14, %s1810_s22  ;;  %v243_v14 = vor.u32 %v2076_v26, %v239_v16  ;;  %v296_v16 = vrot.slane %v2055_v9, 3 }
  0x7d   : >> { %883 = vrot.lane.b32.xlu0 %v880_v17, %s1813_s25 }
  0x80   : >> { %249 = vrot.lane.b32.xlu1 %v240_v19, %s1812_s24  ;;  %v292_v19 = vrot.slane %v2051_v7, 2 }
  0x81   : >> { %915 = vrot.lane.b32.xlu0 %v907_v20, %s1810_s22  ;;  %v293_v20 = vrot.slane %v2036_v62, 3 }
  0x83   : >> { %v294_v7 = vor.u32 %v293_v20, %v292_v19  ;;  %v2227_v19 = vld [vmem:[%s1877_s21 + $0x80] sm:$0xff]  }
  0x84   : >> { %924 = vrot.lane.b32.xlu1 %v919_v22, %s1814_s26  ;;  %v295_v22 = vrot.slane %v2076_v26, 2  ;;  %v2824_v1 = vrot.slane %v2227_v19, 7 }
  0x85   : >> { %854 = vrot.lane.b32.xlu0 %v753_v53, %s1812_s24  ;;  %v2122_v53 = vshll.u32 %v2110_v46, 16 }
  0x86   : >> { %v2174_v26 = vor.u32 %v296_v16, %v295_v22  ;;  %v987_v22 = vrot.slane %v2211_v6, 6  ;;  %v2234_v16 = vshrl.u32 %v2211_v6, 16 }
  0x87   : >> { %v911_v4 = vrot.slane %v2122_v53, 7  ;;  %v2820_v13 = vrot.slane %v2122_v53, 1 }
  0x88   : >> { %259 = vrot.lane.b32.xlu1 %v256_v28, %s1811_s23  ;;  %v922_v28 = vrot.slane %v2110_v46, 7 }
  0x89   : >> { %926 = vrot.lane.b32.xlu0 %v921_v35, %s1814_s26  ;;  %v912_v58 = vsel %vm890_vm7, %v906_v18, %v911_v4  ;;  %v248_v18 = vsel %vm228_vm2, %v243_v14, %v247_v15  ;;  %v298_v35 = vsel %vm2832_vm8, %v294_v7, %v2174_v26  ;;  %v2247_v7 = vshll.u32 %v2227_v19, 16 }
  0x8a   : >> { %v2098_v41 = vpop.permute.xlu0 %575  ;;  %v2100_v43 = vpop.permute.xlu1 %547  ;;  %v923_v30 = vsel %vm591_vm4, %v920_v27, %v922_v28  ;;  %v308_v27 = vrot.slane %v2018_v56, 3  ;;  %v2241_v28 = vld [vmem:[%s1877_s21 + $0x14] sm:$0xff]  }
  0x8c   : >> { %940 = vrot.lane.b32.xlu1 %v931_v38, %s1815_s27  ;;  %v966_v38 = vrot.slane %v2012_v52, 1 }
  0x8d   : >> { %865 = vrot.lane.b32.xlu0 %v859_v63, %s1811_s23 }
  0x8e   : >> { %v2112_v47 = vpop.permute.xlu1 %549  ;;  %v968_v50 = vsel %vm2830_vm1, %v966_v38, %v967_v32 }
  0x8f   : >> { %v2115_v49 = vpop.permute.xlu0 %536 }
  0x90   : >> { %277 = vrot.lane.b32.xlu1 %v270_v45, %s1813_s25  ;;  %v2817_v45 = vrot.slane %v2033_v61, 3 }
  0x91   : >> { %942 = vrot.lane.b32.xlu0 %v934_v48, %s1815_s27  ;;  %v271_v48 = vshrl.u32 %v2126_v55, 16 }
  0x92   : >> { %v2128_v60 = vpop.permute.xlu1 %577 }
  0x93   : >> { %v2130_v63 = vpop.permute.xlu0 %538  ;;  %v273_v14 = vrot.slane %v271_v48, 1 }
  0x94   : >> { %946 = vrot.lane.b32.xlu1 %v2012_v52, %s1816_s28 }
  0x95   : >> { %885 = vrot.lane.b32.xlu0 %v879_v11, %s1813_s25  ;;  %v956_v11 = vor.u32 %v954_v59, %v2040_v2  ;;  %v310_v59 = vsel %vm2831_vm9, %v308_v27, %v2817_v45  ;;  %v1013_v2 = vrot.slane %v2247_v7, 7 }
  0x96   : >> { %v2144_v10 = vpop.permute.xlu1 %566 }
  0x97   : >> { %v2146_v12 = vpop.permute.xlu0 %564  ;;  %v958_v62 = vsel %vm228_vm2, %v956_v11, %v2820_v13  ;;  %v258_v11 = vsel %vm2830_vm1, %v255_v25, %v257_v54 }
  0x98   : >> { %287 = vrot.lane.b32.xlu1 %v284_v5, %s1810_s22  ;;  %v937_v5 = vrot.slane %v2821_v39, 7 }
  0x99   : >> { %948 = vrot.lane.b32.xlu0 %v2021_v57, %s1816_s28  ;;  %v970_v57 = vsel %vm2830_vm1, %v967_v32, %v2819_v33  ;;  %v299_v33 = vrot.slane %v271_v48, 2  ;;  %v2841_v48 = vrot.slane %v2122_v53, 1 }
  0x9a   : >> { %v2157_v17 = vpop.permute.xlu1 %595  ;;  %v938_v15 = vor.u32 %v937_v5, %v2122_v53  ;;  %v2269_v5 = vshll.u32 %v2241_v28, 16 }
  0x9b   : >> { %v2163_v24 = vpop.permute.xlu0 %540 }
  0x9c   : >> { %960 = vrot.lane.b32.xlu1 %v955_v3, %s1817_s29  ;;  %v939_v32 = vsel %vm604_vm5, %v932_v37, %v938_v15  ;;  %v2266_v37 = vld [vmem:[%s1877_s21 + $0x1c] sm:$0xff]  }
  0x9d   : >> { %917 = vrot.lane.b32.xlu0 %v912_v58, %s1810_s22  ;;  %v274_v58 = vrot.slane %v2142_v8, 2  ;;  %v2845_v31 = vrot.slane %v2266_v37, 1 }
  0x9e   : >> { %v2169_v29 = vpop.permute.xlu1 %551 }
  0x9f   : >> { %v2176_v9 = vpop.permute.xlu0 %597  ;;  %v275_v25 = vor.u32 %v274_v58, %v273_v14 }
  0xa0   : >> { %251 = vrot.lane.b32.xlu1 %v248_v18, %s1812_s24  ;;  %v2237_v18 = vshll.u32 %v2211_v6, 16 }
  0xa1   : >> { %962 = vrot.lane.b32.xlu0 %v958_v62, %s1817_s29  ;;  %v2244_v62 = vshrl.u32 %v2227_v19, 16 }
  0xa2   : >> { %v2185_v34 = vpop.permute.xlu1 %626  ;;  %v1005_v27 = vrot.slane %v2237_v18, 7 }
  0xa3   : >> { %v2191_v44 = vpop.permute.xlu0 %624  ;;  %v1010_v54 = vrot.slane %v2244_v62, 6  ;;  %v2829_v53 = vrot.slane %v2244_v62, 7 }
  0xa4   : >> { %928 = vrot.lane.b32.xlu1 %v923_v30, %s1814_s26 }
  0xa5   : >> { %303 = vrot.lane.b32.xlu0 %v298_v35, %s1814_s26  ;;  %v2818_v35 = vrot.slane %v2227_v19, 6  ;;  %v2283_v15 = vor.u32 %v1013_v2, %v1010_v54  ;;  %v285_v2 = vrot.slane %v2126_v55, 2 }
  0xa6   : >> { %v2201_v52 = vpop.permute.xlu1 %630 }
  0xa7   : >> { %v2207_v4 = vpop.permute.xlu0 %568  ;;  %v989_v14 = vsel %vm877_vm6, %v987_v22, %v2818_v35  ;;  %v286_v39 = vsel %vm2833_vm0, %v283_v51, %v285_v2  ;;  %v1751_v51 = vld [vmem:[%s2815_s1] sm:$0xff]  }
  0xa8   : >> { %973 = vrot.lane.b32.xlu1 %v970_v57, %s1818_s30  ;;  %v1002_v57 = vrot.slane %v2234_v16, 6 }
  0xa9   : >> { %971 = vrot.lane.b32.xlu0 %v968_v50, %s1818_s30  ;;  %v276_v50 = vsel %vm263_vm3, %v2096_v40, %v275_v25  ;;  %v2280_v40 = vshrl.u32 %v2241_v28, 16  ;;  %v339_v25 = vrot.slane %v2269_v5, 1 }
  0xaa   : >> { %v2220_v3 = vpop.permute.xlu1 %579 }
  0xab   : >> { %v2229_v20 = vpop.permute.xlu0 %632 }
  0xac   : >> { %313 = vrot.lane.b32.xlu1 %v310_v59, %s1815_s27 }
  0xad   : >> { %261 = vrot.lane.b32.xlu0 %v258_v11, %s1811_s23  ;;  %v1006_v11 = vor.u32 %v1005_v27, %v1002_v57  ;;  %v340_v27 = vor.u32 %v339_v25, %v2280_v40  ;;  %v300_v25 = vrot.slane %v2142_v8, 3 }
  0xae   : >> { %v2249_v30 = vpop.permute.xlu1 %648 }
  0xaf   : >> { %v2255_v38 = vpop.permute.xlu0 %646  ;;  %v1015_v57 = vsel %vm890_vm7, %v1006_v11, %v2283_v15  ;;  %v301_v8 = vor.u32 %v300_v25, %v299_v33  ;;  %v2342_v33 = vshrl.u32 %v2266_v37, 16 }
  0xb0   : >> { %990 = vrot.lane.b32.xlu1 %v987_v22, %s1819_s3 }
  0xb1   : >> { %944 = vrot.lane.b32.xlu0 %v939_v32, %s1815_s27  ;;  %v2287_v32 = vshll.u32 %v2266_v37, 16 }
  0xb2   : >> { %v2271_v59 = vpop.permute.xlu1 %657 }
  0xb3   : >> { %v2276_v58 = vpop.permute.xlu0 %599 }
  0xb4   : >> { %279 = vrot.lane.b32.xlu1 %v276_v50, %s1813_s25  ;;  %v2822_v50 = vrot.slane %v2287_v32, 1 }
  0xb5   : >> { %992 = vrot.lane.b32.xlu0 %v989_v14, %s1819_s3 }
  0xb6   : >> { %v2289_v45 = vpop.permute.xlu1 %628  ;;  %v345_v35 = vsel %vm228_vm2, %v340_v27, %v2822_v50 }
  0xb7   : >> { %v2291_v22 = vpop.permute.xlu0 %659 }
  0xb8   : >> { %950 = vrot.lane.b32.xlu1 %v2110_v46, %s1816_s28 }
  0xb9   : >> { %327 = vrot.lane.b32.xlu0 %v2241_v28, %s1816_s28 }
  0xba   : >> { %v2301_v54 = vpop.permute.xlu1 %676 }
  0xbb   : >> { %v2304_v14 = vpop.permute.xlu0 %674 }
  0xbc   : >> { %1023 = vrot.lane.b32.xlu1 %v1015_v57, %s1820_s4  ;;  %v2840_v57 = vshrl.u32 %v2110_v46, 16 }
  0xbd   : >> { %1021 = vrot.lane.b32.xlu0 %v1006_v11, %s1820_s4  ;;  %v1027_v11 = vrot.slane %v2211_v6, 7 }
  0xbe   : >> { %v2314_v13 = vpop.permute.xlu1 %685  ;;  %v959_v27 = vor.u32 %v2841_v48, %v2840_v57  ;;  %v358_v57 = vrot.slane %v2241_v28, 1  ;;  %v371_v48 = vrot.slane %v2287_v32, 2 }
  0xbf   : >> { %2839 = vst [vmem:[#allocation8_spill] sm:$0xff] %v2314_v13  ;;  %v2319_v0 = vpop.permute.xlu0 %634  ;;  %v1029_v25 = vsel %vm591_vm4, %v1027_v11, %v2824_v1  ;;  %v1041_v1 = vor.u32 %v2829_v53, %v2247_v7  ;;  %v2848_v53 = vrot.slane %v2110_v46, 1  ;;  %v311_v46 = vrot.slane %v2126_v55, 3 }
  0xc0   : >> { %354 = vrot.lane.b32.xlu1 %v345_v35, %s1817_s29  ;;  %v2827_v35 = vmov 0  }
  0xc1   : >> { %289 = vrot.lane.b32.xlu0 %v286_v39, %s1810_s22  ;;  %v302_v39 = vsel %vm2832_vm8, %v2174_v26, %v301_v8  ;;  %1315 = vmatprep.subr.bf16.mxu0 %v2827_v35  ;;  %v367_v8 = vrot.slane %v2280_v40, 1 }
  0xc2   : >> { %v2328_v50 = vpop.permute.xlu1 %650  ;;  %1316 = vmatpush1.bf16.msra.mxu0 %v1751_v51  ;;  %1646 = vmatprep.subr.bf16.mxu1 %v2827_v35 }
  0xc3   : >> { %2842 = vst [vmem:[#allocation9_spill] sm:$0xff] %v2328_v50  ;;  %v2331_v36 = vpop.permute.xlu0 %687  ;;  %1317 = vmatprep.subr.bf16.mxu0 %v2827_v35  ;;  %1659 = vmatpush1.bf16.msra.mxu1 %v1751_v51  ;;  %v368_v51 = vrot.slane %v2269_v5, 2  ;;  %v1753_v50 = vld [vmem:[%s2815_s1 + $0x10] sm:$0xff]  }
  0xc4   : >> { %1032 = vrot.lane.b32.xlu1 %v1027_v11, %s1821_s5  ;;  %v1752_v11 = vld [vmem:[%s2815_s1 + $0x8] sm:$0xff]   ;;  %1647 = vmatprep.subr.bf16.mxu1 %v2827_v35 }
  0xc5   : >> { %964 = vrot.lane.b32.xlu0 %v959_v27, %s1817_s29  ;;  %v1038_v27 = vrot.slane %v2234_v16, 7 }
  0xc6   : >> { %v2345_v2 = vpop.permute.xlu1 %706  ;;  %1318 = vmatpush1.bf16.msra.mxu0 %v1752_v11 }
  0xc7   : >> { %v2353_v26 = vpop.permute.xlu0 %704  ;;  %1660 = vmatpush1.bf16.msra.mxu1 %v1752_v11 }
  0xc8   : >> { %2843 = vst [vmem:[#allocation10_spill] sm:$0xff] %v2353_v26  ;;  %305 = vrot.lane.b32.xlu1 %v302_v39, %s1814_s26  ;;  %v370_v39 = vrot.slane %v2342_v33, 1  ;;  %v360_v26 = vsel %vm2830_vm1, %v358_v57, %v2845_v31  ;;  %v1039_v31 = vor.u32 %v1038_v27, %v2237_v18  ;;  %v1042_v57 = vsel %vm604_vm5, %v1038_v27, %v1041_v1  ;;  %v1754_v1 = vld [vmem:[%s2815_s1 + $0x18] sm:$0xff]  }
  0xc9   : >> { %1034 = vrot.lane.b32.xlu0 %v1029_v25, %s1821_s5  ;;  %v2847_v25 = vmov 0   ;;  %v2852_v27 = vrot.slane %v2033_v61, 3 }
  0xca   : >> { %v2370_v42 = vpop.permute.xlu1 %732  ;;  %1319 = vmatprep.subr.bf16.mxu0 %v2847_v25  ;;  %1648 = vmatprep.subr.bf16.mxu1 %v2847_v25 }
  0xcb   : >> { %2844 = vst [vmem:[#allocation11_spill] sm:$0xff] %v2370_v42  ;;  %v2375_v35 = vpop.permute.xlu0 %661  ;;  %v369_v42 = vor.u32 %v368_v51, %v367_v8  ;;  %1320 = vmatpush1.bf16.msra.mxu0 %v1753_v50  ;;  %1661 = vmatpush1.bf16.msra.mxu1 %v1753_v50  ;;  %v312_v50 = vsel %vm2831_vm9, %v2852_v27, %v311_v46  ;;  %v1756_v46 = vld [vmem:[%s2815_s1 + $0x28] sm:$0xff]   ;;  %v384_v27 = vrot.slane %v2241_v28, 2 }
  0xcc   : >> { %2846 = vst [vmem:[#allocation12_spill] sm:$0xff] %v2375_v35  ;;  %975 = vrot.lane.b32.xlu1 %v2848_v53, %s1818_s30  ;;  %v2388_v35 = vor.u32 %v371_v48, %v370_v39  ;;  %1321 = vmatprep.subr.bf16.mxu0 %v2847_v25 }
  0xcd   : >> { %363 = vrot.lane.b32.xlu0 %v360_v26, %s1818_s30  ;;  %v2398_v26 = vld [vmem:[%s1877_s21 + $0x88] ss:$0 sps:$4 sm:$0x77]   ;;  %1649 = vmatprep.subr.bf16.mxu1 %v2847_v25 }
  0xce   : >> { %v2390_v11 = vpop.permute.xlu1 %678  ;;  %v373_v55 = vsel %vm263_vm3, %v369_v42, %v2388_v35  ;;  %v2417_v51 = vshll.u32 %v2398_v26, 16  ;;  %v1755_v42 = vld [vmem:[%s2815_s1 + $0x20] sm:$0xff]  }
  0xcf   : >> { %2849 = vst [vmem:[#allocation13_spill] sm:$0xff] %v2390_v11  ;;  %v2393_v53 = vpop.permute.xlu0 %734  ;;  %1322 = vmatpush1.bf16.msra.mxu0 %v1754_v1  ;;  %1662 = vmatpush1.bf16.msra.mxu1 %v1754_v1  ;;  %v2856_v1 = vrot.slane %v2227_v19, 6 }
  0xd0   : >> { %2850 = vst [vmem:[#allocation14_spill] sm:$0xff] %v2393_v53  ;;  %1050 = vrot.lane.b32.xlu1 %v1042_v57, %s1822_s6  ;;  %1323 = vmatprep.subr.bf16.mxu0 %v2847_v25  ;;  %v1062_v57 = vrot.slane %v2247_v7, 1 }
  0xd1   : >> { %1048 = vrot.lane.b32.xlu0 %v1039_v31, %s1822_s6  ;;  %1650 = vmatprep.subr.bf16.mxu1 %v2847_v25  ;;  %v1019_v31 = vrot.slane %v2417_v51, 7 }
  0xd2   : >> { %v2407_v48 = vpop.permute.xlu1 %740 }
  0xd3   : >> { %2851 = vst [vmem:[#allocation15_spill] sm:$0xff] %v2407_v48  ;;  %v2412_v8 = vpop.permute.xlu0 %738  ;;  %1324 = vmatpush1.bf16.msra.mxu0 %v1755_v42  ;;  %1663 = vmatpush1.bf16.msra.mxu1 %v1755_v42  ;;  %v1060_v42 = vrot.slane %v2237_v18, 1  ;;  %v1757_v18 = vld [vmem:[%s2815_s1 + $0x30] sm:$0xff]  }
  0xd4   : >> { %2853 = vst [vmem:[#allocation16_spill] sm:$0xff] %v2412_v8  ;;  %380 = vrot.lane.b32.xlu1 %v373_v55, %s1819_s3  ;;  %1325 = vmatprep.subr.bf16.mxu0 %v2847_v25  ;;  %v396_v8 = vrot.slane %v2342_v33, 2 }
  0xd5   : >> { %315 = vrot.lane.b32.xlu0 %v312_v50, %s1815_s27  ;;  %1651 = vmatprep.subr.bf16.mxu1 %v2847_v25  ;;  %v2860_v50 = vrot.slane %v2266_v37, 2  ;;  %v1061_v11 = vor.u32 %v1060_v42, %v2234_v16  ;;  %v2862_v16 = vrot.slane %v2417_v51, 1  ;;  %v1043_v42 = vshrl.u32 %v2398_v26, 16 }
  0xd6   : >> { %v2424_v61 = vpop.permute.xlu1 %754 }
  0xd7   : >> { %2854 = vst [vmem:[#allocation17_spill] sm:$0xff] %v2424_v61  ;;  %v2426_v39 = vpop.permute.xlu0 %689  ;;  %v2446_v61 = vld [vmem:[%s1877_s21 + $0x24] ss:$0 sps:$4 sm:$0x77]   ;;  %1326 = vmatpush1.bf16.msra.mxu0 %v1756_v46  ;;  %1664 = vmatpush1.bf16.msra.mxu1 %v1756_v46  ;;  %v393_v46 = vrot.slane %v2280_v40, 2 }
  0xd8   : >> { %2855 = vst [vmem:[#allocation18_spill] sm:$0xff] %v2426_v39  ;;  %1054 = vrot.lane.b32.xlu1 %v2211_v6, %s1823_s7  ;;  %1327 = vmatprep.subr.bf16.mxu0 %v2847_v25  ;;  %v394_v39 = vrot.slane %v2269_v5, 3  ;;  %v2474_v48 = vshll.u32 %v2446_v61, 16  ;;  %v1758_v5 = vld [vmem:[%s2815_s1 + $0x38] sm:$0xff]  }
  0xd9   : >> { %994 = vrot.lane.b32.xlu0 %v2856_v1, %s1819_s3  ;;  %v1020_v1 = vsel %vm890_vm7, %v2283_v15, %v1019_v31  ;;  %1652 = vmatprep.subr.bf16.mxu1 %v2847_v25  ;;  %v397_v15 = vrot.slane %v2287_v32, 3  ;;  %vm503_vm7 = vcmask 326656  }
  0xda   : >> { %v2440_v55 = vpop.permute.xlu1 %708  ;;  %v352_v13 = vrot.slane %v2474_v48, 1 }
  0xdb   : >> { %2857 = vst [vmem:[#allocation19_spill] sm:$0xff] %v2440_v55  ;;  %v2448_v7 = vpop.permute.xlu0 %756  ;;  %v1064_v55 = vor.u32 %v1062_v57, %v2244_v62  ;;  %1328 = vmatpush1.bf16.msra.mxu0 %v1757_v18  ;;  %1665 = vmatpush1.bf16.msra.mxu1 %v1757_v18 }
  0xdc   : >> { %2858 = vst [vmem:[#allocation20_spill] sm:$0xff] %v2448_v7  ;;  %329 = vrot.lane.b32.xlu1 %v2266_v37, %s1816_s28  ;;  %v386_v7 = vsel %vm2833_vm0, %v384_v27, %v2860_v50  ;;  %1329 = vmatprep.subr.bf16.mxu0 %v2847_v25  ;;  %v395_v27 = vor.u32 %v394_v39, %v393_v46  ;;  %v1030_v46 = vrot.slane %v2398_v26, 7 }
  0xdd   : >> { %1056 = vrot.lane.b32.xlu0 %v2227_v19, %s1823_s7  ;;  %1653 = vmatprep.subr.bf16.mxu1 %v2847_v25  ;;  %v1066_v40 = vsel %vm228_vm2, %v1064_v55, %v2862_v16  ;;  %v2488_v50 = vor.u32 %v397_v15, %v396_v8  ;;  %v1759_v8 = vld [vmem:[%s2815_s1 + $0x40] sm:$0xff]   ;;  %v374_v15 = vshrl.u32 %v2446_v61, 16  ;;  %v408_v16 = vrot.slane %v2241_v28, 3 }
  0xde   : >> { %v2467_v31 = vpop.permute.xlu1 %742 }
  0xdf   : >> { %2859 = vst [vmem:[#allocation21_spill] sm:$0xff] %v2467_v31  ;;  %v2476_v53 = vpop.permute.xlu0 %736  ;;  %v2863_v31 = vrot.slane %v2287_v32, 1  ;;  %1330 = vmatpush1.bf16.msra.mxu0 %v1758_v5  ;;  %1666 = vmatpush1.bf16.msra.mxu1 %v1758_v5  ;;  %v399_v32 = vsel %vm2832_vm8, %v395_v27, %v2488_v50  ;;  %vm523_vm8 = vcmask 457728  }
  0xe0   : >> { %2861 = vst [vmem:[#allocation22_spill] sm:$0xff] %v2476_v53  ;;  %1025 = vrot.lane.b32.xlu1 %v1020_v1, %s1820_s4  ;;  %v1063_v1 = vsel %vm228_vm2, %v1061_v11, %v1062_v57  ;;  %1331 = vmatprep.subr.bf16.mxu0 %v2847_v25  ;;  %v1045_v11 = vrot.slane %v1043_v42, 7 }
  0xe1   : >> { %389 = vrot.lane.b32.xlu0 %v386_v7, %s1820_s4  ;;  %v348_v53 = vor.u32 %v2342_v33, %v2863_v31  ;;  %1654 = vmatprep.subr.bf16.mxu1 %v2847_v25  ;;  %v361_v33 = vrot.slane %v2446_v61, 1 }
  0xe2   : >> { %v851_v18 = vpop.permute.xlu1 %850  ;;  %v1046_v27 = vor.u32 %v1045_v11, %v2417_v51 }
  0xe3   : >> { %v2496_v7 = vpop.permute.xlu0 %758  ;;  %v1075_v39 = vsel %vm458_vm10, %v1965_v21, %v851_v18  ;;  %v353_v55 = vsel %vm228_vm2, %v348_v53, %v352_v13  ;;  %1332 = vmatpush1.bf16.msra.mxu0 %v1759_v8  ;;  %1667 = vmatpush1.bf16.msra.mxu1 %v1759_v8  ;;  %v1760_v21 = vld [vmem:[%s2815_s1 + $0x48] sm:$0xff]   ;;  %v2864_v13 = vrot.slane %v2266_v37, 1  ;;  %vm488_vm2 = vcmask 228352  }
  0xe4   : >> { %1070 = vrot.lane.b32.xlu1 %v1066_v40, %s1824_s8  ;;  %1333 = vmatprep.subr.bf16.mxu0 %v2847_v25  ;;  %v409_v40 = vrot.slane %v2266_v37, 3 }
  0xe5   : >> { %1068 = vrot.lane.b32.xlu0 %v1063_v1, %s1824_s8  ;;  %1655 = vmatprep.subr.bf16.mxu1 %v2847_v25  ;;  %v362_v53 = vsel %vm2830_vm1, %v2864_v13, %v361_v33  ;;  %v2865_v1 = vrot.slane %v2227_v19, 7  ;;  %vm508_vm1 = vcmask 359424  }
  0xe6   : >> { %v862_v57 = vpop.permute.xlu1 %861 }
  0xe7   : >> { %v1081_v31 = vsel %vm463_vm11, %v1075_v39, %v862_v57  ;;  %v853_v5 = vpop.permute.xlu0 %852  ;;  %v1031_v8 = vsel %vm591_vm4, %v2865_v1, %v1030_v46  ;;  %v377_v39 = vrot.slane %v2474_v48, 2  ;;  %1334 = vmatpush1.bf16.msra.mxu0 %v1760_v21  ;;  %v2534_v57 = vld [vmem:[%s1877_s21 + $0x30] sm:$0xff]   ;;  %1668 = vmatpush1.bf16.msra.mxu1 %v1760_v21  ;;  %v1765_v46 = vld [vmem:[%s1877_s21 + $0x28] sm:$0xff]   ;;  %vm493_vm4 = vcmask 261120  }
  0xe8   : >> { %404 = vrot.lane.b32.xlu1 %v399_v32, %s1821_s5  ;;  %v376_v32 = vrot.slane %v374_v15, 1  ;;  %v763_v28 = vsel %vm458_vm10, %v2534_v57, %v2130_v63  ;;  %v1077_v33 = vsel %vm458_vm10, %v1970_v23, %v853_v5  ;;  %1335 = vmatprep.subr.bf16.mxu0 %v2847_v25  ;;  %v761_v13 = vsel %vm458_vm10, %v1765_v46, %v2115_v49  ;;  %v1761_v63 = vld [vmem:[%s2815_s1 + $0x50] sm:$0xff]  }
  0xe9   : >> { %356 = vrot.lane.b32.xlu0 %v353_v55, %s1817_s29  ;;  %1656 = vmatprep.subr.bf16.mxu1 %v2847_v25  ;;  %v410_v23 = vsel %vm2831_vm9, %v408_v16, %v409_v40  ;;  %v2866_v49 = vrot.slane %v2244_v62, 7  ;;  %v769_v5 = vsel %vm463_vm11, %v763_v28, %v2112_v47  ;;  %vm513_vm9 = vcmask 392192  }
  0xea   : >> { %v882_v18 = vpop.permute.xlu1 %881  ;;  %v2868_v28 = vrot.slane %v2417_v51, 1 }
  0xeb   : >> { %v1087_v11 = vsel %vm468_vm12, %v1081_v31, %v882_v18  ;;  %v864_v55 = vpop.permute.xlu0 %863  ;;  %v1047_v31 = vsel %vm604_vm5, %v2866_v49, %v1046_v27  ;;  %v387_v18 = vrot.slane %v2446_v61, 2  ;;  %1336 = vmatpush1.bf16.msra.mxu0 %v1761_v63  ;;  %v401_v27 = vrot.slane %v2474_v48, 3  ;;  %1669 = vmatpush1.bf16.msra.mxu1 %v1761_v63 }
  0xec   : >> { %v1083_v1 = vsel %vm463_vm11, %v1077_v33, %v864_v55  ;;  %365 = vrot.lane.b32.xlu1 %v362_v53, %s1818_s30  ;;  %v378_v53 = vor.u32 %v377_v39, %v376_v32  ;;  %v400_v33 = vrot.slane %v374_v15, 2  ;;  %v767_v55 = vsel %vm463_vm11, %v761_v13, %v2100_v43  ;;  %1337 = vmatprep.subr.bf16.mxu0 %v2847_v25  ;;  %v1762_v43 = vld [vmem:[%s2815_s1 + $0x58] sm:$0xff]  }
  0xed   : >> { %1036 = vrot.lane.b32.xlu0 %v1031_v8, %s1821_s5  ;;  %v775_v8 = vsel %vm468_vm12, %v769_v5, %v2144_v10  ;;  %v773_v47 = vsel %vm468_vm12, %v767_v55, %v2146_v12  ;;  %1657 = vmatprep.subr.bf16.mxu1 %v2847_v25  ;;  %vm498_vm5 = vcmask 293888   ;;  %v2867_v32 = vrot.slane %v2266_v37, 2 }
  0xee   : >> { %v914_v21 = vpop.permute.xlu1 %913  ;;  %v781_v10 = vsel %vm473_vm13, %v775_v8, %v2128_v60  ;;  %v379_v48 = vsel %vm263_vm3, %v2388_v35, %v378_v53  ;;  %v779_v13 = vsel %vm473_vm13, %v773_v47, %v2098_v41  ;;  %v402_v63 = vor.u32 %v401_v27, %v400_v33  ;;  %v1763_v35 = vld [vmem:[%s2815_s1 + $0x60] ss:$0 sps:$4 sm:$0x33]   ;;  %v2871_v8 = vld [vmem:[#allocation9_spill] sm:$0xff] }
  0xef   : >> { %v1093_v16 = vsel %vm473_vm13, %v1087_v11, %v914_v21  ;;  %v884_v62 = vpop.permute.xlu0 %883  ;;  %v388_v39 = vsel %vm2833_vm0, %v2867_v32, %v387_v18  ;;  %v1067_v11 = vor.u32 %v2868_v28, %v1043_v42  ;;  %1338 = vmatpush1.bf16.msra.mxu0 %v1762_v43  ;;  %v787_v60 = vsel %vm478_vm14, %v781_v10, %v2176_v9  ;;  %v2877_v10 = vld [vmem:[#allocation11_spill] sm:$0xff] }
  0xf0   : >> { %v1089_v15 = vsel %vm468_vm12, %v1083_v1, %v884_v62  ;;  %1052 = vrot.lane.b32.xlu1 %v1047_v31, %s1822_s6  ;;  %1339 = vmatprep.subr.bf16.mxu0 %v2847_v25  ;;  %v793_v41 = vsel %vm483_vm15, %v787_v60, %v2185_v34  ;;  %vm528_vm3 = vcmask 490496   ;;  %v785_v42 = vsel %vm478_vm14, %v779_v13, %v2157_v17  ;;  %v2881_v13 = vld [vmem:[#allocation5_spill] sm:$0xff] }
  0xf1   : >> { %413 = vrot.lane.b32.xlu0 %v410_v23, %s1822_s6  ;;  %1670 = vmatpush1.bf16.msra.mxu1 %v1762_v43  ;;  %v1766_v23 = vld [vmem:[%s1877_s21 + $0x38] ss:$0 sps:$4 sm:$0x77]   ;;  %v799_v31 = vsel %vm488_vm2, %v793_v41, %v2229_v20  ;;  %v791_v34 = vsel %vm483_vm15, %v785_v42, %v2191_v44  ;;  %v1184_v5 = vrot.slane %v2211_v6, 3  ;;  %v411_v60 = vrot.slane %v2446_v61, 3  ;;  %v2885_v41 = vld [vmem:[#allocation17_spill] sm:$0xff] }
  0xf2   : >> { %v250_v12 = vpop.permute.xlu1 %249  ;;  %v765_v51 = vsel %vm458_vm10, %v1766_v23, %v2163_v24  ;;  %1658 = vmatprep.subr.bf16.mxu1 %v2847_v25  ;;  %v1313_v24 = vsel %vm877_vm6, %v1763_v35, 0  ;;  %v805_v25 = vsel %vm493_vm4, %v799_v31, %v2249_v30  ;;  %vm2869_vm6 = vsmask.f32 5376  ;;  %v2883_v35 = vld [vmem:[#allocation18_spill] sm:$0xff]  ;;  %v2886_v42 = vld [vmem:[#allocation19_spill] sm:$0xff] }
  0xf3   : >> { %v916_v1 = vpop.permute.xlu0 %915  ;;  %v771_v49 = vsel %vm463_vm11, %v765_v51, %v2169_v29  ;;  %1340 = vmatpush1.bf16.msra.mxu0 %v1313_v24  ;;  %v797_v29 = vsel %vm488_vm2, %v791_v34, %v2201_v52  ;;  %v811_v21 = vsel %vm498_vm5, %v805_v25, %v2291_v22  ;;  %v1185_v52 = vrot.slane %v2227_v19, 3  ;;  %v2887_v31 = vld [vmem:[#allocation7_spill] sm:$0xff]  ;;  %v2888_v25 = vld [vmem:[#allocation22_spill] sm:$0xff] }
  0xf4   : >> { %v1095_v9 = vsel %vm473_vm13, %v1089_v15, %v916_v1  ;;  %427 = vrot.lane.b32.xlu1 %v1765_v46, %s1823_s7  ;;  %v777_v46 = vsel %vm468_vm12, %v771_v49, %v2207_v4  ;;  %v803_v4 = vsel %vm493_vm4, %v797_v29, %v2255_v38  ;;  %v817_v30 = vsel %vm503_vm7, %v811_v21, %v2301_v54  ;;  %v2882_v1 = vld [vmem:[#allocation16_spill] sm:$0xff] }
  0xf5   : >> { %382 = vrot.lane.b32.xlu0 %v379_v48, %s1819_s3  ;;  %v783_v20 = vsel %vm473_vm13, %v777_v46, %v2220_v3  ;;  %1671 = vmatpush1.bf16.msra.mxu1 %v1313_v24  ;;  %v809_v3 = vsel %vm498_vm5, %v803_v4, %v2271_v59  ;;  %v823_v18 = vsel %vm508_vm1, %v817_v30, %v2331_v36  ;;  %v2870_v36 = vld [vmem:[#allocation8_spill] sm:$0xff]  ;;  %v2879_v48 = vld [vmem:[#allocation13_spill] sm:$0xff]  ;;  %s1826_s3 = smov 64  }
  0xf6   : >> { %v925_v17 = vpop.permute.xlu1 %924  ;;  %v789_v6 = vsel %vm478_vm14, %v783_v20, %v2276_v58  ;;  %v403_v38 = vsel %vm2869_vm6, %v2488_v50, %v402_v63  ;;  %v815_v58 = vsel %vm503_vm7, %v809_v3, %v2304_v14  ;;  %v829_v59 = vsel %vm513_vm9, %v823_v18, %v2345_v2  ;;  %v2872_v50 = vld [vmem:[#allocation14_spill] sm:$0xff]  ;;  %v2875_v2 = vld [vmem:[#allocation12_spill] sm:$0xff] }
  0xf7   : >> { %v855_v44 = vpop.permute.xlu0 %854  ;;  %v1099_v53 = vsel %vm478_vm14, %v1093_v16, %v925_v17  ;;  %v795_v22 = vsel %vm483_vm15, %v789_v6, %v2289_v45  ;;  %v460_v45 = vsel %vm458_vm10, %v2018_v56, %v250_v12  ;;  %v821_v33 = vsel %vm508_vm1, %v815_v58, %v2870_v36  ;;  %v2876_v56 = vld [vmem:[#allocation15_spill] sm:$0xff] }
  0xf8   : >> { %391 = vrot.lane.b32.xlu1 %v388_v39, %s1820_s4  ;;  %v801_v19 = vsel %vm488_vm2, %v795_v22, %v2319_v0  ;;  %vm2873_vm6 = vcmask 424960   ;;  %v2874_v0 = vld [vmem:[#allocation10_spill] sm:$0xff]  ;;  %v2880_v39 = vld [vmem:[#allocation20_spill] sm:$0xff]  ;;  %v1079_v24 = vsel %vm458_vm10, %v2887_v31, %v855_v44  ;;  %v2889_v44 = vld [vmem:[#allocation21_spill] sm:$0xff] }
  0xf9   : >> { %1058 = vrot.lane.b32.xlu0 %v2398_v26, %s1823_s7  ;;  %v807_v55 = vsel %vm493_vm4, %v801_v19, %v2871_v8  ;;  %v835_v16 = vsel %vm2873_vm6, %v829_v59, %v2872_v50  ;;  %v827_v27 = vsel %vm513_vm9, %v821_v33, %v2874_v0  ;;  %vm2878_vm0 = vmmov %vm2873_vm6  ;;  %vm2884_vm6 = vcmask 1044480   ;;  %v2891_v59 = vld [vmem:[#allocation6_spill] sm:$0xff] }
  0xfa   : >> { %v260_v54 = vpop.permute.xlu1 %259  ;;  %v813_v47 = vsel %vm498_vm5, %v807_v55, %v2875_v2  ;;  %v841_v15 = vsel %vm523_vm8, %v835_v16, %v2876_v56  ;;  %v833_v12 = vsel %vm2878_vm0, %v827_v27, %v2877_v10  ;;  %v1186_v51 = vsel %vm2884_vm6, %v1184_v5, %v1185_v52 }
  0xfb   : >> { %v927_v14 = vpop.permute.xlu0 %926  ;;  %v465_v62 = vsel %vm463_vm11, %v460_v45, %v260_v54  ;;  %v819_v32 = vsel %vm503_vm7, %v813_v47, %v2879_v48  ;;  %v847_v28 = vsel %vm528_vm3, %v841_v15, %v2880_v39  ;;  %v839_v63 = vsel %vm523_vm8, %v833_v12, %v2882_v1  ;;  %v1767_v12 = vld [vmem:[%s1877_s21 + $0x8] sm:$0xff]   ;;  %s1629_s21 = sshll.u32 %s1804_s19, 5  ;;  %s150_s19 = sadd.s32 1, %s1804_s19  }
  0xfc   : >> { %v1101_v43 = vsel %vm478_vm14, %v1095_v9, %v927_v14  ;;  %1072 = vrot.lane.b32.xlu1 %v1067_v11, %s1824_s8  ;;  %v825_v11 = vsel %vm508_vm1, %v819_v32, %v2883_v35  ;;  %v845_v9 = vsel %vm528_vm3, %v839_v63, %v2885_v41  ;;  %v1168_v46 = vrot.slane %v847_v28, 1  ;;  %s1365_s4 = scalar_lea.vmem [#allocation2], %s1629_s21  ;;  %p147_p4 = scmp.ge.s32.totalorder %s150_s19, 32  }
  0xfd   : >> { %454 = vrot.lane.b32.xlu0 %v2881_v13, %s1824_s8  ;;  %v831_v49 = vsel %vm513_vm9, %v825_v11, %v2886_v42  ;;  %v412_v5 = vsel %vm2884_vm6, %v409_v40, %v411_v60  ;;  %v1167_v20 = vrot.slane %v845_v9, 1  ;;  %v1187_v40 = vrot.slane %v2398_v26, 3 }
  0xfe   : >> { %v941_v23 = vpop.permute.xlu1 %940  ;;  %v837_v17 = vsel %vm2878_vm0, %v831_v49, %v2888_v25  ;;  %vm2890_vm0 = vcmask 1046528  }
  0xff   : >> { %v866_v34 = vpop.permute.xlu0 %865  ;;  %v1105_v61 = vsel %vm483_vm15, %v1099_v53, %v941_v23  ;;  %v843_v4 = vsel %vm523_vm8, %v837_v17, %v2889_v44  ;;  %v1169_v22 = vsel %vm2890_vm0, %v1167_v20, %v1168_v46  ;;  %v1188_v45 = vsel %vm2884_vm6, %v1185_v52, %v1187_v40 }
 0x100   : >> { %v1085_v29 = vsel %vm463_vm11, %v1079_v24, %v866_v34  ;;  %406 = vrot.lane.b32.xlu1 %v403_v38, %s1821_s5  ;;  %v849_v30 = vsel %vm528_vm3, %v843_v4, %v2496_v7  ;;  %s2800_s5 = smov (%p147_p4), 0  }
 0x101   : >> { %1189 = vrot.lane.b32.xlu0 %v1186_v51, %s1826_s3  ;;  %v1170_v18 = vrot.slane %v849_v30, 1 }
 0x102   : >> { %v278_v21 = vpop.permute.xlu1 %277 }
 0x103   : >> { %v943_v53 = vpop.permute.xlu0 %942  ;;  %v470_v6 = vsel %vm468_vm12, %v465_v62, %v278_v21  ;;  %v1171_v26 = vsel %vm2890_vm0, %v1168_v46, %v1170_v18  ;;  %vm1193_vm0 = vcmask 523264  }
 0x104   : >> { %v1107_v3 = vsel %vm483_vm15, %v1101_v43, %v943_v53  ;;  %415 = vrot.lane.b32.xlu1 %v412_v5, %s1822_s6 }
 0x105   : >> { %1172 = vrot.lane.b32.xlu0 %v1169_v22, %s1826_s3 }
 0x106   : >> { %v947_v37 = vpop.permute.xlu1 %946 }
 0x107   : >> { %v886_v38 = vpop.permute.xlu0 %885  ;;  %v1111_v58 = vsel %vm488_vm2, %v1105_v61, %v947_v37 }
 0x108   : >> { %v1091_v19 = vsel %vm468_vm12, %v1085_v29, %v886_v38  ;;  %456 = vrot.lane.b32.xlu1 %v2891_v59, %s1824_s8 }
 0x109   : >> { %429 = vrot.lane.b32.xlu0 %v2534_v57, %s1823_s7 }
 0x10a   : >> { %v288_v7 = vpop.permute.xlu1 %287 }
 0x10b   : >> { %v949_v54 = vpop.permute.xlu0 %948  ;;  %v475_v36 = vsel %vm473_vm13, %v470_v6, %v288_v7 }
 0x10c   : >> { %v1113_v33 = vsel %vm488_vm2, %v1107_v3, %v949_v54  ;;  %1174 = vrot.lane.b32.xlu1 %v1171_v26, %s1826_s3 }
 0x10d   : >> { %1191 = vrot.lane.b32.xlu0 %v1188_v45, %s1826_s3 }
 0x10e   : >> { %v961_v8 = vpop.permute.xlu1 %960 }
 0x10f   : >> { %v918_v55 = vpop.permute.xlu0 %917  ;;  %v1117_v50 = vsel %vm493_vm4, %v1111_v58, %v961_v8 }
 0x110   : >> { %v1097_v16 = vsel %vm473_vm13, %v1091_v19, %v918_v55 }
 0x112   : >> { %v252_v57 = vpop.permute.xlu1 %251 }
 0x113   : >> { %v963_v14 = vpop.permute.xlu0 %962  ;;  %v462_v48 = vsel %vm458_vm10, %v1767_v12, %v252_v57  ;;  %vm2892_vm10 = vcmask 424960  }
 0x114   : >> { %v1119_v52 = vsel %vm493_vm4, %v1113_v33, %v963_v14  ;;  %vm2895_vm6 = vmmov %vm2892_vm10 }
 0x116   : >> { %v929_v62 = vpop.permute.xlu1 %928 }
 0x117   : >> { %v304_v0 = vpop.permute.xlu0 %303  ;;  %v1103_v27 = vsel %vm478_vm14, %v1097_v16, %v929_v62 }
 0x118   : >> { %v480_v2 = vsel %vm478_vm14, %v475_v36, %v304_v0 }
 0x11a   : >> { %v974_v47 = vpop.permute.xlu1 %973 }
 0x11b   : >> { %v972_v56 = vpop.permute.xlu0 %971  ;;  %v1125_v15 = vsel %vm498_vm5, %v1119_v52, %v974_v47 }
 0x11c   : >> { %v1123_v43 = vsel %vm498_vm5, %v1117_v50, %v972_v56 }
 0x11e   : >> { %v314_v10 = vpop.permute.xlu1 %313 }
 0x11f   : >> { %v262_v32 = vpop.permute.xlu0 %261  ;;  %v485_v39 = vsel %vm483_vm15, %v480_v2, %v314_v10 }
 0x120   : >> { %v467_v28 = vsel %vm463_vm11, %v462_v48, %v262_v32 }
 0x122   : >> { %v991_v13 = vpop.permute.xlu1 %990 }
 0x123   : >> { %v945_v60 = vpop.permute.xlu0 %944  ;;  %v1129_v1 = vsel %vm503_vm7, %v1123_v43, %v991_v13 }
 0x124   : >> { %v1109_v63 = vsel %vm483_vm15, %v1103_v27, %v945_v60 }
 0x126   : >> { %v280_v35 = vpop.permute.xlu1 %279 }
 0x127   : >> { %v993_v11 = vpop.permute.xlu0 %992  ;;  %v472_v23 = vsel %vm468_vm12, %v467_v28, %v280_v35  ;;  %vm2893_vm12 = vmmov %vm2892_vm10 }
 0x128   : >> { %v1131_v51 = vsel %vm503_vm7, %v1125_v15, %v993_v11 }
 0x12a   : >> { %v951_v41 = vpop.permute.xlu1 %950 }
 0x12b   : >> { %v328_v9 = vpop.permute.xlu0 %327  ;;  %v1115_v42 = vsel %vm488_vm2, %v1109_v63, %v951_v41 }
 0x12c   : >> { %v490_v49 = vsel %vm488_vm2, %v485_v39, %v328_v9 }
 0x12e   : >> { %v1024_v31 = vpop.permute.xlu1 %1023 }
 0x12f   : >> { %v1022_v24 = vpop.permute.xlu0 %1021  ;;  %v1137_v18 = vsel %vm508_vm1, %v1131_v51, %v1024_v31 }
 0x130   : >> { %v1135_v58 = vsel %vm508_vm1, %v1129_v1, %v1022_v24 }
 0x132   : >> { %v355_v34 = vpop.permute.xlu1 %354 }
 0x133   : >> { %v290_v61 = vpop.permute.xlu0 %289  ;;  %v495_v35 = vsel %vm493_vm4, %v490_v49, %v355_v34 }
 0x134   : >> { %v477_v46 = vsel %vm473_vm13, %v472_v23, %v290_v61  ;;  %vm2894_vm13 = vcmask 1045504  }
 0x136   : >> { %v1033_v25 = vpop.permute.xlu1 %1032 }
 0x137   : >> { %v965_v17 = vpop.permute.xlu0 %964  ;;  %v1141_v59 = vsel %vm513_vm9, %v1135_v58, %v1033_v25 }
 0x138   : >> { %v1121_v15 = vsel %vm493_vm4, %v1115_v42, %v965_v17 }
 0x13a   : >> { %v306_v29 = vpop.permute.xlu1 %305 }
 0x13b   : >> { %v1035_v5 = vpop.permute.xlu0 %1034  ;;  %v482_v42 = vsel %vm478_vm14, %v477_v46, %v306_v29  ;;  %vm2898_vm14 = vmmov %vm2895_vm6 }
 0x13c   : >> { %v1143_v19 = vsel %vm513_vm9, %v1137_v18, %v1035_v5 }
 0x13e   : >> { %v976_v20 = vpop.permute.xlu1 %975 }
 0x13f   : >> { %v364_v21 = vpop.permute.xlu0 %363  ;;  %v1127_v43 = vsel %vm498_vm5, %v1121_v15, %v976_v20 }
 0x140   : >> { %v500_v23 = vsel %vm498_vm5, %v495_v35, %v364_v21 }
 0x142   : >> { %v1051_v44 = vpop.permute.xlu1 %1050 }
 0x143   : >> { %v1049_v4 = vpop.permute.xlu0 %1048  ;;  %v1149_v7 = vsel %vm2892_vm10, %v1143_v19, %v1051_v44  ;;  %vm1306_vm10 = vcmask 556032  }
 0x144   : >> { %v1147_v45 = vsel %vm2893_vm12, %v1141_v59, %v1049_v4  ;;  %vm2896_vm12 = vmmov %vm2894_vm13 }
 0x146   : >> { %v381_v53 = vpop.permute.xlu1 %380 }
 0x147   : >> { %v316_v6 = vpop.permute.xlu0 %315  ;;  %v505_v51 = vsel %vm503_vm7, %v500_v23, %v381_v53 }
 0x148   : >> { %v487_v61 = vsel %vm483_vm15, %v482_v42, %v316_v6  ;;  %v2899_v42 = vld [vmem:[#allocation4_spill] sm:$0xff] }
 0x14a   : >> { %v1055_v30 = vpop.permute.xlu1 %1054 }
 0x14b   : >> { %v995_v3 = vpop.permute.xlu0 %994  ;;  %v1153_v26 = vsel %vm523_vm8, %v1147_v45, %v1055_v30 }
 0x14c   : >> { %v1133_v10 = vsel %vm503_vm7, %v1127_v43, %v995_v3 }
 0x14e   : >> { %v330_v22 = vpop.permute.xlu1 %329 }
 0x14f   : >> { %v1057_v37 = vpop.permute.xlu0 %1056  ;;  %v492_v34 = vsel %vm488_vm2, %v487_v61, %v330_v22  ;;  %v2900_v61 = vld [vmem:[#allocation3_spill] sm:$0xff] }
 0x150   : >> { %v1155_v54 = vsel %vm523_vm8, %v1149_v7, %v1057_v37 }
 0x152   : >> { %v1026_v40 = vpop.permute.xlu1 %1025 }
 0x153   : >> { %v390_v38 = vpop.permute.xlu0 %389  ;;  %v1139_v48 = vsel %vm508_vm1, %v1133_v10, %v1026_v40 }
 0x154   : >> { %v510_v31 = vsel %vm508_vm1, %v505_v51, %v390_v38 }
 0x156   : >> { %v1071_v36 = vpop.permute.xlu1 %1070 }
 0x157   : >> { %v1069_v33 = vpop.permute.xlu0 %1068  ;;  %v1161_v8 = vsel %vm528_vm3, %v1155_v54, %v1071_v36 }
 0x158   : >> { %v1159_v55 = vsel %vm528_vm3, %v1153_v26, %v1069_v33  ;;  %v1180_v50 = vrot.slane %v1161_v8, 2 }
 0x159   : >> { %v1179_v16 = vrot.slane %v1159_v55, 2 }
 0x15a   : >> { %v405_v57 = vpop.permute.xlu1 %404 }
 0x15b   : >> { %v357_v14 = vpop.permute.xlu0 %356  ;;  %v1181_v52 = vsel %vm2894_vm13, %v1179_v16, %v1180_v50  ;;  %v515_v25 = vsel %vm513_vm9, %v510_v31, %v405_v57  ;;  %vm2897_vm13 = vmmov %vm2895_vm6 }
 0x15c   : >> { %v497_v5 = vsel %vm493_vm4, %v492_v34, %v357_v14 }
 0x15e   : >> { %v366_v62 = vpop.permute.xlu1 %365 }
 0x15f   : >> { %v1037_v0 = vpop.permute.xlu0 %1036  ;;  %v502_v29 = vsel %vm498_vm5, %v497_v5, %v366_v62 }
 0x160   : >> { %v1145_v39 = vsel %vm513_vm9, %v1139_v48, %v1037_v0 }
 0x162   : >> { %v1053_v27 = vpop.permute.xlu1 %1052 }
 0x163   : >> { %v414_v2 = vpop.permute.xlu0 %413  ;;  %v1151_v28 = vsel %vm2895_vm6, %v1145_v39, %v1053_v27 }
 0x164   : >> { %v520_v17 = vsel %vm2897_vm13, %v515_v25, %v414_v2 }
 0x166   : >> { %v428_v47 = vpop.permute.xlu1 %427 }
 0x167   : >> { %v383_v56 = vpop.permute.xlu0 %382  ;;  %v525_v20 = vsel %vm523_vm8, %v520_v17, %v428_v47 }
 0x168   : >> { %v507_v4 = vsel %vm503_vm7, %v502_v29, %v383_v56 }
 0x16a   : >> { %v392_v12 = vpop.permute.xlu1 %391 }
 0x16b   : >> { %v1059_v32 = vpop.permute.xlu0 %1058  ;;  %v512_v6 = vsel %vm508_vm1, %v507_v4, %v392_v12 }
 0x16c   : >> { %v1157_v13 = vsel %vm523_vm8, %v1151_v28, %v1059_v32 }
 0x16e   : >> { %v1073_v60 = vpop.permute.xlu1 %1072 }
 0x16f   : >> { %v455_v1 = vpop.permute.xlu0 %454  ;;  %v1163_v63 = vsel %vm528_vm3, %v1157_v13, %v1073_v60 }
 0x170   : >> { %v1182_v11 = vrot.slane %v1163_v63, 2  ;;  %v530_v21 = vsel %vm528_vm3, %v525_v20, %v455_v1 }
 0x172   : >> { %v407_v41 = vpop.permute.xlu1 %406  ;;  %v1183_v9 = vsel %vm2896_vm12, %v1180_v50, %v1182_v11 }
 0x173   : >> { %v1190_v24 = vpop.permute.xlu0 %1189  ;;  %v517_v30 = vsel %vm513_vm9, %v512_v6, %v407_v41 }
 0x174   : >> { %v1202_v49 = vsel %vm1193_vm0, %v1181_v52, %v1190_v24 }
 0x175   : >> { %1627 = vmatprep.mubr.msk.bf16.mxu0 %vm1306_vm10, %v1202_v49 }
 0x176   : >> { %v416_v46 = vpop.permute.xlu1 %415 }
 0x177   : >> { %v1173_v44 = vpop.permute.xlu0 %1172  ;;  %v522_v22 = vsel %vm2898_vm14, %v517_v30, %v416_v46 }
 0x178   : >> { %v1195_v53 = vsel %vm1193_vm0, %v530_v21, %v1173_v44 }
 0x179   : >> { %1348 = vmatmul.mubr.bf16.vlgmr.msra.gmra.mrb[0].mxu0 %v1195_v53 }
 0x17a   : >> { %v457_v3 = vpop.permute.xlu1 %456 }
 0x17b   : >> { %v430_v37 = vpop.permute.xlu0 %429 }
 0x17c   : >> { %v527_v40 = vsel %vm523_vm8, %v522_v22, %v430_v37 }
 0x17d   : >> { %v532_v18 = vsel %vm528_vm3, %v527_v40, %v457_v3 }
 0x17e   : >> { %v1175_v38 = vpop.permute.xlu1 %1174 }
 0x17f   : >> { %v1192_v58 = vpop.permute.xlu0 %1191  ;;  %v1198_v19 = vsel %vm1193_vm0, %v532_v18, %v1175_v38 }
 0x180   : >> { %v1205_v59 = vsel %vm1193_vm0, %v1183_v9, %v1192_v58 }
 0x181   : >> { %1628 = vmatprep.mubr.msk.bf16.mxu1 %vm1306_vm10, %v1205_v59 }
 0x182   : >> { %1356 = vmatmul.mubr.bf16.vlgmr.msra.gmra.mrb[0].mxu1 %v1198_v19 }
 0x24c   : >> { %v1349_v7 = vpop.f32.mrb[0].mxu0 }
 0x24d   : >> { %1366 = vst.msk [vmem:[%s1365_s4] sm:$0xff] %vm463_vm11, %v1349_v7  ;;  %v1384_v45 = vmul.f32 %v1349_v7, %v1349_v7  ;;  %v1351_v54 = vpop.f32.mrb[1].mxu0  ;;  %v1370_v26 = vsel %vm463_vm11, %v1349_v7, 0.0 }
 0x24e   : >> { %v1352_v36 = vpop.f32.mrb[2].mxu0 }
 0x24f   : >> { %1367 = vst.msk [vmem:[%s1365_s4 + $0x8] sm:$0xff] %vm463_vm11, %v1352_v36  ;;  %v1371_v33 = vsel %vm463_vm11, %v1352_v36, 0.0  ;;  %v1385_v8 = vmul.f32 %v1352_v36, %v1352_v36  ;;  %v1354_v55 = vpop.f32.mrb[3].mxu0  ;;  %v1388_v16 = vsel %vm463_vm11, %v1384_v45, 0.0 }
 0x250   : >> { %v1372_v50 = vadd.f32 %v1371_v33, %v1370_v26 }
 0x251   : >> { %v1389_v57 = vsel %vm463_vm11, %v1385_v8, 0.0 }
 0x252   : >> { %v1390_v14 = vadd.f32 %v1389_v57, %v1388_v16 }
 0x255   : >> { %v1357_v52 = vpop.f32.mrb[0].mxu1 }
 0x256   : >> { %1368 = vst.msk [vmem:[%s1365_s4 + $0x10] sm:$0xff] %vm463_vm11, %v1357_v52  ;;  %v1373_v62 = vsel %vm463_vm11, %v1357_v52, 0.0  ;;  %v1386_v0 = vmul.f32 %v1357_v52, %v1357_v52  ;;  %v1359_v27 = vpop.f32.mrb[1].mxu1 }
 0x257   : >> { %v1374_v2 = vadd.f32 %v1373_v62, %v1372_v50  ;;  %v1360_v47 = vpop.f32.mrb[2].mxu1 }
 0x258   : >> { %v1391_v56 = vsel %vm463_vm11, %v1386_v0, 0.0  ;;  %1369 = vst.msk [vmem:[%s1365_s4 + $0x18] sm:$0xff] %vm463_vm11, %v1360_v47  ;;  %v1375_v15 = vsel %vm463_vm11, %v1360_v47, 0.0  ;;  %v1387_v43 = vmul.f32 %v1360_v47, %v1360_v47  ;;  %v1362_v10 = vpop.f32.mrb[3].mxu1 }
 0x259   : >> { %v1392_v12 = vadd.f32 %v1391_v56, %v1390_v14  ;;  %v1376_v48 = vadd.f32 %v1375_v15, %v1374_v2 }
 0x25a   : >> { %v1393_v32 = vsel %vm463_vm11, %v1387_v43, 0.0 }
 0x25b   : >> { %v1377_v39 = vrot.slane %v1376_v48, 4  ;;  %v1394_v28 = vadd.f32 %v1393_v32, %v1392_v12 }
 0x25d   : >> { %v1378_v13 = vadd.f32 %v1377_v39, %v1376_v48  ;;  %v1395_v60 = vrot.slane %v1394_v28, 4 }
 0x25f   : >> { %v1379_v1 = vrot.slane %v1378_v13, 2  ;;  %v1396_v63 = vadd.f32 %v1395_v60, %v1394_v28 }
 0x261   : >> { %v1380_v35 = vadd.f32 %v1379_v1, %v1378_v13  ;;  %v1397_v11 = vrot.slane %v1396_v63, 2 }
 0x263   : >> { %v1381_v23 = vrot.slane %v1380_v35, 1  ;;  %v1398_v51 = vadd.f32 %v1397_v11, %v1396_v63 }
 0x265   : >> { %v1382_v41 = vadd.f32 %v1381_v23, %v1380_v35  ;;  %v1399_v9 = vrot.slane %v1398_v51, 1  ;;  %149 = sbr.rel (!%p147_p4) target bundleno = 17 (0x11), region = 82 }
 0x267   : >> { %v1383_v31 = vadd.f32 %v2899_v42, %v1382_v41   ;;  %v1400_v24 = vadd.f32 %v1399_v9, %v1398_v51 }
 0x269   : >> { %v1401_v25 = vadd.f32 %v2900_v61, %v1400_v24   ;;  %v2902_v1 = vmov %v1383_v31  ;;  %v1402_v49 = vmul.f32 (%p147_p4), 0.0009765625, %v1383_v31 }
 0x26b   : >> { %v2901_v0 = vmov %v1401_v25  ;;  %v1403_v34 = vmul.f32 (%p147_p4), 0.0009765625, %v1401_v25  ;;  %v1404_v17 = vmul.f32 (%p147_p4), %v1402_v49, %v1402_v49 }
 0x26d   : > { %v1405_v5 = vsub.f32 %v1403_v34, %v1404_v17 }
 0x26f   : > { %v1406_v20 = vmax.f32 %v1405_v5, 0.0 }
 0x271   : > { %v1407_v46 = vadd.f32 1e-05, %v1406_v20 }
 0x273   : > { %1768 = vrsqrt.f32 %v1407_v46 }
 0x27d   : > { %v1769_v29 = vpop.eup %1768 }
 0x27e LB: >> { %s1630_s6 = sshll.u32 %s1808_s5, 5  ;;  %s1645_s18 = sshll.u32 %s1808_s5, 4  ;;  %vm1452_vm1 = vcmask 60416   ;;  %s1808_s5 = sphi %s2800_s5, %s1414_s5  }
 0x27f   : >> { %s1416_s19 = scalar_lea.vmem [#allocation2], %s1630_s6  ;;  %s1451_s7 = scalar_lea.vmem %s1853_s15, %s1645_s18 }
 0x280   : >> { %v1417_v21 = vld [vmem:[%s1416_s19] sm:$0xff]  ;;  %v1418_v44 = vld [vmem:[%s1416_s19 + $0x8] sm:$0xff]  ;;  %v1419_v4 = vld [vmem:[%s1416_s19 + $0x10] sm:$0xff]  ;;  %s1414_s5 = sadd.s32 1, %s1808_s5  }
 0x281   : >> { %v1421_v53 = vsub.f32 %v1417_v21, %v1402_v49  ;;  %v1422_v6 = vsub.f32 %v1418_v44, %v1402_v49  ;;  %v1423_v30 = vsub.f32 %v1419_v4, %v1402_v49  ;;  %v1420_v3 = vld [vmem:[%s1416_s19 + $0x18] sm:$0xff]  ;;  %p1411_p5 = scmp.ge.s32.totalorder %s1414_s5, 32  }
 0x282   : >> { %v1424_v22 = vsub.f32 %v1420_v3, %v1402_v49 }
 0x283   : >> { %v1425_v37 = vmul.f32 %v1769_v29, %v1421_v53  ;;  %v1426_v40 = vmul.f32 %v1769_v29, %v1422_v6  ;;  %v1427_v18 = vmul.f32 %v1769_v29, %v1423_v30 }
 0x284   : >> { %v1428_v38 = vmul.f32 %v1769_v29, %v1424_v22  ;;  %1413 = sbr.rel (!%p1411_p5) target bundleno = 638 (0x27e), region = 93 }
 0x285   : >> { %v1429_v58 = vmax.f32 %v1425_v37, 0.0  ;;  %v1430_v19 = vmax.f32 %v1426_v40, 0.0  ;;  %v1431_v59 = vmax.f32 %v1427_v18, 0.0 }
 0x286   : >> { %v1432_v7 = vmax.f32 %v1428_v38, 0.0 }
 0x287   : >> { %v1641_v45 = vpack.c.bf16 %v1429_v58, %v1429_v58  ;;  %v1642_v54 = vpack.c.bf16 %v1430_v19, %v1430_v19  ;;  %v1643_v36 = vpack.c.bf16 %v1431_v59, %v1431_v59 }
 0x288   : >> { %v1644_v26 = vpack.c.bf16 %v1432_v7, %v1432_v7 }
 0x289   : >> { %1453 = vst.msk [vmem:[%s1451_s7] sm:$0xf] %vm1452_vm1, %v1641_v45  ;;  %1454 = vst.msk [vmem:[%s1451_s7 + $0x4] sm:$0xf] %vm1452_vm1, %v1642_v54 }
 0x28a   : >> { %1455 = vst.msk [vmem:[%s1451_s7 + $0x8] sm:$0xf] %vm1452_vm1, %v1643_v36  ;;  %1456 = vst.msk [vmem:[%s1451_s7 + $0xc] sm:$0xf] %vm1452_vm1, %v1644_v26 }
 0x28b PF: > { %s12_s9 = sadd.s32 1, %s1792_s9  }
 0x28c   : > { %p9_p6 = scmp.ge.s32.totalorder %s12_s9, 4  }
 0x28e   :  { %11 = sbr.rel (!%p9_p6) target bundleno = 1 (0x1), region = 104 }

// kernel: pix2pixhd_forward.29
= control target key start
LH: loop header
LB: loop body
LE: loop exit
PB: predicated region body
PF: predicated region fallthrough
CT: control target
= control target key end

     0   :  { %s660_s9 = smov 0   ;;  %s735_s0 = inlined_call_operand.vmem [shape: bf16[2,17,17,32], index: 0, kind: input, shape index: {}]   ;;  %s736_s1 = inlined_call_operand.vmem [shape: bf16[128,16], index: 1, kind: input, shape index: {}]   ;;  %s737_s2 = inlined_call_operand.vmem [shape: bf16[2,16,16,16], index: 2, kind: output, shape index: {}]  }
   0x1 LB: > { %s474_s10 = sadd.s32 4294967295, %s622_s9   ;;  %p478_p0 = scmp.ge.s32.totalorder %s622_s9, 1  ;;  %s622_s9 = sphi %s660_s9, %s12_s9  }
   0x2   : > { %p112_p1 = scmp.lt.s32.totalorder %s622_s9, 3 }
   0x4   : > { %p113_p2 = pnand %p478_p0, %p112_p1 }
   0x5   : > { %p134_p3 = scmp.lt.s32.totalorder (!%p113_p2), %s474_s10, 1  ;;  %v678_v0 = vmov (!%p113_p2), 0.0   ;;  %v680_v1 = vmov (!%p113_p2), 0.0   ;;  %s682_s19 = smov (!%p113_p2), 0  }
   0x6   : > { %116 = sbr.rel (%p113_p2) target bundleno = 413 (0x19d), region = 28 }
   0xd   : > { %s741_s10 = smov (!%p134_p3, %s474_s10), 1 }
   0xe   : > { %s540_s11 = smul.u32 204, %s741_s10  ;;  %s506_s12 = sshll.u32 %s741_s10, 7 }
   0xf   : > { %s671_s15 = scalar_lea.vmem %s737_s2, %s506_s12 }
  0x10   : > { %s676_s18 = scalar_lea.vmem %s735_s0, %s540_s11 }
  0x11 LB: >> { %v640_v2 = vmov 0.0   ;;  %v590_v3 = vld [vmem:[%s736_s1] sm:$0xff]   ;;  %s507_s22 = smul.u32 12, %s634_s19  ;;  %v591_v4 = vld [vmem:[%s736_s1 + $0x8] sm:$0xff]   ;;  %v592_v5 = vld [vmem:[%s736_s1 + $0x10] sm:$0xff]   ;;  %vm641_vm1 = vmmov 0   ;;  %s634_s19 = sphi %s682_s19, %s150_s19   ;;  %v630_v1 = vphi %v680_v1, %v739_v1   ;;  %v626_v0 = vphi %v678_v0, %v738_v0  }
  0x12   : >> { %520 = vmatprep.subr.bf16.mxu0 %v640_v2  ;;  %vm174_vm0 = vsmask.f32 7424  ;;  %v593_v19 = vld [vmem:[%s736_s1 + $0x18] sm:$0xff]   ;;  %536 = vmatprep.mubr.msk.bf16.mxu0 %vm641_vm1, %v640_v2  ;;  %s642_s30 = smov 32   ;;  %v594_v25 = vld [vmem:[%s736_s1 + $0x20] sm:$0xff]   ;;  %s643_s5 = smov 96  }
  0x13   : >> { %521 = vmatpush3.bf16.msra.mxu0 %v590_v3  ;;  %s155_s25 = scalar_lea.vmem %s676_s18, %s507_s22  ;;  %s644_s6 = smov 64   ;;  %v595_v26 = vld [vmem:[%s736_s1 + $0x28] sm:$0xff]   ;;  %v596_v27 = vld [vmem:[%s736_s1 + $0x30] sm:$0xff]   ;;  %v597_v28 = vld [vmem:[%s736_s1 + $0x38] sm:$0xff]   ;;  %vm213_vm2 = vcmask 261120   ;;  %vm216_vm3 = vcmask 523264  }
  0x14   : >> { %522 = vmatprep.subr.bf16.mxu0 %v640_v2  ;;  %v586_v6 = vld [vmem:[%s155_s25] sm:$0xff]   ;;  %v587_v7 = vld [vmem:[%s155_s25 + $0x8] ss:$0 sps:$4 sm:$0x11]   ;;  %v588_v8 = vld [vmem:[%s155_s25 + $0xc] sm:$0xff]   ;;  %vm219_vm4 = vcmask 785408  }
  0x15   : >> { %v176_v9 = vshrl.u32 %v586_v6, 16  ;;  %v178_v10 = vshll.u32 %v586_v6, 16  ;;  %v183_v11 = vshll.u32 %v587_v7, 16  ;;  %v589_v12 = vld [vmem:[%s155_s25 + $0x14] ss:$0 sps:$4 sm:$0x11]  }
  0x16   : >> { %v200_v13 = vshrl.u32 %v588_v8, 16  ;;  %v202_v14 = vshll.u32 %v588_v8, 16  ;;  %v207_v17 = vshll.u32 %v589_v12, 16  ;;  %s498_s14 = sshll.u32 %s634_s19, 4  ;;  %vm330_vm5 = vcmask 130048   ;;  %s150_s19 = sadd.s32 1, %s634_s19  }
  0x17   : >> { %523 = vmatpush3.bf16.msra.mxu0 %v591_v4  ;;  %v180_v15 = vrot.slane %v178_v10, 1  ;;  %v185_v16 = vrot.slane %v183_v11, 1  ;;  %s329_s16 = scalar_lea.vmem [#allocation2], %s498_s14  ;;  %p147_p4 = scmp.ge.s32.totalorder %s150_s19, 16  }
  0x18   : >> { %524 = vmatprep.subr.bf16.mxu0 %v640_v2  ;;  %v204_v18 = vrot.slane %v202_v14, 1  ;;  %v209_v21 = vrot.slane %v207_v17, 1  ;;  %s636_s17 = smov (%p147_p4), 0  }
  0x19   : >> { %v181_v20 = vor.u32 %v180_v15, %v176_v9 }
  0x1a   : >> { %v205_v22 = vor.u32 %v204_v18, %v200_v13 }
  0x1b   : >> { %525 = vmatpush3.bf16.msra.mxu0 %v592_v5  ;;  %v186_v23 = vsel %vm174_vm0, %v181_v20, %v185_v16 }
  0x1c   : >> { %526 = vmatprep.subr.bf16.mxu0 %v640_v2  ;;  %187 = vrot.lane.b32.xlu0 %v186_v23, %s642_s30  ;;  %v210_v24 = vsel %vm174_vm0, %v205_v22, %v209_v21 }
  0x1d   : >> { %211 = vrot.lane.b32.xlu1 %v210_v24, %s643_s5 }
  0x1f   : >> { %527 = vmatpush3.bf16.msra.mxu0 %v593_v19 }
  0x20   : >> { %528 = vmatprep.subr.bf16.mxu0 %v640_v2  ;;  %194 = vrot.lane.b32.xlu0 %v588_v8, %s644_s6 }
  0x23   : >> { %529 = vmatpush3.bf16.msra.mxu0 %v594_v25 }
  0x24   : >> { %530 = vmatprep.subr.bf16.mxu0 %v640_v2 }
  0x27   : >> { %531 = vmatpush3.bf16.msra.mxu0 %v595_v26 }
  0x28   : >> { %532 = vmatprep.subr.bf16.mxu0 %v640_v2 }
  0x2b   : >> { %533 = vmatpush3.bf16.msra.mxu0 %v596_v27 }
  0x2c   : >> { %534 = vmatprep.subr.bf16.mxu0 %v640_v2 }
  0x2f   : >> { %535 = vmatpush3.bf16.msra.mxu0 %v597_v28 }
  0x8e   : >> { %v188_v29 = vpop.permute.xlu0 %187 }
  0x8f   : >> { %v212_v30 = vpop.permute.xlu1 %211  ;;  %v215_v31 = vsel %vm213_vm2, %v586_v6, %v188_v29 }
  0x92   : >> { %v195_v32 = vpop.permute.xlu0 %194 }
  0x93   : >> { %v218_v33 = vsel %vm216_vm3, %v215_v31, %v195_v32 }
  0x94   : >> { %v221_v34 = vsel %vm219_vm4, %v218_v33, %v212_v30 }
  0x95   : >> { %537 = vmatmul.mubr.bf16.vlgmr.msra.gmra.mrb[0].mxu0 %v221_v34 }
 0x168   : >> { %v321_v35 = vpop.f32.mrb[0].mxu0 }
 0x169   : >> { %331 = vst.msk [vmem:[%s329_s16] sm:$0xff] %vm330_vm5, %v321_v35  ;;  %v343_v36 = vmul.f32 %v321_v35, %v321_v35  ;;  %v538_v37 = vpop.f32.mrb[1].mxu0  ;;  %v333_v39 = vsel %vm330_vm5, %v321_v35, 0.0 }
 0x16a   : >> { %v324_v38 = vpop.f32.mrb[2].mxu0 }
 0x16b   : >> { %332 = vst.msk [vmem:[%s329_s16 + $0x8] sm:$0xff] %vm330_vm5, %v324_v38  ;;  %v334_v40 = vsel %vm330_vm5, %v324_v38, 0.0  ;;  %v344_v41 = vmul.f32 %v324_v38, %v324_v38  ;;  %v539_v42 = vpop.f32.mrb[3].mxu0  ;;  %v345_v44 = vsel %vm330_vm5, %v343_v36, 0.0 }
 0x16c   : >> { %v335_v43 = vadd.f32 %v334_v40, %v333_v39 }
 0x16d   : >> { %v346_v45 = vsel %vm330_vm5, %v344_v41, 0.0 }
 0x16e   : >> { %v336_v46 = vrot.slane %v335_v43, 4  ;;  %v347_v47 = vadd.f32 %v346_v45, %v345_v44 }
 0x170   : >> { %v337_v48 = vadd.f32 %v336_v46, %v335_v43  ;;  %v348_v49 = vrot.slane %v347_v47, 4 }
 0x172   : >> { %v338_v50 = vrot.slane %v337_v48, 2  ;;  %v349_v51 = vadd.f32 %v348_v49, %v347_v47 }
 0x174   : >> { %v339_v52 = vadd.f32 %v338_v50, %v337_v48  ;;  %v350_v53 = vrot.slane %v349_v51, 2 }
 0x176   : >> { %v340_v54 = vrot.slane %v339_v52, 1  ;;  %v351_v55 = vadd.f32 %v350_v53, %v349_v51 }
 0x178   : >> { %v341_v56 = vadd.f32 %v340_v54, %v339_v52  ;;  %v352_v57 = vrot.slane %v351_v55, 1  ;;  %149 = sbr.rel (!%p147_p4) target bundleno = 17 (0x11), region = 77 }
 0x17a   : >> { %v342_v58 = vadd.f32 %v630_v1, %v341_v56   ;;  %v353_v59 = vadd.f32 %v352_v57, %v351_v55 }
 0x17c   : >> { %v354_v60 = vadd.f32 %v626_v0, %v353_v59   ;;  %v739_v1 = vmov %v342_v58  ;;  %v355_v61 = vmul.f32 (%p147_p4), 0.00390625, %v342_v58 }
 0x17e   : >> { %v738_v0 = vmov %v354_v60  ;;  %v356_v62 = vmul.f32 (%p147_p4), 0.00390625, %v354_v60  ;;  %v357_v63 = vmul.f32 (%p147_p4), %v355_v61, %v355_v61 }
 0x180   : > { %v358_v2 = vsub.f32 %v356_v62, %v357_v63 }
 0x182   : > { %v359_v3 = vmax.f32 %v358_v2, 0.0 }
 0x184   : > { %v360_v4 = vadd.f32 1e-05, %v359_v3 }
 0x186   : > { %598 = vrsqrt.f32 %v360_v4 }
 0x190   : > { %v599_v1 = vpop.eup %598 }
 0x191 LB: >> { %s499_s20 = sshll.u32 %s638_s17, 4  ;;  %s510_s18 = sshll.u32 %s638_s17, 3  ;;  %vm389_vm6 = vcmask 125952   ;;  %s638_s17 = sphi %s636_s17, %s367_s17  }
 0x192   : >> { %s369_s21 = scalar_lea.vmem [#allocation2], %s499_s20  ;;  %s388_s19 = scalar_lea.vmem %s671_s15, %s510_s18 }
 0x193   : >> { %v370_v5 = vld [vmem:[%s369_s21] sm:$0xff]  ;;  %v371_v6 = vld [vmem:[%s369_s21 + $0x8] sm:$0xff]  ;;  %s367_s17 = sadd.s32 1, %s638_s17  }
 0x194   : >> { %v372_v7 = vsub.f32 %v370_v5, %v355_v61  ;;  %v373_v8 = vsub.f32 %v371_v6, %v355_v61  ;;  %p364_p5 = scmp.ge.s32.totalorder %s367_s17, 16  }
 0x196   : >> { %v374_v9 = vmul.f32 %v599_v1, %v372_v7  ;;  %v375_v0 = vmul.f32 %v599_v1, %v373_v8  ;;  %366 = sbr.rel (!%p364_p5) target bundleno = 401 (0x191), region = 88 }
 0x198   : >> { %v376_v10 = vmax.f32 %v374_v9, 0.0  ;;  %v377_v11 = vmax.f32 %v375_v0, 0.0 }
 0x19a   : >> { %v508_v12 = vpack.c.bf16 %v376_v10, %v376_v10  ;;  %v509_v13 = vpack.c.bf16 %v377_v11, %v377_v11 }
 0x19c   : >> { %390 = vst.msk [vmem:[%s388_s19] sm:$0xf] %vm389_vm6, %v508_v12  ;;  %391 = vst.msk [vmem:[%s388_s19 + $0x4] sm:$0xf] %vm389_vm6, %v509_v13 }
 0x19d PF: > { %s12_s9 = sadd.s32 1, %s622_s9  }
 0x19e   : > { %p9_p6 = scmp.ge.s32.totalorder %s12_s9, 4  }
 0x1a0   :  { %11 = sbr.rel (!%p9_p6) target bundleno = 1 (0x1), region = 99 }

// kernel: pix2pixhd_forward.30
= control target key start
LH: loop header
LB: loop body
LE: loop exit
PB: predicated region body
PF: predicated region fallthrough
CT: control target
= control target key end

     0   :  { %s674_s9 = smov 0   ;;  %s774_s0 = inlined_call_operand.vmem [shape: bf16[2,9,9,64], index: 0, kind: input, shape index: {}]   ;;  %s775_s1 = inlined_call_operand.vmem [shape: bf16[256,32], index: 1, kind: input, shape index: {}]   ;;  %s776_s2 = inlined_call_operand.vmem [shape: bf16[2,8,8,32], index: 2, kind: output, shape index: {}]  }
   0x1 LB: > { %s496_s10 = sadd.s32 4294967295, %s640_s9   ;;  %p500_p0 = scmp.ge.s32.totalorder %s640_s9, 1  ;;  %s640_s9 = sphi %s674_s9, %s12_s9  }
   0x2   : > { %p112_p1 = scmp.lt.s32.totalorder %s640_s9, 3 }
   0x4   : > { %p113_p2 = pnand %p500_p0, %p112_p1 }
   0x5   : > { %p134_p3 = scmp.lt.s32.totalorder (!%p113_p2), %s496_s10, 1  ;;  %v692_v0 = vmov (!%p113_p2), 0.0   ;;  %v694_v1 = vmov (!%p113_p2), 0.0   ;;  %s696_s19 = smov (!%p113_p2), 0  }
   0x6   : > { %116 = sbr.rel (%p113_p2) target bundleno = 411 (0x19b), region = 28 }
   0xd   : > { %s780_s10 = smov (!%p134_p3, %s496_s10), 1 }
   0xe   : > { %s556_s11 = smul.u32 72, %s780_s10  ;;  %s532_s12 = sshll.u32 %s780_s10, 5 }
   0xf   : > { %s685_s15 = scalar_lea.vmem %s776_s2, %s532_s12 }
  0x10   : > { %s690_s18 = scalar_lea.vmem %s774_s0, %s556_s11 }
  0x11 LB: >> { %v600_v2 = vld [vmem:[%s775_s1 + $0x40] sm:$0xff]   ;;  %s533_s24 = sshll.u32 %s652_s19, 3  ;;  %v602_v4 = vld [vmem:[%s775_s1 + $0x48] sm:$0xff]   ;;  %v604_v12 = vld [vmem:[%s775_s1 + $0x50] sm:$0xff]   ;;  %s658_s13 = smov 64   ;;  %vm192_vm0 = vcmask 523264   ;;  %s652_s19 = sphi %s696_s19, %s150_s19   ;;  %v648_v1 = vphi %v694_v1, %v778_v1   ;;  %v644_v0 = vphi %v692_v0, %v777_v0  }
  0x12   : >> { %v601_v3 = vld [vmem:[%s775_s1] sm:$0xff]   ;;  %534 = vmatprep.subr.bf16.mxu0 %v600_v2  ;;  %s155_s27 = scalar_lea.vmem %s690_s18, %s533_s24  ;;  %v603_v5 = vld [vmem:[%s775_s1 + $0x8] sm:$0xff]   ;;  %v605_v15 = vld [vmem:[%s775_s1 + $0x10] sm:$0xff]   ;;  %vm371_vm1 = vcmask 261120   ;;  %s370_s4 = scalar_lea.vmem [#allocation2], %s533_s24 }
  0x13   : >> { %535 = vmatpush3.bf16.msra.mxu0 %v601_v3  ;;  %v507_v6 = vld [vmem:[%s155_s27 + $0x8] sm:$0xf]  ;;  %v508_v7 = vld [vmem:[%s155_s27 + $0xc] sm:$0x1]  ;;  %v156_v8 = vld [vmem:[%s155_s27] sm:$0xf] }
  0x14   : >> { %536 = vmatprep.subr.bf16.mxu0 %v602_v4  ;;  %v510_v9 = vcombine.low %v507_v6, %v508_v7  ;;  %v157_v10 = vld [vmem:[%s155_s27 + $0x4] sm:$0x1]  ;;  %v606_v17 = vld [vmem:[%s775_s1 + $0x58] sm:$0xff]   ;;  %v610_v26 = vld [vmem:[%s775_s1 + $0x68] sm:$0xff]   ;;  %s150_s19 = sadd.s32 1, %s652_s19  }
  0x15   : >> { %v509_v11 = vcombine.low %v156_v8, %v157_v10  ;;  %v607_v22 = vld [vmem:[%s775_s1 + $0x18] sm:$0xff]   ;;  %v608_v23 = vld [vmem:[%s775_s1 + $0x60] sm:$0xff]   ;;  %v611_v27 = vld [vmem:[%s775_s1 + $0x28] sm:$0xff]   ;;  %p147_p4 = scmp.ge.s32.totalorder %s150_s19, 8  }
  0x16   : >> { %v184_v13 = vshrl.u32 %v510_v9, 16  ;;  %v186_v14 = vshll.u32 %v510_v9, 16  ;;  %v609_v25 = vld [vmem:[%s775_s1 + $0x20] sm:$0xff]   ;;  %v612_v28 = vld [vmem:[%s775_s1 + $0x70] sm:$0xff]   ;;  %v614_v30 = vld [vmem:[%s775_s1 + $0x78] sm:$0xff]   ;;  %s654_s24 = smov (%p147_p4), 0  }
  0x17   : >> { %537 = vmatpush3.bf16.msra.mxu0 %v603_v5  ;;  %v172_v16 = vshll.u32 %v509_v11, 16  ;;  %v170_v19 = vshrl.u32 %v509_v11, 16  ;;  %v613_v29 = vld [vmem:[%s775_s1 + $0x30] sm:$0xff]   ;;  %v615_v31 = vld [vmem:[%s775_s1 + $0x38] sm:$0xff]  }
  0x18   : >> { %538 = vmatprep.subr.bf16.mxu0 %v604_v12  ;;  %v188_v18 = vrot.slane %v186_v14, 1 }
  0x19   : >> { %v174_v20 = vrot.slane %v172_v16, 1 }
  0x1a   : >> { %v189_v21 = vor.u32 %v188_v18, %v184_v13 }
  0x1b   : >> { %539 = vmatpush3.bf16.msra.mxu0 %v605_v15  ;;  %v175_v24 = vor.u32 %v174_v20, %v170_v19 }
  0x1c   : >> { %540 = vmatprep.subr.bf16.mxu0 %v606_v17  ;;  %190 = vrot.lane.b32.xlu0 %v189_v21, %s658_s13 }
  0x1f   : >> { %541 = vmatpush3.bf16.msra.mxu0 %v607_v22 }
  0x20   : >> { %542 = vmatprep.subr.bf16.mxu0 %v608_v23  ;;  %176 = vrot.lane.b32.xlu0 %v175_v24, %s658_s13 }
  0x23   : >> { %543 = vmatpush3.bf16.msra.mxu0 %v609_v25 }
  0x24   : >> { %544 = vmatprep.subr.bf16.mxu0 %v610_v26 }
  0x27   : >> { %545 = vmatpush3.bf16.msra.mxu0 %v611_v27 }
  0x28   : >> { %546 = vmatprep.subr.bf16.mxu0 %v612_v28 }
  0x2b   : >> { %547 = vmatpush3.bf16.msra.mxu0 %v613_v29 }
  0x2c   : >> { %548 = vmatprep.subr.bf16.mxu0 %v614_v30 }
  0x2f   : >> { %549 = vmatpush3.bf16.msra.mxu0 %v615_v31 }
  0x8e   : >> { %v191_v32 = vpop.permute.xlu0 %190 }
  0x8f   : >> { %v199_v33 = vsel %vm192_vm0, %v507_v6, %v191_v32 }
  0x90   : >> { %361 = vmatprep.mubr.bf16.mxu0 %v199_v33 }
  0x92   : >> { %v177_v34 = vpop.permute.xlu0 %176 }
  0x93   : >> { %v195_v35 = vsel %vm192_vm0, %v156_v8, %v177_v34 }
  0x94   : >> { %362 = vmatmul.mubr.bf16.vlgmr.msra.gmra.mrb[0].mxu0 %v195_v35 }
 0x167   : >> { %v550_v36 = vpop.f32.mrb[0].mxu0 }
 0x168   : >> { %v551_v37 = vpop.f32.mrb[1].mxu0 }
 0x169   : >> { %v552_v38 = vadd.f32 %v551_v37, %v550_v36  ;;  %v553_v39 = vpop.f32.mrb[2].mxu0 }
 0x16a   : >> { %v554_v40 = vpop.f32.mrb[3].mxu0 }
 0x16b   : >> { %372 = vst.msk [vmem:[%s370_s4] sm:$0xff] %vm371_vm1, %v552_v38  ;;  %v373_v41 = vsel %vm371_vm1, %v552_v38, 0.0  ;;  %v381_v42 = vmul.f32 %v552_v38, %v552_v38 }
 0x16c   : >> { %v374_v43 = vrot.slane %v373_v41, 4 }
 0x16d   : >> { %v382_v44 = vsel %vm371_vm1, %v381_v42, 0.0 }
 0x16e   : >> { %v375_v45 = vadd.f32 %v374_v43, %v373_v41  ;;  %v383_v46 = vrot.slane %v382_v44, 4 }
 0x170   : >> { %v376_v47 = vrot.slane %v375_v45, 2  ;;  %v384_v48 = vadd.f32 %v383_v46, %v382_v44 }
 0x172   : >> { %v377_v49 = vadd.f32 %v376_v47, %v375_v45  ;;  %v385_v50 = vrot.slane %v384_v48, 2 }
 0x174   : >> { %v378_v51 = vrot.slane %v377_v49, 1  ;;  %v386_v52 = vadd.f32 %v385_v50, %v384_v48 }
 0x176   : >> { %v379_v53 = vadd.f32 %v378_v51, %v377_v49  ;;  %v387_v54 = vrot.slane %v386_v52, 1  ;;  %149 = sbr.rel (!%p147_p4) target bundleno = 17 (0x11), region = 77 }
 0x178   : >> { %v380_v55 = vadd.f32 %v648_v1, %v379_v53   ;;  %v388_v56 = vadd.f32 %v387_v54, %v386_v52 }
 0x17a   : >> { %v389_v57 = vadd.f32 %v644_v0, %v388_v56   ;;  %v778_v1 = vmov %v380_v55  ;;  %v390_v58 = vmul.f32 (%p147_p4), 0.015625, %v380_v55 }
 0x17c   : >> { %v777_v0 = vmov %v389_v57  ;;  %v391_v59 = vmul.f32 (%p147_p4), 0.015625, %v389_v57  ;;  %v392_v60 = vmul.f32 (%p147_p4), %v390_v58, %v390_v58 }
 0x17e   : > { %v393_v61 = vsub.f32 %v391_v59, %v392_v60 }
 0x180   : > { %v394_v62 = vmax.f32 %v393_v61, 0.0 }
 0x182   : > { %v395_v63 = vadd.f32 1e-05, %v394_v62 }
 0x184   : > { %616 = vrsqrt.f32 %v395_v63 }
 0x18e   : > { %v617_v1 = vpop.eup %616 }
 0x18f LB: >> { %s528_s5 = sshll.u32 %s656_s24, 3  ;;  %s529_s19 = sshll.u32 %s656_s24, 2  ;;  %vm412_vm2 = vcmask 257024   ;;  %s656_s24 = sphi %s654_s24, %s402_s24  }
 0x190   : >> { %s404_s6 = scalar_lea.vmem [#allocation2], %s528_s5  ;;  %s411_s18 = scalar_lea.vmem %s685_s15, %s529_s19 }
 0x191   : >> { %v405_v2 = vld [vmem:[%s404_s6] sm:$0xff]  ;;  %s402_s24 = sadd.s32 1, %s656_s24  }
 0x192   : >> { %v406_v3 = vsub.f32 %v405_v2, %v390_v58  ;;  %p399_p5 = scmp.ge.s32.totalorder %s402_s24, 8  }
 0x194   : >> { %v407_v4 = vmul.f32 %v617_v1, %v406_v3  ;;  %401 = sbr.rel (!%p399_p5) target bundleno = 399 (0x18f), region = 88 }
 0x196   : >> { %v408_v5 = vmax.f32 %v407_v4, 0.0 }
 0x198   : >> { %v409_v0 = vpack.c.bf16 %v408_v5, %v408_v5 }
 0x19a   : >> { %413 = vst.msk [vmem:[%s411_s18] sm:$0xf] %vm412_vm2, %v409_v0 }
 0x19b PF: > { %s12_s9 = sadd.s32 1, %s640_s9  }
 0x19c   : > { %p9_p6 = scmp.ge.s32.totalorder %s12_s9, 4  }
 0x19e   :  { %11 = sbr.rel (!%p9_p6) target bundleno = 1 (0x1), region = 99 }

// kernel: pix2pixhd_forward.31
= control target key start
LH: loop header
LB: loop body
LE: loop exit
PB: predicated region body
PF: predicated region fallthrough
CT: control target
= control target key end

     0   :  { %s872_s9 = smov 0   ;;  %s1020_s0 = inlined_call_operand.vmem [shape: bf16[2,5,5,128], index: 0, kind: input, shape index: {}]   ;;  %s1021_s1 = inlined_call_operand.vmem [shape: bf16[512,64], index: 1, kind: input, shape index: {}]   ;;  %s1022_s2 = inlined_call_operand.vmem [shape: bf16[2,4,4,64], index: 2, kind: output, shape index: {}]  }
   0x1 LB: > { %s645_s10 = sadd.s32 4294967295, %s839_s9   ;;  %p649_p0 = scmp.ge.s32.totalorder %s839_s9, 1  ;;  %s839_s9 = sphi %s872_s9, %s12_s9  }
   0x2   : > { %p112_p1 = scmp.lt.s32.totalorder %s839_s9, 3 }
   0x4   : > { %p113_p2 = pnand %p649_p0, %p112_p1 }
   0x5   : > { %p134_p3 = scmp.lt.s32.totalorder (!%p113_p2), %s645_s10, 1  ;;  %v890_v0 = vmov (!%p113_p2), 0.0   ;;  %v892_v1 = vmov (!%p113_p2), 0.0   ;;  %s894_s19 = smov (!%p113_p2), 0  }
   0x6   : > { %116 = sbr.rel (%p113_p2) target bundleno = 317 (0x13d), region = 28 }
   0xd   : > { %s1026_s10 = smov (!%p134_p3, %s645_s10), 1 }
   0xe   : > { %s740_s11 = smul.u32 20, %s1026_s10  ;;  %s695_s12 = sshll.u32 %s1026_s10, 3 }
   0xf   : > { %s883_s15 = scalar_lea.vmem %s1022_s2, %s695_s12 }
  0x10   : > { %s888_s18 = scalar_lea.vmem %s1020_s0, %s740_s11 }
  0x11 LB: >> { %v781_v2 = vld [vmem:[%s1021_s1 + $0x40] sm:$0xff]   ;;  %v785_v6 = vld [vmem:[%s1021_s1 + $0x48] sm:$0xff]   ;;  %v789_v10 = vld [vmem:[%s1021_s1 + $0x50] sm:$0xff]   ;;  %s653_s26 = sshll.u32 %s851_s19, 2  ;;  %vm520_vm0 = vcmask 519168   ;;  %s150_s19 = sadd.s32 1, %s851_s19   ;;  %s851_s19 = sphi %s894_s19, %s150_s19   ;;  %v847_v1 = vphi %v892_v1, %v1024_v1   ;;  %v843_v0 = vphi %v890_v0, %v1023_v0  }
  0x12   : >> { %v782_v3 = vld [vmem:[%s1021_s1 + $0xc0] sm:$0xff]   ;;  %696 = vmatprep.subr.bf16.mxu0 %v781_v2  ;;  %v786_v7 = vld [vmem:[%s1021_s1 + $0xc8] sm:$0xff]   ;;  %v790_v11 = vld [vmem:[%s1021_s1 + $0xd0] sm:$0xff]   ;;  %s154_s5 = scalar_lea.vmem %s888_s18, %s653_s26  ;;  %s519_s11 = scalar_lea.vmem [#allocation2], %s653_s26 }
  0x13   : >> { %v783_v4 = vld [vmem:[%s1021_s1] sm:$0xff]   ;;  %718 = vmatprep.subr.bf16.mxu1 %v782_v3  ;;  %v787_v8 = vld [vmem:[%s1021_s1 + $0x8] sm:$0xff]   ;;  %v791_v12 = vld [vmem:[%s1021_s1 + $0x10] sm:$0xff]   ;;  %p147_p4 = scmp.ge.s32.totalorder %s150_s19, 4  }
  0x14   : >> { %v784_v5 = vld [vmem:[%s1021_s1 + $0x80] sm:$0xff]   ;;  %697 = vmatpush3.bf16.msra.mxu0 %v783_v4  ;;  %v788_v9 = vld [vmem:[%s1021_s1 + $0x88] sm:$0xff]   ;;  %v792_v13 = vld [vmem:[%s1021_s1 + $0x90] sm:$0xff]   ;;  %s853_s12 = smov (%p147_p4), 0  }
  0x15   : >> { %719 = vmatpush3.bf16.msra.mxu1 %v784_v5  ;;  %698 = vmatprep.subr.bf16.mxu0 %v785_v6  ;;  %v793_v14 = vld [vmem:[%s1021_s1 + $0x58] sm:$0xff]   ;;  %v797_v18 = vld [vmem:[%s1021_s1 + $0x60] sm:$0xff]   ;;  %v801_v22 = vld [vmem:[%s1021_s1 + $0x68] sm:$0xff]  }
  0x16   : >> { %720 = vmatprep.subr.bf16.mxu1 %v786_v7  ;;  %v794_v15 = vld [vmem:[%s1021_s1 + $0xd8] sm:$0xff]   ;;  %v798_v19 = vld [vmem:[%s1021_s1 + $0xe0] sm:$0xff]   ;;  %v802_v23 = vld [vmem:[%s1021_s1 + $0xe8] sm:$0xff]  }
  0x17   : >> { %v795_v16 = vld [vmem:[%s1021_s1 + $0x18] sm:$0xff]   ;;  %v799_v20 = vld [vmem:[%s1021_s1 + $0x20] sm:$0xff]   ;;  %v803_v24 = vld [vmem:[%s1021_s1 + $0x28] sm:$0xff]  }
  0x18   : >> { %699 = vmatpush3.bf16.msra.mxu0 %v787_v8  ;;  %v796_v17 = vld [vmem:[%s1021_s1 + $0x98] sm:$0xff]   ;;  %v800_v21 = vld [vmem:[%s1021_s1 + $0xa0] sm:$0xff]   ;;  %v804_v25 = vld [vmem:[%s1021_s1 + $0xa8] sm:$0xff]  }
  0x19   : >> { %721 = vmatpush3.bf16.msra.mxu1 %v788_v9  ;;  %700 = vmatprep.subr.bf16.mxu0 %v789_v10  ;;  %v805_v26 = vld [vmem:[%s1021_s1 + $0x70] sm:$0xff]   ;;  %v809_v30 = vld [vmem:[%s1021_s1 + $0x78] sm:$0xff]   ;;  %v155_v34 = vld [vmem:[%s154_s5] sm:$0x7] }
  0x1a   : >> { %722 = vmatprep.subr.bf16.mxu1 %v790_v11  ;;  %v806_v27 = vld [vmem:[%s1021_s1 + $0xf0] sm:$0xff]   ;;  %v810_v31 = vld [vmem:[%s1021_s1 + $0xf8] sm:$0xff]   ;;  %v655_v35 = vld [vmem:[%s154_s5 + $0x4] sm:$0x7]  ;;  %v656_v36 = vcombine.low %v155_v34, %v155_v34 }
  0x1b   : >> { %v807_v28 = vld [vmem:[%s1021_s1 + $0x30] sm:$0xff]   ;;  %v811_v32 = vld [vmem:[%s1021_s1 + $0x38] sm:$0xff]   ;;  %v657_v37 = vcombine.low %v655_v35, %v655_v35 }
  0x1c   : >> { %701 = vmatpush3.bf16.msra.mxu0 %v791_v12  ;;  %v808_v29 = vld [vmem:[%s1021_s1 + $0xb0] sm:$0xff]   ;;  %v812_v33 = vld [vmem:[%s1021_s1 + $0xb8] sm:$0xff]   ;;  %v164_v38 = vshrl.u32 %v656_v36, 16  ;;  %v166_v39 = vshll.u32 %v656_v36, 16 }
  0x1d   : >> { %723 = vmatpush3.bf16.msra.mxu1 %v792_v13  ;;  %702 = vmatprep.subr.bf16.mxu0 %v793_v14  ;;  %v175_v40 = vshrl.u32 %v657_v37, 16  ;;  %v177_v41 = vshll.u32 %v657_v37, 16 }
  0x1e   : >> { %724 = vmatprep.subr.bf16.mxu1 %v794_v15  ;;  %v168_v42 = vrot.slane %v166_v39, 1 }
  0x1f   : >> { %v179_v43 = vrot.slane %v177_v41, 1 }
  0x20   : >> { %703 = vmatpush3.bf16.msra.mxu0 %v795_v16  ;;  %v169_v44 = vor.u32 %v168_v42, %v164_v38 }
  0x21   : >> { %725 = vmatpush3.bf16.msra.mxu1 %v796_v17  ;;  %704 = vmatprep.subr.bf16.mxu0 %v797_v18  ;;  %v180_v45 = vor.u32 %v179_v43, %v175_v40 }
  0x22   : >> { %726 = vmatprep.subr.bf16.mxu1 %v798_v19  ;;  %470 = vmatprep.mubr.bf16.mxu0 %v169_v44 }
  0x23   : >> { %510 = vmatprep.mubr.bf16.mxu1 %v180_v45 }
  0x24   : >> { %705 = vmatpush3.bf16.msra.mxu0 %v799_v20 }
  0x25   : >> { %727 = vmatpush3.bf16.msra.mxu1 %v800_v21  ;;  %706 = vmatprep.subr.bf16.mxu0 %v801_v22 }
  0x26   : >> { %728 = vmatprep.subr.bf16.mxu1 %v802_v23 }
  0x28   : >> { %707 = vmatpush3.bf16.msra.mxu0 %v803_v24 }
  0x29   : >> { %729 = vmatpush3.bf16.msra.mxu1 %v804_v25  ;;  %708 = vmatprep.subr.bf16.mxu0 %v805_v26 }
  0x2a   : >> { %730 = vmatprep.subr.bf16.mxu1 %v806_v27 }
  0x2c   : >> { %709 = vmatpush3.bf16.msra.mxu0 %v807_v28 }
  0x2d   : >> { %731 = vmatpush3.bf16.msra.mxu1 %v808_v29  ;;  %710 = vmatprep.subr.bf16.mxu0 %v809_v30 }
  0x2e   : >> { %732 = vmatprep.subr.bf16.mxu1 %v810_v31 }
  0x30   : >> { %711 = vmatpush3.bf16.msra.mxu0 %v811_v32 }
  0x31   : >> { %733 = vmatpush3.bf16.msra.mxu1 %v812_v33 }
  0x33   : >> { %471 = vmatmul.mubr.bf16.vlgmr.msra.gmra.mrb[0].mxu0 %v155_v34 }
  0x34   : >> { %511 = vmatmul.mubr.bf16.vlgmr.msra.gmra.mrb[0].mxu1 %v655_v35 }
 0x106   : >> { %v712_v46 = vpop.f32.mrb[0].mxu0 }
 0x107   : >> { %v734_v47 = vpop.f32.mrb[0].mxu1  ;;  %v713_v48 = vpop.f32.mrb[1].mxu0 }
 0x108   : >> { %v735_v49 = vpop.f32.mrb[1].mxu1  ;;  %v714_v50 = vadd.f32 %v713_v48, %v712_v46  ;;  %v715_v52 = vpop.f32.mrb[2].mxu0 }
 0x109   : >> { %v736_v51 = vadd.f32 %v735_v49, %v734_v47  ;;  %v737_v53 = vpop.f32.mrb[2].mxu1  ;;  %v716_v54 = vpop.f32.mrb[3].mxu0 }
 0x10a   : >> { %v738_v55 = vpop.f32.mrb[3].mxu1 }
 0x10b   : >> { %v513_v56 = vadd.f32 %v736_v51, %v714_v50 }
 0x10d   : >> { %521 = vst.msk [vmem:[%s519_s11] sm:$0xf] %vm520_vm0, %v513_v56  ;;  %v522_v57 = vsel %vm520_vm0, %v513_v56, 0.0  ;;  %v530_v58 = vmul.f32 %v513_v56, %v513_v56 }
 0x10e   : >> { %v523_v59 = vrot.slane %v522_v57, 4 }
 0x10f   : >> { %v531_v60 = vsel %vm520_vm0, %v530_v58, 0.0 }
 0x110   : >> { %v524_v61 = vadd.f32 %v523_v59, %v522_v57  ;;  %v532_v62 = vrot.slane %v531_v60, 4 }
 0x112   : >> { %v525_v63 = vrot.slane %v524_v61, 2  ;;  %v533_v2 = vadd.f32 %v532_v62, %v531_v60 }
 0x114   : >> { %v526_v3 = vadd.f32 %v525_v63, %v524_v61  ;;  %v534_v4 = vrot.slane %v533_v2, 2 }
 0x116   : >> { %v527_v5 = vrot.slane %v526_v3, 1  ;;  %v535_v6 = vadd.f32 %v534_v4, %v533_v2 }
 0x118   : >> { %v528_v7 = vadd.f32 %v527_v5, %v526_v3  ;;  %v536_v8 = vrot.slane %v535_v6, 1  ;;  %149 = sbr.rel (!%p147_p4) target bundleno = 17 (0x11), region = 77 }
 0x11a   : >> { %v529_v9 = vadd.f32 %v847_v1, %v528_v7   ;;  %v537_v10 = vadd.f32 %v536_v8, %v535_v6 }
 0x11c   : >> { %v538_v11 = vadd.f32 %v843_v0, %v537_v10   ;;  %v1024_v1 = vmov %v529_v9  ;;  %v539_v12 = vmul.f32 (%p147_p4), 0.0625, %v529_v9 }
 0x11e   : >> { %v1023_v0 = vmov %v538_v11  ;;  %v540_v13 = vmul.f32 (%p147_p4), 0.0625, %v538_v11  ;;  %v541_v14 = vmul.f32 (%p147_p4), %v539_v12, %v539_v12 }
 0x120   : > { %v542_v15 = vsub.f32 %v540_v13, %v541_v14 }
 0x122   : > { %v543_v16 = vmax.f32 %v542_v15, 0.0 }
 0x124   : > { %v544_v17 = vadd.f32 1e-05, %v543_v16 }
 0x126   : > { %815 = vrsqrt.f32 %v544_v17 }
 0x130   : > { %v816_v1 = vpop.eup %815 }
 0x131 LB: >> { %s691_s13 = sshll.u32 %s855_s12, 2  ;;  %s692_s19 = sshll.u32 %s855_s12, 1  ;;  %vm561_vm1 = vcmask 517120   ;;  %s855_s12 = sphi %s853_s12, %s551_s12  }
 0x132   : >> { %s553_s14 = scalar_lea.vmem [#allocation2], %s691_s13  ;;  %s560_s18 = scalar_lea.vmem %s883_s15, %s692_s19 }
 0x133   : >> { %v554_v18 = vld [vmem:[%s553_s14] sm:$0xf]  ;;  %s551_s12 = sadd.s32 1, %s855_s12  }
 0x134   : >> { %v555_v19 = vsub.f32 %v554_v18, %v539_v12  ;;  %p548_p5 = scmp.ge.s32.totalorder %s551_s12, 4  }
 0x136   : >> { %v556_v20 = vmul.f32 %v816_v1, %v555_v19  ;;  %550 = sbr.rel (!%p548_p5) target bundleno = 305 (0x131), region = 88 }
 0x138   : >> { %v557_v21 = vmax.f32 %v556_v20, 0.0 }
 0x13a   : >> { %v558_v0 = vpack.c.bf16 %v557_v21, %v557_v21 }
 0x13c   : >> { %562 = vst.msk [vmem:[%s560_s18] sm:$0x3] %vm561_vm1, %v558_v0 }
 0x13d PF: > { %s12_s9 = sadd.s32 1, %s839_s9  }
 0x13e   : > { %p9_p6 = scmp.ge.s32.totalorder %s12_s9, 4  }
 0x140   :  { %11 = sbr.rel (!%p9_p6) target bundleno = 1 (0x1), region = 99 }

// kernel: pix2pixhd_forward.32
= control target key start
LH: loop header
LB: loop body
LE: loop exit
PB: predicated region body
PF: predicated region fallthrough
CT: control target
= control target key end

     0   :  { %s1338_s9 = smov 0   ;;  %s1583_s0 = inlined_call_operand.vmem [shape: bf16[2,3,3,256], index: 0, kind: input, shape index: {}]   ;;  %s1584_s1 = inlined_call_operand.vmem [shape: bf16[1024,128], index: 1, kind: input, shape index: {}]   ;;  %s1585_s2 = inlined_call_operand.vmem [shape: bf16[2,2,2,128], index: 2, kind: output, shape index: {}]  }
   0x1 LB: > { %s1007_s10 = sadd.s32 4294967295, %s1305_s9   ;;  %p1011_p0 = scmp.ge.s32.totalorder %s1305_s9, 1  ;;  %s1305_s9 = sphi %s1338_s9, %s12_s9  }
   0x2   : > { %p112_p1 = scmp.lt.s32.totalorder %s1305_s9, 3 }
   0x4   : > { %p113_p2 = pnand %p1011_p0, %p112_p1 }
   0x5   : > { %p133_p3 = scmp.lt.s32.totalorder (!%p113_p2), %s1007_s10, 1  ;;  %v1356_v0 = vmov (!%p113_p2), 0.0   ;;  %v1358_v1 = vmov (!%p113_p2), 0.0   ;;  %s1360_s19 = smov (!%p113_p2), 0  }
   0x6   : > { %116 = sbr.rel (%p113_p2) target bundleno = 350 (0x15e), region = 28 }
   0xd   : > { %s1589_s10 = smov (!%p133_p3, %s1007_s10), 1 }
   0xe   : > { %s1176_s11 = smul.u32 12, %s1589_s10  ;;  %s1013_s12 = sshll.u32 %s1589_s10, 1 }
   0xf   : > { %s1349_s15 = scalar_lea.vmem %s1585_s2, %s1013_s12 }
  0x10   : > { %s1354_s18 = scalar_lea.vmem %s1583_s0, %s1176_s11 }
  0x11 LB: >> { %v1217_v2 = vld [vmem:[%s1584_s1 + $0x40] sm:$0xff]   ;;  %v1221_v6 = vld [vmem:[%s1584_s1 + $0x48] sm:$0xff]   ;;  %v1225_v10 = vld [vmem:[%s1584_s1 + $0x50] sm:$0xff]   ;;  %s1087_s26 = sshll.u32 %s1317_s19, 2  ;;  %vm888_vm0 = vcmask 1041408   ;;  %s1317_s19 = sphi %s1360_s19, %s148_s19   ;;  %v1313_v1 = vphi %v1358_v1, %v1587_v1   ;;  %v1309_v0 = vphi %v1356_v0, %v1586_v0  }
  0x12   : >> { %v1218_v3 = vld [vmem:[%s1584_s1 + $0xc0] sm:$0xff]   ;;  %1088 = vmatprep.subr.bf16.mxu0 %v1217_v2  ;;  %v1222_v7 = vld [vmem:[%s1584_s1 + $0xc8] sm:$0xff]   ;;  %v1226_v11 = vld [vmem:[%s1584_s1 + $0xd0] sm:$0xff]   ;;  %s1463_s5 = scalar_lea.vmem %s1354_s18, %s1087_s26 }
  0x13   : >> { %v1219_v4 = vld [vmem:[%s1584_s1] sm:$0xff]   ;;  %1110 = vmatprep.subr.bf16.mxu1 %v1218_v3  ;;  %v1223_v8 = vld [vmem:[%s1584_s1 + $0x8] sm:$0xff]   ;;  %v1227_v12 = vld [vmem:[%s1584_s1 + $0x10] sm:$0xff]  }
  0x14   : >> { %v1220_v5 = vld [vmem:[%s1584_s1 + $0x80] sm:$0xff]   ;;  %1089 = vmatpush3.bf16.msra.mxu0 %v1219_v4  ;;  %v1224_v9 = vld [vmem:[%s1584_s1 + $0x88] sm:$0xff]   ;;  %v1228_v13 = vld [vmem:[%s1584_s1 + $0x90] sm:$0xff]  }
  0x15   : >> { %1111 = vmatpush3.bf16.msra.mxu1 %v1220_v5  ;;  %1090 = vmatprep.subr.bf16.mxu0 %v1221_v6  ;;  %v1229_v14 = vld [vmem:[%s1584_s1 + $0x58] sm:$0xff]   ;;  %v1233_v18 = vld [vmem:[%s1584_s1 + $0x60] sm:$0xff]   ;;  %v1237_v22 = vld [vmem:[%s1584_s1 + $0x68] sm:$0xff]  }
  0x16   : >> { %1112 = vmatprep.subr.bf16.mxu1 %v1222_v7  ;;  %v1230_v15 = vld [vmem:[%s1584_s1 + $0xd8] sm:$0xff]   ;;  %v1234_v19 = vld [vmem:[%s1584_s1 + $0xe0] sm:$0xff]   ;;  %v1238_v23 = vld [vmem:[%s1584_s1 + $0xe8] sm:$0xff]  }
  0x17   : >> { %v1231_v16 = vld [vmem:[%s1584_s1 + $0x18] sm:$0xff]   ;;  %v1235_v20 = vld [vmem:[%s1584_s1 + $0x20] sm:$0xff]   ;;  %v1239_v24 = vld [vmem:[%s1584_s1 + $0x28] sm:$0xff]  }
  0x18   : >> { %1091 = vmatpush3.bf16.msra.mxu0 %v1223_v8  ;;  %v1232_v17 = vld [vmem:[%s1584_s1 + $0x98] sm:$0xff]   ;;  %v1236_v21 = vld [vmem:[%s1584_s1 + $0xa0] sm:$0xff]   ;;  %v1240_v25 = vld [vmem:[%s1584_s1 + $0xa8] sm:$0xff]  }
  0x19   : >> { %1113 = vmatpush3.bf16.msra.mxu1 %v1224_v9  ;;  %1092 = vmatprep.subr.bf16.mxu0 %v1225_v10  ;;  %v1241_v26 = vld [vmem:[%s1584_s1 + $0x70] sm:$0xff]   ;;  %v1245_v30 = vld [vmem:[%s1584_s1 + $0x78] sm:$0xff]   ;;  %v1018_v34 = vld.sshfl [vmem:[%s1463_s5] sm:$0x33 pattern:$0x76325410] }
  0x1a   : >> { %1114 = vmatprep.subr.bf16.mxu1 %v1226_v11  ;;  %v1242_v27 = vld [vmem:[%s1584_s1 + $0xf0] sm:$0xff]   ;;  %v1246_v31 = vld [vmem:[%s1584_s1 + $0xf8] sm:$0xff]   ;;  %v168_v35 = vcombine.high %v1018_v34, %v1018_v34  ;;  %v172_v36 = vshrl.u32 %v1018_v34, 16  ;;  %v174_v37 = vshll.u32 %v1018_v34, 16  ;;  %v1249_v38 = vld [vmem:[%s1584_s1 + $0x140] sm:$0xff]  }
  0x1b   : >> { %v1243_v28 = vld [vmem:[%s1584_s1 + $0x30] sm:$0xff]   ;;  %v1247_v32 = vld [vmem:[%s1584_s1 + $0x38] sm:$0xff]   ;;  %v1250_v39 = vld [vmem:[%s1584_s1 + $0x1c0] sm:$0xff]  }
  0x1c   : >> { %1093 = vmatpush3.bf16.msra.mxu0 %v1227_v12  ;;  %v1244_v29 = vld [vmem:[%s1584_s1 + $0xb0] sm:$0xff]   ;;  %v1248_v33 = vld [vmem:[%s1584_s1 + $0xb8] sm:$0xff]   ;;  %758 = vmatprep.mubr.bf16.mxu0 %v168_v35  ;;  %v179_v40 = vshrl.u32 %v168_v35, 16  ;;  %v181_v41 = vshll.u32 %v168_v35, 16  ;;  %v176_v42 = vrot.slane %v174_v37, 1  ;;  %v1251_v43 = vld [vmem:[%s1584_s1 + $0x100] sm:$0xff]  }
  0x1d   : >> { %1115 = vmatpush3.bf16.msra.mxu1 %v1228_v13  ;;  %1094 = vmatprep.subr.bf16.mxu0 %v1229_v14  ;;  %v1253_v45 = vld [vmem:[%s1584_s1 + $0x148] sm:$0xff]   ;;  %v1252_v47 = vld [vmem:[%s1584_s1 + $0x180] sm:$0xff]   ;;  %v1257_v51 = vld [vmem:[%s1584_s1 + $0x150] sm:$0xff]  }
  0x1e   : >> { %1116 = vmatprep.subr.bf16.mxu1 %v1230_v15  ;;  %v183_v44 = vrot.slane %v181_v41, 1  ;;  %v177_v46 = vor.u32 %v176_v42, %v172_v36  ;;  %v1255_v49 = vld [vmem:[%s1584_s1 + $0x108] sm:$0xff]   ;;  %v1259_v53 = vld [vmem:[%s1584_s1 + $0x110] sm:$0xff]   ;;  %v1261_v55 = vld [vmem:[%s1584_s1 + $0x158] sm:$0xff]  }
  0x1f   : >> { %v1254_v50 = vld [vmem:[%s1584_s1 + $0x1c8] sm:$0xff]   ;;  %v1258_v54 = vld [vmem:[%s1584_s1 + $0x1d0] sm:$0xff]   ;;  %v1263_v57 = vld [vmem:[%s1584_s1 + $0x118] sm:$0xff]  }
  0x20   : >> { %1095 = vmatpush3.bf16.msra.mxu0 %v1231_v16  ;;  %v184_v48 = vor.u32 %v183_v44, %v179_v40  ;;  %v1256_v52 = vld [vmem:[%s1584_s1 + $0x188] sm:$0xff]   ;;  %v1260_v56 = vld [vmem:[%s1584_s1 + $0x190] sm:$0xff]   ;;  %v1262_v58 = vld [vmem:[%s1584_s1 + $0x1d8] sm:$0xff]  }
  0x21   : >> { %1117 = vmatpush3.bf16.msra.mxu1 %v1232_v17  ;;  %1096 = vmatprep.subr.bf16.mxu0 %v1233_v18  ;;  %v1265_v59 = vld [vmem:[%s1584_s1 + $0x160] sm:$0xff]   ;;  %v1264_v60 = vld [vmem:[%s1584_s1 + $0x198] sm:$0xff]   ;;  %v1269_v63 = vld [vmem:[%s1584_s1 + $0x168] sm:$0xff]  }
  0x22   : >> { %1118 = vmatprep.subr.bf16.mxu1 %v1234_v19  ;;  %798 = vmatprep.mubr.bf16.mxu1 %v184_v48  ;;  %v1267_v61 = vld [vmem:[%s1584_s1 + $0x120] sm:$0xff]   ;;  %v1271_v3 = vld [vmem:[%s1584_s1 + $0x128] sm:$0xff]   ;;  %v1273_v5 = vld [vmem:[%s1584_s1 + $0x170] sm:$0xff]  }
  0x23   : >> { %v1266_v62 = vld [vmem:[%s1584_s1 + $0x1e0] sm:$0xff]   ;;  %v1270_v4 = vld [vmem:[%s1584_s1 + $0x1e8] sm:$0xff]   ;;  %v1275_v7 = vld [vmem:[%s1584_s1 + $0x130] sm:$0xff]  }
  0x24   : >> { %1097 = vmatpush3.bf16.msra.mxu0 %v1235_v20  ;;  %v1268_v2 = vld [vmem:[%s1584_s1 + $0x1a0] sm:$0xff]   ;;  %v1272_v6 = vld [vmem:[%s1584_s1 + $0x1a8] sm:$0xff]   ;;  %v1274_v8 = vld [vmem:[%s1584_s1 + $0x1f0] sm:$0xff]  }
  0x25   : >> { %1119 = vmatpush3.bf16.msra.mxu1 %v1236_v21  ;;  %1098 = vmatprep.subr.bf16.mxu0 %v1237_v22  ;;  %v1277_v9 = vld [vmem:[%s1584_s1 + $0x178] sm:$0xff]   ;;  %v1276_v10 = vld [vmem:[%s1584_s1 + $0x1b0] sm:$0xff]   ;;  %v1019_v13 = vld.sshfl [vmem:[%s1463_s5 + $0x4] sm:$0x33 pattern:$0x76325410] }
  0x26   : >> { %1120 = vmatprep.subr.bf16.mxu1 %v1238_v23  ;;  %v1279_v11 = vld [vmem:[%s1584_s1 + $0x138] sm:$0xff]   ;;  %v195_v14 = vcombine.high %v1019_v13, %v1019_v13  ;;  %v201_v15 = vshll.u32 %v1019_v13, 16  ;;  %v199_v17 = vshrl.u32 %v1019_v13, 16  ;;  %s1014_s5 = sshll.u32 %s1317_s19, 1  ;;  %s148_s19 = sadd.s32 1, %s1317_s19  }
  0x27   : >> { %v1278_v12 = vld [vmem:[%s1584_s1 + $0x1f8] sm:$0xff]   ;;  %s886_s4 = scalar_lea.vmem [#allocation2], %s1014_s5  ;;  %p145_p4 = scmp.ge.s32.totalorder %s148_s19, 2  }
  0x28   : >> { %1099 = vmatpush3.bf16.msra.mxu0 %v1239_v24  ;;  %v1280_v16 = vld [vmem:[%s1584_s1 + $0x1b8] sm:$0xff]   ;;  %v206_v18 = vshrl.u32 %v195_v14, 16  ;;  %v208_v19 = vshll.u32 %v195_v14, 16  ;;  %v203_v20 = vrot.slane %v201_v15, 1  ;;  %s1319_s6 = smov (%p145_p4), 0  }
  0x29   : >> { %1121 = vmatpush3.bf16.msra.mxu1 %v1240_v25  ;;  %1100 = vmatprep.subr.bf16.mxu0 %v1241_v26 }
  0x2a   : >> { %1122 = vmatprep.subr.bf16.mxu1 %v1242_v27  ;;  %v210_v21 = vrot.slane %v208_v19, 1  ;;  %v204_v22 = vor.u32 %v203_v20, %v199_v17 }
  0x2c   : >> { %1101 = vmatpush3.bf16.msra.mxu0 %v1243_v28  ;;  %v211_v23 = vor.u32 %v210_v21, %v206_v18 }
  0x2d   : >> { %1123 = vmatpush3.bf16.msra.mxu1 %v1244_v29  ;;  %1102 = vmatprep.subr.bf16.mxu0 %v1245_v30 }
  0x2e   : >> { %1124 = vmatprep.subr.bf16.mxu1 %v1246_v31 }
  0x30   : >> { %1103 = vmatpush3.bf16.msra.mxu0 %v1247_v32 }
  0x31   : >> { %1125 = vmatpush3.bf16.msra.mxu1 %v1248_v33  ;;  %1132 = vmatprep.subr.bf16.mxu0 %v1249_v38 }
  0x32   : >> { %1154 = vmatprep.subr.bf16.mxu1 %v1250_v39 }
  0x33   : >> { %759 = vmatmul.mubr.bf16.vlgmr.msra.gmra.mrb[0].mxu0 %v1018_v34 }
  0x34   : >> { %1133 = vmatpush3.bf16.msra.mxu0 %v1251_v43  ;;  %799 = vmatmul.mubr.bf16.vlgmr.msra.gmra.mrb[0].mxu1 %v177_v46 }
  0x35   : >> { %1134 = vmatprep.subr.bf16.mxu0 %v1253_v45  ;;  %1155 = vmatpush3.bf16.msra.mxu1 %v1252_v47 }
  0x36   : >> { %1156 = vmatprep.subr.bf16.mxu1 %v1254_v50  ;;  %838 = vmatprep.mubr.bf16.mxu0 %v195_v14 }
  0x37   : >> { %878 = vmatprep.mubr.bf16.mxu1 %v211_v23 }
  0x38   : >> { %1135 = vmatpush3.bf16.msra.mxu0 %v1255_v49 }
  0x39   : >> { %1136 = vmatprep.subr.bf16.mxu0 %v1257_v51  ;;  %1157 = vmatpush3.bf16.msra.mxu1 %v1256_v52 }
  0x3a   : >> { %1158 = vmatprep.subr.bf16.mxu1 %v1258_v54 }
  0x3c   : >> { %1137 = vmatpush3.bf16.msra.mxu0 %v1259_v53 }
  0x3d   : >> { %1138 = vmatprep.subr.bf16.mxu0 %v1261_v55  ;;  %1159 = vmatpush3.bf16.msra.mxu1 %v1260_v56 }
  0x3e   : >> { %1160 = vmatprep.subr.bf16.mxu1 %v1262_v58 }
  0x40   : >> { %1139 = vmatpush3.bf16.msra.mxu0 %v1263_v57 }
  0x41   : >> { %1140 = vmatprep.subr.bf16.mxu0 %v1265_v59  ;;  %1161 = vmatpush3.bf16.msra.mxu1 %v1264_v60 }
  0x42   : >> { %1162 = vmatprep.subr.bf16.mxu1 %v1266_v62 }
  0x44   : >> { %1141 = vmatpush3.bf16.msra.mxu0 %v1267_v61 }
  0x45   : >> { %1142 = vmatprep.subr.bf16.mxu0 %v1269_v63  ;;  %1163 = vmatpush3.bf16.msra.mxu1 %v1268_v2 }
  0x46   : >> { %1164 = vmatprep.subr.bf16.mxu1 %v1270_v4 }
  0x48   : >> { %1143 = vmatpush3.bf16.msra.mxu0 %v1271_v3 }
  0x49   : >> { %1144 = vmatprep.subr.bf16.mxu0 %v1273_v5  ;;  %1165 = vmatpush3.bf16.msra.mxu1 %v1272_v6 }
  0x4a   : >> { %1166 = vmatprep.subr.bf16.mxu1 %v1274_v8 }
  0x4c   : >> { %1145 = vmatpush3.bf16.msra.mxu0 %v1275_v7 }
  0x4d   : >> { %1146 = vmatprep.subr.bf16.mxu0 %v1277_v9  ;;  %1167 = vmatpush3.bf16.msra.mxu1 %v1276_v10 }
  0x4e   : >> { %1168 = vmatprep.subr.bf16.mxu1 %v1278_v12 }
  0x50   : >> { %1147 = vmatpush3.bf16.msra.mxu0 %v1279_v11 }
  0x51   : >> { %1169 = vmatpush3.bf16.msra.mxu1 %v1280_v16 }
  0x53   : >> { %839 = vmatmul.mubr.bf16.vlgmr.msra.gmra.mrb[4].mxu0 %v1019_v13 }
  0x54   : >> { %879 = vmatmul.mubr.bf16.vlgmr.msra.gmra.mrb[4].mxu1 %v204_v22 }
 0x106   : >> { %v1104_v24 = vpop.f32.mrb[0].mxu0 }
 0x107   : >> { %v1105_v25 = vpop.f32.mrb[1].mxu0  ;;  %v1126_v29 = vpop.f32.mrb[0].mxu1 }
 0x108   : >> { %v1106_v26 = vadd.f32 %v1105_v25, %v1104_v24  ;;  %v1107_v27 = vpop.f32.mrb[2].mxu0  ;;  %v1127_v30 = vpop.f32.mrb[1].mxu1 }
 0x109   : >> { %v1108_v28 = vpop.f32.mrb[3].mxu0  ;;  %v1128_v31 = vadd.f32 %v1127_v30, %v1126_v29  ;;  %v1129_v32 = vpop.f32.mrb[2].mxu1 }
 0x10a   : >> { %v1130_v33 = vpop.f32.mrb[3].mxu1 }
 0x10b   : >> { %v801_v34 = vadd.f32 %v1128_v31, %v1106_v26 }
 0x126   : >> { %v1148_v35 = vpop.f32.mrb[4].mxu0 }
 0x127   : >> { %v1149_v36 = vpop.f32.mrb[5].mxu0  ;;  %v1170_v41 = vpop.f32.mrb[4].mxu1 }
 0x128   : >> { %v1150_v37 = vadd.f32 %v1149_v36, %v1148_v35  ;;  %v1151_v38 = vpop.f32.mrb[6].mxu0  ;;  %v1171_v42 = vpop.f32.mrb[5].mxu1 }
 0x129   : >> { %v1152_v39 = vpop.f32.mrb[7].mxu0  ;;  %v1172_v43 = vadd.f32 %v1171_v42, %v1170_v41  ;;  %v1173_v44 = vpop.f32.mrb[6].mxu1 }
 0x12a   : >> { %v841_v40 = vadd.f32 %v1150_v37, %v801_v34  ;;  %v1174_v45 = vpop.f32.mrb[7].mxu1 }
 0x12c   : >> { %v881_v46 = vadd.f32 %v1172_v43, %v841_v40 }
 0x12e   : >> { %887 = vst [vmem:[%s886_s4] sm:$0x3] %v881_v46  ;;  %v889_v47 = vsel %vm888_vm0, %v881_v46, 0.0  ;;  %v897_v48 = vmul.f32 %v881_v46, %v881_v46 }
 0x12f   : >> { %v890_v49 = vrot.slane %v889_v47, 4 }
 0x130   : >> { %v898_v50 = vsel %vm888_vm0, %v897_v48, 0.0 }
 0x131   : >> { %v891_v51 = vadd.f32 %v890_v49, %v889_v47  ;;  %v899_v52 = vrot.slane %v898_v50, 4 }
 0x133   : >> { %v892_v53 = vrot.slane %v891_v51, 2  ;;  %v900_v54 = vadd.f32 %v899_v52, %v898_v50 }
 0x135   : >> { %v893_v55 = vadd.f32 %v892_v53, %v891_v51  ;;  %v901_v56 = vrot.slane %v900_v54, 2 }
 0x137   : >> { %v894_v57 = vrot.slane %v893_v55, 1  ;;  %v902_v58 = vadd.f32 %v901_v56, %v900_v54 }
 0x139   : >> { %v895_v59 = vadd.f32 %v894_v57, %v893_v55  ;;  %v903_v60 = vrot.slane %v902_v58, 1  ;;  %147 = sbr.rel (!%p145_p4) target bundleno = 17 (0x11), region = 77 }
 0x13b   : >> { %v896_v61 = vadd.f32 %v1313_v1, %v895_v59   ;;  %v904_v62 = vadd.f32 %v903_v60, %v902_v58 }
 0x13d   : >> { %v905_v63 = vadd.f32 %v1309_v0, %v904_v62   ;;  %v1587_v1 = vmov %v896_v61  ;;  %v906_v2 = vmul.f32 (%p145_p4), 0.25, %v896_v61 }
 0x13f   : >> { %v1586_v0 = vmov %v905_v63  ;;  %v907_v3 = vmul.f32 (%p145_p4), 0.25, %v905_v63  ;;  %v908_v4 = vmul.f32 (%p145_p4), %v906_v2, %v906_v2 }
 0x141   : > { %v909_v5 = vsub.f32 %v907_v3, %v908_v4 }
 0x143   : > { %v910_v6 = vmax.f32 %v909_v5, 0.0 }
 0x145   : > { %v911_v7 = vadd.f32 1e-05, %v910_v6 }
 0x147   : > { %1281 = vrsqrt.f32 %v911_v7 }
 0x151   : > { %v1282_v1 = vpop.eup %1281 }
 0x152 LB: >> { %s1084_s7 = sshll.u32 %s1321_s6, 1  ;;  %s926_s19 = scalar_lea.vmem %s1349_s15, %s1321_s6  ;;  %s1321_s6 = sphi %s1319_s6, %s918_s6  }
 0x153   : >> { %s920_s8 = scalar_lea.vmem [#allocation2], %s1084_s7  ;;  %s918_s6 = sadd.s32 1, %s1321_s6  }
 0x154   : >> { %v921_v8 = vld [vmem:[%s920_s8] sm:$0x3]  ;;  %p915_p5 = scmp.ge.s32.totalorder %s918_s6, 2  }
 0x155   : >> { %v922_v9 = vsub.f32 %v921_v8, %v906_v2 }
 0x157   : >> { %v923_v10 = vmul.f32 %v1282_v1, %v922_v9  ;;  %917 = sbr.rel (!%p915_p5) target bundleno = 338 (0x152), region = 88 }
 0x159   : >> { %v924_v11 = vmax.f32 %v923_v10, 0.0 }
 0x15b   : >> { %v925_v0 = vpack.c.bf16 %v924_v11, %v924_v11 }
 0x15d   : >> { %927 = vst [vmem:[%s926_s19] sm:$0x1] %v925_v0 }
 0x15e PF: > { %s12_s9 = sadd.s32 1, %s1305_s9  }
 0x15f   : > { %p9_p6 = scmp.ge.s32.totalorder %s12_s9, 4  }
 0x161   :  { %11 = sbr.rel (!%p9_p6) target bundleno = 1 (0x1), region = 99 }

// kernel: pix2pixhd_forward.34
= control target key start
LH: loop header
LB: loop body
LE: loop exit
PB: predicated region body
PF: predicated region fallthrough
CT: control target
= control target key end

     0   :  { %s1565_s12 = smov 0   ;;  %s1854_s0 = inlined_call_operand.vmem [shape: bf16[2,4,4,128], index: 0, kind: input, shape index: {}]   ;;  %s1855_s1 = inlined_call_operand.vmem [shape: bf16[1152,128], index: 1, kind: input, shape index: {}]   ;;  %s1856_s2 = inlined_call_operand.vmem [shape: bf16[2,2,2,128], index: 2, kind: input, shape index: {}]   ;;  %s1857_s3 = inlined_call_operand.vmem [shape: bf16[2,2,2,128], index: 3, kind: output, shape index: {}]  }
   0x1 LB: > { %s1177_s13 = sadd.s32 4294967295, %s1524_s12   ;;  %p1181_p0 = scmp.ge.s32.totalorder %s1524_s12, 1  ;;  %s1524_s12 = sphi %s1565_s12, %s13_s12  }
   0x2   : > { %p146_p1 = scmp.lt.s32.totalorder %s1524_s12, 3 }
   0x4   : > { %p147_p2 = pnand %p1181_p0, %p146_p1 }
   0x5   : > { %p173_p3 = scmp.lt.s32.totalorder (!%p147_p2), %s1177_s13, 1  ;;  %v1588_v0 = vmov (!%p147_p2), 0.0   ;;  %v1590_v1 = vmov (!%p147_p2), 0.0   ;;  %s1592_s25 = smov (!%p147_p2), 0  }
   0x6   : > { %150 = sbr.rel (%p147_p2) target bundleno = 377 (0x179), region = 32 }
   0xd   : > { %s1861_s13 = smov (!%p173_p3, %s1177_s13), 1 }
   0xe   : > { %s1267_s14 = sshll.u32 %s1861_s13, 3  ;;  %s1184_s15 = sshll.u32 %s1861_s13, 1 }
   0xf   : > { %s1576_s18 = scalar_lea.vmem %s1854_s0, %s1267_s14  ;;  %s1581_s21 = scalar_lea.vmem %s1856_s2, %s1184_s15 }
  0x10   : > { %s1586_s24 = scalar_lea.vmem %s1857_s3, %s1184_s15 }
  0x11 LB: >> { %v1428_v2 = vld [vmem:[%s1855_s1 + $0x40] sm:$0xff]   ;;  %v1432_v6 = vld [vmem:[%s1855_s1 + $0x48] sm:$0xff]   ;;  %v1436_v10 = vld [vmem:[%s1855_s1 + $0x50] sm:$0xff]   ;;  %s1186_s14 = sshll.u32 %s1536_s25, 1  ;;  %v210_v32 = vlaneseq  ;;  %v1542_v36 = vmov 1983009808   ;;  %s1536_s25 = sphi %s1592_s25, %s192_s25   ;;  %v1532_v1 = vphi %v1590_v1, %v1859_v1   ;;  %v1528_v0 = vphi %v1588_v0, %v1858_v0  }
  0x12   : >> { %v1429_v3 = vld [vmem:[%s1855_s1 + $0xc0] sm:$0xff]   ;;  %1268 = vmatprep.subr.bf16.mxu0 %v1428_v2  ;;  %v1433_v7 = vld [vmem:[%s1855_s1 + $0xc8] sm:$0xff]   ;;  %v1437_v11 = vld [vmem:[%s1855_s1 + $0xd0] sm:$0xff]   ;;  %s1703_s23 = scalar_lea.vmem %s1576_s18, %s1186_s14  ;;  %v208_v37 = vunpack.c.l.s4 %v1542_v36  ;;  %vm1544_vm0 = vmmov 0   ;;  %vm1039_vm1 = vcmask 1041408   ;;  %s192_s25 = sadd.s32 1, %s1536_s25  }
  0x13   : >> { %v1430_v4 = vld [vmem:[%s1855_s1] sm:$0xff]   ;;  %1290 = vmatprep.subr.bf16.mxu1 %v1429_v3  ;;  %v1434_v8 = vld [vmem:[%s1855_s1 + $0x8] sm:$0xff]   ;;  %v1438_v12 = vld [vmem:[%s1855_s1 + $0x10] sm:$0xff]   ;;  %v211_v38 = vshrl.u32 %v210_v32, 7  ;;  %p189_p4 = scmp.ge.s32.totalorder %s192_s25, 2  }
  0x14   : >> { %v1431_v5 = vld [vmem:[%s1855_s1 + $0x80] sm:$0xff]   ;;  %1269 = vmatpush3.bf16.msra.mxu0 %v1430_v4  ;;  %v1435_v9 = vld [vmem:[%s1855_s1 + $0x88] sm:$0xff]   ;;  %v1439_v13 = vld [vmem:[%s1855_s1 + $0x90] sm:$0xff]   ;;  %v209_v40 = vunpack.c.0.s8 %v208_v37 }
  0x15   : >> { %1291 = vmatpush3.bf16.msra.mxu1 %v1431_v5  ;;  %1270 = vmatprep.subr.bf16.mxu0 %v1432_v6  ;;  %v1440_v14 = vld [vmem:[%s1855_s1 + $0x58] sm:$0xff]   ;;  %v1444_v18 = vld [vmem:[%s1855_s1 + $0x60] sm:$0xff]   ;;  %v1448_v22 = vld [vmem:[%s1855_s1 + $0x68] sm:$0xff]  }
  0x16   : >> { %1292 = vmatprep.subr.bf16.mxu1 %v1433_v7  ;;  %v1441_v15 = vld [vmem:[%s1855_s1 + $0xd8] sm:$0xff]   ;;  %v1445_v19 = vld [vmem:[%s1855_s1 + $0xe0] sm:$0xff]   ;;  %v1449_v23 = vld [vmem:[%s1855_s1 + $0xe8] sm:$0xff]   ;;  %v1713_v43 = vsub.s32 %v209_v40, %v211_v38 }
  0x17   : >> { %v1442_v16 = vld [vmem:[%s1855_s1 + $0x18] sm:$0xff]   ;;  %v1446_v20 = vld [vmem:[%s1855_s1 + $0x20] sm:$0xff]   ;;  %v1450_v24 = vld [vmem:[%s1855_s1 + $0x28] sm:$0xff]  }
  0x18   : >> { %1271 = vmatpush3.bf16.msra.mxu0 %v1434_v8  ;;  %v1443_v17 = vld [vmem:[%s1855_s1 + $0x98] sm:$0xff]   ;;  %v1447_v21 = vld [vmem:[%s1855_s1 + $0xa0] sm:$0xff]   ;;  %v1451_v25 = vld [vmem:[%s1855_s1 + $0xa8] sm:$0xff]  }
  0x19   : >> { %1293 = vmatpush3.bf16.msra.mxu1 %v1435_v9  ;;  %1272 = vmatprep.subr.bf16.mxu0 %v1436_v10  ;;  %v1452_v26 = vld [vmem:[%s1855_s1 + $0x70] sm:$0xff]   ;;  %v1456_v30 = vld [vmem:[%s1855_s1 + $0x78] sm:$0xff]   ;;  %v1188_v35 = vld [vmem:[%s1703_s23 + $0x2] sm:$0x3] }
  0x1a   : >> { %1294 = vmatprep.subr.bf16.mxu1 %v1437_v11  ;;  %v1453_v27 = vld [vmem:[%s1855_s1 + $0xf0] sm:$0xff]   ;;  %v1457_v31 = vld [vmem:[%s1855_s1 + $0xf8] sm:$0xff]   ;;  %908 = vmatprep.mubr.bf16.mxu1 %v1188_v35  ;;  %v1460_v39 = vld [vmem:[%s1855_s1 + $0x140] sm:$0xff]   ;;  %v1729_v54 = vrot.slane %v1188_v35, %v1713_v43 }
  0x1b   : >> { %v1454_v28 = vld [vmem:[%s1855_s1 + $0x30] sm:$0xff]   ;;  %v1458_v33 = vld [vmem:[%s1855_s1 + $0x38] sm:$0xff]   ;;  %v1462_v41 = vld [vmem:[%s1855_s1 + $0x1c0] sm:$0xff]  }
  0x1c   : >> { %1273 = vmatpush3.bf16.msra.mxu0 %v1438_v12  ;;  %v1455_v29 = vld [vmem:[%s1855_s1 + $0xb0] sm:$0xff]   ;;  %v1459_v34 = vld [vmem:[%s1855_s1 + $0xb8] sm:$0xff]   ;;  %v197_v42 = vld [vmem:[%s1703_s23] sm:$0x3]  ;;  %v240_v58 = vrot.slane %v1729_v54, 1 }
  0x1d   : >> { %1295 = vmatpush3.bf16.msra.mxu1 %v1439_v13  ;;  %1274 = vmatprep.subr.bf16.mxu0 %v1440_v14  ;;  %v213_v44 = vrot.slane %v197_v42, %v1713_v43  ;;  %v1463_v47 = vld [vmem:[%s1855_s1 + $0x180] sm:$0xff]   ;;  %v1466_v49 = vld [vmem:[%s1855_s1 + $0x1c8] sm:$0xff]   ;;  %v1470_v56 = vld [vmem:[%s1855_s1 + $0x1d0] sm:$0xff]  }
  0x1e   : >> { %1296 = vmatprep.subr.bf16.mxu1 %v1441_v15  ;;  %v1461_v51 = vld [vmem:[%s1855_s1 + $0x100] sm:$0xff]   ;;  %v1464_v52 = vld [vmem:[%s1855_s1 + $0x148] sm:$0xff]   ;;  %v1468_v59 = vld [vmem:[%s1855_s1 + $0x150] sm:$0xff]  }
  0x1f   : >> { %v215_v45 = vshrl.u32 %v213_v44, 16  ;;  %v217_v46 = vshll.u32 %v213_v44, 16  ;;  %v222_v48 = vrot.slane %v213_v44, 1  ;;  %v1467_v55 = vld [vmem:[%s1855_s1 + $0x188] sm:$0xff]   ;;  %v1471_v60 = vld [vmem:[%s1855_s1 + $0x190] sm:$0xff]   ;;  %v1474_v61 = vld [vmem:[%s1855_s1 + $0x1d8] sm:$0xff]  }
  0x20   : >> { %1275 = vmatpush3.bf16.msra.mxu0 %v1442_v16  ;;  %v1465_v57 = vld [vmem:[%s1855_s1 + $0x108] sm:$0xff]   ;;  %v1469_v62 = vld [vmem:[%s1855_s1 + $0x110] sm:$0xff]   ;;  %v1472_v63 = vld [vmem:[%s1855_s1 + $0x158] sm:$0xff]  }
  0x21   : >> { %1297 = vmatpush3.bf16.msra.mxu1 %v1443_v17  ;;  %1276 = vmatprep.subr.bf16.mxu0 %v1444_v18  ;;  %v219_v50 = vrot.slane %v217_v46, 1  ;;  %v1475_v2 = vld [vmem:[%s1855_s1 + $0x198] sm:$0xff]   ;;  %v1478_v3 = vld [vmem:[%s1855_s1 + $0x1e0] sm:$0xff]   ;;  %v1482_v7 = vld [vmem:[%s1855_s1 + $0x1e8] sm:$0xff]   ;;  %v235_v18 = vshll.u32 %v1729_v54, 16 }
  0x22   : >> { %1298 = vmatprep.subr.bf16.mxu1 %v1445_v19  ;;  %v1473_v4 = vld [vmem:[%s1855_s1 + $0x118] sm:$0xff]   ;;  %v1476_v5 = vld [vmem:[%s1855_s1 + $0x160] sm:$0xff]   ;;  %v1480_v9 = vld [vmem:[%s1855_s1 + $0x168] sm:$0xff]  }
  0x23   : >> { %v220_v53 = vor.u32 %v219_v50, %v215_v45  ;;  %v1479_v6 = vld [vmem:[%s1855_s1 + $0x1a0] sm:$0xff]   ;;  %v1483_v10 = vld [vmem:[%s1855_s1 + $0x1a8] sm:$0xff]   ;;  %v1486_v11 = vld [vmem:[%s1855_s1 + $0x1f0] sm:$0xff]  }
  0x24   : >> { %1277 = vmatpush3.bf16.msra.mxu0 %v1446_v20  ;;  %v1477_v8 = vld [vmem:[%s1855_s1 + $0x120] sm:$0xff]   ;;  %v1481_v12 = vld [vmem:[%s1855_s1 + $0x128] sm:$0xff]   ;;  %v1484_v13 = vld [vmem:[%s1855_s1 + $0x170] sm:$0xff]  }
  0x25   : >> { %1299 = vmatpush3.bf16.msra.mxu1 %v1447_v21  ;;  %1278 = vmatprep.subr.bf16.mxu0 %v1448_v22  ;;  %v1487_v14 = vld [vmem:[%s1855_s1 + $0x1b0] sm:$0xff]   ;;  %v1190_v15 = vld [vmem:[%s1703_s23 + $0x4] sm:$0x3]  ;;  %v1490_v16 = vld [vmem:[%s1855_s1 + $0x1f8] sm:$0xff]   ;;  %s1037_s23 = scalar_lea.vmem [#allocation2], %s1186_s14  ;;  %s1538_s14 = smov (%p189_p4), 0  }
  0x26   : >> { %1300 = vmatprep.subr.bf16.mxu1 %v1449_v23  ;;  %868 = vmatprep.mubr.bf16.mxu0 %v220_v53  ;;  %v249_v17 = vrot.slane %v1190_v15, %v1713_v43  ;;  %v1485_v19 = vld [vmem:[%s1855_s1 + $0x130] sm:$0xff]   ;;  %v1491_v22 = vld [vmem:[%s1855_s1 + $0x1b8] sm:$0xff]   ;;  %v1493_v32 = vld [vmem:[%s1855_s1 + $0x208] sm:$0xff]  }
  0x27   : >> { %v1488_v23 = vld [vmem:[%s1855_s1 + $0x178] sm:$0xff]   ;;  %v1496_v35 = vld [vmem:[%s1855_s1 + $0x220] sm:$0xff]   ;;  %v1497_v36 = vld [vmem:[%s1855_s1 + $0x228] sm:$0xff]  }
  0x28   : >> { %1279 = vmatpush3.bf16.msra.mxu0 %v1450_v24  ;;  %v251_v20 = vshrl.u32 %v249_v17, 16  ;;  %v253_v21 = vshll.u32 %v249_v17, 16  ;;  %v1498_v37 = vld [vmem:[%s1855_s1 + $0x230] sm:$0xff]   ;;  %v1499_v38 = vld [vmem:[%s1855_s1 + $0x238] sm:$0xff]  }
  0x29   : >> { %1301 = vmatpush3.bf16.msra.mxu1 %v1451_v25  ;;  %1280 = vmatprep.subr.bf16.mxu0 %v1452_v26  ;;  %v233_v25 = vshrl.u32 %v1729_v54, 16  ;;  %v237_v26 = vrot.slane %v235_v18, 1 }
  0x2a   : >> { %1302 = vmatprep.subr.bf16.mxu1 %v1453_v27  ;;  %v255_v24 = vrot.slane %v253_v21, 1 }
  0x2c   : >> { %1281 = vmatpush3.bf16.msra.mxu0 %v1454_v28  ;;  %v256_v27 = vor.u32 %v255_v24, %v251_v20  ;;  %v1489_v28 = vld [vmem:[%s1855_s1 + $0x138] sm:$0xff]  }
  0x2d   : >> { %1303 = vmatpush3.bf16.msra.mxu1 %v1455_v29  ;;  %1282 = vmatprep.subr.bf16.mxu0 %v1456_v30  ;;  %v238_v29 = vor.u32 %v237_v26, %v233_v25  ;;  %v1492_v30 = vld [vmem:[%s1855_s1 + $0x200] sm:$0xff]  }
  0x2e   : >> { %1304 = vmatprep.subr.bf16.mxu1 %v1457_v31  ;;  %v1543_v31 = vmov 0.0  }
  0x30   : >> { %1283 = vmatpush3.bf16.msra.mxu0 %v1458_v33  ;;  %v1494_v33 = vld [vmem:[%s1855_s1 + $0x210] sm:$0xff]  }
  0x31   : >> { %1305 = vmatpush3.bf16.msra.mxu1 %v1459_v34  ;;  %1312 = vmatprep.subr.bf16.mxu0 %v1460_v39  ;;  %v1495_v34 = vld [vmem:[%s1855_s1 + $0x218] sm:$0xff]   ;;  %v258_v39 = vrot.slane %v249_v17, 1 }
  0x32   : >> { %1334 = vmatprep.subr.bf16.mxu1 %v1462_v41 }
  0x33   : >> { %869 = vmatmul.mubr.bf16.vlgmr.msra.gmra.mrb[0].mxu0 %v197_v42 }
  0x34   : >> { %909 = vmatmul.mubr.bf16.vlgmr.msra.gmra.mrb[0].mxu1 %v222_v48  ;;  %1313 = vmatpush3.bf16.msra.mxu0 %v1461_v51 }
  0x35   : >> { %1335 = vmatpush3.bf16.msra.mxu1 %v1463_v47  ;;  %1314 = vmatprep.subr.bf16.mxu0 %v1464_v52 }
  0x36   : >> { %1336 = vmatprep.subr.bf16.mxu1 %v1466_v49  ;;  %948 = vmatprep.mubr.bf16.mxu0 %v240_v58 }
  0x37   : >> { %988 = vmatprep.mubr.bf16.mxu1 %v256_v27 }
  0x38   : >> { %1315 = vmatpush3.bf16.msra.mxu0 %v1465_v57 }
  0x39   : >> { %1337 = vmatpush3.bf16.msra.mxu1 %v1467_v55  ;;  %1316 = vmatprep.subr.bf16.mxu0 %v1468_v59 }
  0x3a   : >> { %1338 = vmatprep.subr.bf16.mxu1 %v1470_v56 }
  0x3c   : >> { %1317 = vmatpush3.bf16.msra.mxu0 %v1469_v62 }
  0x3d   : >> { %1339 = vmatpush3.bf16.msra.mxu1 %v1471_v60  ;;  %1318 = vmatprep.subr.bf16.mxu0 %v1472_v63 }
  0x3e   : >> { %1340 = vmatprep.subr.bf16.mxu1 %v1474_v61 }
  0x40   : >> { %1319 = vmatpush3.bf16.msra.mxu0 %v1473_v4 }
  0x41   : >> { %1341 = vmatpush3.bf16.msra.mxu1 %v1475_v2  ;;  %1320 = vmatprep.subr.bf16.mxu0 %v1476_v5 }
  0x42   : >> { %1342 = vmatprep.subr.bf16.mxu1 %v1478_v3 }
  0x44   : >> { %1321 = vmatpush3.bf16.msra.mxu0 %v1477_v8 }
  0x45   : >> { %1343 = vmatpush3.bf16.msra.mxu1 %v1479_v6  ;;  %1322 = vmatprep.subr.bf16.mxu0 %v1480_v9 }
  0x46   : >> { %1344 = vmatprep.subr.bf16.mxu1 %v1482_v7 }
  0x48   : >> { %1323 = vmatpush3.bf16.msra.mxu0 %v1481_v12 }
  0x49   : >> { %1345 = vmatpush3.bf16.msra.mxu1 %v1483_v10  ;;  %1324 = vmatprep.subr.bf16.mxu0 %v1484_v13 }
  0x4a   : >> { %1346 = vmatprep.subr.bf16.mxu1 %v1486_v11 }
  0x4c   : >> { %1325 = vmatpush3.bf16.msra.mxu0 %v1485_v19 }
  0x4d   : >> { %1347 = vmatpush3.bf16.msra.mxu1 %v1487_v14  ;;  %1326 = vmatprep.subr.bf16.mxu0 %v1488_v23 }
  0x4e   : >> { %1348 = vmatprep.subr.bf16.mxu1 %v1490_v16 }
  0x50   : >> { %1327 = vmatpush3.bf16.msra.mxu0 %v1489_v28 }
  0x51   : >> { %1349 = vmatpush3.bf16.msra.mxu1 %v1491_v22  ;;  %1365 = vmatprep.subr.bf16.mxu0 %v1543_v31 }
  0x53   : >> { %949 = vmatmul.mubr.bf16.vlgmr.msra.gmra.mrb[4].mxu0 %v238_v29 }
  0x54   : >> { %989 = vmatmul.mubr.bf16.vlgmr.msra.gmra.mrb[4].mxu1 %v1190_v15  ;;  %1366 = vmatpush3.bf16.msra.mxu0 %v1492_v30 }
  0x55   : >> { %1381 = vmatprep.mubr.msk.bf16.mxu0 %vm1544_vm0, %v1543_v31  ;;  %1367 = vmatprep.subr.bf16.mxu0 %v1543_v31 }
  0x58   : >> { %1368 = vmatpush3.bf16.msra.mxu0 %v1493_v32 }
  0x59   : >> { %1369 = vmatprep.subr.bf16.mxu0 %v1543_v31 }
  0x5c   : >> { %1370 = vmatpush3.bf16.msra.mxu0 %v1494_v33 }
  0x5d   : >> { %1371 = vmatprep.subr.bf16.mxu0 %v1543_v31 }
  0x60   : >> { %1372 = vmatpush3.bf16.msra.mxu0 %v1495_v34 }
  0x61   : >> { %1373 = vmatprep.subr.bf16.mxu0 %v1543_v31 }
  0x64   : >> { %1374 = vmatpush3.bf16.msra.mxu0 %v1496_v35 }
  0x65   : >> { %1375 = vmatprep.subr.bf16.mxu0 %v1543_v31 }
  0x68   : >> { %1376 = vmatpush3.bf16.msra.mxu0 %v1497_v36 }
  0x69   : >> { %1377 = vmatprep.subr.bf16.mxu0 %v1543_v31 }
  0x6c   : >> { %1378 = vmatpush3.bf16.msra.mxu0 %v1498_v37 }
  0x6d   : >> { %1379 = vmatprep.subr.bf16.mxu0 %v1543_v31 }
  0x70   : >> { %1380 = vmatpush3.bf16.msra.mxu0 %v1499_v38 }
  0x73   : >> { %1382 = vmatmul.mubr.bf16.vlgmr.msra.gmra.mrb[8].mxu0 %v258_v39 }
 0x106   : >> { %v1284_v45 = vpop.f32.mrb[0].mxu0 }
 0x107   : >> { %v1306_v40 = vpop.f32.mrb[0].mxu1  ;;  %v1285_v46 = vpop.f32.mrb[1].mxu0 }
 0x108   : >> { %v1307_v41 = vpop.f32.mrb[1].mxu1  ;;  %v1286_v47 = vadd.f32 %v1285_v46, %v1284_v45  ;;  %v1287_v48 = vpop.f32.mrb[2].mxu0 }
 0x109   : >> { %v1308_v42 = vadd.f32 %v1307_v41, %v1306_v40  ;;  %v1309_v43 = vpop.f32.mrb[2].mxu1  ;;  %v1288_v49 = vpop.f32.mrb[3].mxu0 }
 0x10a   : >> { %v1310_v44 = vpop.f32.mrb[3].mxu1 }
 0x10b   : >> { %v911_v50 = vadd.f32 %v1308_v42, %v1286_v47 }
 0x126   : >> { %v1328_v56 = vpop.f32.mrb[4].mxu0 }
 0x127   : >> { %v1350_v51 = vpop.f32.mrb[4].mxu1  ;;  %v1329_v57 = vpop.f32.mrb[5].mxu0 }
 0x128   : >> { %v1351_v52 = vpop.f32.mrb[5].mxu1  ;;  %v1330_v58 = vadd.f32 %v1329_v57, %v1328_v56  ;;  %v1331_v59 = vpop.f32.mrb[6].mxu0 }
 0x129   : >> { %v1352_v53 = vadd.f32 %v1351_v52, %v1350_v51  ;;  %v1353_v54 = vpop.f32.mrb[6].mxu1  ;;  %v1332_v60 = vpop.f32.mrb[7].mxu0 }
 0x12a   : >> { %v1354_v55 = vpop.f32.mrb[7].mxu1  ;;  %v951_v61 = vadd.f32 %v1330_v58, %v911_v50 }
 0x12c   : >> { %v991_v62 = vadd.f32 %v1352_v53, %v951_v61 }
 0x146   : >> { %v1030_v63 = vpop.f32.mrb[8].mxu0 }
 0x147   : >> { %v1031_v2 = vadd.f32 %v1030_v63, %v991_v62  ;;  %v1383_v3 = vpop.f32.mrb[9].mxu0 }
 0x148   : >> { %v1033_v4 = vpop.f32.mrb[10].mxu0 }
 0x149   : >> { %1038 = vst [vmem:[%s1037_s23] sm:$0x3] %v1031_v2  ;;  %v1040_v5 = vsel %vm1039_vm1, %v1031_v2, 0.0  ;;  %v1048_v6 = vmul.f32 %v1031_v2, %v1031_v2  ;;  %v1384_v7 = vpop.f32.mrb[11].mxu0 }
 0x14a   : >> { %v1041_v8 = vrot.slane %v1040_v5, 4 }
 0x14b   : >> { %v1049_v9 = vsel %vm1039_vm1, %v1048_v6, 0.0 }
 0x14c   : >> { %v1042_v10 = vadd.f32 %v1041_v8, %v1040_v5  ;;  %v1050_v11 = vrot.slane %v1049_v9, 4 }
 0x14e   : >> { %v1043_v12 = vrot.slane %v1042_v10, 2  ;;  %v1051_v13 = vadd.f32 %v1050_v11, %v1049_v9 }
 0x150   : >> { %v1044_v14 = vadd.f32 %v1043_v12, %v1042_v10  ;;  %v1052_v15 = vrot.slane %v1051_v13, 2 }
 0x152   : >> { %v1045_v16 = vrot.slane %v1044_v14, 1  ;;  %v1053_v17 = vadd.f32 %v1052_v15, %v1051_v13 }
 0x154   : >> { %v1046_v18 = vadd.f32 %v1045_v16, %v1044_v14  ;;  %v1054_v19 = vrot.slane %v1053_v17, 1  ;;  %191 = sbr.rel (!%p189_p4) target bundleno = 17 (0x11), region = 86 }
 0x156   : >> { %v1047_v20 = vadd.f32 %v1532_v1, %v1046_v18   ;;  %v1055_v21 = vadd.f32 %v1054_v19, %v1053_v17 }
 0x158   : >> { %v1056_v22 = vadd.f32 %v1528_v0, %v1055_v21   ;;  %v1859_v1 = vmov %v1047_v20  ;;  %v1057_v23 = vmul.f32 (%p189_p4), 0.25, %v1047_v20 }
 0x15a   : >> { %v1858_v0 = vmov %v1056_v22  ;;  %v1058_v24 = vmul.f32 (%p189_p4), 0.25, %v1056_v22  ;;  %v1059_v25 = vmul.f32 (%p189_p4), %v1057_v23, %v1057_v23 }
 0x15c   : > { %v1060_v26 = vsub.f32 %v1058_v24, %v1059_v25 }
 0x15e   : > { %v1061_v27 = vmax.f32 %v1060_v26, 0.0 }
 0x160   : > { %v1062_v28 = vadd.f32 1e-05, %v1061_v27 }
 0x162   : > { %1500 = vrsqrt.f32 %v1062_v28 }
 0x16c   : > { %v1501_v1 = vpop.eup %1500 }
 0x16d LB: >> { %s1264_s22 = sshll.u32 %s1540_s14, 1  ;;  %s1075_s26 = scalar_lea.vmem %s1581_s21, %s1540_s14  ;;  %s1540_s14 = sphi %s1538_s14, %s1069_s14  }
 0x16e   : >> { %v1076_v29 = vld [vmem:[%s1075_s26] sm:$0x1]  ;;  %s1071_s27 = scalar_lea.vmem [#allocation2], %s1264_s22  ;;  %s1080_s18 = scalar_lea.vmem %s1586_s24, %s1540_s14 }
 0x16f   : >> { %v1072_v30 = vld [vmem:[%s1071_s27] sm:$0x3]  ;;  %v1077_v0 = vunpack.c.l.bf16 %v1076_v29  ;;  %s1069_s14 = sadd.s32 1, %s1540_s14  }
 0x170   : >> { %v1073_v31 = vsub.f32 %v1072_v30, %v1057_v23  ;;  %p1066_p5 = scmp.ge.s32.totalorder %s1069_s14, 2  }
 0x172   : >> { %v1074_v32 = vmul.f32 %v1501_v1, %v1073_v31  ;;  %1068 = sbr.rel (!%p1066_p5) target bundleno = 365 (0x16d), region = 97 }
 0x174   : >> { %v1078_v33 = vadd.f32 %v1077_v0, %v1074_v32 }
 0x176   : >> { %v1079_v34 = vpack.c.bf16 %v1078_v33, %v1078_v33 }
 0x178   : >> { %1081 = vst [vmem:[%s1080_s18] sm:$0x1] %v1079_v34 }
 0x179 PF: > { %s13_s12 = sadd.s32 1, %s1524_s12  }
 0x17a   : > { %p10_p6 = scmp.ge.s32.totalorder %s13_s12, 4  }
 0x17c   :  { %12 = sbr.rel (!%p10_p6) target bundleno = 1 (0x1), region = 108 }

// kernel: pix2pixhd_forward.51
= control target key start
LH: loop header
LB: loop body
LE: loop exit
PB: predicated region body
PF: predicated region fallthrough
CT: control target
= control target key end

     0   :  { %s1228_s9 = smov 0   ;;  %s1506_s0 = inlined_call_operand.vmem [shape: bf16[2,3,3,128], index: 0, kind: input, shape index: {}]   ;;  %s1507_s1 = inlined_call_operand.vmem [shape: bf16[512,256], index: 1, kind: input, shape index: {}]   ;;  %s1508_s2 = inlined_call_operand.vmem [shape: bf16[2,2,2,256], index: 2, kind: output, shape index: {}]  }
   0x1 LB: > { %s909_s10 = sadd.s32 4294967295, %s1184_s9   ;;  %p913_p0 = scmp.ge.s32.totalorder %s1184_s9, 1  ;;  %s1184_s9 = sphi %s1228_s9, %s12_s9  }
   0x2   : > { %p112_p1 = scmp.lt.s32.totalorder %s1184_s9, 3 }
   0x4   : > { %p113_p2 = pnand %p913_p0, %p112_p1 }
   0x5   : > { %p133_p3 = scmp.lt.s32.totalorder (!%p113_p2), %s909_s10, 1  ;;  %v1246_v0 = vmov (!%p113_p2), 0.0   ;;  %v1248_v1 = vmov (!%p113_p2), 0.0   ;;  %v1250_v2 = vmov (!%p113_p2), 0.0   ;;  %v1252_v3 = vmov (!%p113_p2), 0.0   ;;  %s1254_s19 = smov (!%p113_p2), 0  }
   0x6   : > { %116 = sbr.rel (%p113_p2) target bundleno = 595 (0x253), region = 28 }
   0xd   : > { %s1514_s10 = smov (!%p133_p3, %s909_s10), 1 }
   0xe   : > { %s996_s11 = smul.u32 6, %s1514_s10  ;;  %s915_s12 = sshll.u32 %s1514_s10, 2 }
   0xf   : > { %s1239_s15 = scalar_lea.vmem %s1508_s2, %s915_s12 }
  0x10   : > { %s1244_s18 = scalar_lea.vmem %s1506_s0, %s996_s11 }
  0x11 LB: >> { %v1056_v4 = vld [vmem:[%s1507_s1 + $0x4] ss:$8 sps:$4 sm:$0xff]   ;;  %v1060_v6 = vld [vmem:[%s1507_s1] ss:$8 sps:$4 sm:$0xff]   ;;  %v1062_v8 = vld [vmem:[%s1507_s1 + $0x14] ss:$8 sps:$4 sm:$0xff]   ;;  %v163_v42 = vlaneseq  ;;  %s1204_s19 = sphi %s1254_s19, %s147_s19   ;;  %v1200_v3 = vphi %v1252_v3, %v1512_v3   ;;  %v1196_v2 = vphi %v1250_v2, %v1511_v2   ;;  %v1192_v1 = vphi %v1248_v1, %v1510_v1   ;;  %v1188_v0 = vphi %v1246_v0, %v1509_v0  }
  0x12   : >> { %v1058_v5 = vld [vmem:[%s1507_s1 + $0x104] ss:$8 sps:$4 sm:$0xff]   ;;  %575 = vmatprep.subr.bf16.mxu1 %v1056_v4  ;;  %v1061_v7 = vld [vmem:[%s1507_s1 + $0x100] ss:$8 sps:$4 sm:$0xff]   ;;  %v1064_v9 = vld [vmem:[%s1507_s1 + $0x114] ss:$8 sps:$4 sm:$0xff]  }
  0x13   : >> { %616 = vmatprep.subr.bf16.mxu0 %v1058_v5  ;;  %576 = vmatpush1.bf16.msra.mxu1 %v1060_v6  ;;  %v1066_v10 = vld [vmem:[%s1507_s1 + $0x10] ss:$8 sps:$4 sm:$0xff]   ;;  %v1068_v12 = vld [vmem:[%s1507_s1 + $0x24] ss:$8 sps:$4 sm:$0xff]   ;;  %v1072_v14 = vld [vmem:[%s1507_s1 + $0x20] ss:$8 sps:$4 sm:$0xff]  }
  0x14   : >> { %617 = vmatpush1.bf16.msra.mxu0 %v1061_v7  ;;  %577 = vmatprep.subr.bf16.mxu1 %v1062_v8  ;;  %v1067_v11 = vld [vmem:[%s1507_s1 + $0x110] ss:$8 sps:$4 sm:$0xff]   ;;  %v1070_v13 = vld [vmem:[%s1507_s1 + $0x124] ss:$8 sps:$4 sm:$0xff]   ;;  %v1073_v15 = vld [vmem:[%s1507_s1 + $0x120] ss:$8 sps:$4 sm:$0xff]  }
  0x15   : >> { %618 = vmatprep.subr.bf16.mxu0 %v1064_v9  ;;  %v1074_v16 = vld [vmem:[%s1507_s1 + $0x34] ss:$8 sps:$4 sm:$0xff]   ;;  %v1078_v18 = vld [vmem:[%s1507_s1 + $0x30] ss:$8 sps:$4 sm:$0xff]   ;;  %v1080_v20 = vld [vmem:[%s1507_s1 + $0x44] ss:$8 sps:$4 sm:$0xff]  }
  0x16   : >> { %v1076_v17 = vld [vmem:[%s1507_s1 + $0x134] ss:$8 sps:$4 sm:$0xff]   ;;  %v1079_v19 = vld [vmem:[%s1507_s1 + $0x130] ss:$8 sps:$4 sm:$0xff]   ;;  %v1082_v21 = vld [vmem:[%s1507_s1 + $0x144] ss:$8 sps:$4 sm:$0xff]  }
  0x17   : >> { %578 = vmatpush1.bf16.msra.mxu1 %v1066_v10  ;;  %v1084_v22 = vld [vmem:[%s1507_s1 + $0x40] ss:$8 sps:$4 sm:$0xff]   ;;  %v1086_v24 = vld [vmem:[%s1507_s1 + $0x54] ss:$8 sps:$4 sm:$0xff]   ;;  %v1090_v26 = vld [vmem:[%s1507_s1 + $0x50] ss:$8 sps:$4 sm:$0xff]  }
  0x18   : >> { %619 = vmatpush1.bf16.msra.mxu0 %v1067_v11  ;;  %579 = vmatprep.subr.bf16.mxu1 %v1068_v12  ;;  %v1085_v23 = vld [vmem:[%s1507_s1 + $0x140] ss:$8 sps:$4 sm:$0xff]   ;;  %v1088_v25 = vld [vmem:[%s1507_s1 + $0x154] ss:$8 sps:$4 sm:$0xff]   ;;  %v1091_v27 = vld [vmem:[%s1507_s1 + $0x150] ss:$8 sps:$4 sm:$0xff]  }
  0x19   : >> { %620 = vmatprep.subr.bf16.mxu0 %v1070_v13  ;;  %v1092_v28 = vld [vmem:[%s1507_s1 + $0x64] ss:$8 sps:$4 sm:$0xff]   ;;  %v1096_v30 = vld [vmem:[%s1507_s1 + $0x60] ss:$8 sps:$4 sm:$0xff]   ;;  %v1098_v32 = vld [vmem:[%s1507_s1 + $0x74] ss:$8 sps:$4 sm:$0xff]  }
  0x1a   : >> { %v1094_v29 = vld [vmem:[%s1507_s1 + $0x164] ss:$8 sps:$4 sm:$0xff]   ;;  %v1097_v31 = vld [vmem:[%s1507_s1 + $0x160] ss:$8 sps:$4 sm:$0xff]   ;;  %v1100_v33 = vld [vmem:[%s1507_s1 + $0x174] ss:$8 sps:$4 sm:$0xff]  }
  0x1b   : >> { %580 = vmatpush1.bf16.msra.mxu1 %v1072_v14  ;;  %v1102_v34 = vld [vmem:[%s1507_s1 + $0x70] ss:$8 sps:$4 sm:$0xff]   ;;  %v1104_v36 = vld [vmem:[%s1507_s1 + $0x84] ss:$8 sps:$4 sm:$0xff]   ;;  %v1108_v38 = vld [vmem:[%s1507_s1 + $0x80] ss:$8 sps:$4 sm:$0xff]  }
  0x1c   : >> { %621 = vmatpush1.bf16.msra.mxu0 %v1073_v15  ;;  %581 = vmatprep.subr.bf16.mxu1 %v1074_v16  ;;  %v1103_v35 = vld [vmem:[%s1507_s1 + $0x170] ss:$8 sps:$4 sm:$0xff]   ;;  %v1106_v37 = vld [vmem:[%s1507_s1 + $0x184] ss:$8 sps:$4 sm:$0xff]   ;;  %v1109_v39 = vld [vmem:[%s1507_s1 + $0x180] ss:$8 sps:$4 sm:$0xff]  }
  0x1d   : >> { %622 = vmatprep.subr.bf16.mxu0 %v1076_v17  ;;  %v1210_v40 = vmov 1983009808   ;;  %v1110_v43 = vld [vmem:[%s1507_s1 + $0x94] ss:$8 sps:$4 sm:$0xff]   ;;  %v1114_v45 = vld [vmem:[%s1507_s1 + $0x90] ss:$8 sps:$4 sm:$0xff]  }
  0x1e   : >> { %v161_v41 = vunpack.c.l.s4 %v1210_v40  ;;  %v1112_v44 = vld [vmem:[%s1507_s1 + $0x194] ss:$8 sps:$4 sm:$0xff]   ;;  %v1388_v47 = vshrl.u32 %v163_v42, 7  ;;  %v1115_v48 = vld [vmem:[%s1507_s1 + $0x190] ss:$8 sps:$4 sm:$0xff]   ;;  %s916_s30 = sshll.u32 %s1204_s19, 1 }
  0x1f   : >> { %582 = vmatpush1.bf16.msra.mxu1 %v1078_v18  ;;  %v1116_v49 = vld [vmem:[%s1507_s1 + $0xa4] ss:$8 sps:$4 sm:$0xff]   ;;  %v1120_v51 = vld [vmem:[%s1507_s1 + $0xa0] ss:$8 sps:$4 sm:$0xff]   ;;  %s153_s10 = scalar_lea.vmem %s1244_s18, %s916_s30  ;;  %v1122_v54 = vld [vmem:[%s1507_s1 + $0xb4] ss:$8 sps:$4 sm:$0xff]  }
  0x20   : >> { %623 = vmatpush1.bf16.msra.mxu0 %v1079_v19  ;;  %583 = vmatprep.subr.bf16.mxu1 %v1080_v20  ;;  %v162_v46 = vunpack.c.0.s8 %v161_v41  ;;  %v1118_v50 = vld [vmem:[%s1507_s1 + $0x1a4] ss:$8 sps:$4 sm:$0xff]   ;;  %v1121_v52 = vld [vmem:[%s1507_s1 + $0x1a0] ss:$8 sps:$4 sm:$0xff]   ;;  %v1124_v55 = vld [vmem:[%s1507_s1 + $0x1b4] ss:$8 sps:$4 sm:$0xff]  }
  0x21   : >> { %624 = vmatprep.subr.bf16.mxu0 %v1082_v21  ;;  %v154_v56 = vld [vmem:[%s153_s10] sm:$0x3]  ;;  %v918_v58 = vld [vmem:[%s153_s10 + $0x2] sm:$0x3]  ;;  %v1126_v59 = vld [vmem:[%s1507_s1 + $0xb0] ss:$8 sps:$4 sm:$0xff]  }
  0x22   : >> { %v1408_v53 = vsub.s32 %v162_v46, %v1388_v47  ;;  %v1127_v60 = vld [vmem:[%s1507_s1 + $0x1b0] ss:$8 sps:$4 sm:$0xff]   ;;  %v1128_v62 = vld [vmem:[%s1507_s1 + $0xc4] ss:$8 sps:$4 sm:$0xff]   ;;  %v1132_v9 = vld [vmem:[%s1507_s1 + $0xc0] ss:$8 sps:$4 sm:$0xff]  }
  0x23   : >> { %584 = vmatpush1.bf16.msra.mxu1 %v1084_v22  ;;  %v1130_v63 = vld [vmem:[%s1507_s1 + $0x1c4] ss:$8 sps:$4 sm:$0xff]   ;;  %v1133_v10 = vld [vmem:[%s1507_s1 + $0x1c0] ss:$8 sps:$4 sm:$0xff]   ;;  %v1134_v12 = vld [vmem:[%s1507_s1 + $0xd4] ss:$8 sps:$4 sm:$0xff]  }
  0x24   : >> { %625 = vmatpush1.bf16.msra.mxu0 %v1085_v23  ;;  %585 = vmatprep.subr.bf16.mxu1 %v1086_v24  ;;  %v166_v57 = vrot.slane %v154_v56, %v1408_v53  ;;  %v182_v61 = vrot.slane %v918_v58, %v1408_v53  ;;  %v1136_v13 = vld [vmem:[%s1507_s1 + $0x1d4] ss:$8 sps:$4 sm:$0xff]   ;;  %v1138_v16 = vld [vmem:[%s1507_s1 + $0xd0] ss:$8 sps:$4 sm:$0xff]   ;;  %v1140_v18 = vld [vmem:[%s1507_s1 + $0xe4] ss:$8 sps:$4 sm:$0xff]  }
  0x25   : >> { %626 = vmatprep.subr.bf16.mxu0 %v1088_v25  ;;  %v1139_v17 = vld [vmem:[%s1507_s1 + $0x1d0] ss:$8 sps:$4 sm:$0xff]   ;;  %v1142_v19 = vld [vmem:[%s1507_s1 + $0x1e4] ss:$8 sps:$4 sm:$0xff]   ;;  %v1144_v20 = vld [vmem:[%s1507_s1 + $0xe0] ss:$8 sps:$4 sm:$0xff]  }
  0x26   : >> { %v168_v4 = vshrl.u32 %v166_v57, 16  ;;  %v170_v5 = vshll.u32 %v166_v57, 16  ;;  %v184_v6 = vshrl.u32 %v182_v61, 16  ;;  %v186_v7 = vshll.u32 %v182_v61, 16  ;;  %v1145_v21 = vld [vmem:[%s1507_s1 + $0x1e0] ss:$8 sps:$4 sm:$0xff]  }
  0x27   : >> { %586 = vmatpush1.bf16.msra.mxu1 %v1090_v26  ;;  %v1146_v22 = vld [vmem:[%s1507_s1 + $0xf4] ss:$8 sps:$4 sm:$0xff]   ;;  %v1150_v24 = vld [vmem:[%s1507_s1 + $0xf0] ss:$8 sps:$4 sm:$0xff]   ;;  %vm672_vm0 = vcmask 1041408   ;;  %s992_s30 = sshll.u32 %s1204_s19, 2 }
  0x28   : >> { %627 = vmatpush1.bf16.msra.mxu0 %v1091_v27  ;;  %587 = vmatprep.subr.bf16.mxu1 %v1092_v28  ;;  %v172_v8 = vrot.slane %v170_v5, 1  ;;  %v188_v11 = vrot.slane %v186_v7, 1  ;;  %v1148_v23 = vld [vmem:[%s1507_s1 + $0x1f4] ss:$8 sps:$4 sm:$0xff]   ;;  %v1151_v25 = vld [vmem:[%s1507_s1 + $0x1f0] ss:$8 sps:$4 sm:$0xff]  }
  0x29   : >> { %628 = vmatprep.subr.bf16.mxu0 %v1094_v29  ;;  %s670_s3 = scalar_lea.vmem [#allocation2], %s992_s30  ;;  %s147_s19 = sadd.s32 1, %s1204_s19  }
  0x2a   : >> { %v173_v14 = vor.u32 %v172_v8, %v168_v4  ;;  %v189_v15 = vor.u32 %v188_v11, %v184_v6  ;;  %p144_p4 = scmp.ge.s32.totalorder %s147_s19, 2  }
  0x2b   : >> { %588 = vmatpush1.bf16.msra.mxu1 %v1096_v30  ;;  %s1211_s4 = smov (%p144_p4), 64   ;;  %vm742_vm1 = vcmask (%p144_p4), 523264   ;;  %s1492_s18 = smov (%p144_p4), 0  }
  0x2c   : >> { %629 = vmatpush1.bf16.msra.mxu0 %v1097_v31  ;;  %589 = vmatprep.subr.bf16.mxu1 %v1098_v32 }
  0x2d   : >> { %630 = vmatprep.subr.bf16.mxu0 %v1100_v33  ;;  %607 = vmatprep.mubr.bf16.mxu1 %v173_v14 }
  0x2e   : >> { %648 = vmatprep.mubr.bf16.mxu0 %v189_v15 }
  0x2f   : >> { %590 = vmatpush1.bf16.msra.mxu1 %v1102_v34 }
  0x30   : >> { %631 = vmatpush1.bf16.msra.mxu0 %v1103_v35  ;;  %591 = vmatprep.subr.bf16.mxu1 %v1104_v36 }
  0x31   : >> { %632 = vmatprep.subr.bf16.mxu0 %v1106_v37 }
  0x33   : >> { %592 = vmatpush1.bf16.msra.mxu1 %v1108_v38 }
  0x34   : >> { %633 = vmatpush1.bf16.msra.mxu0 %v1109_v39  ;;  %593 = vmatprep.subr.bf16.mxu1 %v1110_v43 }
  0x35   : >> { %634 = vmatprep.subr.bf16.mxu0 %v1112_v44 }
  0x37   : >> { %594 = vmatpush1.bf16.msra.mxu1 %v1114_v45 }
  0x38   : >> { %635 = vmatpush1.bf16.msra.mxu0 %v1115_v48  ;;  %595 = vmatprep.subr.bf16.mxu1 %v1116_v49 }
  0x39   : >> { %636 = vmatprep.subr.bf16.mxu0 %v1118_v50 }
  0x3b   : >> { %596 = vmatpush1.bf16.msra.mxu1 %v1120_v51 }
  0x3c   : >> { %637 = vmatpush1.bf16.msra.mxu0 %v1121_v52  ;;  %597 = vmatprep.subr.bf16.mxu1 %v1122_v54 }
  0x3d   : >> { %638 = vmatprep.subr.bf16.mxu0 %v1124_v55 }
  0x3f   : >> { %598 = vmatpush1.bf16.msra.mxu1 %v1126_v59 }
  0x40   : >> { %639 = vmatpush1.bf16.msra.mxu0 %v1127_v60  ;;  %599 = vmatprep.subr.bf16.mxu1 %v1128_v62 }
  0x41   : >> { %640 = vmatprep.subr.bf16.mxu0 %v1130_v63 }
  0x43   : >> { %600 = vmatpush1.bf16.msra.mxu1 %v1132_v9 }
  0x44   : >> { %641 = vmatpush1.bf16.msra.mxu0 %v1133_v10  ;;  %601 = vmatprep.subr.bf16.mxu1 %v1134_v12 }
  0x45   : >> { %642 = vmatprep.subr.bf16.mxu0 %v1136_v13 }
  0x47   : >> { %602 = vmatpush1.bf16.msra.mxu1 %v1138_v16 }
  0x48   : >> { %643 = vmatpush1.bf16.msra.mxu0 %v1139_v17  ;;  %603 = vmatprep.subr.bf16.mxu1 %v1140_v18 }
  0x49   : >> { %644 = vmatprep.subr.bf16.mxu0 %v1142_v19 }
  0x4b   : >> { %604 = vmatpush1.bf16.msra.mxu1 %v1144_v20 }
  0x4c   : >> { %645 = vmatpush1.bf16.msra.mxu0 %v1145_v21  ;;  %605 = vmatprep.subr.bf16.mxu1 %v1146_v22 }
  0x4d   : >> { %646 = vmatprep.subr.bf16.mxu0 %v1148_v23 }
  0x4f   : >> { %606 = vmatpush1.bf16.msra.mxu1 %v1150_v24 }
  0x50   : >> { %647 = vmatpush1.bf16.msra.mxu0 %v1151_v25 }
  0x52   : >> { %608 = vmatmul.mubr.bf16.vlgmr.msra.gmra.mrb[0].mxu1 %v154_v56 }
  0x53   : >> { %649 = vmatmul.mubr.bf16.vlgmr.msra.gmra.mrb[0].mxu0 %v918_v58 }
 0x125   : >> { %v609_v26 = vpop.f32.mrb[0].mxu1 }
 0x126   : >> { %v650_v27 = vpop.f32.mrb[0].mxu0  ;;  %v611_v29 = vpop.f32.mrb[1].mxu1 }
 0x127   : >> { %v651_v28 = vadd.f32 %v650_v27, %v609_v26  ;;  %v652_v30 = vpop.f32.mrb[1].mxu0  ;;  %v613_v32 = vpop.f32.mrb[2].mxu1 }
 0x128   : >> { %v653_v31 = vadd.f32 %v652_v30, %v611_v29  ;;  %v654_v33 = vpop.f32.mrb[2].mxu0  ;;  %v614_v36 = vpop.f32.mrb[3].mxu1 }
 0x129   : >> { %v673_v34 = vsel %vm672_vm0, %v651_v28, 0.0  ;;  %v689_v35 = vmul.f32 %v651_v28, %v651_v28  ;;  %v655_v37 = vpop.f32.mrb[3].mxu0 }
 0x12a   : >> { %v674_v38 = vrot.slane %v673_v34, 4  ;;  %v659_v39 = vcombine.low %v651_v28, %v653_v31  ;;  %v680_v40 = vsel %vm672_vm0, %v653_v31, 0.0  ;;  %v690_v41 = vmul.f32 %v653_v31, %v653_v31 }
 0x12b   : >> { %v691_v42 = vsel %vm672_vm0, %v689_v35, 0.0  ;;  %v681_v43 = vrot.slane %v680_v40, 4 }
 0x12c   : >> { %v675_v44 = vadd.f32 %v674_v38, %v673_v34  ;;  %v692_v45 = vrot.slane %v691_v42, 4  ;;  %985 = vst.sshfl [vmem:[%s670_s3] sm:$0x33 pattern:$0x76325410] %v659_v39  ;;  %v698_v46 = vsel %vm672_vm0, %v690_v41, 0.0 }
 0x12d   : >> { %v682_v48 = vadd.f32 %v681_v43, %v680_v40  ;;  %v699_v49 = vrot.slane %v698_v46, 4 }
 0x12e   : >> { %v676_v50 = vrot.slane %v675_v44, 2  ;;  %v693_v51 = vadd.f32 %v692_v45, %v691_v42 }
 0x12f   : >> { %v683_v52 = vrot.slane %v682_v48, 2  ;;  %v700_v54 = vadd.f32 %v699_v49, %v698_v46 }
 0x130   : >> { %v677_v55 = vadd.f32 %v676_v50, %v675_v44  ;;  %v694_v56 = vrot.slane %v693_v51, 2 }
 0x131   : >> { %v684_v57 = vadd.f32 %v683_v52, %v682_v48  ;;  %v701_v58 = vrot.slane %v700_v54, 2 }
 0x132   : >> { %v678_v59 = vrot.slane %v677_v55, 1  ;;  %v695_v60 = vadd.f32 %v694_v56, %v693_v51 }
 0x133   : >> { %v685_v61 = vrot.slane %v684_v57, 1  ;;  %v702_v62 = vadd.f32 %v701_v58, %v700_v54 }
 0x134   : >> { %v679_v63 = vadd.f32 %v678_v59, %v677_v55  ;;  %v696_v4 = vrot.slane %v695_v60, 1 }
 0x135   : >> { %v686_v5 = vadd.f32 %v685_v61, %v684_v57  ;;  %v703_v6 = vrot.slane %v702_v62, 1  ;;  %146 = sbr.rel (!%p144_p4) target bundleno = 17 (0x11), region = 77 }
 0x136   : >> { %v687_v7 = vadd.f32 %v1200_v3, %v679_v63   ;;  %v697_v8 = vadd.f32 %v696_v4, %v695_v60 }
 0x137   : >> { %v688_v9 = vadd.f32 %v1196_v2, %v686_v5   ;;  %v704_v10 = vadd.f32 %v703_v6, %v702_v62 }
 0x138   : >> { %v705_v11 = vadd.f32 %v1192_v1, %v697_v8   ;;  %v1512_v3 = vmov %v687_v7  ;;  %709 = vrot.lane.b32.xlu0 (%p144_p4), %v687_v7, %s1211_s4 }
 0x139   : >> { %v706_v12 = vadd.f32 %v1188_v0, %v704_v10   ;;  %v1511_v2 = vmov %v688_v9  ;;  %715 = vrot.lane.b32.xlu1 (%p144_p4), %v688_v9, %s1211_s4 }
 0x13a   : >> { %v1510_v1 = vmov %v705_v11 }
 0x13b   : >> { %v1509_v0 = vmov %v706_v12 }
 0x13c   : > { %721 = vrot.lane.b32.xlu0 %v705_v11, %s1211_s4 }
 0x13d   : > { %727 = vrot.lane.b32.xlu1 %v706_v12, %s1211_s4 }
 0x1aa   : > { %v710_v3 = vpop.permute.xlu0 %709 }
 0x1ab   : > { %v716_v13 = vpop.permute.xlu1 %715  ;;  %v712_v14 = vadd.f32 %v710_v3, %v687_v7 }
 0x1ad   : > { %v713_v15 = vadd.f32 %v712_v14, %v688_v9 }
 0x1ae   : > { %v722_v16 = vpop.permute.xlu0 %721 }
 0x1af   : > { %v718_v17 = vadd.f32 %v716_v13, %v713_v15  ;;  %v724_v18 = vadd.f32 %v722_v16, %v705_v11  ;;  %v728_v19 = vpop.permute.xlu1 %727 }
 0x1b1   : > { %v731_v20 = vmul.f32 0.0625, %v718_v17  ;;  %v725_v21 = vadd.f32 %v724_v18, %v706_v12 }
 0x1b3   : > { %v730_v22 = vadd.f32 %v728_v19, %v725_v21  ;;  %739 = vrot.lane.b32.xlu0 %v731_v20, %s1211_s4  ;;  %v733_v24 = vmul.f32 %v731_v20, %v731_v20 }
 0x1b5   : > { %v732_v23 = vmul.f32 0.0625, %v730_v22 }
 0x1b7   : > { %v734_v25 = vsub.f32 %v732_v23, %v733_v24 }
 0x1b9   : > { %v735_v0 = vmax.f32 %v734_v25, 0.0 }
 0x1bb   : > { %v736_v1 = vadd.f32 1e-05, %v735_v0 }
 0x1bd   : > { %1152 = vrsqrt.f32 %v736_v1 }
 0x1c7   : > { %v1153_v2 = vpop.eup %1152 }
 0x1c8   : > { %745 = vrot.lane.b32.xlu1 %v1153_v2, %s1211_s4 }
 0x225   : > { %v740_v26 = vpop.permute.xlu0 %739 }
 0x226   : > { %v743_v27 = vsel %vm742_vm1, %v731_v20, %v740_v26 }
 0x23a   : > { %v746_v28 = vpop.permute.xlu1 %745 }
 0x23b   : > { %v748_v29 = vsel %vm742_vm1, %v1153_v2, %v746_v28 }
 0x23c LB: >> { %v761_v30 = vsub.s32 0, %v1388_v47  ;;  %s993_s19 = sshll.u32 %s1208_s18, 2  ;;  %v1212_v39 = vmov 1966171168   ;;  %s986_s6 = sshll.u32 %s1208_s18, 1  ;;  %s1208_s18 = sphi %s1492_s18, %s754_s18  }
 0x23d   : >> { %s757_s5 = scalar_lea.vmem [#allocation2], %s993_s19  ;;  %v807_v40 = vunpack.c.l.s4 %v1212_v39  ;;  %s821_s7 = scalar_lea.vmem %s1239_s15, %s986_s6 }
 0x23e   : >> { %v762_v31 = vrot.slane %v743_v27, %v761_v30  ;;  %v777_v32 = vrot.slane %v748_v29, %v761_v30  ;;  %v758_v35 = vld [vmem:[%s757_s5] sm:$0xf]  ;;  %s754_s18 = sadd.s32 1, %s1208_s18  }
 0x23f   : >> { %v808_v43 = vunpack.c.0.s8 %v807_v40  ;;  %p751_p5 = scmp.ge.s32.totalorder %s754_s18, 2  }
 0x240   : >> { %v764_v33 = vcombine.low %v762_v31, %v762_v31  ;;  %v779_v34 = vcombine.low %v777_v32, %v777_v32 }
 0x241   : >> { %v811_v46 = vsub.s32 %v808_v43, %v1388_v47 }
 0x242   : >> { %v771_v36 = vrot.slane %v764_v33, %v1408_v53  ;;  %v786_v37 = vrot.slane %v779_v34, %v1408_v53 }
 0x244   : >> { %v773_v38 = vsub.f32 %v758_v35, %v771_v36 }
 0x246   : >> { %v788_v41 = vmul.f32 %v786_v37, %v773_v38 }
 0x248   : >> { %v789_v42 = vmax.f32 %v788_v41, 0.0 }
 0x24a   : >> { %v797_v44 = vrot.slane %v789_v42, %v1408_v53 }
 0x24c   : >> { %v798_v45 = vcombine.high %v797_v44, %v797_v44  ;;  %753 = sbr.rel (!%p751_p5) target bundleno = 572 (0x23c), region = 88 }
 0x24e   : >> { %v988_v48 = vpack.c.bf16 %v798_v45, %v797_v44 }
 0x250   : >> { %v812_v49 = vrot.slane %v988_v48, %v811_v46 }
 0x252   : >> { %989 = vst.sshfl [vmem:[%s821_s7] sm:$0x5 pattern:$0x73625140] %v812_v49 }
 0x253 PF: > { %s12_s9 = sadd.s32 1, %s1184_s9  }
 0x254   : > { %p9_p6 = scmp.ge.s32.totalorder %s12_s9, 4  }
 0x256   :  { %11 = sbr.rel (!%p9_p6) target bundleno = 1 (0x1), region = 99 }

// kernel: pix2pixhd_forward.33
= control target key start
LH: loop header
LB: loop body
LE: loop exit
PB: predicated region body
PF: predicated region fallthrough
CT: control target
= control target key end

     0   :  { %s1499_s9 = smov 0   ;;  %s1782_s0 = inlined_call_operand.vmem [shape: bf16[2,4,4,128], index: 0, kind: input, shape index: {}]   ;;  %s1783_s1 = inlined_call_operand.vmem [shape: bf16[1152,128], index: 1, kind: input, shape index: {}]   ;;  %s1784_s2 = inlined_call_operand.vmem [shape: bf16[2,2,2,128], index: 2, kind: output, shape index: {}]  }
   0x1 LB: > { %s1117_s10 = sadd.s32 4294967295, %s1463_s9   ;;  %p1121_p0 = scmp.ge.s32.totalorder %s1463_s9, 1  ;;  %s1463_s9 = sphi %s1499_s9, %s12_s9  }
   0x2   : > { %p112_p1 = scmp.lt.s32.totalorder %s1463_s9, 3 }
   0x4   : > { %p113_p2 = pnand %p1121_p0, %p112_p1 }
   0x5   : > { %p133_p3 = scmp.lt.s32.totalorder (!%p113_p2), %s1117_s10, 1  ;;  %v1517_v0 = vmov (!%p113_p2), 0.0   ;;  %v1519_v1 = vmov (!%p113_p2), 0.0   ;;  %s1521_s19 = smov (!%p113_p2), 0  }
   0x6   : > { %116 = sbr.rel (%p113_p2) target bundleno = 376 (0x178), region = 28 }
   0xd   : > { %s1788_s10 = smov (!%p133_p3, %s1117_s10), 1 }
   0xe   : > { %s1206_s11 = sshll.u32 %s1788_s10, 3  ;;  %s1124_s12 = sshll.u32 %s1788_s10, 1 }
   0xf   : > { %s1510_s15 = scalar_lea.vmem %s1782_s0, %s1206_s11  ;;  %s1515_s18 = scalar_lea.vmem %s1784_s2, %s1124_s12 }
  0x10 LB: >> { %v1367_v2 = vld [vmem:[%s1783_s1 + $0x40] sm:$0xff]   ;;  %v1371_v6 = vld [vmem:[%s1783_s1 + $0x48] sm:$0xff]   ;;  %v1375_v10 = vld [vmem:[%s1783_s1 + $0x50] sm:$0xff]   ;;  %s1125_s30 = sshll.u32 %s1475_s19, 1  ;;  %v166_v32 = vlaneseq  ;;  %v1481_v36 = vmov 1983009808   ;;  %s1475_s19 = sphi %s1521_s19, %s148_s19   ;;  %v1471_v1 = vphi %v1519_v1, %v1786_v1   ;;  %v1467_v0 = vphi %v1517_v0, %v1785_v0  }
  0x11   : >> { %v1368_v3 = vld [vmem:[%s1783_s1 + $0xc0] sm:$0xff]   ;;  %1207 = vmatprep.subr.bf16.mxu0 %v1367_v2  ;;  %v1372_v7 = vld [vmem:[%s1783_s1 + $0xc8] sm:$0xff]   ;;  %v1376_v11 = vld [vmem:[%s1783_s1 + $0xd0] sm:$0xff]   ;;  %s1632_s10 = scalar_lea.vmem %s1510_s15, %s1125_s30  ;;  %v164_v37 = vunpack.c.l.s4 %v1481_v36  ;;  %vm1483_vm0 = vmmov 0   ;;  %vm995_vm1 = vcmask 1041408   ;;  %s993_s27 = scalar_lea.vmem [#allocation2], %s1125_s30 }
  0x12   : >> { %v1369_v4 = vld [vmem:[%s1783_s1] sm:$0xff]   ;;  %1229 = vmatprep.subr.bf16.mxu1 %v1368_v3  ;;  %v1373_v8 = vld [vmem:[%s1783_s1 + $0x8] sm:$0xff]   ;;  %v1377_v12 = vld [vmem:[%s1783_s1 + $0x10] sm:$0xff]   ;;  %v167_v38 = vshrl.u32 %v166_v32, 7  ;;  %s148_s19 = sadd.s32 1, %s1475_s19  }
  0x13   : >> { %v1370_v5 = vld [vmem:[%s1783_s1 + $0x80] sm:$0xff]   ;;  %1208 = vmatpush3.bf16.msra.mxu0 %v1369_v4  ;;  %v1374_v9 = vld [vmem:[%s1783_s1 + $0x88] sm:$0xff]   ;;  %v1378_v13 = vld [vmem:[%s1783_s1 + $0x90] sm:$0xff]   ;;  %v165_v40 = vunpack.c.0.s8 %v164_v37  ;;  %p145_p4 = scmp.ge.s32.totalorder %s148_s19, 2  }
  0x14   : >> { %1230 = vmatpush3.bf16.msra.mxu1 %v1370_v5  ;;  %1209 = vmatprep.subr.bf16.mxu0 %v1371_v6  ;;  %v1379_v14 = vld [vmem:[%s1783_s1 + $0x58] sm:$0xff]   ;;  %v1383_v18 = vld [vmem:[%s1783_s1 + $0x60] sm:$0xff]   ;;  %v1387_v22 = vld [vmem:[%s1783_s1 + $0x68] sm:$0xff]   ;;  %s1477_s30 = smov (%p145_p4), 0  }
  0x15   : >> { %1231 = vmatprep.subr.bf16.mxu1 %v1372_v7  ;;  %v1380_v15 = vld [vmem:[%s1783_s1 + $0xd8] sm:$0xff]   ;;  %v1384_v19 = vld [vmem:[%s1783_s1 + $0xe0] sm:$0xff]   ;;  %v1388_v23 = vld [vmem:[%s1783_s1 + $0xe8] sm:$0xff]   ;;  %v1642_v43 = vsub.s32 %v165_v40, %v167_v38 }
  0x16   : >> { %v1381_v16 = vld [vmem:[%s1783_s1 + $0x18] sm:$0xff]   ;;  %v1385_v20 = vld [vmem:[%s1783_s1 + $0x20] sm:$0xff]   ;;  %v1389_v24 = vld [vmem:[%s1783_s1 + $0x28] sm:$0xff]  }
  0x17   : >> { %1210 = vmatpush3.bf16.msra.mxu0 %v1373_v8  ;;  %v1382_v17 = vld [vmem:[%s1783_s1 + $0x98] sm:$0xff]   ;;  %v1386_v21 = vld [vmem:[%s1783_s1 + $0xa0] sm:$0xff]   ;;  %v1390_v25 = vld [vmem:[%s1783_s1 + $0xa8] sm:$0xff]  }
  0x18   : >> { %1232 = vmatpush3.bf16.msra.mxu1 %v1374_v9  ;;  %1211 = vmatprep.subr.bf16.mxu0 %v1375_v10  ;;  %v1391_v26 = vld [vmem:[%s1783_s1 + $0x70] sm:$0xff]   ;;  %v1395_v30 = vld [vmem:[%s1783_s1 + $0x78] sm:$0xff]   ;;  %v1127_v35 = vld [vmem:[%s1632_s10 + $0x2] sm:$0x3] }
  0x19   : >> { %1233 = vmatprep.subr.bf16.mxu1 %v1376_v11  ;;  %v1392_v27 = vld [vmem:[%s1783_s1 + $0xf0] sm:$0xff]   ;;  %v1396_v31 = vld [vmem:[%s1783_s1 + $0xf8] sm:$0xff]   ;;  %864 = vmatprep.mubr.bf16.mxu1 %v1127_v35  ;;  %v1399_v39 = vld [vmem:[%s1783_s1 + $0x140] sm:$0xff]   ;;  %v1658_v54 = vrot.slane %v1127_v35, %v1642_v43 }
  0x1a   : >> { %v1393_v28 = vld [vmem:[%s1783_s1 + $0x30] sm:$0xff]   ;;  %v1397_v33 = vld [vmem:[%s1783_s1 + $0x38] sm:$0xff]   ;;  %v1401_v41 = vld [vmem:[%s1783_s1 + $0x1c0] sm:$0xff]  }
  0x1b   : >> { %1212 = vmatpush3.bf16.msra.mxu0 %v1377_v12  ;;  %v1394_v29 = vld [vmem:[%s1783_s1 + $0xb0] sm:$0xff]   ;;  %v1398_v34 = vld [vmem:[%s1783_s1 + $0xb8] sm:$0xff]   ;;  %v153_v42 = vld [vmem:[%s1632_s10] sm:$0x3]  ;;  %v196_v58 = vrot.slane %v1658_v54, 1 }
  0x1c   : >> { %1234 = vmatpush3.bf16.msra.mxu1 %v1378_v13  ;;  %1213 = vmatprep.subr.bf16.mxu0 %v1379_v14  ;;  %v169_v44 = vrot.slane %v153_v42, %v1642_v43  ;;  %v1402_v47 = vld [vmem:[%s1783_s1 + $0x180] sm:$0xff]   ;;  %v1405_v49 = vld [vmem:[%s1783_s1 + $0x1c8] sm:$0xff]   ;;  %v1409_v56 = vld [vmem:[%s1783_s1 + $0x1d0] sm:$0xff]  }
  0x1d   : >> { %1235 = vmatprep.subr.bf16.mxu1 %v1380_v15  ;;  %v1400_v51 = vld [vmem:[%s1783_s1 + $0x100] sm:$0xff]   ;;  %v1403_v52 = vld [vmem:[%s1783_s1 + $0x148] sm:$0xff]   ;;  %v1407_v59 = vld [vmem:[%s1783_s1 + $0x150] sm:$0xff]  }
  0x1e   : >> { %v171_v45 = vshrl.u32 %v169_v44, 16  ;;  %v173_v46 = vshll.u32 %v169_v44, 16  ;;  %v178_v48 = vrot.slane %v169_v44, 1  ;;  %v1406_v55 = vld [vmem:[%s1783_s1 + $0x188] sm:$0xff]   ;;  %v1410_v60 = vld [vmem:[%s1783_s1 + $0x190] sm:$0xff]   ;;  %v1413_v61 = vld [vmem:[%s1783_s1 + $0x1d8] sm:$0xff]  }
  0x1f   : >> { %1214 = vmatpush3.bf16.msra.mxu0 %v1381_v16  ;;  %v1404_v57 = vld [vmem:[%s1783_s1 + $0x108] sm:$0xff]   ;;  %v1408_v62 = vld [vmem:[%s1783_s1 + $0x110] sm:$0xff]   ;;  %v1411_v63 = vld [vmem:[%s1783_s1 + $0x158] sm:$0xff]  }
  0x20   : >> { %1236 = vmatpush3.bf16.msra.mxu1 %v1382_v17  ;;  %1215 = vmatprep.subr.bf16.mxu0 %v1383_v18  ;;  %v175_v50 = vrot.slane %v173_v46, 1  ;;  %v1414_v2 = vld [vmem:[%s1783_s1 + $0x198] sm:$0xff]   ;;  %v1417_v3 = vld [vmem:[%s1783_s1 + $0x1e0] sm:$0xff]   ;;  %v1421_v7 = vld [vmem:[%s1783_s1 + $0x1e8] sm:$0xff]   ;;  %v191_v18 = vshll.u32 %v1658_v54, 16 }
  0x21   : >> { %1237 = vmatprep.subr.bf16.mxu1 %v1384_v19  ;;  %v1412_v4 = vld [vmem:[%s1783_s1 + $0x118] sm:$0xff]   ;;  %v1415_v5 = vld [vmem:[%s1783_s1 + $0x160] sm:$0xff]   ;;  %v1419_v9 = vld [vmem:[%s1783_s1 + $0x168] sm:$0xff]  }
  0x22   : >> { %v176_v53 = vor.u32 %v175_v50, %v171_v45  ;;  %v1418_v6 = vld [vmem:[%s1783_s1 + $0x1a0] sm:$0xff]   ;;  %v1422_v10 = vld [vmem:[%s1783_s1 + $0x1a8] sm:$0xff]   ;;  %v1425_v11 = vld [vmem:[%s1783_s1 + $0x1f0] sm:$0xff]  }
  0x23   : >> { %1216 = vmatpush3.bf16.msra.mxu0 %v1385_v20  ;;  %v1416_v8 = vld [vmem:[%s1783_s1 + $0x120] sm:$0xff]   ;;  %v1420_v12 = vld [vmem:[%s1783_s1 + $0x128] sm:$0xff]   ;;  %v1423_v13 = vld [vmem:[%s1783_s1 + $0x170] sm:$0xff]  }
  0x24   : >> { %1238 = vmatpush3.bf16.msra.mxu1 %v1386_v21  ;;  %1217 = vmatprep.subr.bf16.mxu0 %v1387_v22  ;;  %v1426_v14 = vld [vmem:[%s1783_s1 + $0x1b0] sm:$0xff]   ;;  %v1129_v15 = vld [vmem:[%s1632_s10 + $0x4] sm:$0x3]  ;;  %v1429_v16 = vld [vmem:[%s1783_s1 + $0x1f8] sm:$0xff]  }
  0x25   : >> { %1239 = vmatprep.subr.bf16.mxu1 %v1388_v23  ;;  %824 = vmatprep.mubr.bf16.mxu0 %v176_v53  ;;  %v205_v17 = vrot.slane %v1129_v15, %v1642_v43  ;;  %v1424_v19 = vld [vmem:[%s1783_s1 + $0x130] sm:$0xff]   ;;  %v1430_v22 = vld [vmem:[%s1783_s1 + $0x1b8] sm:$0xff]   ;;  %v1432_v32 = vld [vmem:[%s1783_s1 + $0x208] sm:$0xff]  }
  0x26   : >> { %v1427_v23 = vld [vmem:[%s1783_s1 + $0x178] sm:$0xff]   ;;  %v1435_v35 = vld [vmem:[%s1783_s1 + $0x220] sm:$0xff]   ;;  %v1436_v36 = vld [vmem:[%s1783_s1 + $0x228] sm:$0xff]  }
  0x27   : >> { %1218 = vmatpush3.bf16.msra.mxu0 %v1389_v24  ;;  %v207_v20 = vshrl.u32 %v205_v17, 16  ;;  %v209_v21 = vshll.u32 %v205_v17, 16  ;;  %v1437_v37 = vld [vmem:[%s1783_s1 + $0x230] sm:$0xff]   ;;  %v1438_v38 = vld [vmem:[%s1783_s1 + $0x238] sm:$0xff]  }
  0x28   : >> { %1240 = vmatpush3.bf16.msra.mxu1 %v1390_v25  ;;  %1219 = vmatprep.subr.bf16.mxu0 %v1391_v26  ;;  %v189_v25 = vshrl.u32 %v1658_v54, 16  ;;  %v193_v26 = vrot.slane %v191_v18, 1 }
  0x29   : >> { %1241 = vmatprep.subr.bf16.mxu1 %v1392_v27  ;;  %v211_v24 = vrot.slane %v209_v21, 1 }
  0x2b   : >> { %1220 = vmatpush3.bf16.msra.mxu0 %v1393_v28  ;;  %v212_v27 = vor.u32 %v211_v24, %v207_v20  ;;  %v1428_v28 = vld [vmem:[%s1783_s1 + $0x138] sm:$0xff]  }
  0x2c   : >> { %1242 = vmatpush3.bf16.msra.mxu1 %v1394_v29  ;;  %1221 = vmatprep.subr.bf16.mxu0 %v1395_v30  ;;  %v194_v29 = vor.u32 %v193_v26, %v189_v25  ;;  %v1431_v30 = vld [vmem:[%s1783_s1 + $0x200] sm:$0xff]  }
  0x2d   : >> { %1243 = vmatprep.subr.bf16.mxu1 %v1396_v31  ;;  %v1482_v31 = vmov 0.0  }
  0x2f   : >> { %1222 = vmatpush3.bf16.msra.mxu0 %v1397_v33  ;;  %v1433_v33 = vld [vmem:[%s1783_s1 + $0x210] sm:$0xff]  }
  0x30   : >> { %1244 = vmatpush3.bf16.msra.mxu1 %v1398_v34  ;;  %1251 = vmatprep.subr.bf16.mxu0 %v1399_v39  ;;  %v1434_v34 = vld [vmem:[%s1783_s1 + $0x218] sm:$0xff]   ;;  %v214_v39 = vrot.slane %v205_v17, 1 }
  0x31   : >> { %1273 = vmatprep.subr.bf16.mxu1 %v1401_v41 }
  0x32   : >> { %825 = vmatmul.mubr.bf16.vlgmr.msra.gmra.mrb[0].mxu0 %v153_v42 }
  0x33   : >> { %865 = vmatmul.mubr.bf16.vlgmr.msra.gmra.mrb[0].mxu1 %v178_v48  ;;  %1252 = vmatpush3.bf16.msra.mxu0 %v1400_v51 }
  0x34   : >> { %1274 = vmatpush3.bf16.msra.mxu1 %v1402_v47  ;;  %1253 = vmatprep.subr.bf16.mxu0 %v1403_v52 }
  0x35   : >> { %1275 = vmatprep.subr.bf16.mxu1 %v1405_v49  ;;  %904 = vmatprep.mubr.bf16.mxu0 %v196_v58 }
  0x36   : >> { %944 = vmatprep.mubr.bf16.mxu1 %v212_v27 }
  0x37   : >> { %1254 = vmatpush3.bf16.msra.mxu0 %v1404_v57 }
  0x38   : >> { %1276 = vmatpush3.bf16.msra.mxu1 %v1406_v55  ;;  %1255 = vmatprep.subr.bf16.mxu0 %v1407_v59 }
  0x39   : >> { %1277 = vmatprep.subr.bf16.mxu1 %v1409_v56 }
  0x3b   : >> { %1256 = vmatpush3.bf16.msra.mxu0 %v1408_v62 }
  0x3c   : >> { %1278 = vmatpush3.bf16.msra.mxu1 %v1410_v60  ;;  %1257 = vmatprep.subr.bf16.mxu0 %v1411_v63 }
  0x3d   : >> { %1279 = vmatprep.subr.bf16.mxu1 %v1413_v61 }
  0x3f   : >> { %1258 = vmatpush3.bf16.msra.mxu0 %v1412_v4 }
  0x40   : >> { %1280 = vmatpush3.bf16.msra.mxu1 %v1414_v2  ;;  %1259 = vmatprep.subr.bf16.mxu0 %v1415_v5 }
  0x41   : >> { %1281 = vmatprep.subr.bf16.mxu1 %v1417_v3 }
  0x43   : >> { %1260 = vmatpush3.bf16.msra.mxu0 %v1416_v8 }
  0x44   : >> { %1282 = vmatpush3.bf16.msra.mxu1 %v1418_v6  ;;  %1261 = vmatprep.subr.bf16.mxu0 %v1419_v9 }
  0x45   : >> { %1283 = vmatprep.subr.bf16.mxu1 %v1421_v7 }
  0x47   : >> { %1262 = vmatpush3.bf16.msra.mxu0 %v1420_v12 }
  0x48   : >> { %1284 = vmatpush3.bf16.msra.mxu1 %v1422_v10  ;;  %1263 = vmatprep.subr.bf16.mxu0 %v1423_v13 }
  0x49   : >> { %1285 = vmatprep.subr.bf16.mxu1 %v1425_v11 }
  0x4b   : >> { %1264 = vmatpush3.bf16.msra.mxu0 %v1424_v19 }
  0x4c   : >> { %1286 = vmatpush3.bf16.msra.mxu1 %v1426_v14  ;;  %1265 = vmatprep.subr.bf16.mxu0 %v1427_v23 }
  0x4d   : >> { %1287 = vmatprep.subr.bf16.mxu1 %v1429_v16 }
  0x4f   : >> { %1266 = vmatpush3.bf16.msra.mxu0 %v1428_v28 }
  0x50   : >> { %1288 = vmatpush3.bf16.msra.mxu1 %v1430_v22  ;;  %1304 = vmatprep.subr.bf16.mxu0 %v1482_v31 }
  0x52   : >> { %905 = vmatmul.mubr.bf16.vlgmr.msra.gmra.mrb[4].mxu0 %v194_v29 }
  0x53   : >> { %945 = vmatmul.mubr.bf16.vlgmr.msra.gmra.mrb[4].mxu1 %v1129_v15  ;;  %1305 = vmatpush3.bf16.msra.mxu0 %v1431_v30 }
  0x54   : >> { %1320 = vmatprep.mubr.msk.bf16.mxu0 %vm1483_vm0, %v1482_v31  ;;  %1306 = vmatprep.subr.bf16.mxu0 %v1482_v31 }
  0x57   : >> { %1307 = vmatpush3.bf16.msra.mxu0 %v1432_v32 }
  0x58   : >> { %1308 = vmatprep.subr.bf16.mxu0 %v1482_v31 }
  0x5b   : >> { %1309 = vmatpush3.bf16.msra.mxu0 %v1433_v33 }
  0x5c   : >> { %1310 = vmatprep.subr.bf16.mxu0 %v1482_v31 }
  0x5f   : >> { %1311 = vmatpush3.bf16.msra.mxu0 %v1434_v34 }
  0x60   : >> { %1312 = vmatprep.subr.bf16.mxu0 %v1482_v31 }
  0x63   : >> { %1313 = vmatpush3.bf16.msra.mxu0 %v1435_v35 }
  0x64   : >> { %1314 = vmatprep.subr.bf16.mxu0 %v1482_v31 }
  0x67   : >> { %1315 = vmatpush3.bf16.msra.mxu0 %v1436_v36 }
  0x68   : >> { %1316 = vmatprep.subr.bf16.mxu0 %v1482_v31 }
  0x6b   : >> { %1317 = vmatpush3.bf16.msra.mxu0 %v1437_v37 }
  0x6c   : >> { %1318 = vmatprep.subr.bf16.mxu0 %v1482_v31 }
  0x6f   : >> { %1319 = vmatpush3.bf16.msra.mxu0 %v1438_v38 }
  0x72   : >> { %1321 = vmatmul.mubr.bf16.vlgmr.msra.gmra.mrb[8].mxu0 %v214_v39 }
 0x105   : >> { %v1223_v45 = vpop.f32.mrb[0].mxu0 }
 0x106   : >> { %v1245_v40 = vpop.f32.mrb[0].mxu1  ;;  %v1224_v46 = vpop.f32.mrb[1].mxu0 }
 0x107   : >> { %v1246_v41 = vpop.f32.mrb[1].mxu1  ;;  %v1225_v47 = vadd.f32 %v1224_v46, %v1223_v45  ;;  %v1226_v48 = vpop.f32.mrb[2].mxu0 }
 0x108   : >> { %v1247_v42 = vadd.f32 %v1246_v41, %v1245_v40  ;;  %v1248_v43 = vpop.f32.mrb[2].mxu1  ;;  %v1227_v49 = vpop.f32.mrb[3].mxu0 }
 0x109   : >> { %v1249_v44 = vpop.f32.mrb[3].mxu1 }
 0x10a   : >> { %v867_v50 = vadd.f32 %v1247_v42, %v1225_v47 }
 0x125   : >> { %v1267_v56 = vpop.f32.mrb[4].mxu0 }
 0x126   : >> { %v1289_v51 = vpop.f32.mrb[4].mxu1  ;;  %v1268_v57 = vpop.f32.mrb[5].mxu0 }
 0x127   : >> { %v1290_v52 = vpop.f32.mrb[5].mxu1  ;;  %v1269_v58 = vadd.f32 %v1268_v57, %v1267_v56  ;;  %v1270_v59 = vpop.f32.mrb[6].mxu0 }
 0x128   : >> { %v1291_v53 = vadd.f32 %v1290_v52, %v1289_v51  ;;  %v1292_v54 = vpop.f32.mrb[6].mxu1  ;;  %v1271_v60 = vpop.f32.mrb[7].mxu0 }
 0x129   : >> { %v1293_v55 = vpop.f32.mrb[7].mxu1  ;;  %v907_v61 = vadd.f32 %v1269_v58, %v867_v50 }
 0x12b   : >> { %v947_v62 = vadd.f32 %v1291_v53, %v907_v61 }
 0x145   : >> { %v986_v63 = vpop.f32.mrb[8].mxu0 }
 0x146   : >> { %v987_v2 = vadd.f32 %v986_v63, %v947_v62  ;;  %v1322_v3 = vpop.f32.mrb[9].mxu0 }
 0x147   : >> { %v989_v4 = vpop.f32.mrb[10].mxu0 }
 0x148   : >> { %994 = vst [vmem:[%s993_s27] sm:$0x3] %v987_v2  ;;  %v996_v5 = vsel %vm995_vm1, %v987_v2, 0.0  ;;  %v1004_v6 = vmul.f32 %v987_v2, %v987_v2  ;;  %v1323_v7 = vpop.f32.mrb[11].mxu0 }
 0x149   : >> { %v997_v8 = vrot.slane %v996_v5, 4 }
 0x14a   : >> { %v1005_v9 = vsel %vm995_vm1, %v1004_v6, 0.0 }
 0x14b   : >> { %v998_v10 = vadd.f32 %v997_v8, %v996_v5  ;;  %v1006_v11 = vrot.slane %v1005_v9, 4 }
 0x14d   : >> { %v999_v12 = vrot.slane %v998_v10, 2  ;;  %v1007_v13 = vadd.f32 %v1006_v11, %v1005_v9 }
 0x14f   : >> { %v1000_v14 = vadd.f32 %v999_v12, %v998_v10  ;;  %v1008_v15 = vrot.slane %v1007_v13, 2 }
 0x151   : >> { %v1001_v16 = vrot.slane %v1000_v14, 1  ;;  %v1009_v17 = vadd.f32 %v1008_v15, %v1007_v13 }
 0x153   : >> { %v1002_v18 = vadd.f32 %v1001_v16, %v1000_v14  ;;  %v1010_v19 = vrot.slane %v1009_v17, 1  ;;  %147 = sbr.rel (!%p145_p4) target bundleno = 16 (0x10), region = 78 }
 0x155   : >> { %v1003_v20 = vadd.f32 %v1471_v1, %v1002_v18   ;;  %v1011_v21 = vadd.f32 %v1010_v19, %v1009_v17 }
 0x157   : >> { %v1012_v22 = vadd.f32 %v1467_v0, %v1011_v21   ;;  %v1786_v1 = vmov %v1003_v20  ;;  %v1013_v23 = vmul.f32 (%p145_p4), 0.25, %v1003_v20 }
 0x159   : >> { %v1785_v0 = vmov %v1012_v22  ;;  %v1014_v24 = vmul.f32 (%p145_p4), 0.25, %v1012_v22  ;;  %v1015_v25 = vmul.f32 (%p145_p4), %v1013_v23, %v1013_v23 }
 0x15b   : > { %v1016_v26 = vsub.f32 %v1014_v24, %v1015_v25 }
 0x15d   : > { %v1017_v27 = vmax.f32 %v1016_v26, 0.0 }
 0x15f   : > { %v1018_v28 = vadd.f32 1e-05, %v1017_v27 }
 0x161   : > { %1439 = vrsqrt.f32 %v1018_v28 }
 0x16b   : > { %v1440_v1 = vpop.eup %1439 }
 0x16c LB: >> { %s1203_s28 = sshll.u32 %s1479_s30, 1  ;;  %s1033_s19 = scalar_lea.vmem %s1515_s18, %s1479_s30  ;;  %s1479_s30 = sphi %s1477_s30, %s1025_s30  }
 0x16d   : >> { %s1027_s10 = scalar_lea.vmem [#allocation2], %s1203_s28  ;;  %s1025_s30 = sadd.s32 1, %s1479_s30  }
 0x16e   : >> { %v1028_v29 = vld [vmem:[%s1027_s10] sm:$0x3]  ;;  %p1022_p5 = scmp.ge.s32.totalorder %s1025_s30, 2  }
 0x16f   : >> { %v1029_v30 = vsub.f32 %v1028_v29, %v1013_v23 }
 0x171   : >> { %v1030_v31 = vmul.f32 %v1440_v1, %v1029_v30  ;;  %1024 = sbr.rel (!%p1022_p5) target bundleno = 364 (0x16c), region = 89 }
 0x173   : >> { %v1031_v32 = vmax.f32 %v1030_v31, 0.0 }
 0x175   : >> { %v1032_v0 = vpack.c.bf16 %v1031_v32, %v1031_v32 }
 0x177   : >> { %1034 = vst [vmem:[%s1033_s19] sm:$0x1] %v1032_v0 }
 0x178 PF: > { %s12_s9 = sadd.s32 1, %s1463_s9  }
 0x179   : > { %p9_p6 = scmp.ge.s32.totalorder %s12_s9, 4  }
 0x17b   :  { %11 = sbr.rel (!%p9_p6) target bundleno = 1 (0x1), region = 100 }

// kernel: pix2pixhd_forward.52
= control target key start
LH: loop header
LB: loop body
LE: loop exit
PB: predicated region body
PF: predicated region fallthrough
CT: control target
= control target key end

     0   :  { %s733_s9 = smov 0   ;;  %s845_s0 = inlined_call_operand.vmem [shape: bf16[2,5,5,64], index: 0, kind: input, shape index: {}]   ;;  %s846_s1 = inlined_call_operand.vmem [shape: bf16[256,128], index: 1, kind: input, shape index: {}]   ;;  %s847_s2 = inlined_call_operand.vmem [shape: bf16[2,4,4,128], index: 2, kind: output, shape index: {}]  }
   0x1 LB: > { %s552_s10 = sadd.s32 4294967295, %s696_s9   ;;  %p556_p0 = scmp.ge.s32.totalorder %s696_s9, 1  ;;  %s696_s9 = sphi %s733_s9, %s12_s9  }
   0x2   : > { %p112_p1 = scmp.lt.s32.totalorder %s696_s9, 3 }
   0x4   : > { %p113_p2 = pnand %p556_p0, %p112_p1 }
   0x5   : > { %p134_p3 = scmp.lt.s32.totalorder (!%p113_p2), %s552_s10, 1  ;;  %v751_v0 = vmov (!%p113_p2), 0.0   ;;  %v753_v1 = vmov (!%p113_p2), 0.0   ;;  %s755_s19 = smov (!%p113_p2), 0  }
   0x6   : > { %116 = sbr.rel (%p113_p2) target bundleno = 665 (0x299), region = 28 }
   0xd   : > { %s851_s10 = smov (!%p134_p3, %s552_s10), 1 }
   0xe   : > { %s609_s11 = smul.u32 20, %s851_s10  ;;  %s586_s12 = sshll.u32 %s851_s10, 3 }
   0xf   : > { %s744_s15 = scalar_lea.vmem %s847_s2, %s586_s12 }
  0x10   : > { %s749_s18 = scalar_lea.vmem %s845_s0, %s609_s11 }
  0x11 LB: >> { %v656_v2 = vld [vmem:[%s846_s1 + $0x40] sm:$0xff]   ;;  %s560_s24 = sshll.u32 %s708_s19, 2  ;;  %v658_v4 = vld [vmem:[%s846_s1 + $0x48] sm:$0xff]   ;;  %v660_v10 = vld [vmem:[%s846_s1 + $0x50] sm:$0xff]   ;;  %s714_s13 = smov 64   ;;  %vm184_vm0 = vcmask 523264   ;;  %s708_s19 = sphi %s755_s19, %s150_s19   ;;  %v704_v1 = vphi %v753_v1, %v849_v1   ;;  %v700_v0 = vphi %v751_v0, %v848_v0  }
  0x12   : >> { %v657_v3 = vld [vmem:[%s846_s1] sm:$0xff]   ;;  %587 = vmatprep.subr.bf16.mxu0 %v656_v2  ;;  %s154_s27 = scalar_lea.vmem %s749_s18, %s560_s24  ;;  %v659_v5 = vld [vmem:[%s846_s1 + $0x8] sm:$0xff]   ;;  %v661_v14 = vld [vmem:[%s846_s1 + $0x10] sm:$0xff]   ;;  %vm364_vm1 = vcmask 1043456   ;;  %s362_s4 = scalar_lea.vmem [#allocation2], %s560_s24 }
  0x13   : >> { %588 = vmatpush3.bf16.msra.mxu0 %v657_v3  ;;  %v562_v6 = vld [vmem:[%s154_s27 + $0x4] sm:$0x7]  ;;  %v155_v7 = vld [vmem:[%s154_s27] sm:$0x7]  ;;  %v662_v15 = vld [vmem:[%s846_s1 + $0x58] sm:$0xff]   ;;  %s150_s19 = sadd.s32 1, %s708_s19  }
  0x14   : >> { %589 = vmatprep.subr.bf16.mxu0 %v658_v4  ;;  %v564_v8 = vcombine.low %v562_v6, %v562_v6  ;;  %v563_v9 = vcombine.low %v155_v7, %v155_v7  ;;  %v663_v20 = vld [vmem:[%s846_s1 + $0x18] sm:$0xff]   ;;  %v664_v21 = vld [vmem:[%s846_s1 + $0x60] sm:$0xff]   ;;  %v666_v24 = vld [vmem:[%s846_s1 + $0x68] sm:$0xff]   ;;  %p147_p4 = scmp.ge.s32.totalorder %s150_s19, 4  }
  0x15   : >> { %v665_v23 = vld [vmem:[%s846_s1 + $0x20] sm:$0xff]   ;;  %v667_v25 = vld [vmem:[%s846_s1 + $0x28] sm:$0xff]   ;;  %v668_v26 = vld [vmem:[%s846_s1 + $0x70] sm:$0xff]   ;;  %s715_s24 = smov (%p147_p4), 96   ;;  %s716_s5 = smov (%p147_p4), 64   ;;  %vm427_vm2 = vcmask (%p147_p4), 261120  }
  0x16   : >> { %v176_v11 = vshrl.u32 %v564_v8, 16  ;;  %v178_v12 = vshll.u32 %v564_v8, 16  ;;  %v166_v13 = vshll.u32 %v563_v9, 16  ;;  %v164_v17 = vshrl.u32 %v563_v9, 16  ;;  %v669_v27 = vld [vmem:[%s846_s1 + $0x30] sm:$0xff]   ;;  %v670_v28 = vld [vmem:[%s846_s1 + $0x78] sm:$0xff]  }
  0x17   : >> { %590 = vmatpush3.bf16.msra.mxu0 %v659_v5  ;;  %v671_v29 = vld [vmem:[%s846_s1 + $0x38] sm:$0xff]   ;;  %s717_s6 = smov (%p147_p4), 32   ;;  %vm431_vm3 = vcmask (%p147_p4), 785408   ;;  %s710_s18 = smov (%p147_p4), 0  }
  0x18   : >> { %591 = vmatprep.subr.bf16.mxu0 %v660_v10  ;;  %v180_v16 = vrot.slane %v178_v12, 1  ;;  %v168_v18 = vrot.slane %v166_v13, 1 }
  0x1a   : >> { %v181_v19 = vor.u32 %v180_v16, %v176_v11  ;;  %v169_v22 = vor.u32 %v168_v18, %v164_v17 }
  0x1b   : >> { %592 = vmatpush3.bf16.msra.mxu0 %v661_v14 }
  0x1c   : >> { %593 = vmatprep.subr.bf16.mxu0 %v662_v15  ;;  %182 = vrot.lane.b32.xlu0 %v181_v19, %s714_s13 }
  0x1f   : >> { %594 = vmatpush3.bf16.msra.mxu0 %v663_v20 }
  0x20   : >> { %595 = vmatprep.subr.bf16.mxu0 %v664_v21  ;;  %170 = vrot.lane.b32.xlu0 %v169_v22, %s714_s13 }
  0x23   : >> { %596 = vmatpush3.bf16.msra.mxu0 %v665_v23 }
  0x24   : >> { %597 = vmatprep.subr.bf16.mxu0 %v666_v24 }
  0x27   : >> { %598 = vmatpush3.bf16.msra.mxu0 %v667_v25 }
  0x28   : >> { %599 = vmatprep.subr.bf16.mxu0 %v668_v26 }
  0x2b   : >> { %600 = vmatpush3.bf16.msra.mxu0 %v669_v27 }
  0x2c   : >> { %601 = vmatprep.subr.bf16.mxu0 %v670_v28 }
  0x2f   : >> { %602 = vmatpush3.bf16.msra.mxu0 %v671_v29 }
  0x8e   : >> { %v183_v30 = vpop.permute.xlu0 %182 }
  0x8f   : >> { %v191_v31 = vsel %vm184_vm0, %v562_v6, %v183_v30 }
  0x90   : >> { %353 = vmatprep.mubr.bf16.mxu0 %v191_v31 }
  0x92   : >> { %v171_v32 = vpop.permute.xlu0 %170 }
  0x93   : >> { %v187_v33 = vsel %vm184_vm0, %v155_v7, %v171_v32 }
  0x94   : >> { %354 = vmatmul.mubr.bf16.vlgmr.msra.gmra.mrb[0].mxu0 %v187_v33 }
 0x167   : >> { %v603_v34 = vpop.f32.mrb[0].mxu0 }
 0x168   : >> { %v604_v35 = vpop.f32.mrb[1].mxu0 }
 0x169   : >> { %v605_v36 = vadd.f32 %v604_v35, %v603_v34  ;;  %v606_v37 = vpop.f32.mrb[2].mxu0 }
 0x16a   : >> { %v607_v38 = vpop.f32.mrb[3].mxu0 }
 0x16b   : >> { %363 = vst [vmem:[%s362_s4] sm:$0xf] %v605_v36  ;;  %v365_v39 = vsel %vm364_vm1, %v605_v36, 0.0  ;;  %v373_v40 = vmul.f32 %v605_v36, %v605_v36 }
 0x16c   : >> { %v366_v41 = vrot.slane %v365_v39, 4 }
 0x16d   : >> { %v374_v42 = vsel %vm364_vm1, %v373_v40, 0.0 }
 0x16e   : >> { %v367_v43 = vadd.f32 %v366_v41, %v365_v39  ;;  %v375_v44 = vrot.slane %v374_v42, 4 }
 0x170   : >> { %v368_v45 = vrot.slane %v367_v43, 2  ;;  %v376_v46 = vadd.f32 %v375_v44, %v374_v42 }
 0x172   : >> { %v369_v47 = vadd.f32 %v368_v45, %v367_v43  ;;  %v377_v48 = vrot.slane %v376_v46, 2 }
 0x174   : >> { %v370_v49 = vrot.slane %v369_v47, 1  ;;  %v378_v50 = vadd.f32 %v377_v48, %v376_v46 }
 0x176   : >> { %v371_v51 = vadd.f32 %v370_v49, %v369_v47  ;;  %v379_v52 = vrot.slane %v378_v50, 1  ;;  %149 = sbr.rel (!%p147_p4) target bundleno = 17 (0x11), region = 77 }
 0x178   : >> { %v372_v53 = vadd.f32 %v704_v1, %v371_v51   ;;  %v380_v54 = vadd.f32 %v379_v52, %v378_v50 }
 0x17a   : >> { %v381_v55 = vadd.f32 %v700_v0, %v380_v54   ;;  %v849_v1 = vmov %v372_v53  ;;  %384 = vrot.lane.b32.xlu0 (%p147_p4), %v372_v53, %s715_s24 }
 0x17c   : >> { %v848_v0 = vmov %v381_v55  ;;  %398 = vrot.lane.b32.xlu1 (%p147_p4), %v381_v55, %s715_s24 }
 0x17e   : > { %388 = vrot.lane.b32.xlu0 %v372_v53, %s716_s5 }
 0x180   : > { %392 = vrot.lane.b32.xlu1 %v372_v53, %s717_s6 }
 0x182   : > { %402 = vrot.lane.b32.xlu0 %v381_v55, %s716_s5 }
 0x184   : > { %406 = vrot.lane.b32.xlu1 %v381_v55, %s717_s6 }
 0x1ec   : > { %v385_v56 = vpop.permute.xlu0 %384 }
 0x1ed   : > { %v387_v58 = vadd.f32 %v385_v56, %v372_v53 }
 0x1ee   : > { %v399_v57 = vpop.permute.xlu1 %398 }
 0x1ef   : > { %v401_v62 = vadd.f32 %v399_v57, %v381_v55 }
 0x1f0   : > { %v389_v59 = vpop.permute.xlu0 %388 }
 0x1f1   : > { %v391_v61 = vadd.f32 %v389_v59, %v387_v58 }
 0x1f2   : > { %v393_v60 = vpop.permute.xlu1 %392 }
 0x1f3   : > { %v395_v63 = vadd.f32 %v393_v60, %v391_v61 }
 0x1f4   : > { %v403_v0 = vpop.permute.xlu0 %402 }
 0x1f5   : > { %v410_v2 = vmul.f32 0.015625, %v395_v63  ;;  %v405_v3 = vadd.f32 %v403_v0, %v401_v62 }
 0x1f6   : > { %v407_v1 = vpop.permute.xlu1 %406 }
 0x1f7   : > { %v409_v4 = vadd.f32 %v407_v1, %v405_v3  ;;  %418 = vrot.lane.b32.xlu0 %v410_v2, %s717_s6  ;;  %v412_v6 = vmul.f32 %v410_v2, %v410_v2 }
 0x1f9   : > { %v411_v5 = vmul.f32 0.015625, %v409_v4 }
 0x1fb   : > { %v413_v7 = vsub.f32 %v411_v5, %v412_v6  ;;  %421 = vrot.lane.b32.xlu0 %v410_v2, %s716_s5 }
 0x1fd   : > { %v414_v8 = vmax.f32 %v413_v7, 0.0 }
 0x1ff   : > { %v415_v9 = vadd.f32 1e-05, %v414_v8  ;;  %424 = vrot.lane.b32.xlu0 %v410_v2, %s715_s24 }
 0x201   : > { %672 = vrsqrt.f32 %v415_v9 }
 0x20b   : > { %v673_v10 = vpop.eup %672 }
 0x20c   : > { %434 = vrot.lane.b32.xlu1 %v673_v10, %s717_s6 }
 0x210   : > { %437 = vrot.lane.b32.xlu1 %v673_v10, %s716_s5 }
 0x214   : > { %440 = vrot.lane.b32.xlu1 %v673_v10, %s715_s24 }
 0x269   : > { %v419_v11 = vpop.permute.xlu0 %418 }
 0x26a   : > { %v428_v13 = vsel %vm427_vm2, %v410_v2, %v419_v11 }
 0x26d   : > { %v422_v12 = vpop.permute.xlu0 %421 }
 0x26e   : > { %v430_v14 = vsel %vm184_vm0, %v428_v13, %v422_v12 }
 0x271   : > { %v425_v15 = vpop.permute.xlu0 %424 }
 0x272   : > { %v432_v16 = vsel %vm431_vm3, %v430_v14, %v425_v15 }
 0x27e   : > { %v435_v17 = vpop.permute.xlu1 %434 }
 0x27f   : > { %v443_v19 = vsel %vm427_vm2, %v673_v10, %v435_v17 }
 0x282   : > { %v438_v18 = vpop.permute.xlu1 %437 }
 0x283   : > { %v444_v20 = vsel %vm184_vm0, %v443_v19, %v438_v18 }
 0x286   : > { %v441_v21 = vpop.permute.xlu1 %440 }
 0x287   : > { %v445_v22 = vsel %vm431_vm3, %v444_v20, %v441_v21 }
 0x288 LB: >> { %v455_v23 = vlaneseq  ;;  %s582_s19 = sshll.u32 %s712_s18, 2  ;;  %s583_s8 = sshll.u32 %s712_s18, 1  ;;  %s712_s18 = sphi %s710_s18, %s451_s18  }
 0x289   : >> { %s453_s7 = scalar_lea.vmem [#allocation2], %s582_s19  ;;  %s468_s10 = scalar_lea.vmem %s744_s15, %s583_s8 }
 0x28a   : >> { %v456_v24 = vshrl.u32 %v455_v23, 7  ;;  %v454_v26 = vld [vmem:[%s453_s7] sm:$0xf]  ;;  %s451_s18 = sadd.s32 1, %s712_s18  }
 0x28b   : >> { %p448_p5 = scmp.ge.s32.totalorder %s451_s18, 4  }
 0x28c   : >> { %v457_v25 = vsub.s32 0, %v456_v24 }
 0x28e   : >> { %v458_v27 = vrot.slane %v432_v16, %v457_v25  ;;  %v463_v28 = vrot.slane %v445_v22, %v457_v25 }
 0x290   : >> { %v459_v29 = vsub.f32 %v454_v26, %v458_v27 }
 0x292   : >> { %v464_v30 = vmul.f32 %v463_v28, %v459_v29  ;;  %450 = sbr.rel (!%p448_p5) target bundleno = 648 (0x288), region = 88 }
 0x294   : >> { %v465_v31 = vmax.f32 %v464_v30, 0.0 }
 0x296   : >> { %v466_v32 = vpack.c.bf16 %v465_v31, %v465_v31 }
 0x298   : >> { %469 = vst [vmem:[%s468_s10] sm:$0x3] %v466_v32 }
 0x299 PF: > { %s12_s9 = sadd.s32 1, %s696_s9  }
 0x29a   : > { %p9_p6 = scmp.ge.s32.totalorder %s12_s9, 4  }
 0x29c   :  { %11 = sbr.rel (!%p9_p6) target bundleno = 1 (0x1), region = 99 }

// kernel: pix2pixhd_forward.53
= control target key start
LH: loop header
LB: loop body
LE: loop exit
PB: predicated region body
PF: predicated region fallthrough
CT: control target
= control target key end

     0   :  { %s692_s9 = smov 0   ;;  %s775_s0 = inlined_call_operand.vmem [shape: bf16[2,9,9,32], index: 0, kind: input, shape index: {}]   ;;  %s776_s1 = inlined_call_operand.vmem [shape: bf16[128,64], index: 1, kind: input, shape index: {}]   ;;  %s777_s2 = inlined_call_operand.vmem [shape: bf16[2,8,8,64], index: 2, kind: output, shape index: {}]  }
   0x1 LB: > { %s501_s10 = sadd.s32 4294967295, %s648_s9   ;;  %p505_p0 = scmp.ge.s32.totalorder %s648_s9, 1  ;;  %s648_s9 = sphi %s692_s9, %s12_s9  }
   0x2   : > { %p112_p1 = scmp.lt.s32.totalorder %s648_s9, 3 }
   0x4   : > { %p113_p2 = pnand %p505_p0, %p112_p1 }
   0x5   : > { %p134_p3 = scmp.lt.s32.totalorder (!%p113_p2), %s501_s10, 1  ;;  %v710_v0 = vmov (!%p113_p2), 0.0   ;;  %v712_v1 = vmov (!%p113_p2), 0.0   ;;  %s714_s19 = smov (!%p113_p2), 0  }
   0x6   : > { %116 = sbr.rel (%p113_p2) target bundleno = 663 (0x297), region = 28 }
   0xd   : > { %s781_s10 = smov (!%p134_p3, %s501_s10), 1 }
   0xe   : > { %s561_s11 = smul.u32 72, %s781_s10  ;;  %s530_s12 = sshll.u32 %s781_s10, 5 }
   0xf   : > { %s703_s15 = scalar_lea.vmem %s777_s2, %s530_s12 }
  0x10   : > { %s708_s18 = scalar_lea.vmem %s775_s0, %s561_s11 }
  0x11 LB: >> { %v666_v2 = vmov 0.0   ;;  %v616_v3 = vld [vmem:[%s776_s1] sm:$0xff]   ;;  %s531_s22 = sshll.u32 %s660_s19, 3  ;;  %v617_v4 = vld [vmem:[%s776_s1 + $0x8] sm:$0xff]   ;;  %v618_v13 = vld [vmem:[%s776_s1 + $0x10] sm:$0xff]   ;;  %vm667_vm0 = vmmov 0   ;;  %s660_s19 = sphi %s714_s19, %s150_s19   ;;  %v656_v1 = vphi %v712_v1, %v779_v1   ;;  %v652_v0 = vphi %v710_v0, %v778_v0  }
  0x12   : >> { %541 = vmatprep.subr.bf16.mxu0 %v666_v2  ;;  %s155_s25 = scalar_lea.vmem %s708_s18, %s531_s22  ;;  %v619_v19 = vld [vmem:[%s776_s1 + $0x18] sm:$0xff]   ;;  %557 = vmatprep.mubr.msk.bf16.mxu0 %vm667_vm0, %v666_v2  ;;  %s668_s30 = smov 32   ;;  %v620_v22 = vld [vmem:[%s776_s1 + $0x20] sm:$0xff]   ;;  %v621_v23 = vld [vmem:[%s776_s1 + $0x28] sm:$0xff]   ;;  %vm195_vm1 = vcmask 261120   ;;  %vm199_vm2 = vcmask 523264  }
  0x13   : >> { %542 = vmatpush3.bf16.msra.mxu0 %v616_v3  ;;  %v156_v5 = vld [vmem:[%s155_s25] sm:$0xf]  ;;  %v157_v6 = vld [vmem:[%s155_s25 + $0x4] sm:$0x1]  ;;  %v512_v7 = vld [vmem:[%s155_s25 + $0x8] sm:$0xf] }
  0x14   : >> { %543 = vmatprep.subr.bf16.mxu0 %v666_v2  ;;  %v514_v8 = vcombine.low %v156_v5, %v157_v6  ;;  %v513_v9 = vld [vmem:[%s155_s25 + $0xc] sm:$0x1]  ;;  %v515_v21 = vcombine.low %v512_v7, %v512_v7  ;;  %s669_s3 = smov 96   ;;  %s670_s6 = smov 64   ;;  %v622_v24 = vld [vmem:[%s776_s1 + $0x30] sm:$0xff]   ;;  %v623_v25 = vld [vmem:[%s776_s1 + $0x38] sm:$0xff]  }
  0x15   : >> { %v516_v10 = vcombine.low %v512_v7, %v513_v9  ;;  %vm202_vm3 = vcmask 785408   ;;  %s311_s14 = scalar_lea.vmem [#allocation2], %s531_s22  ;;  %s150_s19 = sadd.s32 1, %s660_s19  }
  0x16   : >> { %v170_v11 = vshrl.u32 %v514_v8, 16  ;;  %v172_v12 = vshll.u32 %v514_v8, 16  ;;  %p147_p4 = scmp.ge.s32.totalorder %s150_s19, 8  }
  0x17   : >> { %544 = vmatpush3.bf16.msra.mxu0 %v617_v4  ;;  %v187_v14 = vshrl.u32 %v516_v10, 16  ;;  %v189_v15 = vshll.u32 %v516_v10, 16  ;;  %s671_s16 = smov (%p147_p4), 112   ;;  %s672_s17 = smov (%p147_p4), 96   ;;  %vm375_vm4 = vcmask (%p147_p4), 130048   ;;  %vm379_vm5 = vcmask (%p147_p4), 392192  }
  0x18   : >> { %545 = vmatprep.subr.bf16.mxu0 %v666_v2  ;;  %v174_v16 = vrot.slane %v172_v12, 1  ;;  %s673_s20 = smov (%p147_p4), 80   ;;  %s674_s18 = smov (%p147_p4), 16  }
  0x19   : >> { %v191_v17 = vrot.slane %v189_v15, 1  ;;  %s675_s19 = smov (%p147_p4), 32   ;;  %s676_s21 = smov (%p147_p4), 48  }
  0x1a   : >> { %v175_v18 = vor.u32 %v174_v16, %v170_v11  ;;  %s662_s22 = smov (%p147_p4), 0  }
  0x1b   : >> { %546 = vmatpush3.bf16.msra.mxu0 %v618_v13  ;;  %v192_v20 = vor.u32 %v191_v17, %v187_v14 }
  0x1c   : >> { %547 = vmatprep.subr.bf16.mxu0 %v666_v2  ;;  %176 = vrot.lane.b32.xlu0 %v175_v18, %s668_s30 }
  0x1d   : >> { %193 = vrot.lane.b32.xlu1 %v192_v20, %s669_s3 }
  0x1f   : >> { %548 = vmatpush3.bf16.msra.mxu0 %v619_v19 }
  0x20   : >> { %549 = vmatprep.subr.bf16.mxu0 %v666_v2  ;;  %181 = vrot.lane.b32.xlu0 %v515_v21, %s670_s6 }
  0x23   : >> { %550 = vmatpush3.bf16.msra.mxu0 %v620_v22 }
  0x24   : >> { %551 = vmatprep.subr.bf16.mxu0 %v666_v2 }
  0x27   : >> { %552 = vmatpush3.bf16.msra.mxu0 %v621_v23 }
  0x28   : >> { %553 = vmatprep.subr.bf16.mxu0 %v666_v2 }
  0x2b   : >> { %554 = vmatpush3.bf16.msra.mxu0 %v622_v24 }
  0x2c   : >> { %555 = vmatprep.subr.bf16.mxu0 %v666_v2 }
  0x2f   : >> { %556 = vmatpush3.bf16.msra.mxu0 %v623_v25 }
  0x8e   : >> { %v177_v26 = vpop.permute.xlu0 %176 }
  0x8f   : >> { %v194_v27 = vpop.permute.xlu1 %193  ;;  %v198_v28 = vsel %vm195_vm1, %v156_v5, %v177_v26 }
  0x92   : >> { %v182_v29 = vpop.permute.xlu0 %181 }
  0x93   : >> { %v201_v30 = vsel %vm199_vm2, %v198_v28, %v182_v29 }
  0x94   : >> { %v204_v31 = vsel %vm202_vm3, %v201_v30, %v194_v27 }
  0x95   : >> { %558 = vmatmul.mubr.bf16.vlgmr.msra.gmra.mrb[0].mxu0 %v204_v31 }
 0x168   : >> { %v304_v32 = vpop.f32.mrb[0].mxu0 }
 0x169   : >> { %312 = vst.msk [vmem:[%s311_s14] sm:$0xff] %vm199_vm2, %v304_v32  ;;  %v313_v33 = vsel %vm199_vm2, %v304_v32, 0.0  ;;  %v321_v34 = vmul.f32 %v304_v32, %v304_v32  ;;  %v559_v35 = vpop.f32.mrb[1].mxu0 }
 0x16a   : >> { %v314_v36 = vrot.slane %v313_v33, 4  ;;  %v307_v37 = vpop.f32.mrb[2].mxu0 }
 0x16b   : >> { %v322_v38 = vsel %vm199_vm2, %v321_v34, 0.0  ;;  %v560_v39 = vpop.f32.mrb[3].mxu0 }
 0x16c   : >> { %v315_v40 = vadd.f32 %v314_v36, %v313_v33  ;;  %v323_v41 = vrot.slane %v322_v38, 4 }
 0x16e   : >> { %v316_v42 = vrot.slane %v315_v40, 2  ;;  %v324_v43 = vadd.f32 %v323_v41, %v322_v38 }
 0x170   : >> { %v317_v44 = vadd.f32 %v316_v42, %v315_v40  ;;  %v325_v45 = vrot.slane %v324_v43, 2 }
 0x172   : >> { %v318_v46 = vrot.slane %v317_v44, 1  ;;  %v326_v47 = vadd.f32 %v325_v45, %v324_v43 }
 0x174   : >> { %v319_v48 = vadd.f32 %v318_v46, %v317_v44  ;;  %v327_v49 = vrot.slane %v326_v47, 1  ;;  %149 = sbr.rel (!%p147_p4) target bundleno = 17 (0x11), region = 77 }
 0x176   : >> { %v320_v50 = vadd.f32 %v656_v1, %v319_v48   ;;  %v328_v51 = vadd.f32 %v327_v49, %v326_v47 }
 0x178   : >> { %v329_v52 = vadd.f32 %v652_v0, %v328_v51   ;;  %v779_v1 = vmov %v320_v50  ;;  %332 = vrot.lane.b32.xlu0 (%p147_p4), %v320_v50, %s671_s16 }
 0x17a   : >> { %v778_v0 = vmov %v329_v52  ;;  %346 = vrot.lane.b32.xlu1 (%p147_p4), %v329_v52, %s671_s16 }
 0x17c   : > { %336 = vrot.lane.b32.xlu0 %v320_v50, %s672_s17 }
 0x17e   : > { %340 = vrot.lane.b32.xlu1 %v320_v50, %s673_s20 }
 0x180   : > { %350 = vrot.lane.b32.xlu0 %v329_v52, %s672_s17 }
 0x182   : > { %354 = vrot.lane.b32.xlu1 %v329_v52, %s673_s20 }
 0x1ea   : > { %v333_v53 = vpop.permute.xlu0 %332 }
 0x1eb   : > { %v335_v55 = vadd.f32 %v333_v53, %v320_v50 }
 0x1ec   : > { %v347_v54 = vpop.permute.xlu1 %346 }
 0x1ed   : > { %v349_v59 = vadd.f32 %v347_v54, %v329_v52 }
 0x1ee   : > { %v337_v56 = vpop.permute.xlu0 %336 }
 0x1ef   : > { %v339_v58 = vadd.f32 %v337_v56, %v335_v55 }
 0x1f0   : > { %v341_v57 = vpop.permute.xlu1 %340 }
 0x1f1   : > { %v343_v60 = vadd.f32 %v341_v57, %v339_v58 }
 0x1f2   : > { %v351_v61 = vpop.permute.xlu0 %350 }
 0x1f3   : > { %v358_v63 = vmul.f32 0.00390625, %v343_v60  ;;  %v353_v0 = vadd.f32 %v351_v61, %v349_v59 }
 0x1f4   : > { %v355_v62 = vpop.permute.xlu1 %354 }
 0x1f5   : > { %v357_v1 = vadd.f32 %v355_v62, %v353_v0  ;;  %366 = vrot.lane.b32.xlu0 %v358_v63, %s674_s18  ;;  %v360_v3 = vmul.f32 %v358_v63, %v358_v63 }
 0x1f7   : > { %v359_v2 = vmul.f32 0.00390625, %v357_v1 }
 0x1f9   : > { %v361_v4 = vsub.f32 %v359_v2, %v360_v3  ;;  %369 = vrot.lane.b32.xlu0 %v358_v63, %s675_s19 }
 0x1fb   : > { %v362_v5 = vmax.f32 %v361_v4, 0.0 }
 0x1fd   : > { %v363_v6 = vadd.f32 1e-05, %v362_v5  ;;  %372 = vrot.lane.b32.xlu0 %v358_v63, %s676_s21 }
 0x1ff   : > { %624 = vrsqrt.f32 %v363_v6 }
 0x209   : > { %v625_v7 = vpop.eup %624 }
 0x20a   : > { %382 = vrot.lane.b32.xlu1 %v625_v7, %s674_s18 }
 0x20e   : > { %385 = vrot.lane.b32.xlu1 %v625_v7, %s675_s19 }
 0x212   : > { %388 = vrot.lane.b32.xlu1 %v625_v7, %s676_s21 }
 0x267   : > { %v367_v8 = vpop.permute.xlu0 %366 }
 0x268   : > { %v376_v10 = vsel %vm375_vm4, %v358_v63, %v367_v8 }
 0x26b   : > { %v370_v9 = vpop.permute.xlu0 %369 }
 0x26c   : > { %v378_v11 = vsel %vm195_vm1, %v376_v10, %v370_v9 }
 0x26f   : > { %v373_v12 = vpop.permute.xlu0 %372 }
 0x270   : > { %v380_v13 = vsel %vm379_vm5, %v378_v11, %v373_v12 }
 0x27c   : > { %v383_v14 = vpop.permute.xlu1 %382 }
 0x27d   : > { %v391_v16 = vsel %vm375_vm4, %v625_v7, %v383_v14 }
 0x280   : > { %v386_v15 = vpop.permute.xlu1 %385 }
 0x281   : > { %v392_v17 = vsel %vm195_vm1, %v391_v16, %v386_v15 }
 0x284   : > { %v389_v18 = vpop.permute.xlu1 %388 }
 0x285   : > { %v393_v19 = vsel %vm379_vm5, %v392_v17, %v389_v18 }
 0x286 LB: >> { %v403_v20 = vlaneseq  ;;  %s526_s23 = sshll.u32 %s664_s22, 3  ;;  %s527_s25 = sshll.u32 %s664_s22, 2  ;;  %vm417_vm6 = vcmask 519168   ;;  %s664_s22 = sphi %s662_s22, %s399_s22  }
 0x287   : >> { %s401_s24 = scalar_lea.vmem [#allocation2], %s526_s23  ;;  %s416_s26 = scalar_lea.vmem %s703_s15, %s527_s25 }
 0x288   : >> { %v404_v21 = vshrl.u32 %v403_v20, 7  ;;  %v402_v23 = vld [vmem:[%s401_s24] sm:$0xff]  ;;  %s399_s22 = sadd.s32 1, %s664_s22  }
 0x289   : >> { %p396_p5 = scmp.ge.s32.totalorder %s399_s22, 8  }
 0x28a   : >> { %v405_v22 = vsub.s32 0, %v404_v21 }
 0x28c   : >> { %v406_v24 = vrot.slane %v380_v13, %v405_v22  ;;  %v411_v25 = vrot.slane %v393_v19, %v405_v22 }
 0x28e   : >> { %v407_v26 = vsub.f32 %v402_v23, %v406_v24 }
 0x290   : >> { %v412_v27 = vmul.f32 %v411_v25, %v407_v26  ;;  %398 = sbr.rel (!%p396_p5) target bundleno = 646 (0x286), region = 88 }
 0x292   : >> { %v413_v28 = vmax.f32 %v412_v27, 0.0 }
 0x294   : >> { %v414_v29 = vpack.c.bf16 %v413_v28, %v413_v28 }
 0x296   : >> { %418 = vst.msk [vmem:[%s416_s26] sm:$0xf] %vm417_vm6, %v414_v29 }
 0x297 PF: > { %s12_s9 = sadd.s32 1, %s648_s9  }
 0x298   : > { %p9_p6 = scmp.ge.s32.totalorder %s12_s9, 4  }
 0x29a   :  { %11 = sbr.rel (!%p9_p6) target bundleno = 1 (0x1), region = 99 }

// kernel: pix2pixhd_forward.54
= control target key start
LH: loop header
LB: loop body
LE: loop exit
PB: predicated region body
PF: predicated region fallthrough
CT: control target
= control target key end

     0   :  { %s687_s9 = smov 0   ;;  %s763_s0 = inlined_call_operand.vmem [shape: bf16[2,17,17,16], index: 0, kind: input, shape index: {}]   ;;  %s764_s1 = inlined_call_operand.vmem [shape: bf16[64,32], index: 1, kind: input, shape index: {}]   ;;  %s765_s2 = inlined_call_operand.vmem [shape: bf16[2,16,16,32], index: 2, kind: output, shape index: {}]  }
   0x1 LB: > { %s508_s10 = sadd.s32 4294967295, %s643_s9   ;;  %p512_p0 = scmp.ge.s32.totalorder %s643_s9, 1  ;;  %s643_s9 = sphi %s687_s9, %s12_s9  }
   0x2   : > { %p112_p1 = scmp.lt.s32.totalorder %s643_s9, 3 }
   0x4   : > { %p113_p2 = pnand %p512_p0, %p112_p1 }
   0x5   : > { %p134_p3 = scmp.lt.s32.totalorder (!%p113_p2), %s508_s10, 1  ;;  %v705_v0 = vmov (!%p113_p2), 0.0   ;;  %v707_v1 = vmov (!%p113_p2), 0.0   ;;  %s709_s19 = smov (!%p113_p2), 0  }
   0x6   : > { %116 = sbr.rel (%p113_p2) target bundleno = 667 (0x29b), region = 28 }
   0xd   : > { %s769_s10 = smov (!%p134_p3, %s508_s10), 1 }
   0xe   : > { %s559_s11 = smul.u32 204, %s769_s10  ;;  %s537_s12 = sshll.u32 %s769_s10, 7 }
   0xf   : > { %s698_s15 = scalar_lea.vmem %s765_s2, %s537_s12 }
  0x10   : > { %s703_s18 = scalar_lea.vmem %s763_s0, %s559_s11 }
  0x11 LB: >> { %v661_v2 = vmov 0.0   ;;  %v615_v3 = vld [vmem:[%s764_s1] sm:$0xff]   ;;  %s538_s22 = smul.u32 12, %s655_s19  ;;  %v616_v4 = vld [vmem:[%s764_s1 + $0x8] sm:$0xff]   ;;  %v617_v5 = vld [vmem:[%s764_s1 + $0x10] sm:$0xff]   ;;  %vm662_vm0 = vmmov 0   ;;  %s655_s19 = sphi %s709_s19, %s150_s19   ;;  %v651_v1 = vphi %v707_v1, %v767_v1   ;;  %v647_v0 = vphi %v705_v0, %v766_v0  }
  0x12   : >> { %547 = vmatprep.subr.bf16.mxu0 %v661_v2  ;;  %555 = vmatprep.mubr.msk.bf16.mxu0 %vm662_vm0, %v661_v2  ;;  %vm174_vm1 = vsmask.f32 7424  ;;  %v618_v19 = vld [vmem:[%s764_s1 + $0x18] sm:$0xff]   ;;  %s663_s30 = smov 16   ;;  %s664_s3 = smov 48   ;;  %vm213_vm2 = vcmask 130048  }
  0x13   : >> { %548 = vmatpush3.bf16.msra.mxu0 %v615_v3  ;;  %s155_s25 = scalar_lea.vmem %s703_s18, %s538_s22  ;;  %s665_s4 = smov 32   ;;  %vm216_vm3 = vcmask 261120   ;;  %vm219_vm4 = vcmask 392192   ;;  %vm254_vm5 = vcmask 523264  }
  0x14   : >> { %549 = vmatprep.subr.bf16.mxu0 %v661_v2  ;;  %v611_v6 = vld [vmem:[%s155_s25] sm:$0xff]   ;;  %v612_v7 = vld [vmem:[%s155_s25 + $0x8] ss:$0 sps:$4 sm:$0x11]   ;;  %v613_v8 = vld [vmem:[%s155_s25 + $0xc] sm:$0xff]   ;;  %s529_s5 = sshll.u32 %s655_s19, 4 }
  0x15   : >> { %v176_v9 = vshrl.u32 %v611_v6, 16  ;;  %v178_v10 = vshll.u32 %v611_v6, 16  ;;  %v183_v11 = vshll.u32 %v612_v7, 16  ;;  %v614_v12 = vld [vmem:[%s155_s25 + $0x14] ss:$0 sps:$4 sm:$0x11]  }
  0x16   : >> { %v200_v13 = vshrl.u32 %v613_v8, 16  ;;  %v202_v14 = vshll.u32 %v613_v8, 16  ;;  %v207_v17 = vshll.u32 %v614_v12, 16  ;;  %s299_s6 = scalar_lea.vmem [#allocation2], %s529_s5  ;;  %s150_s19 = sadd.s32 1, %s655_s19  }
  0x17   : >> { %550 = vmatpush3.bf16.msra.mxu0 %v616_v4  ;;  %v180_v15 = vrot.slane %v178_v10, 1  ;;  %v185_v16 = vrot.slane %v183_v11, 1  ;;  %p147_p4 = scmp.ge.s32.totalorder %s150_s19, 16  }
  0x18   : >> { %551 = vmatprep.subr.bf16.mxu0 %v661_v2  ;;  %v204_v18 = vrot.slane %v202_v14, 1  ;;  %v209_v21 = vrot.slane %v207_v17, 1  ;;  %s666_s7 = smov (%p147_p4), 120   ;;  %s667_s8 = smov (%p147_p4), 112   ;;  %vm369_vm6 = vcmask (%p147_p4), 64512   ;;  %vm373_vm7 = vcmask (%p147_p4), 195584  }
  0x19   : >> { %v181_v20 = vor.u32 %v180_v15, %v176_v9  ;;  %s668_s10 = smov (%p147_p4), 104   ;;  %s669_s11 = smov (%p147_p4), 8  }
  0x1a   : >> { %v205_v22 = vor.u32 %v204_v18, %v200_v13  ;;  %s670_s12 = smov (%p147_p4), 16   ;;  %s671_s13 = smov (%p147_p4), 24  }
  0x1b   : >> { %552 = vmatpush3.bf16.msra.mxu0 %v617_v5  ;;  %v186_v23 = vsel %vm174_vm1, %v181_v20, %v185_v16  ;;  %s754_s14 = smov (%p147_p4), 0  }
  0x1c   : >> { %553 = vmatprep.subr.bf16.mxu0 %v661_v2  ;;  %187 = vrot.lane.b32.xlu0 %v186_v23, %s663_s30  ;;  %v210_v24 = vsel %vm174_vm1, %v205_v22, %v209_v21 }
  0x1d   : >> { %211 = vrot.lane.b32.xlu1 %v210_v24, %s664_s3 }
  0x1f   : >> { %554 = vmatpush3.bf16.msra.mxu0 %v618_v19 }
  0x20   : >> { %194 = vrot.lane.b32.xlu0 %v613_v8, %s665_s4 }
  0x8e   : >> { %v188_v25 = vpop.permute.xlu0 %187 }
  0x8f   : >> { %v212_v26 = vpop.permute.xlu1 %211  ;;  %v215_v27 = vsel %vm213_vm2, %v611_v6, %v188_v25 }
  0x92   : >> { %v195_v28 = vpop.permute.xlu0 %194 }
  0x93   : >> { %v218_v29 = vsel %vm216_vm3, %v215_v27, %v195_v28 }
  0x94   : >> { %v221_v30 = vsel %vm219_vm4, %v218_v29, %v212_v26 }
  0x95   : >> { %556 = vmatmul.mubr.msk.bf16.vlgmr.msra.gmra.mrb[0].mxu0 %vm254_vm5, %v221_v30 }
 0x168   : >> { %v291_v31 = vpop.f32.mrb[0].mxu0 }
 0x169   : >> { %300 = vst.msk [vmem:[%s299_s6] sm:$0xff] %vm216_vm3, %v291_v31  ;;  %v312_v32 = vmul.f32 %v291_v31, %v291_v31  ;;  %v557_v33 = vpop.f32.mrb[1].mxu0  ;;  %v302_v35 = vsel %vm216_vm3, %v291_v31, 0.0 }
 0x16a   : >> { %v294_v34 = vpop.f32.mrb[2].mxu0 }
 0x16b   : >> { %301 = vst.msk [vmem:[%s299_s6 + $0x8] sm:$0xff] %vm216_vm3, %v294_v34  ;;  %v303_v36 = vsel %vm216_vm3, %v294_v34, 0.0  ;;  %v313_v37 = vmul.f32 %v294_v34, %v294_v34  ;;  %v558_v38 = vpop.f32.mrb[3].mxu0  ;;  %v314_v40 = vsel %vm216_vm3, %v312_v32, 0.0 }
 0x16c   : >> { %v304_v39 = vadd.f32 %v303_v36, %v302_v35 }
 0x16d   : >> { %v315_v41 = vsel %vm216_vm3, %v313_v37, 0.0 }
 0x16e   : >> { %v305_v42 = vrot.slane %v304_v39, 4  ;;  %v316_v43 = vadd.f32 %v315_v41, %v314_v40 }
 0x170   : >> { %v306_v44 = vadd.f32 %v305_v42, %v304_v39  ;;  %v317_v45 = vrot.slane %v316_v43, 4 }
 0x172   : >> { %v307_v46 = vrot.slane %v306_v44, 2  ;;  %v318_v47 = vadd.f32 %v317_v45, %v316_v43 }
 0x174   : >> { %v308_v48 = vadd.f32 %v307_v46, %v306_v44  ;;  %v319_v49 = vrot.slane %v318_v47, 2 }
 0x176   : >> { %v309_v50 = vrot.slane %v308_v48, 1  ;;  %v320_v51 = vadd.f32 %v319_v49, %v318_v47 }
 0x178   : >> { %v310_v52 = vadd.f32 %v309_v50, %v308_v48  ;;  %v321_v53 = vrot.slane %v320_v51, 1  ;;  %149 = sbr.rel (!%p147_p4) target bundleno = 17 (0x11), region = 77 }
 0x17a   : >> { %v311_v54 = vadd.f32 %v651_v1, %v310_v52   ;;  %v322_v55 = vadd.f32 %v321_v53, %v320_v51 }
 0x17c   : >> { %v323_v56 = vadd.f32 %v647_v0, %v322_v55   ;;  %v767_v1 = vmov %v311_v54  ;;  %326 = vrot.lane.b32.xlu0 (%p147_p4), %v311_v54, %s666_s7 }
 0x17e   : >> { %v766_v0 = vmov %v323_v56  ;;  %340 = vrot.lane.b32.xlu1 (%p147_p4), %v323_v56, %s666_s7 }
 0x180   : > { %330 = vrot.lane.b32.xlu0 %v311_v54, %s667_s8 }
 0x182   : > { %334 = vrot.lane.b32.xlu1 %v311_v54, %s668_s10 }
 0x184   : > { %344 = vrot.lane.b32.xlu0 %v323_v56, %s667_s8 }
 0x186   : > { %348 = vrot.lane.b32.xlu1 %v323_v56, %s668_s10 }
 0x1ee   : > { %v327_v57 = vpop.permute.xlu0 %326 }
 0x1ef   : > { %v329_v59 = vadd.f32 %v327_v57, %v311_v54 }
 0x1f0   : > { %v341_v58 = vpop.permute.xlu1 %340 }
 0x1f1   : > { %v343_v63 = vadd.f32 %v341_v58, %v323_v56 }
 0x1f2   : > { %v331_v60 = vpop.permute.xlu0 %330 }
 0x1f3   : > { %v333_v62 = vadd.f32 %v331_v60, %v329_v59 }
 0x1f4   : > { %v335_v61 = vpop.permute.xlu1 %334 }
 0x1f5   : > { %v337_v1 = vadd.f32 %v335_v61, %v333_v62 }
 0x1f6   : > { %v345_v2 = vpop.permute.xlu0 %344 }
 0x1f7   : > { %v352_v4 = vmul.f32 0.0009765625, %v337_v1  ;;  %v347_v0 = vadd.f32 %v345_v2, %v343_v63 }
 0x1f8   : > { %v349_v3 = vpop.permute.xlu1 %348 }
 0x1f9   : > { %v351_v5 = vadd.f32 %v349_v3, %v347_v0  ;;  %360 = vrot.lane.b32.xlu0 %v352_v4, %s669_s11  ;;  %v354_v7 = vmul.f32 %v352_v4, %v352_v4 }
 0x1fb   : > { %v353_v6 = vmul.f32 0.0009765625, %v351_v5 }
 0x1fd   : > { %v355_v8 = vsub.f32 %v353_v6, %v354_v7  ;;  %363 = vrot.lane.b32.xlu0 %v352_v4, %s670_s12 }
 0x1ff   : > { %v356_v9 = vmax.f32 %v355_v8, 0.0 }
 0x201   : > { %v357_v10 = vadd.f32 1e-05, %v356_v9  ;;  %366 = vrot.lane.b32.xlu0 %v352_v4, %s671_s13 }
 0x203   : > { %619 = vrsqrt.f32 %v357_v10 }
 0x20d   : > { %v620_v11 = vpop.eup %619 }
 0x20e   : > { %376 = vrot.lane.b32.xlu1 %v620_v11, %s669_s11 }
 0x212   : > { %379 = vrot.lane.b32.xlu1 %v620_v11, %s670_s12 }
 0x216   : > { %382 = vrot.lane.b32.xlu1 %v620_v11, %s671_s13 }
 0x26b   : > { %v361_v12 = vpop.permute.xlu0 %360 }
 0x26c   : > { %v370_v14 = vsel %vm369_vm6, %v352_v4, %v361_v12 }
 0x26f   : > { %v364_v13 = vpop.permute.xlu0 %363 }
 0x270   : > { %v372_v15 = vsel %vm213_vm2, %v370_v14, %v364_v13 }
 0x273   : > { %v367_v16 = vpop.permute.xlu0 %366 }
 0x274   : > { %v374_v17 = vsel %vm373_vm7, %v372_v15, %v367_v16 }
 0x280   : > { %v377_v18 = vpop.permute.xlu1 %376 }
 0x281   : > { %v385_v20 = vsel %vm369_vm6, %v620_v11, %v377_v18 }
 0x284   : > { %v380_v19 = vpop.permute.xlu1 %379 }
 0x285   : > { %v386_v21 = vsel %vm213_vm2, %v385_v20, %v380_v19 }
 0x288   : > { %v383_v22 = vpop.permute.xlu1 %382 }
 0x289   : > { %v387_v23 = vsel %vm373_vm7, %v386_v21, %v383_v22 }
 0x28a LB: >> { %v398_v24 = vlaneseq  ;;  %s530_s16 = sshll.u32 %s659_s14, 4  ;;  %s541_s18 = sshll.u32 %s659_s14, 3  ;;  %vm423_vm8 = vcmask 257024   ;;  %s659_s14 = sphi %s754_s14, %s393_s14  }
 0x28b   : >> { %s395_s17 = scalar_lea.vmem [#allocation2], %s530_s16  ;;  %s422_s19 = scalar_lea.vmem %s698_s15, %s541_s18 }
 0x28c   : >> { %v399_v25 = vshrl.u32 %v398_v24, 7  ;;  %v396_v27 = vld [vmem:[%s395_s17] sm:$0xff]  ;;  %v397_v28 = vld [vmem:[%s395_s17 + $0x8] sm:$0xff]  ;;  %s393_s14 = sadd.s32 1, %s659_s14  }
 0x28d   : >> { %p390_p5 = scmp.ge.s32.totalorder %s393_s14, 16  }
 0x28e   : >> { %v400_v26 = vsub.s32 0, %v399_v25 }
 0x290   : >> { %v401_v29 = vrot.slane %v374_v17, %v400_v26  ;;  %v407_v30 = vrot.slane %v387_v23, %v400_v26 }
 0x292   : >> { %v402_v31 = vsub.f32 %v396_v27, %v401_v29  ;;  %v403_v32 = vsub.f32 %v397_v28, %v401_v29 }
 0x294   : >> { %v408_v33 = vmul.f32 %v407_v30, %v402_v31  ;;  %v409_v34 = vmul.f32 %v407_v30, %v403_v32  ;;  %392 = sbr.rel (!%p390_p5) target bundleno = 650 (0x28a), region = 88 }
 0x296   : >> { %v410_v35 = vmax.f32 %v408_v33, 0.0  ;;  %v411_v36 = vmax.f32 %v409_v34, 0.0 }
 0x298   : >> { %v539_v37 = vpack.c.bf16 %v410_v35, %v410_v35  ;;  %v540_v38 = vpack.c.bf16 %v411_v36, %v411_v36 }
 0x29a   : >> { %424 = vst.msk [vmem:[%s422_s19] sm:$0xf] %vm423_vm8, %v539_v37  ;;  %425 = vst.msk [vmem:[%s422_s19 + $0x4] sm:$0xf] %vm423_vm8, %v540_v38 }
 0x29b PF: > { %s12_s9 = sadd.s32 1, %s643_s9  }
 0x29c   : > { %p9_p6 = scmp.ge.s32.totalorder %s12_s9, 4  }
 0x29e   :  { %11 = sbr.rel (!%p9_p6) target bundleno = 1 (0x1), region = 99 }

// kernel: pix2pixhd_forward.55
= control target key start
LH: loop header
LB: loop body
LE: loop exit
PB: predicated region body
PF: predicated region fallthrough
CT: control target
= control target key end

     0   :  { %s1912_s12 = smov 0   ;;  %s2988_s0 = inlined_call_operand.vmem [shape: bf16[2,38,38,8], index: 0, kind: input, shape index: {}]   ;;  %s2989_s1 = inlined_call_operand.vmem [shape: bf16[392,3], index: 1, kind: input, shape index: {}]   ;;  %s2990_s2 = inlined_call_operand.vmem [shape: f32[1,3], index: 2, kind: input, shape index: {}]   ;;  %s2991_s3 = inlined_call_operand.vmem [shape: bf16[2,32,32,3], index: 3, kind: output, shape index: {}]  }
   0x1 LB: > { %s1637_s13 = sadd.s32 4294967295, %s1870_s12   ;;  %p1641_p0 = scmp.ge.s32.totalorder %s1870_s12, 1  ;;  %s1870_s12 = sphi %s1912_s12, %s13_s12  }
   0x2   : > { %p137_p1 = scmp.lt.s32.totalorder %s1870_s12, 3 }
   0x4   : > { %p138_p2 = pnand %p1641_p0, %p137_p1 }
   0x5   : > { %p161_p3 = scmp.lt.s32.totalorder (!%p138_p2), %s1637_s13, 1  ;;  %v1923_v0 = vld [vmem:[%s2990_s2] ss:$0 sm:$0xff] (!%p138_p2)  ;;  %s1935_s24 = smov (!%p138_p2), 0  }
   0x6   : > { %141 = sbr.rel (%p138_p2) target bundleno = 611 (0x263), region = 32  ;;  %3010 = vst [vmem:[#allocation2_spill] sm:$0xff] (!%p138_p2), %v1923_v0 }
   0xd   : > { %s3041_s13 = smov (!%p161_p3, %s1637_s13), 1 }
   0xe   : > { %s1768_s16 = smul.u32 760, %s3041_s13  ;;  %s1733_s17 = sshll.u32 %s3041_s13, 9 }
   0xf   : > { %s1928_s20 = scalar_lea.vmem %s2991_s3, %s1733_s17 }
  0x10   : > { %s1933_s23 = scalar_lea.vmem %s2988_s0, %s1768_s16 }
  0x11 LB: >> { %s1734_s25 = smul.u32 20, %s1874_s24  ;;  %vm3007_vm0 = vcmask 1045504   ;;  %vm254_vm1 = vsmask.f32 7424  ;;  %vm279_vm2 = vcmask 1046528   ;;  %s1876_s27 = smov 32   ;;  %s1874_s24 = sphi %s1935_s24, %s178_s24  }
  0x12   : >> { %s1877_s28 = smov 16   ;;  %vm289_vm3 = vsmask.f32 6400  ;;  %s1878_s29 = smov 8   ;;  %vm619_vm4 = vcmask 1040384   ;;  %vm905_vm7 = vcmask 1041408  }
  0x13   : >> { %s1942_s26 = scalar_lea.vmem %s1933_s23, %s1734_s25  ;;  %s1879_s30 = smov 24   ;;  %vm632_vm5 = vsmask.f32 256  ;;  %vm3006_vm6 = vsmask.f32 5376  ;;  %vm333_vm8 = vcmask 1044480  }
  0x14   : >> { %v1801_v1 = vld [vmem:[%s1942_s26 + $0x28] sm:$0xff]   ;;  %v1802_v2 = vld [vmem:[%s1942_s26 + $0x30] sm:$0xff]   ;;  %v1947_v3 = vld [vmem:[%s1942_s26 + $0x38] ss:$0 sps:$4 sm:$0x77]   ;;  %s1880_s4 = smov 40  }
  0x15   : >> { %v598_v4 = vrot.slane %v1801_v1, 2  ;;  %v599_v5 = vrot.slane %v1802_v2, 2  ;;  %v570_v6 = vrot.slane %v1801_v1, 1  ;;  %v571_v7 = vrot.slane %v1802_v2, 1  ;;  %v1957_v19 = vld [vmem:[%s1942_s26] sm:$0xff]   ;;  %v1964_v24 = vld [vmem:[%s1942_s26 + $0x8] sm:$0xff]  }
  0x16   : >> { %v573_v8 = vrot.slane %v1947_v3, 1  ;;  %v461_v9 = vshrl.u32 %v1801_v1, 16  ;;  %v463_v10 = vshll.u32 %v1801_v1, 16  ;;  %v468_v11 = vshll.u32 %v1802_v2, 16  ;;  %v1985_v37 = vld [vmem:[%s1942_s26 + $0x44] sm:$0xff]   ;;  %v2000_v43 = vld [vmem:[%s1942_s26 + $0x3c] sm:$0xff]  }
  0x17   : >> { %v600_v12 = vsel %vm3007_vm0, %v598_v4, %v599_v5  ;;  %v572_v13 = vsel %vm279_vm2, %v570_v6, %v571_v7  ;;  %v601_v14 = vrot.slane %v1947_v3, 2  ;;  %v472_v15 = vshrl.u32 %v1802_v2, 16  ;;  %v2019_v52 = vld [vmem:[%s1942_s26 + $0x50] sm:$0xff]   ;;  %v2050_v1 = vld [vmem:[%s1942_s26 + $0x58] sm:$0xff]   ;;  %s1881_s5 = smov 48   ;;  %s1882_s6 = smov 56  }
  0x18   : >> { %603 = vrot.lane.b32.xlu0 %v600_v12, %s1876_s27  ;;  %575 = vrot.lane.b32.xlu1 %v572_v13, %s1877_s28  ;;  %v465_v16 = vrot.slane %v463_v10, 1  ;;  %v470_v17 = vrot.slane %v468_v11, 1  ;;  %v476_v18 = vshll.u32 %v1947_v3, 16  ;;  %v574_v20 = vsel %vm279_vm2, %v571_v7, %v573_v8  ;;  %s1883_s7 = smov 64   ;;  %s1884_s8 = smov 72  }
  0x19   : >> { %v561_v21 = vshrl.u32 %v1947_v3, 16  ;;  %v584_v22 = vrot.slane %v472_v15, 1  ;;  %v585_v23 = vrot.slane %v468_v11, 2  ;;  %v581_v30 = vrot.slane %v461_v9, 1  ;;  %s1885_s9 = smov 80   ;;  %s1886_s10 = smov 88  }
  0x1a   : >> { %v466_v25 = vor.u32 %v465_v16, %v461_v9  ;;  %v474_v26 = vor.u32 %v472_v15, %v470_v17  ;;  %v1966_v27 = vrot.slane %v476_v18, 1  ;;  %v589_v28 = vrot.slane %v476_v18, 2  ;;  %v2070_v18 = vld [vmem:[%s1942_s26 + $0x4c] ss:$0 sps:$4 sm:$0x77]   ;;  %s1887_s11 = smov 96  }
  0x1b   : >> { %v588_v29 = vrot.slane %v561_v21, 1  ;;  %v582_v31 = vrot.slane %v463_v10, 2  ;;  %v602_v33 = vsel %vm3007_vm0, %v599_v5, %v601_v14  ;;  %v586_v34 = vor.u32 %v585_v23, %v584_v22  ;;  %s1888_s13 = smov 104   ;;  %s1889_s14 = smov 112  }
  0x1c   : >> { %577 = vrot.lane.b32.xlu1 %v574_v20, %s1877_s28  ;;  %v1972_v32 = vsel %vm254_vm1, %v466_v25, %v470_v17  ;;  %v1982_v36 = vshll.u32 %v1957_v19, 16  ;;  %v1989_v38 = vsel %vm254_vm1, %v474_v26, %v1966_v27  ;;  %v1992_v40 = vshrl.u32 %v1957_v19, 16  ;;  %v2066_v17 = vld [vmem:[%s1942_s26 + $0x60] ss:$0 sps:$4 sm:$0x77]   ;;  %s1890_s15 = smov 120  }
  0x1d   : >> { %564 = vrot.lane.b32.xlu0 %v1972_v32, %s1878_s29  ;;  %v1979_v35 = vor.u32 %v589_v28, %v588_v29  ;;  %v583_v39 = vor.u32 %v582_v31, %v581_v30  ;;  %v1995_v41 = vshll.u32 %v1964_v24, 16  ;;  %v2007_v45 = vshrl.u32 %v1985_v37, 16 }
  0x1e   : >> { %v260_v42 = vrot.slane %v1982_v36, 1  ;;  %v620_v49 = vrot.slane %v2000_v43, 7  ;;  %v280_v50 = vrot.slane %v1957_v19, 1  ;;  %v2016_v51 = vshrl.u32 %v2000_v43, 16 }
  0x1f   : >> { %v591_v44 = vsel %vm289_vm3, %v586_v34, %v1979_v35  ;;  %v587_v46 = vsel %vm289_vm3, %v583_v39, %v586_v34  ;;  %v265_v48 = vrot.slane %v1995_v41, 1  ;;  %v281_v53 = vrot.slane %v1964_v24, 1 }
  0x20   : >> { %605 = vrot.lane.b32.xlu1 %v602_v33, %s1876_s27  ;;  %v261_v47 = vor.u32 %v260_v42, %v1992_v40  ;;  %v621_v54 = vrot.slane %v1985_v37, 7  ;;  %v643_v55 = vrot.slane %v2007_v45, 7  ;;  %v2026_v56 = vshll.u32 %v1985_v37, 16 }
  0x21   : >> { %566 = vrot.lane.b32.xlu0 %v1989_v38, %s1878_s29  ;;  %v2032_v58 = vshrl.u32 %v1964_v24, 16  ;;  %v636_v59 = vrot.slane %v2016_v51, 7  ;;  %v2037_v60 = vshll.u32 %v2000_v43, 16  ;;  %v282_v61 = vsel %vm279_vm2, %v280_v50, %v281_v53 }
  0x22   : >> { %v266_v57 = vsel %vm254_vm1, %v261_v47, %v265_v48  ;;  %v622_v62 = vsel %vm619_vm4, %v620_v49, %v621_v54  ;;  %v646_v63 = vor.u32 %v2026_v56, %v643_v55  ;;  %v745_v2 = vshll.u32 %v2019_v52, 16 }
  0x23   : >> { %v290_v4 = vrot.slane %v1992_v40, 1  ;;  %v291_v5 = vrot.slane %v1982_v36, 2  ;;  %v293_v6 = vrot.slane %v2032_v58, 1  ;;  %v294_v7 = vrot.slane %v1995_v41, 2 }
  0x24   : >> { %594 = vrot.lane.b32.xlu1 %v591_v44, %s1879_s30  ;;  %v639_v9 = vor.u32 %v2037_v60, %v636_v59  ;;  %v647_v10 = vsel %vm632_vm5, %v636_v59, %v646_v63  ;;  %v742_v11 = vshrl.u32 %v2019_v52, 16  ;;  %v752_v12 = vshll.u32 %v2050_v1, 16 }
  0x25   : >> { %592 = vrot.lane.b32.xlu0 %v587_v46, %s1879_s30  ;;  %v772_v13 = vrot.slane %v745_v2, 1  ;;  %v292_v15 = vor.u32 %v291_v5, %v290_v4  ;;  %v2063_v16 = vor.u32 %v294_v7, %v293_v6  ;;  %v749_v25 = vshrl.u32 %v2050_v1, 16 }
  0x26   : >> { %v774_v22 = vrot.slane %v752_v12, 1  ;;  %v757_v26 = vshll.u32 %v2066_v17, 16  ;;  %v308_v28 = vrot.slane %v1957_v19, 2  ;;  %v309_v30 = vrot.slane %v1964_v24, 2 }
  0x27   : >> { %v773_v20 = vor.u32 %v772_v13, %v742_v11  ;;  %v296_v23 = vsel %vm289_vm3, %v292_v15, %v2063_v16  ;;  %v2086_v31 = vshll.u32 %v2070_v18, 16  ;;  %v666_v33 = vrot.slane %v2026_v56, 1  ;;  %v2152_v15 = vld [vmem:[%s1942_s26 + $0x64] sm:$0xff]  }
  0x28   : >> { %623 = vrot.lane.b32.xlu1 %v620_v49, %s1880_s4  ;;  %v776_v34 = vor.u32 %v774_v22, %v749_v25  ;;  %v2091_v39 = vrot.slane %v757_v26, 1  ;;  %v664_v42 = vrot.slane %v2037_v60, 1  ;;  %v310_v44 = vsel %vm3007_vm0, %v308_v28, %v309_v30 }
  0x29   : >> { %275 = vrot.lane.b32.xlu0 %v266_v57, %s1878_s29  ;;  %v2082_v29 = vsel %vm254_vm1, %v773_v20, %v774_v22  ;;  %v668_v46 = vor.u32 %v666_v33, %v2007_v45  ;;  %v669_v47 = vrot.slane %v2086_v31, 1  ;;  %v885_v57 = vrot.slane %v2050_v1, 1  ;;  %v2155_v20 = vld [vmem:[%s1942_s26 + $0x6c] sm:$0xff]  }
  0x2a   : >> { %v2105_v49 = vsel %vm254_vm1, %v776_v34, %v2091_v39  ;;  %v665_v50 = vor.u32 %v664_v42, %v2016_v51  ;;  %v887_v59 = vrot.slane %v2066_v17, 1  ;;  %v318_v63 = vrot.slane %v1992_v40, 2  ;;  %v2165_v34 = vld [vmem:[%s1942_s26 + $0x1c] sm:$0xff]   ;;  %v2175_v42 = vld [vmem:[%s1942_s26 + $0x74] ss:$0 sps:$4 sm:$0x77]  }
  0x2b   : >> { %v744_v4 = vrot.slane %v742_v11, 7  ;;  %v670_v5 = vsel %vm254_vm1, %v668_v46, %v669_v47  ;;  %v319_v6 = vrot.slane %v1982_v36, 3  ;;  %v2122_v7 = vrot.slane %v749_v25, 7 }
  0x2c   : >> { %285 = vrot.lane.b32.xlu1 %v282_v61, %s1877_s28  ;;  %v884_v61 = vrot.slane %v2019_v52, 1  ;;  %v321_v40 = vrot.slane %v2032_v58, 2  ;;  %v681_v22 = vrot.slane %v1985_v37, 1  ;;  %v680_v28 = vrot.slane %v2000_v43, 1 }
  0x2d   : >> { %625 = vrot.lane.b32.xlu0 %v622_v62, %s1880_s4  ;;  %v2114_v62 = vor.u32 %v2032_v58, %v265_v48  ;;  %v2128_v48 = vsel %vm632_vm5, %v643_v55, %v2086_v31  ;;  %v2133_v11 = vor.u32 %v745_v2, %v744_v4  ;;  %v754_v36 = vor.u32 %v752_v12, %v2122_v7 }
  0x2e   : >> { %v888_v55 = vsel %vm279_vm2, %v885_v57, %v887_v59  ;;  %v886_v58 = vsel %vm279_vm2, %v884_v61, %v885_v57  ;;  %v563_v12 = vor.u32 %v561_v21, %v1966_v27  ;;  %v2169_v21 = vshrl.u32 %v2155_v20, 16 }
  0x2f   : >> { %v2142_v13 = vsel %vm632_vm5, %v744_v4, %v754_v36  ;;  %v2172_v27 = vshll.u32 %v2155_v20, 16  ;;  %v906_v46 = vrot.slane %v2152_v15, 6  ;;  %v682_v57 = vsel %vm279_vm2, %v680_v28, %v681_v22 }
  0x30   : >> { %654 = vrot.lane.b32.xlu1 %v647_v10, %s1881_s5  ;;  %v322_v10 = vrot.slane %v1995_v41, 3  ;;  %v320_v41 = vor.u32 %v319_v6, %v318_v63  ;;  %v694_v61 = vrot.slane %v2007_v45, 1  ;;  %v695_v4 = vrot.slane %v2026_v56, 2  ;;  %v2190_v6 = vld [vmem:[%s1942_s26 + $0x10] ss:$0 sps:$4 sm:$0x77]  }
  0x31   : >> { %652 = vrot.lane.b32.xlu0 %v639_v9, %s1881_s5  ;;  %v667_v9 = vsel %vm254_vm1, %v665_v50, %v666_v33  ;;  %v671_v33 = vshrl.u32 %v2070_v18, 16  ;;  %v907_v50 = vrot.slane %v2155_v20, 6  ;;  %v933_v36 = vrot.slane %v2172_v27, 7 }
  0x32   : >> { %v2145_v2 = vor.u32 %v322_v10, %v321_v40  ;;  %v2194_v40 = vshrl.u32 %v2152_v15, 16  ;;  %v930_v10 = vrot.slane %v2169_v21, 6  ;;  %v334_v56 = vrot.slane %v1957_v19, 3 }
  0x33   : >> { %v2185_v63 = vor.u32 %v671_v33, %v669_v47  ;;  %v908_v45 = vsel %vm905_vm7, %v906_v46, %v907_v50  ;;  %v2207_v47 = vshll.u32 %v2165_v34, 16  ;;  %vm918_vm9 = vsmask.f32 1280 }
  0x34   : >> { %658 = vrot.lane.b32.xlu1 %v2000_v43, %s1882_s6  ;;  %v324_v25 = vsel %vm3006_vm6, %v320_v41, %v2145_v2  ;;  %v692_v41 = vrot.slane %v2037_v60, 2  ;;  %vm484_vm10 = vcmask 64512   ;;  %vm494_vm11 = vcmask 195584  }
  0x35   : >> { %303 = vrot.lane.b32.xlu0 %v296_v23, %s1879_s30  ;;  %v2999_v23 = vrot.slane %v2070_v18, 1  ;;  %v370_v60 = vrot.slane %v2207_v47, 1  ;;  %vm489_vm12 = vcmask 130048   ;;  %vm499_vm13 = vcmask 261120  }
  0x36   : >> { %vm504_vm14 = vcmask 326656   ;;  %vm3009_vm15 = vcmask 392192  }
  0x38   : >> { %878 = vrot.lane.b32.xlu1 %v2082_v29, %s1878_s29 }
  0x39   : >> { %660 = vrot.lane.b32.xlu0 %v1985_v37, %s1882_s6 }
  0x3c   : >> { %313 = vrot.lane.b32.xlu1 %v310_v44, %s1876_s27  ;;  %v684_v44 = vsel %vm279_vm2, %v681_v22, %v2999_v23  ;;  %v696_v22 = vor.u32 %v695_v4, %v694_v61  ;;  %v2225_v61 = vshrl.u32 %v2165_v34, 16 }
  0x3d   : >> { %880 = vrot.lane.b32.xlu0 %v2105_v49, %s1878_s29 }
  0x40   : >> { %676 = vrot.lane.b32.xlu1 %v670_v5, %s1883_s7  ;;  %v699_v5 = vrot.slane %v2086_v31, 2  ;;  %v2204_v31 = vshll.u32 %v2152_v15, 16 }
  0x41   : >> { %674 = vrot.lane.b32.xlu0 %v667_v9, %s1883_s7  ;;  %v698_v9 = vrot.slane %v671_v33, 1  ;;  %v922_v33 = vrot.slane %v2194_v40, 6 }
  0x43   : >> { %v2217_v28 = vor.u32 %v699_v5, %v698_v9 }
  0x44   : >> { %891 = vrot.lane.b32.xlu1 %v888_v55, %s1877_s28  ;;  %v335_v55 = vrot.slane %v1964_v24, 3 }
  0x45   : >> { %889 = vrot.lane.b32.xlu0 %v886_v58, %s1877_s28  ;;  %v691_v58 = vrot.slane %v2016_v51, 1  ;;  %v925_v51 = vrot.slane %v2204_v31, 7 }
  0x46   : >> { %v336_v5 = vsel %vm333_vm8, %v334_v56, %v335_v55 }
  0x47   : >> { %v693_v9 = vor.u32 %v692_v41, %v691_v58  ;;  %v926_v56 = vor.u32 %v925_v51, %v922_v33  ;;  %v960_v41 = vrot.slane %v2169_v21, 7  ;;  %v709_v33 = vrot.slane %v1985_v37, 2 }
  0x48   : >> { %568 = vrot.lane.b32.xlu1 %v563_v12, %s1878_s29  ;;  %v2213_v12 = vshll.u32 %v2175_v42, 16  ;;  %v2994_v51 = vrot.slane %v2070_v18, 2 }
  0x49   : >> { %329 = vrot.lane.b32.xlu0 %v324_v25, %s1880_s4  ;;  %v337_v25 = vrot.slane %v2190_v6, 3 }
  0x4b   : >> { %v2228_v4 = vsel %vm333_vm8, %v335_v55, %v337_v25  ;;  %v697_v55 = vsel %vm289_vm3, %v693_v9, %v696_v22 }
  0x4c   : >> { %687 = vrot.lane.b32.xlu1 %v684_v44, %s1884_s8  ;;  %v934_v44 = vor.u32 %v933_v36, %v930_v10  ;;  %v2235_v10 = vor.u32 %v2225_v61, %v370_v60  ;;  %v701_v36 = vsel %vm289_vm3, %v696_v22, %v2217_v28  ;;  %v2257_v22 = vld [vmem:[%s1942_s26 + $0x14] sm:$0xff]  }
  0x4d   : >> { %685 = vrot.lane.b32.xlu0 %v682_v57, %s1884_s8  ;;  %v939_v57 = vrot.slane %v2213_v12, 7  ;;  %v2264_v9 = vshll.u32 %v2257_v22, 16 }
  0x4e   : >> { %v935_v25 = vsel %vm918_vm9, %v926_v56, %v934_v44 }
  0x50   : >> { %911 = vrot.lane.b32.xlu1 %v908_v45, %s1879_s30  ;;  %v2232_v45 = vsel %vm918_vm9, %v934_v44, %v939_v57  ;;  %v2272_v44 = vsel %vm632_vm5, %v2122_v7, %v757_v26  ;;  %v365_v26 = vrot.slane %v2264_v9, 1 }
  0x51   : >> { %909 = vrot.lane.b32.xlu0 %v906_v46, %s1879_s30  ;;  %v2992_v46 = vshrl.u32 %v2175_v42, 16 }
  0x53   : >> { %v965_v58 = vrot.slane %v2992_v46, 7 }
  0x54   : >> { %579 = vrot.lane.b32.xlu1 %v573_v8, %s1877_s28 }
  0x55   : >> { %339 = vrot.lane.b32.xlu0 %v336_v5, %s1881_s5  ;;  %v966_v8 = vor.u32 %v965_v58, %v2213_v12  ;;  %v708_v5 = vrot.slane %v2000_v43, 2  ;;  %v947_v43 = vrot.slane %v2152_v15, 7 }
  0x57   : >> { %v2253_v57 = vsel %vm632_vm5, %v960_v41, %v966_v8  ;;  %v729_v8 = vrot.slane %v2019_v52, 7 }
  0x58   : >> { %704 = vrot.lane.b32.xlu1 %v701_v36, %s1885_s9  ;;  %v712_v36 = vsel %vm3007_vm0, %v709_v33, %v2994_v51 }
  0x59   : >> { %702 = vrot.lane.b32.xlu0 %v697_v55, %s1885_s9  ;;  %v2283_v55 = vshrl.u32 %v2257_v22, 16 }
  0x5b   : >> { %v366_v58 = vor.u32 %v365_v26, %v2283_v55  ;;  %v2310_v26 = vshll.u32 %v2190_v6, 16 }
  0x5c   : >> { %943 = vrot.lane.b32.xlu1 %v935_v25, %s1876_s27  ;;  %v2993_v25 = vrot.slane %v2050_v1, 7 }
  0x5d   : >> { %941 = vrot.lane.b32.xlu0 %v926_v56, %s1876_s27  ;;  %v2995_v56 = vrot.slane %v2155_v20, 7  ;;  %v273_v46 = vrot.slane %v2310_v26, 1 }
  0x5f   : >> { %v949_v7 = vsel %vm619_vm4, %v947_v43, %v2995_v56 }
  0x60   : >> { %596 = vrot.lane.b32.xlu1 %v1979_v35, %s1879_s30  ;;  %v710_v35 = vsel %vm3007_vm0, %v708_v5, %v709_v33  ;;  %v371_v33 = vsel %vm254_vm1, %v366_v58, %v370_v60  ;;  %v2301_v5 = vld [vmem:[%s1942_s26 + $0x80] sm:$0xff]   ;;  %v384_v58 = vrot.slane %v2257_v22, 1 }
  0x61   : >> { %353 = vrot.lane.b32.xlu0 %v2257_v22, %s1882_s6  ;;  %v2313_v60 = vshrl.u32 %v2301_v5, 16  ;;  %v2316_v3 = vshll.u32 %v2301_v5, 16  ;;  %v3001_v24 = vrot.slane %v2301_v5, 6 }
  0x63   : >> { %v1041_v51 = vrot.slane %v2316_v3, 7 }
  0x64   : >> { %715 = vrot.lane.b32.xlu1 %v712_v36, %s1886_s10  ;;  %v731_v36 = vsel %vm619_vm4, %v729_v8, %v2993_v25  ;;  %v1038_v25 = vrot.slane %v2313_v60, 6 }
  0x65   : >> { %713 = vrot.lane.b32.xlu0 %v710_v35, %s1886_s10  ;;  %v961_v35 = vor.u32 %v960_v41, %v2172_v27 }
  0x68   : >> { %954 = vrot.lane.b32.xlu1 %v949_v7, %s1880_s4 }
  0x69   : >> { %952 = vrot.lane.b32.xlu0 %v947_v43, %s1880_s4  ;;  %v958_v43 = vrot.slane %v2194_v40, 7 }
  0x6b   : >> { %v962_v7 = vsel %vm632_vm5, %v958_v43, %v961_v35  ;;  %v959_v41 = vor.u32 %v958_v43, %v2204_v31  ;;  %v274_v43 = vsel %vm254_vm1, %v2114_v62, %v273_v46  ;;  %v2340_v35 = vor.u32 %v1041_v51, %v1038_v25 }
  0x6c   : >> { %607 = vrot.lane.b32.xlu1 %v601_v14, %s1876_s27  ;;  %v2320_v14 = vld [vmem:[%s1942_s26 + $0x88] ss:$0 sps:$4 sm:$0x77]   ;;  %v283_v62 = vrot.slane %v2190_v6, 1  ;;  %v393_v46 = vrot.slane %v2283_v55, 1  ;;  %v394_v51 = vrot.slane %v2264_v9, 2 }
  0x6d   : >> { %380 = vrot.lane.b32.xlu0 %v371_v33, %s1883_s7  ;;  %v2998_v33 = vrot.slane %v2165_v34, 1  ;;  %v396_v25 = vrot.slane %v2225_v61, 1 }
  0x6e   : >> { %v284_v37 = vsel %vm279_vm2, %v281_v53, %v283_v62 }
  0x70   : >> { %734 = vrot.lane.b32.xlu1 %v731_v36, %s1887_s11  ;;  %v2332_v36 = vshll.u32 %v2320_v14, 16 }
  0x71   : >> { %732 = vrot.lane.b32.xlu0 %v729_v8, %s1887_s11  ;;  %v386_v8 = vsel %vm279_vm2, %v384_v58, %v2998_v33  ;;  %v311_v33 = vrot.slane %v2190_v6, 2 }
  0x72   : >> { %v1047_v56 = vrot.slane %v2332_v36, 7 }
  0x74   : >> { %970 = vrot.lane.b32.xlu1 %v962_v7, %s1881_s5  ;;  %v2346_v7 = vsel %vm918_vm9, %v2340_v35, %v1047_v56  ;;  %v397_v56 = vrot.slane %v2207_v47, 2 }
  0x75   : >> { %968 = vrot.lane.b32.xlu0 %v959_v41, %s1881_s5  ;;  %v982_v41 = vrot.slane %v2172_v27, 1 }
  0x77   : >> { %v984_v53 = vor.u32 %v982_v41, %v2169_v21  ;;  %v410_v21 = vrot.slane %v2257_v22, 2 }
  0x78   : >> { %389 = vrot.lane.b32.xlu1 %v386_v8, %s1884_s8  ;;  %v980_v8 = vrot.slane %v2204_v31, 1 }
  0x79   : >> { %277 = vrot.lane.b32.xlu0 %v274_v43, %s1878_s29  ;;  %v2996_v43 = vrot.slane %v2213_v12, 1 }
  0x7a   : >> { %v981_v27 = vor.u32 %v980_v8, %v2194_v40  ;;  %v2997_v40 = vrot.slane %v2165_v34, 2 }
  0x7c   : >> { %760 = vrot.lane.b32.xlu1 %v2133_v11, %s1888_s13  ;;  %v2366_v11 = vor.u32 %v397_v56, %v396_v25  ;;  %v983_v56 = vsel %vm254_vm1, %v981_v27, %v982_v41  ;;  %v779_v41 = vshrl.u32 %v2066_v17, 16 }
  0x7d   : >> { %627 = vrot.lane.b32.xlu0 %v621_v54, %s1880_s4  ;;  %v395_v54 = vor.u32 %v394_v51, %v393_v46  ;;  %v300_v51 = vrot.slane %v2310_v26, 2 }
  0x7f   : >> { %v399_v58 = vsel %vm289_vm3, %v395_v54, %v2366_v11 }
  0x80   : >> { %974 = vrot.lane.b32.xlu1 %v2152_v15, %s1882_s6 }
  0x81   : >> { %762 = vrot.lane.b32.xlu0 %v2142_v13, %s1888_s13  ;;  %v297_v13 = vshrl.u32 %v2190_v6, 16  ;;  %v1829_v6 = vld [vmem:[%s2989_s1 + $0x18] sm:$0xff]  }
  0x83   : >> { %v299_v31 = vrot.slane %v297_v13, 1 }
  0x84   : >> { %287 = vrot.lane.b32.xlu1 %v284_v37, %s1877_s28 }
  0x85   : >> { %976 = vrot.lane.b32.xlu0 %v2155_v20, %s1882_s6  ;;  %v301_v37 = vor.u32 %v300_v51, %v299_v31  ;;  %v2424_v51 = vor.u32 %v779_v41, %v2091_v39  ;;  %v1822_v41 = vld [vmem:[%s2989_s1 + $0x40] sm:$0xff]  }
  0x86   : >> { %1740 = vmatprep.subr.bf16.mxu0 %v1822_v41  ;;  %v1826_v41 = vld [vmem:[%s2989_s1 + $0x50] sm:$0xff]  }
  0x88   : >> { %656 = vrot.lane.b32.xlu1 %v2128_v48, %s1881_s5  ;;  %v986_v48 = vsel %vm254_vm1, %v984_v53, %v2996_v43  ;;  %v302_v53 = vsel %vm289_vm3, %v2063_v16, %v301_v37  ;;  %v995_v16 = vrot.slane %v2155_v20, 1  ;;  %v422_v37 = vrot.slane %v2225_v61, 2 }
  0x89   : >> { %406 = vrot.lane.b32.xlu0 %v399_v58, %s1885_s9  ;;  %v412_v58 = vsel %vm3007_vm0, %v410_v21, %v2997_v40  ;;  %v419_v21 = vrot.slane %v2283_v55, 2 }
  0x8a   : >> { %v2381_v62 = vpop.permute.xlu0 %603  ;;  %v2383_v46 = vpop.permute.xlu1 %575 }
  0x8c   : >> { %768 = vrot.lane.b32.xlu1 %v2050_v1, %s1889_s14 }
  0x8d   : >> { %766 = vrot.lane.b32.xlu0 %v2019_v52, %s1889_s14 }
  0x8e   : >> { %v2398_v25 = vpop.permute.xlu1 %577 }
  0x8f   : >> { %v2401_v54 = vpop.permute.xlu0 %564 }
  0x90   : >> { %990 = vrot.lane.b32.xlu1 %v986_v48, %s1883_s7  ;;  %v3002_v48 = vrot.slane %v2175_v42, 1 }
  0x91   : >> { %988 = vrot.lane.b32.xlu0 %v983_v56, %s1883_s7  ;;  %v420_v56 = vrot.slane %v2264_v9, 3  ;;  %v1823_v9 = vld [vmem:[%s2989_s1] sm:$0xff]  }
  0x92   : >> { %v2408_v8 = vpop.permute.xlu1 %605  ;;  %1741 = vmatpush3.bf16.msra.mxu0 %v1823_v9 }
  0x93   : >> { %v2412_v43 = vpop.permute.xlu0 %566 }
  0x94   : >> { %415 = vrot.lane.b32.xlu1 %v412_v58, %s1886_s10  ;;  %v423_v58 = vrot.slane %v2207_v47, 3  ;;  %v421_v47 = vor.u32 %v420_v56, %v419_v21  ;;  %v1825_v21 = vld [vmem:[%s2989_s1 + $0x8] sm:$0xff]   ;;  %v2471_v56 = vld [vmem:[%s1942_s26 + $0x78] sm:$0xff]  }
  0x95   : >> { %305 = vrot.lane.b32.xlu0 %v302_v53, %s1879_s30  ;;  %v1015_v9 = vrot.slane %v2471_v56, 6  ;;  %v2517_v17 = vshll.u32 %v2471_v56, 16 }
  0x96   : >> { %v2417_v27 = vpop.permute.xlu1 %594  ;;  %v2452_v61 = vor.u32 %v423_v58, %v422_v37  ;;  %v312_v58 = vsel %vm3007_vm0, %v309_v30, %v311_v33  ;;  %v325_v33 = vrot.slane %v297_v13, 2  ;;  %v3000_v13 = vrot.slane %v2165_v34, 3 }
  0x97   : >> { %v2419_v31 = vpop.permute.xlu0 %592  ;;  %vm3008_vm0 = vcmask 654336  }
  0x98   : >> { %782 = vrot.lane.b32.xlu1 %v2082_v29, %s1890_s15  ;;  %v994_v29 = vrot.slane %v2152_v15, 1  ;;  %v998_v15 = vsel %vm279_vm2, %v995_v16, %v3002_v48 }
  0x99   : >> { %662 = vrot.lane.b32.xlu0 %v2070_v18, %s1882_s6 }
  0x9a   : >> { %v2434_v53 = vpop.permute.xlu1 %623  ;;  %v996_v40 = vsel %vm279_vm2, %v994_v29, %v995_v16  ;;  %v425_v16 = vsel %vm3006_vm6, %v421_v47, %v2452_v61 }
  0x9b   : >> { %v2437_v39 = vpop.permute.xlu0 %275 }
  0x9c   : >> { %882 = vrot.lane.b32.xlu1 %v2424_v51, %s1878_s29 }
  0x9d   : >> { %784 = vrot.lane.b32.xlu0 %v2105_v49, %s1890_s15  ;;  %v1824_v49 = vld [vmem:[%s2989_s1 + $0x48] sm:$0xff]  }
  0x9e   : >> { %v2454_v55 = vpop.permute.xlu1 %285  ;;  %1742 = vmatprep.subr.bf16.mxu0 %v1824_v49  ;;  %v1828_v49 = vld [vmem:[%s2989_s1 + $0x58] sm:$0xff]  }
  0x9f   : >> { %v2458_v23 = vpop.permute.xlu0 %625  ;;  %1743 = vmatpush3.bf16.msra.mxu0 %v1825_v21  ;;  %v434_v21 = vrot.slane %v2257_v22, 3 }
  0xa0   : >> { %1001 = vrot.lane.b32.xlu1 %v998_v15, %s1884_s8  ;;  %1744 = vmatprep.subr.bf16.mxu0 %v1826_v41  ;;  %v326_v15 = vrot.slane %v2310_v26, 3  ;;  %v1017_v26 = vsel %vm905_vm7, %v1015_v9, %v3001_v24  ;;  %v1831_v41 = vld [vmem:[%s2989_s1 + $0x20] sm:$0xff]   ;;  %vm514_vm7 = vcmask 457728  }
  0xa1   : >> { %999 = vrot.lane.b32.xlu0 %v996_v40, %s1884_s8  ;;  %v1827_v40 = vld [vmem:[%s2989_s1 + $0x10] sm:$0xff]  }
  0xa2   : >> { %v2473_v37 = vpop.permute.xlu1 %654  ;;  %v327_v22 = vor.u32 %v326_v15, %v325_v33  ;;  %v1033_v15 = vrot.slane %v2517_v17, 7 }
  0xa3   : >> { %v2478_v29 = vpop.permute.xlu0 %652  ;;  %1745 = vmatpush3.bf16.msra.mxu0 %v1827_v40  ;;  %v436_v40 = vsel %vm333_vm8, %v434_v21, %v3000_v13  ;;  %v1833_v21 = vld [vmem:[%s2989_s1 + $0x28] sm:$0xff]  }
  0xa4   : >> { %430 = vrot.lane.b32.xlu1 %v425_v16, %s1887_s11  ;;  %v2514_v16 = vshrl.u32 %v2471_v56, 16  ;;  %1746 = vmatprep.subr.bf16.mxu0 %v1828_v49 }
  0xa5   : >> { %315 = vrot.lane.b32.xlu0 %v312_v58, %s1876_s27 }
  0xa6   : >> { %v2490_v30 = vpop.permute.xlu1 %658  ;;  %v1030_v33 = vrot.slane %v2514_v16, 6 }
  0xa7   : >> { %v2495_v47 = vpop.permute.xlu0 %303  ;;  %1747 = vmatpush3.bf16.msra.mxu0 %v1829_v6  ;;  %v328_v6 = vsel %vm3006_vm6, %v2145_v2, %v327_v22  ;;  %v1834_v22 = vld [vmem:[%s2989_s1 + $0x70] sm:$0xff]   ;;  %vm524_vm6 = vcmask 588800  }
  0xa8   : >> { %893 = vrot.lane.b32.xlu1 %v887_v59, %s1877_s28 }
  0xa9   : >> { %678 = vrot.lane.b32.xlu0 %v2185_v63, %s1883_s7  ;;  %v1830_v63 = vld [vmem:[%s2989_s1 + $0x60] sm:$0xff]  }
  0xaa   : >> { %v2519_v59 = vpop.permute.xlu1 %878  ;;  %1748 = vmatprep.subr.bf16.mxu0 %v1830_v63  ;;  %v1034_v63 = vor.u32 %v1033_v15, %v1030_v33 }
  0xab   : >> { %v2521_v58 = vpop.permute.xlu0 %660  ;;  %1749 = vmatpush3.bf16.msra.mxu0 %v1831_v41  ;;  %v1835_v41 = vld [vmem:[%s2989_s1 + $0x30] sm:$0xff]  }
  0xac   : >> { %1020 = vrot.lane.b32.xlu1 %v1017_v26, %s1885_s9  ;;  %v1043_v33 = vsel %vm918_vm9, %v1034_v63, %v2340_v35  ;;  %v1838_v35 = vld [vmem:[%s2989_s1 + $0x38] sm:$0xff]   ;;  %vm519_vm9 = vcmask 523264  }
  0xad   : >> { %1018 = vrot.lane.b32.xlu0 %v1015_v9, %s1885_s9  ;;  %v1832_v9 = vld [vmem:[%s2989_s1 + $0x68] sm:$0xff]  }
  0xae   : >> { %v2536_v49 = vpop.permute.xlu1 %313  ;;  %1750 = vmatprep.subr.bf16.mxu0 %v1832_v9  ;;  %v1837_v9 = vld [vmem:[%s2989_s1 + $0x80] sm:$0xff]  }
  0xaf   : >> { %v881_v26 = vpop.permute.xlu0 %880  ;;  %1751 = vmatpush3.bf16.msra.mxu0 %v1833_v21  ;;  %v3003_v21 = vmov 0  }
  0xb0   : >> { %439 = vrot.lane.b32.xlu1 %v436_v40, %s1888_s13  ;;  %v3011_v40 = vrot.slane %v2070_v18, 1  ;;  %1752 = vmatprep.subr.bf16.mxu0 %v1834_v22 }
  0xb1   : >> { %331 = vrot.lane.b32.xlu0 %v328_v6, %s1880_s4  ;;  %1478 = vmatprep.subr.bf16.mxu1 %v3003_v21 }
  0xb2   : >> { %v2548_v13 = vpop.permute.xlu1 %676  ;;  %1479 = vmatpush1.bf16.msra.mxu1 %v1837_v9  ;;  %v2592_v9 = vld [vmem:[%s1942_s26 + $0x30] sm:$0xff]  }
  0xb3   : >> { %v2550_v2 = vpop.permute.xlu0 %674  ;;  %1753 = vmatpush3.bf16.msra.mxu0 %v1835_v41  ;;  %1480 = vmatprep.subr.bf16.mxu1 %v3003_v21 }
  0xb4   : >> { %913 = vrot.lane.b32.xlu1 %v907_v50, %s1879_s30  ;;  %v1836_v50 = vld [vmem:[%s2989_s1 + $0x78] sm:$0xff]  }
  0xb5   : >> { %689 = vrot.lane.b32.xlu0 %v3011_v40, %s1884_s8  ;;  %1754 = vmatprep.subr.bf16.mxu0 %v1836_v50  ;;  %v1839_v40 = vld [vmem:[%s2989_s1 + $0x88] sm:$0xff]  }
  0xb6   : >> { %v892_v15 = vpop.permute.xlu1 %891  ;;  %1481 = vmatpush1.bf16.msra.mxu1 %v1839_v40  ;;  %v3013_v40 = vrot.slane %v2301_v5, 7 }
  0xb7   : >> { %v890_v6 = vpop.permute.xlu0 %889  ;;  %1755 = vmatpush3.bf16.msra.mxu0 %v1838_v35  ;;  %v791_v35 = vsel %vm484_vm10, %v2592_v9, %v2412_v43  ;;  %1482 = vmatprep.subr.bf16.mxu1 %v3003_v21  ;;  %v1105_v43 = vsel %vm484_vm10, %v2050_v1, %v881_v26 }
  0xb8   : >> { %1051 = vrot.lane.b32.xlu1 %v1043_v33, %s1886_s10  ;;  %v2583_v33 = vld [vmem:[%s1942_s26 + $0x28] sm:$0xff]   ;;  %v797_v50 = vsel %vm489_vm12, %v791_v35, %v2398_v25  ;;  %v1111_v25 = vsel %vm489_vm12, %v1105_v43, %v892_v15 }
  0xb9   : >> { %1049 = vrot.lane.b32.xlu0 %v1034_v63, %s1886_s10  ;;  %v1055_v63 = vrot.slane %v2471_v56, 7  ;;  %v803_v0 = vsel %vm494_vm11, %v797_v50, %v2417_v27  ;;  %v3014_v27 = vmov 0   ;;  %v1068_v50 = vrot.slane %v2313_v60, 7 }
  0xba   : >> { %v569_v22 = vpop.permute.xlu1 %568 }
  0xbb   : >> { %v330_v41 = vpop.permute.xlu0 %329  ;;  %v1057_v21 = vsel %vm619_vm4, %v1055_v63, %v3013_v40 }
  0xbc   : >> { %453 = vrot.lane.b32.xlu1 %v2583_v33, %s1889_s14 }
  0xbd   : >> { %341 = vrot.lane.b32.xlu0 %v2228_v4, %s1881_s5  ;;  %v1840_v4 = vld [vmem:[%s2989_s1 + $0x90] sm:$0xff]  }
  0xbe   : >> { %v688_v24 = vpop.permute.xlu1 %687  ;;  %1483 = vmatpush1.bf16.msra.mxu1 %v1840_v4 }
  0xbf   : >> { %v2597_v48 = vpop.permute.xlu0 %685  ;;  %1484 = vmatprep.subr.bf16.mxu1 %v3014_v27 }
  0xc0   : >> { %3012 = vst [vmem:[#allocation3_spill] sm:$0xff] %v2597_v48  ;;  %945 = vrot.lane.b32.xlu1 %v2232_v45, %s1876_s27  ;;  %v1103_v45 = vsel %vm484_vm10, %v2019_v52, %v2519_v59  ;;  %v1841_v52 = vld [vmem:[%s2989_s1 + $0x98] sm:$0xff]  }
  0xc1   : >> { %706 = vrot.lane.b32.xlu0 %v2217_v28, %s1885_s9  ;;  %v486_v28 = vsel %vm484_vm10, %v1957_v19, %v2437_v39  ;;  %v1109_v26 = vsel %vm489_vm12, %v1103_v45, %v890_v6  ;;  %v809_v39 = vsel %vm499_vm13, %v803_v0, %v2408_v8  ;;  %v950_v6 = vrot.slane %v2175_v42, 7  ;;  %v2647_v8 = vld [vmem:[%s1942_s26 + $0x24] ss:$0 sps:$4 sm:$0x77]  }
  0xc2   : >> { %v912_v35 = vpop.permute.xlu1 %911  ;;  %v491_v59 = vsel %vm489_vm12, %v486_v28, %v2454_v55  ;;  %v815_v55 = vsel %vm504_vm14, %v809_v39, %v2458_v23  ;;  %1485 = vmatpush1.bf16.msra.mxu1 %v1841_v52 }
  0xc3   : >> { %v1117_v40 = vsel %vm494_vm11, %v1111_v25, %v912_v35  ;;  %v910_v48 = vpop.permute.xlu0 %909  ;;  %v496_v15 = vsel %vm494_vm11, %v491_v59, %v2495_v47  ;;  %v821_v47 = vsel %vm3009_vm15, %v815_v55, %v2473_v37  ;;  %1486 = vmatprep.subr.bf16.mxu1 %v3014_v27  ;;  %v1066_v35 = vrot.slane %v2514_v16, 7 }
  0xc4   : >> { %v1115_v19 = vsel %vm494_vm11, %v1109_v26, %v910_v48  ;;  %1062 = vrot.lane.b32.xlu1 %v1057_v21, %s1887_s11  ;;  %v501_v48 = vsel %vm499_vm13, %v496_v15, %v2536_v49  ;;  %v1857_v21 = vld [vmem:[%s1942_s26 + $0x38] ss:$0 sps:$4 sm:$0x77]   ;;  %v1842_v49 = vld [vmem:[%s2989_s1 + $0xa0] sm:$0xff]   ;;  %v2675_v26 = vshll.u32 %v2647_v8, 16 }
  0xc5   : >> { %1060 = vrot.lane.b32.xlu0 %v1055_v63, %s1887_s11  ;;  %v793_v4 = vsel %vm484_vm10, %v1857_v21, %v569_v22  ;;  %v506_v63 = vsel %vm504_vm14, %v501_v48, %v330_v41  ;;  %v827_v22 = vsel %vm514_vm7, %v821_v47, %v2521_v58  ;;  %v3015_v41 = vrot.slane %v2155_v20, 7  ;;  %v1843_v20 = vld [vmem:[%s2989_s1 + $0xa8] sm:$0xff]   ;;  %v1844_v21 = vld [vmem:[%s2989_s1 + $0xb0] sm:$0xff]  }
  0xc6   : >> { %v580_v0 = vpop.permute.xlu1 %579  ;;  %v833_v37 = vsel %vm519_vm9, %v827_v22, %v2548_v13  ;;  %v1069_v58 = vor.u32 %v1068_v50, %v2316_v3  ;;  %1487 = vmatpush1.bf16.msra.mxu1 %v1842_v49  ;;  %v1067_v39 = vor.u32 %v1066_v35, %v2517_v17 }
  0xc7   : >> { %v799_v43 = vsel %vm489_vm12, %v793_v4, %v580_v0  ;;  %v340_v23 = vpop.permute.xlu0 %339  ;;  %v951_v25 = vsel %vm619_vm4, %v3015_v41, %v950_v6  ;;  %v839_v28 = vsel %vm524_vm6, %v833_v37, %v688_v24  ;;  %1488 = vmatprep.subr.bf16.mxu1 %v3014_v27  ;;  %v3016_v24 = vrot.slane %v2070_v18, 2 }
  0xc8   : >> { %v511_v45 = vsel %vm3009_vm15, %v506_v63, %v340_v23  ;;  %480 = vrot.lane.b32.xlu1 %v1972_v32, %s1890_s15  ;;  %v1070_v59 = vsel %vm632_vm5, %v1066_v35, %v1069_v58  ;;  %v378_v6 = vrot.slane %v2675_v26, 1  ;;  %v1845_v63 = vld [vmem:[%s2989_s1 + $0xb8] sm:$0xff]   ;;  %v3017_v23 = vrot.slane %v2050_v1, 7 }
  0xc9   : >> { %355 = vrot.lane.b32.xlu0 %v2165_v34, %s1882_s6  ;;  %v1213_v37 = vrot.slane %v2301_v5, 3  ;;  %v3018_v41 = vrot.slane %v2165_v34, 1  ;;  %v1090_v35 = vrot.slane %v2316_v3, 1 }
  0xca   : >> { %v705_v32 = vpop.permute.xlu1 %704  ;;  %1489 = vmatpush1.bf16.msra.mxu1 %v1843_v20  ;;  %v379_v0 = vsel %vm254_vm1, %v2235_v10, %v378_v6  ;;  %v387_v10 = vrot.slane %v2647_v8, 1 }
  0xcb   : >> { %v2678_v13 = vsel %vm3008_vm0, %v839_v28, %v705_v32  ;;  %v2680_v52 = vpop.permute.xlu0 %702  ;;  %1490 = vmatprep.subr.bf16.mxu1 %v3014_v27  ;;  %vm1425_vm0 = vcmask 1043456   ;;  %v400_v28 = vshrl.u32 %v2647_v8, 16  ;;  %v1092_v3 = vor.u32 %v1090_v35, %v2313_v60 }
  0xcc   : >> { %956 = vrot.lane.b32.xlu1 %v951_v25, %s1880_s4  ;;  %v388_v25 = vsel %vm279_vm2, %v3018_v41, %v387_v10  ;;  %v2769_v10 = vld [vmem:[%s1942_s26 + $0x60] ss:$0 sps:$4 sm:$0x77]  }
  0xcd   : >> { %717 = vrot.lane.b32.xlu0 %v3016_v24, %s1886_s10 }
  0xce   : >> { %v944_v15 = vpop.permute.xlu1 %943  ;;  %1491 = vmatpush1.bf16.msra.mxu1 %v1844_v21 }
  0xcf   : >> { %v1123_v55 = vsel %vm499_vm13, %v1117_v40, %v944_v15  ;;  %v942_v48 = vpop.permute.xlu0 %941  ;;  %1492 = vmatprep.subr.bf16.mxu1 %v3014_v27  ;;  %v403_v15 = vrot.slane %v2675_v26, 2 }
  0xd0   : >> { %v1121_v18 = vsel %vm499_vm13, %v1115_v19, %v942_v48  ;;  %1078 = vrot.lane.b32.xlu1 %v1070_v59, %s1888_s13 }
  0xd1   : >> { %1076 = vrot.lane.b32.xlu0 %v1067_v39, %s1888_s13  ;;  %v402_v39 = vrot.slane %v400_v28, 1 }
  0xd2   : >> { %v597_v4 = vpop.permute.xlu1 %596  ;;  %1493 = vmatpush1.bf16.msra.mxu1 %v1845_v63 }
  0xd3   : >> { %v805_v40 = vsel %vm494_vm11, %v799_v43, %v597_v4  ;;  %v354_v47 = vpop.permute.xlu0 %353  ;;  %v1846_v43 = vld [vmem:[%s2989_s1 + $0xc0] ss:$0 sps:$4 sm:$0xff]   ;;  %1494 = vmatprep.subr.bf16.mxu1 %v3014_v27  ;;  %v1088_v27 = vrot.slane %v2517_v17, 1  ;;  %v1093_v17 = vrot.slane %v2332_v36, 1  ;;  %v404_v4 = vor.u32 %v403_v15, %v402_v39 }
  0xd4   : >> { %v516_v19 = vsel %vm514_vm7, %v511_v45, %v354_v47  ;;  %736 = vrot.lane.b32.xlu1 %v3017_v23, %s1887_s11  ;;  %v1427_v1 = vsel %vm1425_vm0, %v1846_v43, 0  ;;  %v1212_v45 = vrot.slane %v2471_v56, 3  ;;  %v3019_v43 = vrot.slane %v2165_v34, 2 }
  0xd5   : >> { %382 = vrot.lane.b32.xlu0 %v379_v0, %s1883_s7  ;;  %v1089_v59 = vor.u32 %v1088_v27, %v2514_v16  ;;  %v1094_v21 = vsel %vm254_vm1, %v1092_v3, %v1093_v17  ;;  %vm3020_vm0 = vcmask 1045504  }
  0xd6   : >> { %v2714_v49 = vpop.permute.xlu1 %715  ;;  %1495 = vmatpush1.bf16.msra.mxu1 %v1427_v1 }
  0xd7   : >> { %v2719_v22 = vpop.permute.xlu0 %713 }
  0xd8   : >> { %1082 = vrot.lane.b32.xlu1 %v2471_v56, %s1889_s14  ;;  %v1214_v56 = vsel %vm333_vm8, %v1212_v45, %v1213_v37  ;;  %v3021_v45 = vshrl.u32 %v2175_v42, 16 }
  0xd9   : >> { %972 = vrot.lane.b32.xlu0 %v2253_v57, %s1881_s5  ;;  %1723 = vmatprep.mubr.msk.bf16.mxu1 %vm484_vm10, %v1214_v56 }
  0xda   : >> { %v955_v58 = vpop.permute.xlu1 %954 }
  0xdb   : >> { %v1129_v32 = vsel %vm504_vm14, %v1123_v55, %v955_v58  ;;  %v953_v20 = vpop.permute.xlu0 %952  ;;  %v427_v58 = vrot.slane %v2675_v26, 3  ;;  %v1071_v26 = vshrl.u32 %v2320_v14, 16 }
  0xdc   : >> { %v1127_v57 = vsel %vm504_vm14, %v1121_v18, %v953_v20  ;;  %391 = vrot.lane.b32.xlu1 %v388_v25, %s1884_s8  ;;  %v1091_v18 = vsel %vm254_vm1, %v1089_v59, %v1090_v35  ;;  %v426_v35 = vrot.slane %v400_v28, 2  ;;  %v3023_v28 = vrot.slane %v2175_v42, 1 }
  0xdd   : >> { %1084 = vrot.lane.b32.xlu0 %v2301_v5, %s1889_s14  ;;  %vm3024_vm1 = vsmask.f32 5376  ;;  %v437_v59 = vrot.slane %v2647_v8, 3 }
  0xde   : >> { %v608_v24 = vpop.permute.xlu1 %607  ;;  %v428_v20 = vor.u32 %v427_v58, %v426_v35 }
  0xdf   : >> { %v811_v6 = vsel %vm499_vm13, %v805_v40, %v608_v24  ;;  %v381_v55 = vpop.permute.xlu0 %380  ;;  %v413_v40 = vrot.slane %v2647_v8, 2 }
  0xe0   : >> { %v521_v48 = vsel %vm519_vm9, %v516_v19, %v381_v55  ;;  %978 = vrot.lane.b32.xlu1 %v2175_v42, %s1882_s6  ;;  %v429_v24 = vsel %vm3024_vm1, %v2452_v61, %v428_v20  ;;  %v1058_v42 = vrot.slane %v2320_v14, 7  ;;  %v1859_v55 = vld [vmem:[%s1942_s26 + $0x8] sm:$0xff]   ;;  %v3026_v61 = vrot.slane %v2165_v34, 3  ;;  %s1739_s26 = sshll.u32 %s1874_s24, 4  ;;  %s178_s24 = sadd.s32 1, %s1874_s24  }
  0xe1   : >> { %764 = vrot.lane.b32.xlu0 %v2272_v44, %s1888_s13  ;;  %v405_v44 = vsel %vm289_vm3, %v2366_v11, %v404_v4  ;;  %v414_v1 = vsel %vm3020_vm0, %v3019_v43, %v413_v40  ;;  %v3022_v11 = vrot.slane %v2213_v12, 1  ;;  %vm534_vm3 = vcmask 719872   ;;  %s1549_s5 = scalar_lea.vmem %s1928_s20, %s1739_s26  ;;  %p175_p4 = scmp.ge.s32.totalorder %s178_s24, 32  }
  0xe2   : >> { %v2756_v16 = vpop.permute.xlu1 %734  ;;  %v438_v8 = vsel %vm333_vm8, %v3026_v61, %v437_v59  ;;  %vm544_vm0 = vcmask 850944   ;;  %vm549_vm1 = vcmask 916480  }
  0xe3   : >> { %v2759_v0 = vpop.permute.xlu0 %732  ;;  %v987_v41 = vor.u32 %v3022_v11, %v3021_v45 }
  0xe4   : >> { %1098 = vrot.lane.b32.xlu1 %v1094_v21, %s1890_s15 }
  0xe5   : >> { %1096 = vrot.lane.b32.xlu0 %v1091_v18, %s1890_s15 }
  0xe6   : >> { %v971_v47 = vpop.permute.xlu1 %970 }
  0xe7   : >> { %v1135_v63 = vsel %vm3009_vm15, %v1129_v32, %v971_v47  ;;  %v969_v19 = vpop.permute.xlu0 %968  ;;  %v3027_v47 = vrot.slane %v2301_v5, 7 }
  0xe8   : >> { %v1133_v23 = vsel %vm3009_vm15, %v1127_v57, %v969_v19  ;;  %770 = vrot.lane.b32.xlu1 %v2769_v10, %s1889_s14 }
  0xe9   : >> { %408 = vrot.lane.b32.xlu0 %v405_v44, %s1885_s9  ;;  %v1059_v44 = vsel %vm619_vm4, %v3027_v47, %v1058_v42  ;;  %vm539_vm4 = vcmask 785408  }
  0xea   : >> { %v390_v25 = vpop.permute.xlu1 %389 }
  0xeb   : >> { %v2783_v27 = vsel %vm524_vm6, %v521_v48, %v390_v25  ;;  %v278_v56 = vpop.permute.xlu0 %277  ;;  %v3028_v25 = vld [vmem:[#allocation3_spill] sm:$0xff] }
  0xec   : >> { %417 = vrot.lane.b32.xlu1 %v414_v1, %s1886_s10  ;;  %v488_v48 = vsel %vm484_vm10, %v1859_v55, %v278_v56 }
  0xed   : >> { %992 = vrot.lane.b32.xlu0 %v987_v41, %s1883_s7 }
  0xee   : >> { %v2787_v32 = vpop.permute.xlu1 %760 }
  0xef   : >> { %v628_v57 = vpop.permute.xlu0 %627 }
  0xf0   : >> { %v817_v12 = vsel %vm504_vm14, %v811_v6, %v628_v57  ;;  %1003 = vrot.lane.b32.xlu1 %v3023_v28, %s1884_s8  ;;  %v3025_v6 = vrot.slane %v2301_v5, 6  ;;  %v851_v57 = vsel %vm534_vm3, %v2678_v13, %v2714_v49 }
  0xf1   : >> { %786 = vrot.lane.b32.xlu0 %v2424_v51, %s1890_s15  ;;  %v1073_v51 = vrot.slane %v1071_v26, 7  ;;  %v857_v28 = vsel %vm539_vm4, %v851_v57, %v2756_v16 }
  0xf2   : >> { %v975_v3 = vpop.permute.xlu1 %974 }
  0xf3   : >> { %v1139_v39 = vsel %vm514_vm7, %v1133_v23, %v975_v3  ;;  %v763_v15 = vpop.permute.xlu0 %762  ;;  %v1074_v19 = vor.u32 %v1073_v51, %v2332_v36 }
  0xf4   : >> { %1022 = vrot.lane.b32.xlu1 %v3025_v6, %s1885_s9 }
  0xf5   : >> { %432 = vrot.lane.b32.xlu0 %v429_v24, %s1887_s11 }
  0xf6   : >> { %v288_v21 = vpop.permute.xlu1 %287 }
  0xf7   : >> { %v493_v18 = vsel %vm489_vm12, %v488_v48, %v288_v21  ;;  %v977_v4 = vpop.permute.xlu0 %976 }
  0xf8   : >> { %v1141_v40 = vsel %vm514_vm7, %v1135_v63, %v977_v4  ;;  %1053 = vrot.lane.b32.xlu1 %v2346_v7, %s1886_s10  ;;  %v789_v63 = vsel %vm484_vm10, %v2583_v33, %v2401_v54  ;;  %v1075_v7 = vsel %vm632_vm5, %v1068_v50, %v1074_v19  ;;  %v1095_v54 = vor.u32 %v1093_v17, %v1071_v26 }
  0xf9   : >> { %441 = vrot.lane.b32.xlu0 %v438_v8, %s1888_s13  ;;  %v795_v45 = vsel %vm489_vm12, %v789_v63, %v2383_v46  ;;  %vm3029_vm5 = vcmask 654336   ;;  %v863_v26 = vsel %vm544_vm0, %v857_v28, %v763_v15 }
  0xfa   : >> { %v657_v23 = vpop.permute.xlu1 %656  ;;  %v801_v41 = vsel %vm494_vm11, %v795_v45, %v2419_v31 }
  0xfb   : >> { %v823_v34 = vsel %vm3009_vm15, %v817_v12, %v657_v23  ;;  %v2820_v43 = vpop.permute.xlu0 %406  ;;  %v807_v60 = vsel %vm499_vm13, %v801_v41, %v2381_v62 }
  0xfc   : >> { %1064 = vrot.lane.b32.xlu1 %v1059_v44, %s1887_s11  ;;  %v813_v50 = vsel %vm504_vm14, %v807_v60, %v2434_v53 }
  0xfd   : >> { %455 = vrot.lane.b32.xlu0 %v2592_v9, %s1889_s14  ;;  %v819_v36 = vsel %vm3009_vm15, %v813_v50, %v2478_v29  ;;  %vm554_vm15 = vcmask 982016  }
  0xfe   : >> { %v769_v1 = vpop.permute.xlu1 %768 }
  0xff   : >> { %v767_v11 = vpop.permute.xlu0 %766  ;;  %v869_v24 = vsel %vm549_vm1, %v863_v26, %v769_v1 }
 0x100   : >> { %1080 = vrot.lane.b32.xlu1 %v1075_v7, %s1888_s13 }
 0x101   : >> { %482 = vrot.lane.b32.xlu0 %v1989_v38, %s1890_s15  ;;  %v825_v38 = vsel %vm514_vm7, %v819_v36, %v2490_v30 }
 0x102   : >> { %v991_v33 = vpop.permute.xlu1 %990  ;;  %v831_v17 = vsel %vm519_vm9, %v825_v38, %v2550_v2 }
 0x103   : >> { %v2843_v9 = vsel %vm519_vm9, %v1141_v40, %v991_v33  ;;  %v989_v46 = vpop.permute.xlu0 %988  ;;  %v837_v35 = vsel %vm524_vm6, %v831_v17, %v3028_v25 }
 0x104   : >> { %v2848_v31 = vsel %vm519_vm9, %v1139_v39, %v989_v46  ;;  %1100 = vrot.lane.b32.xlu1 %v1095_v54, %s1890_s15  ;;  %v843_v29 = vsel %vm3029_vm5, %v837_v35, %v2680_v52 }
 0x105   : >> { %1086 = vrot.lane.b32.xlu0 %v2320_v14, %s1889_s14  ;;  %v849_v56 = vsel %vm534_vm3, %v843_v29, %v2719_v22 }
 0x106   : >> { %v416_v62 = vpop.permute.xlu1 %415  ;;  %v855_v2 = vsel %vm539_vm4, %v849_v56, %v2759_v0 }
 0x107   : >> { %v306_v53 = vpop.permute.xlu0 %305  ;;  %v861_v12 = vsel %vm544_vm0, %v855_v2, %v2787_v32 }
 0x108   : >> { %v498_v58 = vsel %vm494_vm11, %v493_v18, %v306_v53  ;;  %v867_v22 = vsel %vm549_vm1, %v861_v12, %v767_v11 }
 0x10a   : >> { %v783_v30 = vpop.permute.xlu1 %782 }
 0x10b   : >> { %v663_v20 = vpop.permute.xlu0 %662  ;;  %v873_v0 = vsel %vm554_vm15, %v867_v22, %v783_v30 }
 0x10c   : >> { %v829_v52 = vsel %vm514_vm7, %v823_v34, %v663_v20  ;;  %v1195_v49 = vrot.slane %v873_v0, 1 }
 0x10e   : >> { %v883_v3 = vpop.permute.xlu1 %882 }
 0x10f   : >> { %v785_v59 = vpop.permute.xlu0 %784  ;;  %v1107_v55 = vsel %vm484_vm10, %v2769_v10, %v883_v3 }
 0x110   : >> { %v2881_v13 = vsel %vm554_vm15, %v869_v24, %v785_v59 }
 0x111   : >> { %v1196_v32 = vrot.slane %v2881_v13, 1 }
 0x112   : >> { %v1002_v39 = vpop.permute.xlu1 %1001 }
 0x113   : >> { %v1000_v6 = vpop.permute.xlu0 %999  ;;  %v1197_v16 = vsel %vm279_vm2, %v1195_v49, %v1196_v32  ;;  %v1153_v20 = vsel %vm524_vm6, %v2843_v9, %v1002_v39  ;;  %v1215_v39 = vrot.slane %v2320_v14, 3 }
 0x114   : >> { %1461 = vmatprep.mubr.bf16.mxu0 %v1197_v16  ;;  %v1151_v57 = vsel %vm524_vm6, %v2848_v31, %v1000_v6 }
 0x116   : >> { %v431_v15 = vpop.permute.xlu1 %430 }
 0x117   : >> { %v316_v42 = vpop.permute.xlu0 %315 }
 0x118   : >> { %v503_v51 = vsel %vm499_vm13, %v498_v58, %v316_v42 }
 0x11a   : >> { %v894_v48 = vpop.permute.xlu1 %893 }
 0x11b   : >> { %v1113_v21 = vsel %vm489_vm12, %v1107_v55, %v894_v48  ;;  %v679_v61 = vpop.permute.xlu0 %678  ;;  %vm3030_vm12 = vmmov %vm3029_vm5 }
 0x11c   : >> { %v2892_v8 = vsel %vm519_vm9, %v829_v52, %v679_v61  ;;  %v531_v41 = vsel %vm3030_vm12, %v2783_v27, %v2820_v43  ;;  %vm3032_vm12 = vcmask 1045504  }
 0x11d   : >> { %v536_v33 = vsel %vm534_vm3, %v531_v41, %v416_v62 }
 0x11e   : >> { %v1021_v18 = vpop.permute.xlu1 %1020  ;;  %v541_v46 = vsel %vm539_vm4, %v536_v33, %v431_v15 }
 0x11f   : >> { %v1019_v4 = vpop.permute.xlu0 %1018 }
 0x120   : >> { %v1157_v28 = vsel %vm3029_vm5, %v1151_v57, %v1019_v4 }
 0x122   : >> { %v440_v40 = vpop.permute.xlu1 %439 }
 0x123   : >> { %v332_v47 = vpop.permute.xlu0 %331  ;;  %v546_v50 = vsel %vm544_vm0, %v541_v46, %v440_v40 }
 0x124   : >> { %v2895_v44 = vsel %vm504_vm14, %v503_v51, %v332_v47 }
 0x126   : >> { %v914_v19 = vpop.permute.xlu1 %913 }
 0x127   : >> { %v2898_v23 = vsel %vm494_vm11, %v1113_v21, %v914_v19  ;;  %v690_v34 = vpop.permute.xlu0 %689  ;;  %vm3031_vm11 = vmmov %vm3029_vm5  ;;  %v1216_v21 = vsel %vm333_vm8, %v1213_v37, %v1215_v39  ;;  %vm3034_vm8 = vcmask 392192   ;;  %v3039_v39 = vld [vmem:[#allocation2_spill] sm:$0xff] }
 0x128   : >> { %v1159_v12 = vsel %vm3031_vm11, %v1153_v20, %v1021_v18  ;;  %v841_v14 = vsel %vm524_vm6, %v2892_v8, %v690_v34  ;;  %vm3033_vm11 = vmmov %vm3029_vm5 }
 0x12a   : >> { %v1052_v10 = vpop.permute.xlu1 %1051 }
 0x12b   : >> { %v1050_v63 = vpop.permute.xlu0 %1049  ;;  %v1165_v22 = vsel %vm534_vm3, %v1159_v12, %v1052_v10 }
 0x12c   : >> { %v1163_v0 = vsel %vm534_vm3, %v1157_v28, %v1050_v63 }
 0x12e   : >> { %v454_v7 = vpop.permute.xlu1 %453 }
 0x12f   : >> { %v2900_v1 = vpop.permute.xlu0 %341  ;;  %v551_v36 = vsel %vm549_vm1, %v546_v50, %v454_v7 }
 0x132   : >> { %v2902_v45 = vpop.permute.xlu1 %945 }
 0x133   : >> { %v707_v11 = vpop.permute.xlu0 %706 }
 0x134   : >> { %v847_v40 = vsel %vm3033_vm11, %v841_v14, %v707_v11  ;;  %v513_v11 = vsel %vm3034_vm8, %v2895_v44, %v2900_v1 }
 0x136   : >> { %v1063_v54 = vpop.permute.xlu1 %1062 }
 0x137   : >> { %v1061_v60 = vpop.permute.xlu0 %1060  ;;  %v1171_v3 = vsel %vm539_vm4, %v1165_v22, %v1063_v54 }
 0x138   : >> { %v1169_v24 = vsel %vm539_vm4, %v1163_v0, %v1061_v60 }
 0x13a   : >> { %v481_v38 = vpop.permute.xlu1 %480 }
 0x13b   : >> { %v356_v17 = vpop.permute.xlu0 %355  ;;  %v556_v53 = vsel %vm554_vm15, %v551_v36, %v481_v38  ;;  %v1125_v38 = vsel %vm499_vm13, %v2898_v23, %v2902_v45 }
 0x13c   : >> { %1462 = vmatmul.mubr.bf16.vlgmr.msra.gmra.mrb[0].mxu0 %v556_v53  ;;  %v518_v50 = vsel %vm514_vm7, %v513_v11, %v356_v17 }
 0x13e   : >> { %v957_v25 = vpop.permute.xlu1 %956 }
 0x13f   : >> { %v718_v35 = vpop.permute.xlu0 %717 }
 0x140   : >> { %v853_v19 = vsel %vm534_vm3, %v847_v40, %v718_v35 }
 0x142   : >> { %v1079_v58 = vpop.permute.xlu1 %1078 }
 0x143   : >> { %v1077_v29 = vpop.permute.xlu0 %1076  ;;  %v1177_v59 = vsel %vm544_vm0, %v1171_v3, %v1079_v58 }
 0x144   : >> { %v1175_v9 = vsel %vm544_vm0, %v1169_v24, %v1077_v29 }
 0x146   : >> { %v737_v27 = vpop.permute.xlu1 %736 }
 0x147   : >> { %v383_v43 = vpop.permute.xlu0 %382  ;;  %v859_v10 = vsel %vm539_vm4, %v853_v19, %v737_v27 }
 0x148   : >> { %v523_v36 = vsel %vm519_vm9, %v518_v50, %v383_v43 }
 0x14a   : >> { %v1083_v56 = vpop.permute.xlu1 %1082 }
 0x14b   : >> { %v973_v62 = vpop.permute.xlu0 %972  ;;  %v1181_v6 = vsel %vm549_vm1, %v1175_v9, %v1083_v56 }
 0x14e   : >> { %v392_v30 = vpop.permute.xlu1 %391 }
 0x14f   : >> { %v1085_v2 = vpop.permute.xlu0 %1084  ;;  %v528_v53 = vsel %vm524_vm6, %v523_v36, %v392_v30 }
 0x150   : >> { %v1183_v31 = vsel %vm549_vm1, %v1177_v59, %v1085_v2 }
 0x152   : >> { %v979_v52 = vpop.permute.xlu1 %978 }
 0x153   : >> { %v765_v26 = vpop.permute.xlu0 %764 }
 0x154   : >> { %v865_v5 = vsel %vm544_vm0, %v859_v10, %v765_v26 }
 0x156   : >> { %v1099_v49 = vpop.permute.xlu1 %1098 }
 0x157   : >> { %v1189_v16 = vsel %vm554_vm15, %v1183_v31, %v1099_v49  ;;  %v1097_v15 = vpop.permute.xlu0 %1096 }
 0x158   : >> { %v1206_v42 = vrot.slane %v1189_v16, 2  ;;  %v1187_v51 = vsel %vm554_vm15, %v1181_v6, %v1097_v15 }
 0x159   : >> { %v1205_v55 = vrot.slane %v1187_v51, 2 }
 0x15a   : >> { %v771_v48 = vpop.permute.xlu1 %770 }
 0x15b   : >> { %v409_v61 = vpop.permute.xlu0 %408  ;;  %v1207_v18 = vsel %vm3032_vm12, %v1205_v55, %v1206_v42  ;;  %v871_v63 = vsel %vm549_vm1, %v865_v5, %v771_v48 }
 0x15c   : >> { %1511 = vmatmul.mubr.bf16.vlgmr.msra.gmra.mrb[0].mxu1 %v1207_v18 }
 0x15d   : >> { %1724 = vmatprep.mubr.msk.bf16.mxu1 %vm484_vm10, %v1216_v21  ;;  %vm3036_vm10 = vmmov %vm3034_vm8 }
 0x15e   : >> { %v418_v4 = vpop.permute.xlu1 %417 }
 0x15f   : >> { %v993_v47 = vpop.permute.xlu0 %992 }
 0x162   : >> { %v1004_v37 = vpop.permute.xlu1 %1003 }
 0x163   : >> { %v787_v7 = vpop.permute.xlu0 %786 }
 0x164   : >> { %v877_v41 = vsel %vm554_vm15, %v871_v63, %v787_v7 }
 0x165   : >> { %v1198_v54 = vrot.slane %v877_v41, 1 }
 0x166   : >> { %v1023_v33 = vpop.permute.xlu1 %1022 }
 0x167   : >> { %v433_v60 = vpop.permute.xlu0 %432  ;;  %v1199_v8 = vsel %vm279_vm2, %v1196_v32, %v1198_v54  ;;  %v1131_v32 = vsel %vm504_vm14, %v1125_v38, %v957_v25  ;;  %vm3035_vm2 = vmmov %vm3029_vm5  ;;  %vm1550_vm14 = vcmask 19456  }
 0x168   : >> { %1469 = vmatprep.mubr.bf16.mxu0 %v1199_v8  ;;  %v533_v35 = vsel %vm3035_vm2, %v528_v53, %v409_v61  ;;  %v1137_v29 = vsel %vm3036_vm10, %v1131_v32, %v973_v62  ;;  %vm3037_vm13 = vmmov %vm3035_vm2 }
 0x169   : >> { %v538_v44 = vsel %vm534_vm3, %v533_v35, %v418_v4  ;;  %v1143_v1 = vsel %vm514_vm7, %v1137_v29, %v979_v52 }
 0x16a   : >> { %v1054_v34 = vpop.permute.xlu1 %1053  ;;  %v543_v17 = vsel %vm539_vm4, %v538_v44, %v433_v60  ;;  %v1149_v27 = vsel %vm519_vm9, %v1143_v1, %v993_v47 }
 0x16b   : >> { %v442_v46 = vpop.permute.xlu0 %441  ;;  %v1155_v43 = vsel %vm524_vm6, %v1149_v27, %v1004_v37  ;;  %vm3038_vm6 = vmmov %vm3032_vm12 }
 0x16c   : >> { %v548_v23 = vsel %vm544_vm0, %v543_v17, %v442_v46  ;;  %v1161_v30 = vsel %vm3037_vm13, %v1155_v43, %v1023_v33 }
 0x16d   : >> { %v1167_v2 = vsel %vm534_vm3, %v1161_v30, %v1054_v34 }
 0x16e   : >> { %v1065_v13 = vpop.permute.xlu1 %1064 }
 0x16f   : >> { %v456_v58 = vpop.permute.xlu0 %455  ;;  %v1173_v20 = vsel %vm539_vm4, %v1167_v2, %v1065_v13 }
 0x170   : >> { %v553_v25 = vsel %vm549_vm1, %v548_v23, %v456_v58 }
 0x172   : >> { %v1081_v45 = vpop.permute.xlu1 %1080 }
 0x173   : >> { %v483_v56 = vpop.permute.xlu0 %482  ;;  %v1179_v12 = vsel %vm544_vm0, %v1173_v20, %v1081_v45 }
 0x174   : >> { %v559_v62 = vsel %vm554_vm15, %v553_v25, %v483_v56 }
 0x175   : >> { %1470 = vmatmul.mubr.bf16.gmra.mrb[4].mxu0 %v559_v62 }
 0x176   : >> { %v1101_v57 = vpop.permute.xlu1 %1100 }
 0x177   : >> { %v1087_v52 = vpop.permute.xlu0 %1086 }
 0x178   : >> { %v1185_v28 = vsel %vm549_vm1, %v1179_v12, %v1087_v52 }
 0x179   : >> { %v1191_v22 = vsel %vm554_vm15, %v1185_v28, %v1101_v57 }
 0x17a   : >> { %v1208_v26 = vrot.slane %v1191_v22, 2 }
 0x17c   : >> { %v1209_v0 = vsel %vm3038_vm6, %v1206_v42, %v1208_v26 }
 0x17d   : >> { %1519 = vmatmul.mubr.bf16.gmra.mrb[4].mxu1 %v1209_v0 }
 0x20f   : >> { %v1756_v3 = vpop.f32.mrb[0].mxu0 }
 0x210   : >> { %v1757_v24 = vpop.f32.mrb[1].mxu0 }
 0x211   : >> { %v1758_v59 = vadd.f32 %v1757_v24, %v1756_v3  ;;  %v1759_v9 = vpop.f32.mrb[2].mxu0 }
 0x212   : >> { %v1760_v31 = vpop.f32.mrb[3].mxu0 }
 0x213   : >> { %v1761_v49 = vadd.f32 %v1760_v31, %v1759_v9  ;;  %v1464_v6 = vadd.f32 %v1758_v59, %v3039_v39 }
 0x215   : >> { %v1467_v15 = vadd.f32 %v1761_v49, %v3039_v39 }
 0x22f   : >> { %v1512_v16 = vpop.f32.mrb[0].mxu1 }
 0x230   : >> { %v1513_v51 = vadd.f32 %v1512_v16, %v1464_v6  ;;  %v1514_v55 = vpop.f32.mrb[1].mxu1 }
 0x231   : >> { %v1515_v48 = vpop.f32.mrb[2].mxu1 }
 0x232   : >> { %1847 = vtanh.f32 %v1513_v51  ;;  %v1516_v21 = vadd.f32 %v1515_v48, %v1467_v15  ;;  %v1517_v42 = vpop.f32.mrb[3].mxu1 }
 0x234   : >> { %1849 = vtanh.f32 %v1516_v21 }
 0x23c   : >> { %v1848_v61 = vpop.eup %1847 }
 0x23d   : >> { %v1735_v18 = vpack.c.bf16 %v1848_v61, %v1848_v61 }
 0x23e   : >> { %v1850_v14 = vpop.eup %1849 }
 0x23f   : >> { %1551 = vst.msk [vmem:[%s1549_s5] sm:$0xf] %vm1550_vm14, %v1735_v18  ;;  %v1736_v4 = vpack.c.bf16 %v1850_v14, %v1850_v14 }
 0x241   : >> { %1552 = vst.msk [vmem:[%s1549_s5 + $0x4] sm:$0xf] %vm1550_vm14, %v1736_v4 }
 0x248   : >> { %v1762_v40 = vpop.f32.mrb[4].mxu0 }
 0x249   : >> { %v1763_v47 = vpop.f32.mrb[5].mxu0 }
 0x24a   : >> { %v1764_v19 = vadd.f32 %v1763_v47, %v1762_v40  ;;  %v1765_v10 = vpop.f32.mrb[6].mxu0 }
 0x24b   : >> { %v1766_v5 = vpop.f32.mrb[7].mxu0 }
 0x24c   : >> { %v1767_v37 = vadd.f32 %v1766_v5, %v1765_v10  ;;  %v1472_v63 = vadd.f32 %v1764_v19, %v3039_v39 }
 0x24e   : >> { %v1475_v41 = vadd.f32 %v1767_v37, %v3039_v39 }
 0x250   : >> { %v1520_v7 = vpop.f32.mrb[4].mxu1 }
 0x251   : >> { %v1521_v54 = vadd.f32 %v1520_v7, %v1472_v63  ;;  %v1522_v33 = vpop.f32.mrb[5].mxu1 }
 0x252   : >> { %v1523_v60 = vpop.f32.mrb[6].mxu1 }
 0x253   : >> { %1851 = vtanh.f32 %v1521_v54  ;;  %v1524_v8 = vadd.f32 %v1523_v60, %v1475_v41  ;;  %v1525_v34 = vpop.f32.mrb[7].mxu1 }
 0x255   : >> { %1853 = vtanh.f32 %v1524_v8 }
 0x25c   : > { %177 = sbr.rel (!%p175_p4) target bundleno = 17 (0x11), region = 77 }
 0x25d   : >> { %v1852_v11 = vpop.eup %1851 }
 0x25e   : >> { %v1737_v46 = vpack.c.bf16 %v1852_v11, %v1852_v11 }
 0x25f   : >> { %v1854_v50 = vpop.eup %1853 }
 0x260   : >> { %1553 = vst.msk [vmem:[%s1549_s5 + $0x8] sm:$0xf] %vm1550_vm14, %v1737_v46  ;;  %v1738_v36 = vpack.c.bf16 %v1854_v50, %v1854_v50 }
 0x262   : >> { %1554 = vst.msk [vmem:[%s1549_s5 + $0xc] sm:$0xf] %vm1550_vm14, %v1738_v36 }
 0x263 PF: > { %s13_s12 = sadd.s32 1, %s1870_s12  }
 0x264   : > { %p10_p5 = scmp.ge.s32.totalorder %s13_s12, 4  }
 0x266   :  { %12 = sbr.rel (!%p10_p5) target bundleno = 1 (0x1), region = 88 }

</bundles_post_ra>
